<compile_context>
chip_gen: v5e
topology: v5e:2x2
jax: 0.10.0
libtpu: 0.0.40
codegen_flags: <defaults>
</compile_context>

<pallas_src>
import jax
import jax.numpy as jnp
from jax.experimental import pallas as pl
from jax.experimental.pallas import tpu as pltpu

INPUT_SIZE = 3072
HIDDEN1 = 500
HIDDEN2 = 200
NUM_CLASSES = 10

# lane-aligned (multiple-of-128) padded dims
H1_PAD = 512
H2_PAD = 256
OUT_PAD = 128


def _round_up(n, m):
    return ((n + m - 1) // m) * m


def mlp_kernel(x_ref, w1_ref, b1_ref, w2_ref, b2_ref, w3_ref, b3_ref, o_ref):
    # x arrives f32 (single HBM read of the original data); cast to bf16 in-kernel for MXU.
    x_bf = x_ref[...].astype(jnp.bfloat16)
    # layer1: bf16 MXU matmul, f32 accumulation; bias + ReLU kept in f32 (VPU).
    h1 = jnp.dot(x_bf, w1_ref[...], preferred_element_type=jnp.float32)
    h1 = jnp.maximum(h1 + b1_ref[...], 0.0)
    # layer2
    h2 = jnp.dot(h1.astype(jnp.bfloat16), w2_ref[...], preferred_element_type=jnp.float32)
    h2 = jnp.maximum(h2 + b2_ref[...], 0.0)
    # layer3 (logits, no activation)
    out = jnp.dot(h2.astype(jnp.bfloat16), w3_ref[...], preferred_element_type=jnp.float32)
    o_ref[...] = (out + b3_ref[...]).astype(o_ref.dtype)


def _pad2(a, rows, cols):
    # zero-padding is load-bearing: padded weight rows/cols and bias lanes must stay 0 so
    # the padded hidden/logit lanes remain exactly 0 through bias-add and ReLU.
    return jnp.pad(a, ((0, rows - a.shape[0]), (0, cols - a.shape[1])))


def prepare_params(params):
    """One-time parameter prep (hoisted out of the per-call path): pad to lane-aligned
    dims and cast weights to bf16. Call once and reuse the result for every forward."""
    return {
        "w1": _pad2(params["w1"], INPUT_SIZE, H1_PAD).astype(jnp.bfloat16),
        "w2": _pad2(params["w2"], H1_PAD, H2_PAD).astype(jnp.bfloat16),
        "w3": _pad2(params["w3"], H2_PAD, OUT_PAD).astype(jnp.bfloat16),
        "b1": _pad2(params["b1"], 1, H1_PAD),   # biases stay f32
        "b2": _pad2(params["b2"], 1, H2_PAD),
        "b3": _pad2(params["b3"], 1, OUT_PAD),
    }


def _choose_tile(B):
    """Pick (TB, B_pad): big tiles to amortize per-step overhead, low padding waste,
    and >= 2 grid steps when possible so v7x megacore can split the batch."""
    if B <= 128:
        tb = _round_up(max(B, 16), 16)  # single tile; 16-row granularity for bf16 packing
        return tb, _round_up(B, tb)
    for tb in (1024, 512, 256, 128):
        b_pad = _round_up(B, tb)
        if (b_pad // tb) >= 2 and (b_pad - B) / b_pad <= 0.125:
            return tb, b_pad
    return 128, _round_up(B, 128)


def net_forward(x, prepped):
    """x: [B, 3072] float32. prepped: output of prepare_params(). Returns [B, 10] f32 logits."""
    B = x.shape[0]
    TB, B_pad = _choose_tile(B)
    x_pad = x if B_pad == B else jnp.pad(x, ((0, B_pad - B), (0, 0)))  # stays f32

    # TB=1024 needs a larger scoped-VMEM budget (x f32 double-buffer alone is 24 MiB);
    # 48 MiB still fits v7x's 64 MiB/TC and is comfortable on v5e/v6e (128 MiB).
    vmem_limit = (48 << 20) if TB >= 1024 else (32 << 20)

    def const_spec(shape):
        # weights / biases: constant block index -> DMA'd once, VMEM-resident across steps
        return pl.BlockSpec(shape, lambda i: (0, 0))

    out = pl.pallas_call(
        mlp_kernel,
        out_shape=jax.ShapeDtypeStruct((B_pad, OUT_PAD), jnp.float32),
        grid=(B_pad // TB,),
        in_specs=[
            pl.BlockSpec((TB, INPUT_SIZE), lambda i: (i, 0)),  # f32 x tile, pipelined
            const_spec((INPUT_SIZE, H1_PAD)),
            const_spec((1, H1_PAD)),
            const_spec((H1_PAD, H2_PAD)),
            const_spec((1, H2_PAD)),
            const_spec((H2_PAD, OUT_PAD)),
            const_spec((1, OUT_PAD)),
        ],
        out_specs=pl.BlockSpec((TB, OUT_PAD), lambda i: (i, 0)),
        compiler_params=pltpu.CompilerParams(
            dimension_semantics=("parallel",),
            vmem_limit_bytes=vmem_limit,
        ),
    )(
        x_pad,
        prepped["w1"], prepped["b1"],
        prepped["w2"], prepped["b2"],
        prepped["w3"], prepped["b3"],
    )

    # slice away batch padding and the padded logit lanes
    return out[:B, :NUM_CLASSES]


def init_params(key):
    """Deterministic init mimicking PyTorch nn.Linear default (U[-1/sqrt(fan_in), 1/sqrt(fan_in)]).
    Weights stored PyTorch-transposed: W has shape (in_features, out_features)."""
    def linear(key, fan_in, fan_out):
        kw, kb = jax.random.split(key)
        bound = 1.0 / jnp.sqrt(jnp.float32(fan_in))
        w = jax.random.uniform(kw, (fan_in, fan_out), jnp.float32, -bound, bound)
        b = jax.random.uniform(kb, (1, fan_out), jnp.float32, -bound, bound)
        return w, b

    k1, k2, k3 = jax.random.split(key, 3)
    w1, b1 = linear(k1, INPUT_SIZE, HIDDEN1)
    w2, b2 = linear(k2, HIDDEN1, HIDDEN2)
    w3, b3 = linear(k3, HIDDEN2, NUM_CLASSES)
    return {"w1": w1, "b1": b1, "w2": w2, "b2": b2, "w3": w3, "b3": b3}


def reference_forward(x, params):
    """Pure-JAX reference with the same bf16-weight/bf16-input, f32-accumulate numerics."""
    w1 = params["w1"].astype(jnp.bfloat16)
    w2 = params["w2"].astype(jnp.bfloat16)
    w3 = params["w3"].astype(jnp.bfloat16)
    h1 = jnp.dot(x.astype(jnp.bfloat16), w1, preferred_element_type=jnp.float32)
    h1 = jnp.maximum(h1 + params["b1"], 0.0)
    h2 = jnp.dot(h1.astype(jnp.bfloat16), w2, preferred_element_type=jnp.float32)
    h2 = jnp.maximum(h2 + params["b2"], 0.0)
    return jnp.dot(h2.astype(jnp.bfloat16), w3, preferred_element_type=jnp.float32) + params["b3"]


if __name__ == "__main__":
    key = jax.random.PRNGKey(0)
    kx, kp = jax.random.split(key)

    B = 8  # small demo batch; kernel handles arbitrary B via batch tiling + padding
    x = jax.random.normal(kx, (B, INPUT_SIZE), jnp.float32)
    params = init_params(kp)

    prepped = jax.tree_util.tree_map(jax.block_until_ready, prepare_params(params))  # one-time prep

    out = jax.block_until_ready(net_forward(x, prepped))
    ref = jax.block_until_ready(reference_forward(x, params))

    assert out.shape == (B, NUM_CLASSES), out.shape
    assert jnp.allclose(out, ref, atol=2e-3, rtol=2e-3), "mismatch vs pure-JAX reference"
    print("KERNEL_OK")
</pallas_src>

<mosaic_0001>
module attributes {stable_mosaic.version = 11 : i64} {
  func.func @mlp_kernel(%arg0: i32, %arg1: memref<16x3072xf32, #tpu.memory_space<vmem>>, %arg2: memref<3072x512xbf16, #tpu.memory_space<vmem>>, %arg3: memref<1x512xf32, #tpu.memory_space<vmem>>, %arg4: memref<512x256xbf16, #tpu.memory_space<vmem>>, %arg5: memref<1x256xf32, #tpu.memory_space<vmem>>, %arg6: memref<256x128xbf16, #tpu.memory_space<vmem>>, %arg7: memref<1x128xf32, #tpu.memory_space<vmem>>, %arg8: memref<16x128xf32, #tpu.memory_space<vmem>>) attributes {dimension_semantics = [#tpu.dimension_semantics<parallel>], iteration_bounds = array<i64: 1>, scalar_prefetch = 0 : i64, scratch_operands = 0 : i64, tpu.core_type = #tpu.core_type<tc>, window_params = [{transform_indices = @transform_0, window_bounds = array<i64: 16, 3072>}, {pipeline_mode = #tpu.pipeline_mode<synchronous>, transform_indices = @transform_1, window_bounds = array<i64: 3072, 512>}, {pipeline_mode = #tpu.pipeline_mode<synchronous>, transform_indices = @transform_2, window_bounds = array<i64: 1, 512>}, {pipeline_mode = #tpu.pipeline_mode<synchronous>, transform_indices = @transform_3, window_bounds = array<i64: 512, 256>}, {pipeline_mode = #tpu.pipeline_mode<synchronous>, transform_indices = @transform_4, window_bounds = array<i64: 1, 256>}, {pipeline_mode = #tpu.pipeline_mode<synchronous>, transform_indices = @transform_5, window_bounds = array<i64: 256, 128>}, {pipeline_mode = #tpu.pipeline_mode<synchronous>, transform_indices = @transform_6, window_bounds = array<i64: 1, 128>}, {transform_indices = @transform_7, window_bounds = array<i64: 16, 128>}]} {
    %c0 = arith.constant 0 : index
    %c0_0 = arith.constant 0 : index
    %0 = vector.load %arg1[%c0, %c0_0] : memref<16x3072xf32, #tpu.memory_space<vmem>>, vector<16x3072xf32>
    %1 = arith.truncf %0 : vector<16x3072xf32> to vector<16x3072xbf16>
    %c0_1 = arith.constant 0 : index
    %c0_2 = arith.constant 0 : index
    %2 = vector.load %arg2[%c0_1, %c0_2] : memref<3072x512xbf16, #tpu.memory_space<vmem>>, vector<3072x512xbf16>
    %cst = arith.constant dense<0.000000e+00> : vector<16x512xf32>
    %3 = tpu.matmul %1, %2, %cst {dimension_numbers = #tpu.dot_dimension_numbers<[1], [0], [0], [1], [0, 0, 1, 1], [], []>} : vector<16x3072xbf16>, vector<3072x512xbf16>, vector<16x512xf32> -> vector<16x512xf32>
    %c0_3 = arith.constant 0 : index
    %c0_4 = arith.constant 0 : index
    %4 = vector.load %arg3[%c0_3, %c0_4] : memref<1x512xf32, #tpu.memory_space<vmem>>, vector<1x512xf32>
    %5 = vector.broadcast %4 : vector<1x512xf32> to vector<16x512xf32>
    %6 = arith.addf %3, %5 : vector<16x512xf32>
    %cst_5 = arith.constant 0.000000e+00 : f32
    %7 = vector.broadcast %cst_5 : f32 to vector<16x512xf32>
    %8 = arith.maximumf %6, %7 : vector<16x512xf32>
    %9 = arith.truncf %8 : vector<16x512xf32> to vector<16x512xbf16>
    %c0_6 = arith.constant 0 : index
    %c0_7 = arith.constant 0 : index
    %10 = vector.load %arg4[%c0_6, %c0_7] : memref<512x256xbf16, #tpu.memory_space<vmem>>, vector<512x256xbf16>
    %cst_8 = arith.constant dense<0.000000e+00> : vector<16x256xf32>
    %11 = tpu.matmul %9, %10, %cst_8 {dimension_numbers = #tpu.dot_dimension_numbers<[1], [0], [0], [1], [0, 0, 1, 1], [], []>} : vector<16x512xbf16>, vector<512x256xbf16>, vector<16x256xf32> -> vector<16x256xf32>
    %c0_9 = arith.constant 0 : index
    %c0_10 = arith.constant 0 : index
    %12 = vector.load %arg5[%c0_9, %c0_10] : memref<1x256xf32, #tpu.memory_space<vmem>>, vector<1x256xf32>
    %13 = vector.broadcast %12 : vector<1x256xf32> to vector<16x256xf32>
    %14 = arith.addf %11, %13 : vector<16x256xf32>
    %cst_11 = arith.constant 0.000000e+00 : f32
    %15 = vector.broadcast %cst_11 : f32 to vector<16x256xf32>
    %16 = arith.maximumf %14, %15 : vector<16x256xf32>
    %17 = arith.truncf %16 : vector<16x256xf32> to vector<16x256xbf16>
    %c0_12 = arith.constant 0 : index
    %c0_13 = arith.constant 0 : index
    %18 = vector.load %arg6[%c0_12, %c0_13] : memref<256x128xbf16, #tpu.memory_space<vmem>>, vector<256x128xbf16>
    %cst_14 = arith.constant dense<0.000000e+00> : vector<16x128xf32>
    %19 = tpu.matmul %17, %18, %cst_14 {dimension_numbers = #tpu.dot_dimension_numbers<[1], [0], [0], [1], [0, 0, 1, 1], [], []>} : vector<16x256xbf16>, vector<256x128xbf16>, vector<16x128xf32> -> vector<16x128xf32>
    %c0_15 = arith.constant 0 : index
    %c0_16 = arith.constant 0 : index
    %20 = vector.load %arg7[%c0_15, %c0_16] : memref<1x128xf32, #tpu.memory_space<vmem>>, vector<1x128xf32>
    %21 = vector.broadcast %20 : vector<1x128xf32> to vector<16x128xf32>
    %22 = arith.addf %19, %21 : vector<16x128xf32>
    %c0_17 = arith.constant 0 : index
    %c0_18 = arith.constant 0 : index
    %23 = vector.load %arg8[%c0_17, %c0_18] : memref<16x128xf32, #tpu.memory_space<vmem>>, vector<16x128xf32>
    tpu.vector_store %arg8[%c0_17, %c0_18], %22 {strides = array<i32>} : memref<16x128xf32, #tpu.memory_space<vmem>>, vector<16x128xf32>,
    return
  }
  func.func @transform_0(%arg0: i32) -> (i32, i32) {
    %c0_i32 = arith.constant 0 : i32
    %c0_i32_0 = arith.constant 0 : i32
    return %arg0, %c0_i32 : i32, i32
  }
  func.func @transform_1(%arg0: i32) -> (i32, i32) {
    %c0_i32 = arith.constant 0 : i32
    %c0_i32_0 = arith.constant 0 : i32
    %c0_i32_1 = arith.constant 0 : i32
    return %c0_i32, %c0_i32_0 : i32, i32
  }
  func.func @transform_2(%arg0: i32) -> (i32, i32) {
    %c0_i32 = arith.constant 0 : i32
    %c0_i32_0 = arith.constant 0 : i32
    %c0_i32_1 = arith.constant 0 : i32
    return %c0_i32, %c0_i32_0 : i32, i32
  }
  func.func @transform_3(%arg0: i32) -> (i32, i32) {
    %c0_i32 = arith.constant 0 : i32
    %c0_i32_0 = arith.constant 0 : i32
    %c0_i32_1 = arith.constant 0 : i32
    return %c0_i32, %c0_i32_0 : i32, i32
  }
  func.func @transform_4(%arg0: i32) -> (i32, i32) {
    %c0_i32 = arith.constant 0 : i32
    %c0_i32_0 = arith.constant 0 : i32
    %c0_i32_1 = arith.constant 0 : i32
    return %c0_i32, %c0_i32_0 : i32, i32
  }
  func.func @transform_5(%arg0: i32) -> (i32, i32) {
    %c0_i32 = arith.constant 0 : i32
    %c0_i32_0 = arith.constant 0 : i32
    %c0_i32_1 = arith.constant 0 : i32
    return %c0_i32, %c0_i32_0 : i32, i32
  }
  func.func @transform_6(%arg0: i32) -> (i32, i32) {
    %c0_i32 = arith.constant 0 : i32
    %c0_i32_0 = arith.constant 0 : i32
    %c0_i32_1 = arith.constant 0 : i32
    return %c0_i32, %c0_i32_0 : i32, i32
  }
  func.func @transform_7(%arg0: i32) -> (i32, i32) {
    %c0_i32 = arith.constant 0 : i32
    %c0_i32_0 = arith.constant 0 : i32
    return %arg0, %c0_i32 : i32, i32
  }
}

</mosaic_0001>

<bundles_post_ra>
// kernel: tpu_custom_call.1
= control target key start
LH: loop header
LB: loop body
LE: loop exit
PB: predicated region body
PF: predicated region fallthrough
CT: control target
= control target key end

     0   :  { %12 = vsyncpa [#allocation3], 0  ;;  %s11898_s0 = inlined_call_operand.hbm [shape: f32[16,3072], index: 0, kind: input, shape index: {}]   ;;  %s11899_s1 = inlined_call_operand.hbm [shape: bf16[3072,512], index: 1, kind: input, shape index: {}]   ;;  %s11900_s2 = inlined_call_operand.hbm [shape: f32[1,512], index: 2, kind: input, shape index: {}]   ;;  %s11901_s3 = inlined_call_operand.hbm [shape: bf16[512,256], index: 3, kind: input, shape index: {}]   ;;  %s11902_s4 = inlined_call_operand.hbm [shape: f32[1,256], index: 4, kind: input, shape index: {}]   ;;  %s11903_s5 = inlined_call_operand.hbm [shape: bf16[256,128], index: 5, kind: input, shape index: {}]   ;;  %s11904_s6 = inlined_call_operand.hbm [shape: f32[1,128], index: 6, kind: input, shape index: {}]   ;;  %s11905_s7 = inlined_call_operand.hbm [shape: f32[16,128], index: 7, kind: output, shape index: {}]  }
   0x1   :  { %13 = vsyncpa [#allocation6], 0 }
   0x2   :  { %14 = vsyncpa [#allocation9], 0 }
   0x3   :  { %15 = vsyncpa [#allocation12], 0  ;;  %s34_s26 = sshll.u32 %s11899_s1, 4  ;;  %s35_s26 = int_to_ptr.hbm [resolvable:$true] %s34_s26 }
   0x4   :  { %16 = vsyncpa [#allocation4], 0  ;;  %s11330_s27 = smov [#allocation5]   ;;  %s58_s8 = sshll.u32 %s11901_s3, 4  ;;  %s59_s8 = int_to_ptr.hbm [resolvable:$true] %s58_s8 }
   0x5   :  { %s36_s28 = sshll.u32 %s11330_s27, 4  ;;  %s11331_s9 = smov 256   ;;  %s37_s28 = int_to_ptr.vmem [resolvable:$true] %s36_s28 }
   0x6   :  { %s11332_s10 = smov 16   ;;  %s11333_s11 = smov [#allocation8]  }
   0x7   :  { %42 = dma.hbm_to_vmem [thread:$0]  %s35_s26, 98304, %s37_s28, [#allocation6], %s11331_s9, %s11331_s9, %s11332_s10  }
   0x8   :  { %s60_s12 = sshll.u32 %s11333_s11, 4  ;;  %s11334_s13 = smov 128   ;;  %s61_s12 = int_to_ptr.vmem [resolvable:$true] %s60_s12 }
   0x9   :  { %s11335_s14 = smov 8   ;;  %s82_s16 = sshll.u32 %s11903_s5, 4  ;;  %s83_s16 = int_to_ptr.hbm [resolvable:$true] %s82_s16 }
   0xa   :  { %66 = dma.hbm_to_vmem [thread:$0]  %s59_s8, 8192, %s61_s12, [#allocation9], %s11334_s13, %s11334_s13, %s11335_s14  }
   0xb   :  { %s11336_s17 = smov [#allocation11]   ;;  %s21_s20 = sshll.u32 %s11898_s0, 4  ;;  %s22_s20 = int_to_ptr.hbm [resolvable:$true] %s21_s20 }
   0xc   :  { %s84_s3 = sshll.u32 %s11336_s17, 4  ;;  %s11337_s21 = smov 64   ;;  %s85_s3 = int_to_ptr.vmem [resolvable:$true] %s84_s3 }
   0xd   :  { %s11338_s22 = smov 4   ;;  %s11339_s23 = smov [#allocation2]  }
   0xe   :  { %90 = dma.hbm_to_vmem [thread:$0]  %s83_s16, 2048, %s85_s3, [#allocation12], %s11337_s21, %s11337_s21, %s11338_s22  }
   0xf   :  { %s23_s24 = sshll.u32 %s11339_s23, 4  ;;  %s11340_s25 = smov 3072   ;;  %s24_s24 = int_to_ptr.vmem [resolvable:$true] %s23_s24 }
  0x10   :  { %s11341_s26 = smov 192   ;;  %s48_s28 = sshll.u32 %s11900_s2, 4  ;;  %s49_s28 = int_to_ptr.hbm [resolvable:$true] %s48_s28 }
  0x11   :  { %29 = dma.hbm_to_vmem [thread:$0]  %s22_s20, 6144, %s24_s24, [#allocation3], %s11340_s25, %s11340_s25, %s11341_s26  }
  0x12   :  { %s11342_s29 = smov [#allocation7]   ;;  %s72_s9 = sshll.u32 %s11902_s4, 4  ;;  %s73_s9 = int_to_ptr.hbm [resolvable:$true] %s72_s9 }
  0x13   :  { %s50_s30 = sshll.u32 %s11342_s29, 4  ;;  %s11343_s10 = smov [#allocation10]   ;;  %s51_s30 = int_to_ptr.vmem [resolvable:$true] %s50_s30 }
  0x14   :  { %53 = dma.hbm_to_vmem [thread:$0]  %s49_s28, 64, %s51_s30, [#allocation6]  }
  0x15   :  { %s74_s11 = sshll.u32 %s11343_s10, 4  ;;  %s96_s15 = sshll.u32 %s11904_s6, 4  ;;  %s75_s11 = int_to_ptr.vmem [resolvable:$true] %s74_s11  ;;  %s97_s15 = int_to_ptr.hbm [resolvable:$true] %s96_s15 }
  0x16   :  { %77 = dma.hbm_to_vmem [thread:$0]  %s73_s9, 32, %s75_s11, [#allocation9]  }
  0x17   :  { %s11344_s2 = smov [#allocation13]  }
  0x18   :  { %s98_s16 = sshll.u32 %s11344_s2, 4  ;;  %s99_s16 = int_to_ptr.vmem [resolvable:$true] %s98_s16 }
  0x19   :  { %101 = dma.hbm_to_vmem [thread:$0]  %s97_s15, 16, %s99_s16, [#allocation12]  }
  0x1a   :  { %11320 = dma.done.wait [#allocation3], 6144  }
  0x1b   :  { %11321 = vsyncadd [#allocation3], 4294961152 }
  0x1c   :  { %11322 = dma.done.wait [#allocation6], 98368  }
  0x1d   :  { %11323 = vsyncadd [#allocation6], 4294868928 }
  0x1e   :  { %11324 = dma.done.wait [#allocation9], 8224  }
  0x1f   :  { %11325 = vsyncadd [#allocation9], 4294959072 }
  0x20   :  { %11326 = dma.done.wait [#allocation12], 2064  }
  0x21   :  { %11327 = vsyncadd [#allocation12], 4294965232  ;;  %v6982_v0 = vld [vmem:[#allocation5 + $0xe0] sm:$0xf]  ;;  %v10290_v1 = vld [vmem:[#allocation5 + $0xec] sm:$0xf0] }
  0x22   :  { %v7110_v2 = vld [vmem:[#allocation5 + $0x1e0] sm:$0xf]  ;;  %v6983_v3 = vor.u32 %v10290_v1, %v6982_v0  ;;  %v10322_v4 = vld [vmem:[#allocation5 + $0x1ec] sm:$0xf0]  ;;  %s11345_s4 = smov [#allocation14]   ;;  %s6852_s18 = sshll.u32 %s11905_s7, 4  ;;  %s6853_s18 = int_to_ptr.hbm [resolvable:$true] %s6852_s18 }
  0x23   :  { %v7238_v5 = vld [vmem:[#allocation5 + $0x2e0] sm:$0xf]  ;;  %v10354_v6 = vld [vmem:[#allocation5 + $0x2ec] sm:$0xf0]  ;;  %v7111_v7 = vor.u32 %v10322_v4, %v7110_v2  ;;  %s6850_s6 = sshll.u32 %s11345_s4, 4  ;;  %s6851_s6 = int_to_ptr.vmem [resolvable:$true] %s6850_s6 }
  0x24   :  { %v7239_v8 = vor.u32 %v10354_v6, %v7238_v5  ;;  %v7366_v9 = vld [vmem:[#allocation5 + $0x3e0] sm:$0xf]  ;;  %v10386_v10 = vld [vmem:[#allocation5 + $0x3ec] sm:$0xf0]  ;;  %4820 = vmatpush.bf16.msra.mxu0 %v6983_v3 }
  0x25   :  { %v6966_v11 = vld [vmem:[#allocation5 + $0xc0] sm:$0xf]  ;;  %v7367_v12 = vor.u32 %v10386_v10, %v7366_v9  ;;  %v10286_v13 = vld [vmem:[#allocation5 + $0xcc] sm:$0xf0]  ;;  %4834 = vmatpush.bf16.msra.mxu1 %v7111_v7 }
  0x26   :  { %v7094_v14 = vld [vmem:[#allocation5 + $0x1c0] sm:$0xf]  ;;  %v10318_v15 = vld [vmem:[#allocation5 + $0x1cc] sm:$0xf0]  ;;  %4848 = vmatpush.bf16.msra.mxu2 %v7239_v8  ;;  %v6967_v16 = vor.u32 %v10286_v13, %v6966_v11 }
  0x27   :  { %v7095_v17 = vor.u32 %v10318_v15, %v7094_v14  ;;  %v7222_v18 = vld [vmem:[#allocation5 + $0x2c0] sm:$0xf]  ;;  %v10350_v19 = vld [vmem:[#allocation5 + $0x2cc] sm:$0xf0]  ;;  %4862 = vmatpush.bf16.msra.mxu3 %v7367_v12 }
  0x28   :  { %v7350_v20 = vld [vmem:[#allocation5 + $0x3c0] sm:$0xf]  ;;  %v7223_v21 = vor.u32 %v10350_v19, %v7222_v18  ;;  %v10382_v22 = vld [vmem:[#allocation5 + $0x3cc] sm:$0xf0]  ;;  %4821 = vmatpush.bf16.msra.mxu0 %v6967_v16 }
  0x29   :  { %v6950_v23 = vld [vmem:[#allocation5 + $0xa0] sm:$0xf]  ;;  %v10282_v24 = vld [vmem:[#allocation5 + $0xac] sm:$0xf0]  ;;  %v7351_v25 = vor.u32 %v10382_v22, %v7350_v20  ;;  %4835 = vmatpush.bf16.msra.mxu1 %v7095_v17 }
  0x2a   :  { %v7078_v26 = vld [vmem:[#allocation5 + $0x1a0] sm:$0xf]  ;;  %v10314_v27 = vld [vmem:[#allocation5 + $0x1ac] sm:$0xf0]  ;;  %v6951_v29 = vor.u32 %v10282_v24, %v6950_v23  ;;  %4849 = vmatpush.bf16.msra.mxu2 %v7223_v21 }
  0x2b   :  { %v7206_v28 = vld [vmem:[#allocation5 + $0x2a0] sm:$0xf]  ;;  %v10346_v30 = vld [vmem:[#allocation5 + $0x2ac] sm:$0xf0]  ;;  %v7079_v33 = vor.u32 %v10314_v27, %v7078_v26  ;;  %4863 = vmatpush.bf16.msra.mxu3 %v7351_v25 }
  0x2c   :  { %v7334_v31 = vld [vmem:[#allocation5 + $0x3a0] sm:$0xf]  ;;  %v10378_v32 = vld [vmem:[#allocation5 + $0x3ac] sm:$0xf0]  ;;  %v7207_v34 = vor.u32 %v10346_v30, %v7206_v28  ;;  %4822 = vmatpush.bf16.msra.mxu0 %v6951_v29 }
  0x2d   :  { %v6934_v35 = vld [vmem:[#allocation5 + $0x80] sm:$0xf]  ;;  %v10278_v36 = vld [vmem:[#allocation5 + $0x8c] sm:$0xf0]  ;;  %v7335_v38 = vor.u32 %v10378_v32, %v7334_v31  ;;  %4836 = vmatpush.bf16.msra.mxu1 %v7079_v33 }
  0x2e   :  { %v7062_v37 = vld [vmem:[#allocation5 + $0x180] sm:$0xf]  ;;  %v10310_v39 = vld [vmem:[#allocation5 + $0x18c] sm:$0xf0]  ;;  %v6935_v44 = vor.u32 %v10278_v36, %v6934_v35  ;;  %4850 = vmatpush.bf16.msra.mxu2 %v7207_v34 }
  0x2f   :  { %v7190_v40 = vld [vmem:[#allocation5 + $0x280] sm:$0xf]  ;;  %v10342_v41 = vld [vmem:[#allocation5 + $0x28c] sm:$0xf0]  ;;  %v7063_v45 = vor.u32 %v10310_v39, %v7062_v37  ;;  %4864 = vmatpush.bf16.msra.mxu3 %v7335_v38 }
  0x30   :  { %v7318_v42 = vld [vmem:[#allocation5 + $0x380] sm:$0xf]  ;;  %v10374_v43 = vld [vmem:[#allocation5 + $0x38c] sm:$0xf0]  ;;  %v7191_v46 = vor.u32 %v10342_v41, %v7190_v40  ;;  %4823 = vmatpush.bf16.msra.mxu0 %v6935_v44 }
  0x31   :  { %v6918_v47 = vld [vmem:[#allocation5 + $0x60] sm:$0xf]  ;;  %v10274_v48 = vld [vmem:[#allocation5 + $0x6c] sm:$0xf0]  ;;  %v7319_v50 = vor.u32 %v10374_v43, %v7318_v42  ;;  %4837 = vmatpush.bf16.msra.mxu1 %v7063_v45 }
  0x32   :  { %v7046_v49 = vld [vmem:[#allocation5 + $0x160] sm:$0xf]  ;;  %v10306_v51 = vld [vmem:[#allocation5 + $0x16c] sm:$0xf0]  ;;  %v6919_v56 = vor.u32 %v10274_v48, %v6918_v47  ;;  %4851 = vmatpush.bf16.msra.mxu2 %v7191_v46 }
  0x33   :  { %v7174_v52 = vld [vmem:[#allocation5 + $0x260] sm:$0xf]  ;;  %v10338_v53 = vld [vmem:[#allocation5 + $0x26c] sm:$0xf0]  ;;  %v7047_v57 = vor.u32 %v10306_v51, %v7046_v49  ;;  %4865 = vmatpush.bf16.msra.mxu3 %v7319_v50 }
  0x34   :  { %v7302_v54 = vld [vmem:[#allocation5 + $0x360] sm:$0xf]  ;;  %v10370_v55 = vld [vmem:[#allocation5 + $0x36c] sm:$0xf0]  ;;  %v7175_v58 = vor.u32 %v10338_v53, %v7174_v52  ;;  %4824 = vmatpush.bf16.msra.mxu0 %v6919_v56 }
  0x35   :  { %v6902_v59 = vld [vmem:[#allocation5 + $0x40] sm:$0xf]  ;;  %v10270_v60 = vld [vmem:[#allocation5 + $0x4c] sm:$0xf0]  ;;  %v7303_v62 = vor.u32 %v10370_v55, %v7302_v54  ;;  %4838 = vmatpush.bf16.msra.mxu1 %v7047_v57 }
  0x36   :  { %v7030_v61 = vld [vmem:[#allocation5 + $0x140] sm:$0xf]  ;;  %v10302_v63 = vld [vmem:[#allocation5 + $0x14c] sm:$0xf0]  ;;  %v6903_v4 = vor.u32 %v10270_v60, %v6902_v59  ;;  %4852 = vmatpush.bf16.msra.mxu2 %v7175_v58 }
  0x37   :  { %v7158_v0 = vld [vmem:[#allocation5 + $0x240] sm:$0xf]  ;;  %v10334_v1 = vld [vmem:[#allocation5 + $0x24c] sm:$0xf0]  ;;  %v7031_v5 = vor.u32 %v10302_v63, %v7030_v61  ;;  %4866 = vmatpush.bf16.msra.mxu3 %v7303_v62 }
  0x38   :  { %v7286_v2 = vld [vmem:[#allocation5 + $0x340] sm:$0xf]  ;;  %v10366_v3 = vld [vmem:[#allocation5 + $0x34c] sm:$0xf0]  ;;  %v7159_v6 = vor.u32 %v10334_v1, %v7158_v0  ;;  %4825 = vmatpush.bf16.msra.mxu0 %v6903_v4 }
  0x39   :  { %v6886_v7 = vld [vmem:[#allocation5 + $0x20] sm:$0xf]  ;;  %v10266_v8 = vld [vmem:[#allocation5 + $0x2c] sm:$0xf0]  ;;  %v7287_v10 = vor.u32 %v10366_v3, %v7286_v2  ;;  %4839 = vmatpush.bf16.msra.mxu1 %v7031_v5 }
  0x3a   :  { %v7014_v9 = vld [vmem:[#allocation5 + $0x120] sm:$0xf]  ;;  %v10298_v11 = vld [vmem:[#allocation5 + $0x12c] sm:$0xf0]  ;;  %v6887_v16 = vor.u32 %v10266_v8, %v6886_v7  ;;  %4853 = vmatpush.bf16.msra.mxu2 %v7159_v6  ;;  %v131_v6 = vld [vmem:[#allocation2 + $0x8] sm:$0xff] }
  0x3b   :  { %v7142_v12 = vld [vmem:[#allocation5 + $0x220] sm:$0xf]  ;;  %v10330_v13 = vld [vmem:[#allocation5 + $0x22c] sm:$0xf0]  ;;  %v7015_v19 = vor.u32 %v10298_v11, %v7014_v9  ;;  %4867 = vmatpush.bf16.msra.mxu3 %v7287_v10  ;;  %v155_v7 = vld [vmem:[#allocation2 + $0xc8] sm:$0xff] }
  0x3c   :  { %v7270_v14 = vld [vmem:[#allocation5 + $0x320] sm:$0xf]  ;;  %v10362_v15 = vld [vmem:[#allocation5 + $0x32c] sm:$0xf0]  ;;  %v7143_v20 = vor.u32 %v10330_v13, %v7142_v12  ;;  %4826 = vmatpush.bf16.msra.mxu0 %v6887_v16  ;;  %v133_v8 = vld [vmem:[#allocation2 + $0x18] sm:$0xff]  ;;  %v11416_v10 = vpack.c.bf16 %v155_v7, %v131_v6 }
  0x3d   :  { %v6870_v17 = vld [vmem:[#allocation5] sm:$0xf]  ;;  %v10262_v18 = vld [vmem:[#allocation5 + $0xc] sm:$0xf0]  ;;  %v7271_v24 = vor.u32 %v10362_v15, %v7270_v14  ;;  %4840 = vmatpush.bf16.msra.mxu1 %v7015_v19  ;;  %v157_v11 = vld [vmem:[#allocation2 + $0xd8] sm:$0xff] }
  0x3e   :  { %v6998_v21 = vld [vmem:[#allocation5 + $0x100] sm:$0xf]  ;;  %v10294_v22 = vld [vmem:[#allocation5 + $0x10c] sm:$0xf0]  ;;  %v6871_v31 = vor.u32 %v10262_v18, %v6870_v17  ;;  %4854 = vmatpush.bf16.msra.mxu2 %v7143_v20  ;;  %v11418_v17 = vpack.c.bf16 %v157_v11, %v133_v8 }
  0x3f   :  { %v7126_v23 = vld [vmem:[#allocation5 + $0x200] sm:$0xf]  ;;  %v10326_v25 = vld [vmem:[#allocation5 + $0x20c] sm:$0xf0]  ;;  %v6999_v35 = vor.u32 %v10294_v22, %v6998_v21  ;;  %4868 = vmatpush.bf16.msra.mxu3 %v7271_v24 }
  0x40   :  { %v7254_v26 = vld [vmem:[#allocation5 + $0x300] sm:$0xf]  ;;  %v10358_v27 = vld [vmem:[#allocation5 + $0x30c] sm:$0xf0]  ;;  %v7127_v36 = vor.u32 %v10326_v25, %v7126_v23  ;;  %4827 = vmatpush.bf16.msra.mxu0 %v6871_v31 }
  0x41   :  { %v7494_v28 = vld [vmem:[#allocation5 + $0x4e0] sm:$0xf]  ;;  %v10418_v29 = vld [vmem:[#allocation5 + $0x4ec] sm:$0xf0]  ;;  %v7255_v39 = vor.u32 %v10358_v27, %v7254_v26  ;;  %4841 = vmatpush.bf16.msra.mxu1 %v6999_v35 }
  0x42   :  { %v7622_v30 = vld [vmem:[#allocation5 + $0x5e0] sm:$0xf]  ;;  %v10450_v32 = vld [vmem:[#allocation5 + $0x5ec] sm:$0xf0]  ;;  %v7495_v40 = vor.u32 %v10418_v29, %v7494_v28  ;;  %4855 = vmatpush.bf16.msra.mxu2 %v7127_v36 }
  0x43   :  { %v7750_v33 = vld [vmem:[#allocation5 + $0x6e0] sm:$0xf]  ;;  %v10482_v34 = vld [vmem:[#allocation5 + $0x6ec] sm:$0xf0]  ;;  %v7623_v43 = vor.u32 %v10450_v32, %v7622_v30  ;;  %4869 = vmatpush.bf16.msra.mxu3 %v7255_v39 }
  0x44   :  { %v7878_v37 = vld [vmem:[#allocation5 + $0x7e0] sm:$0xf]  ;;  %v10514_v38 = vld [vmem:[#allocation5 + $0x7ec] sm:$0xf0]  ;;  %v7751_v44 = vor.u32 %v10482_v34, %v7750_v33  ;;  %4876 = vmatpush.bf16.msrb.mxu0 %v7495_v40  ;;  %4842 = vmatmul.bf16.vlgmr.msra.gmra.mxu1 %v11416_v10 }
  0x45   :  { %v7478_v41 = vld [vmem:[#allocation5 + $0x4c0] sm:$0xf]  ;;  %v10414_v42 = vld [vmem:[#allocation5 + $0x4cc] sm:$0xf0]  ;;  %v7879_v48 = vor.u32 %v10514_v38, %v7878_v37  ;;  %4890 = vmatpush.bf16.msrb.mxu1 %v7623_v43 }
  0x46   :  { %v7606_v45 = vld [vmem:[#allocation5 + $0x5c0] sm:$0xf]  ;;  %v10446_v46 = vld [vmem:[#allocation5 + $0x5cc] sm:$0xf0]  ;;  %v7479_v55 = vor.u32 %v10414_v42, %v7478_v41  ;;  %4904 = vmatpush.bf16.msrb.mxu2 %v7751_v44  ;;  %4870 = vmatmul.bf16.vlgmr.msra.gmra.mxu3 %v11418_v17 }
  0x47   :  { %v7734_v47 = vld [vmem:[#allocation5 + $0x6c0] sm:$0xf]  ;;  %v10478_v49 = vld [vmem:[#allocation5 + $0x6cc] sm:$0xf0]  ;;  %v7607_v60 = vor.u32 %v10446_v46, %v7606_v45  ;;  %4918 = vmatpush.bf16.msrb.mxu3 %v7879_v48 }
  0x48   :  { %v7862_v50 = vld [vmem:[#allocation5 + $0x7c0] sm:$0xf]  ;;  %v10510_v51 = vld [vmem:[#allocation5 + $0x7cc] sm:$0xf0]  ;;  %v7735_v61 = vor.u32 %v10478_v49, %v7734_v47  ;;  %4877 = vmatpush.bf16.msrb.mxu0 %v7479_v55 }
  0x49   :  { %v130_v52 = vld [vmem:[#allocation2] sm:$0xff]  ;;  %v132_v54 = vld [vmem:[#allocation2 + $0x10] sm:$0xff]  ;;  %v7863_v2 = vor.u32 %v10510_v51, %v7862_v50  ;;  %4891 = vmatpush.bf16.msrb.mxu1 %v7607_v60 }
  0x4a   :  { %v154_v53 = vld [vmem:[#allocation2 + $0xc0] sm:$0xff]  ;;  %v10410_v57 = vld [vmem:[#allocation5 + $0x4ac] sm:$0xf0]  ;;  %4905 = vmatpush.bf16.msrb.mxu2 %v7735_v61 }
  0x4b   :  { %v7462_v56 = vld [vmem:[#allocation5 + $0x4a0] sm:$0xf]  ;;  %v11410_v58 = vpack.c.bf16 %v154_v53, %v130_v52  ;;  %v156_v59 = vld [vmem:[#allocation2 + $0xd0] sm:$0xff]  ;;  %4919 = vmatpush.bf16.msrb.mxu3 %v7863_v2 }
  0x4c   :  { %v7590_v62 = vld [vmem:[#allocation5 + $0x5a0] sm:$0xf]  ;;  %v10442_v63 = vld [vmem:[#allocation5 + $0x5ac] sm:$0xf0]  ;;  %v11412_v1 = vpack.c.bf16 %v156_v59, %v132_v54  ;;  %v7463_v9 = vor.u32 %v10410_v57, %v7462_v56 }
  0x4d   :  { %v7718_v0 = vld [vmem:[#allocation5 + $0x6a0] sm:$0xf]  ;;  %v10474_v3 = vld [vmem:[#allocation5 + $0x6ac] sm:$0xf0]  ;;  %4828 = vmatmul.bf16.vlgmr.msra.gmra.mxu0 %v11410_v58  ;;  %v7591_v12 = vor.u32 %v10442_v63, %v7590_v62 }
  0x4e   :  { %v7846_v4 = vld [vmem:[#allocation5 + $0x7a0] sm:$0xf]  ;;  %v10506_v5 = vld [vmem:[#allocation5 + $0x7ac] sm:$0xf0]  ;;  %4856 = vmatmul.bf16.vlgmr.msra.gmra.mxu2 %v11412_v1  ;;  %v7719_v13 = vor.u32 %v10474_v3, %v7718_v0  ;;  %4878 = vmatpush.bf16.msrb.mxu0 %v7463_v9 }
  0x4f   :  { %v7446_v14 = vld [vmem:[#allocation5 + $0x480] sm:$0xf]  ;;  %v10406_v15 = vld [vmem:[#allocation5 + $0x48c] sm:$0xf0]  ;;  %v7847_v18 = vor.u32 %v10506_v5, %v7846_v4  ;;  %4892 = vmatpush.bf16.msrb.mxu1 %v7591_v12 }
  0x50   :  { %v7574_v16 = vld [vmem:[#allocation5 + $0x580] sm:$0xf]  ;;  %v10438_v19 = vld [vmem:[#allocation5 + $0x58c] sm:$0xf0]  ;;  %v7447_v24 = vor.u32 %v10406_v15, %v7446_v14  ;;  %4906 = vmatpush.bf16.msrb.mxu2 %v7719_v13 }
  0x51   :  { %v7702_v20 = vld [vmem:[#allocation5 + $0x680] sm:$0xf]  ;;  %v10470_v21 = vld [vmem:[#allocation5 + $0x68c] sm:$0xf0]  ;;  %v7575_v25 = vor.u32 %v10438_v19, %v7574_v16  ;;  %4920 = vmatpush.bf16.msrb.mxu3 %v7847_v18 }
  0x52   :  { %v7830_v22 = vld [vmem:[#allocation5 + $0x780] sm:$0xf]  ;;  %v10502_v23 = vld [vmem:[#allocation5 + $0x78c] sm:$0xf0]  ;;  %v7703_v26 = vor.u32 %v10470_v21, %v7702_v20  ;;  %4879 = vmatpush.bf16.msrb.mxu0 %v7447_v24 }
  0x53   :  { %v7430_v27 = vld [vmem:[#allocation5 + $0x460] sm:$0xf]  ;;  %v10402_v28 = vld [vmem:[#allocation5 + $0x46c] sm:$0xf0]  ;;  %v7831_v30 = vor.u32 %v10502_v23, %v7830_v22  ;;  %4893 = vmatpush.bf16.msrb.mxu1 %v7575_v25 }
  0x54   :  { %v7558_v29 = vld [vmem:[#allocation5 + $0x560] sm:$0xf]  ;;  %v10434_v31 = vld [vmem:[#allocation5 + $0x56c] sm:$0xf0]  ;;  %v7431_v36 = vor.u32 %v10402_v28, %v7430_v27  ;;  %4907 = vmatpush.bf16.msrb.mxu2 %v7703_v26  ;;  %v135_v27 = vld [vmem:[#allocation2 + $0x28] sm:$0xff] }
  0x55   :  { %v7686_v32 = vld [vmem:[#allocation5 + $0x660] sm:$0xf]  ;;  %v10466_v33 = vld [vmem:[#allocation5 + $0x66c] sm:$0xf0]  ;;  %v7559_v37 = vor.u32 %v10434_v31, %v7558_v29  ;;  %4921 = vmatpush.bf16.msrb.mxu3 %v7831_v30  ;;  %v159_v30 = vld [vmem:[#allocation2 + $0xe8] sm:$0xff] }
  0x56   :  { %v7814_v34 = vld [vmem:[#allocation5 + $0x760] sm:$0xf]  ;;  %v10498_v35 = vld [vmem:[#allocation5 + $0x76c] sm:$0xf0]  ;;  %v7687_v38 = vor.u32 %v10466_v33, %v7686_v32  ;;  %4880 = vmatpush.bf16.msrb.mxu0 %v7431_v36  ;;  %v137_v31 = vld [vmem:[#allocation2 + $0x38] sm:$0xff] }
  0x57   :  { %v7414_v39 = vld [vmem:[#allocation5 + $0x440] sm:$0xf]  ;;  %v10398_v40 = vld [vmem:[#allocation5 + $0x44c] sm:$0xf0]  ;;  %v7815_v42 = vor.u32 %v10498_v35, %v7814_v34  ;;  %4894 = vmatpush.bf16.msrb.mxu1 %v7559_v37  ;;  %v161_v32 = vld [vmem:[#allocation2 + $0xf8] sm:$0xff] }
  0x58   :  { %v7542_v41 = vld [vmem:[#allocation5 + $0x540] sm:$0xf]  ;;  %v10430_v43 = vld [vmem:[#allocation5 + $0x54c] sm:$0xf0]  ;;  %v7415_v48 = vor.u32 %v10398_v40, %v7414_v39  ;;  %4908 = vmatpush.bf16.msrb.mxu2 %v7687_v38 }
  0x59   :  { %v7670_v44 = vld [vmem:[#allocation5 + $0x640] sm:$0xf]  ;;  %v10462_v45 = vld [vmem:[#allocation5 + $0x64c] sm:$0xf0]  ;;  %v7543_v50 = vor.u32 %v10430_v43, %v7542_v41  ;;  %4922 = vmatpush.bf16.msrb.mxu3 %v7815_v42 }
  0x5a   :  { %v7798_v46 = vld [vmem:[#allocation5 + $0x740] sm:$0xf]  ;;  %v10494_v47 = vld [vmem:[#allocation5 + $0x74c] sm:$0xf0]  ;;  %v7671_v51 = vor.u32 %v10462_v45, %v7670_v44  ;;  %4881 = vmatpush.bf16.msrb.mxu0 %v7415_v48  ;;  %v11426_v44 = vpack.c.bf16 %v159_v30, %v135_v27 }
  0x5b   :  { %v7398_v49 = vld [vmem:[#allocation5 + $0x420] sm:$0xf]  ;;  %v10394_v52 = vld [vmem:[#allocation5 + $0x42c] sm:$0xf0]  ;;  %v7799_v55 = vor.u32 %v10494_v47, %v7798_v46  ;;  %4895 = vmatpush.bf16.msrb.mxu1 %v7543_v50  ;;  %v11428_v47 = vpack.c.bf16 %v161_v32, %v137_v31 }
  0x5c   :  { %v7526_v53 = vld [vmem:[#allocation5 + $0x520] sm:$0xf]  ;;  %v10426_v54 = vld [vmem:[#allocation5 + $0x52c] sm:$0xf0]  ;;  %v7399_v63 = vor.u32 %v10394_v52, %v7398_v49  ;;  %4909 = vmatpush.bf16.msrb.mxu2 %v7671_v51 }
  0x5d   :  { %v7654_v56 = vld [vmem:[#allocation5 + $0x620] sm:$0xf]  ;;  %v10458_v57 = vld [vmem:[#allocation5 + $0x62c] sm:$0xf0]  ;;  %v7527_v5 = vor.u32 %v10426_v54, %v7526_v53  ;;  %4923 = vmatpush.bf16.msrb.mxu3 %v7799_v55 }
  0x5e   :  { %v7782_v59 = vld [vmem:[#allocation5 + $0x720] sm:$0xf]  ;;  %v10490_v60 = vld [vmem:[#allocation5 + $0x72c] sm:$0xf0]  ;;  %v7655_v6 = vor.u32 %v10458_v57, %v7654_v56  ;;  %4882 = vmatpush.bf16.msrb.mxu0 %v7399_v63 }
  0x5f   :  { %v7382_v61 = vld [vmem:[#allocation5 + $0x400] sm:$0xf]  ;;  %v10390_v62 = vld [vmem:[#allocation5 + $0x40c] sm:$0xf0]  ;;  %v7783_v11 = vor.u32 %v10490_v60, %v7782_v59  ;;  %4896 = vmatpush.bf16.msrb.mxu1 %v7527_v5 }
  0x60   :  { %v7510_v0 = vld [vmem:[#allocation5 + $0x500] sm:$0xf]  ;;  %v10422_v2 = vld [vmem:[#allocation5 + $0x50c] sm:$0xf0]  ;;  %v7383_v19 = vor.u32 %v10390_v62, %v7382_v61  ;;  %4910 = vmatpush.bf16.msrb.mxu2 %v7655_v6 }
  0x61   :  { %v7638_v3 = vld [vmem:[#allocation5 + $0x600] sm:$0xf]  ;;  %v10454_v4 = vld [vmem:[#allocation5 + $0x60c] sm:$0xf0]  ;;  %v7511_v23 = vor.u32 %v10422_v2, %v7510_v0  ;;  %4924 = vmatpush.bf16.msrb.mxu3 %v7783_v11 }
  0x62   :  { %v7766_v7 = vld [vmem:[#allocation5 + $0x700] sm:$0xf]  ;;  %v10486_v8 = vld [vmem:[#allocation5 + $0x70c] sm:$0xf0]  ;;  %v7639_v24 = vor.u32 %v10454_v4, %v7638_v3  ;;  %4883 = vmatpush.bf16.msrb.mxu0 %v7383_v19 }
  0x63   :  { %v8006_v9 = vld [vmem:[#allocation5 + $0x8e0] sm:$0xf]  ;;  %v10546_v12 = vld [vmem:[#allocation5 + $0x8ec] sm:$0xf0]  ;;  %v7767_v28 = vor.u32 %v10486_v8, %v7766_v7  ;;  %4897 = vmatpush.bf16.msrb.mxu1 %v7511_v23 }
  0x64   :  { %v8134_v13 = vld [vmem:[#allocation5 + $0x9e0] sm:$0xf]  ;;  %v10578_v14 = vld [vmem:[#allocation5 + $0x9ec] sm:$0xf0]  ;;  %v8007_v29 = vor.u32 %v10546_v12, %v8006_v9  ;;  %4911 = vmatpush.bf16.msrb.mxu2 %v7639_v24 }
  0x65   :  { %v8262_v15 = vld [vmem:[#allocation5 + $0xae0] sm:$0xf]  ;;  %v10610_v16 = vld [vmem:[#allocation5 + $0xaec] sm:$0xf0]  ;;  %v8135_v33 = vor.u32 %v10578_v14, %v8134_v13  ;;  %4925 = vmatpush.bf16.msrb.mxu3 %v7767_v28 }
  0x66   :  { %v8390_v18 = vld [vmem:[#allocation5 + $0xbe0] sm:$0xf]  ;;  %v10642_v20 = vld [vmem:[#allocation5 + $0xbec] sm:$0xf0]  ;;  %v8263_v34 = vor.u32 %v10610_v16, %v8262_v15  ;;  %4932 = vmatpush.bf16.msra.mxu0 %v8007_v29  ;;  %4898 = vmatmul.bf16.vlgmr.msrb.gmra.mxu1 %v11426_v44 }
  0x67   :  { %v134_v21 = vld [vmem:[#allocation2 + $0x20] sm:$0xff]  ;;  %v136_v25 = vld [vmem:[#allocation2 + $0x30] sm:$0xff]  ;;  %v8391_v38 = vor.u32 %v10642_v20, %v8390_v18  ;;  %4946 = vmatpush.bf16.msra.mxu1 %v8135_v33 }
  0x68   :  { %v158_v22 = vld [vmem:[#allocation2 + $0xe0] sm:$0xff]  ;;  %v160_v26 = vld [vmem:[#allocation2 + $0xf0] sm:$0xff]  ;;  %4960 = vmatpush.bf16.msra.mxu2 %v8263_v34  ;;  %4926 = vmatmul.bf16.vlgmr.msrb.gmra.mxu3 %v11428_v47 }
  0x69   :  { %v7990_v35 = vld [vmem:[#allocation5 + $0x8c0] sm:$0xf]  ;;  %v10542_v36 = vld [vmem:[#allocation5 + $0x8cc] sm:$0xf0]  ;;  %v11422_v39 = vpack.c.bf16 %v158_v22, %v134_v21  ;;  %v11424_v43 = vpack.c.bf16 %v160_v26, %v136_v25  ;;  %4974 = vmatpush.bf16.msra.mxu3 %v8391_v38 }
  0x6a   :  { %v8118_v37 = vld [vmem:[#allocation5 + $0x9c0] sm:$0xf]  ;;  %v10574_v40 = vld [vmem:[#allocation5 + $0x9cc] sm:$0xf0]  ;;  %v7991_v48 = vor.u32 %v10542_v36, %v7990_v35 }
  0x6b   :  { %v8246_v41 = vld [vmem:[#allocation5 + $0xac0] sm:$0xf]  ;;  %v10606_v42 = vld [vmem:[#allocation5 + $0xacc] sm:$0xf0]  ;;  %v8119_v49 = vor.u32 %v10574_v40, %v8118_v37  ;;  %4884 = vmatmul.bf16.vlgmr.msrb.gmra.mxu0 %v11422_v39  ;;  %4912 = vmatmul.bf16.vlgmr.msrb.gmra.mxu2 %v11424_v43 }
  0x6c   :  { %v8374_v45 = vld [vmem:[#allocation5 + $0xbc0] sm:$0xf]  ;;  %v10638_v46 = vld [vmem:[#allocation5 + $0xbcc] sm:$0xf0]  ;;  %v8247_v50 = vor.u32 %v10606_v42, %v8246_v41  ;;  %4933 = vmatpush.bf16.msra.mxu0 %v7991_v48 }
  0x6d   :  { %v7974_v51 = vld [vmem:[#allocation5 + $0x8a0] sm:$0xf]  ;;  %v10538_v52 = vld [vmem:[#allocation5 + $0x8ac] sm:$0xf0]  ;;  %v8375_v54 = vor.u32 %v10638_v46, %v8374_v45  ;;  %4947 = vmatpush.bf16.msra.mxu1 %v8119_v49 }
  0x6e   :  { %v8102_v53 = vld [vmem:[#allocation5 + $0x9a0] sm:$0xf]  ;;  %v10570_v55 = vld [vmem:[#allocation5 + $0x9ac] sm:$0xf0]  ;;  %v7975_v61 = vor.u32 %v10538_v52, %v7974_v51  ;;  %4961 = vmatpush.bf16.msra.mxu2 %v8247_v50 }
  0x6f   :  { %v8230_v56 = vld [vmem:[#allocation5 + $0xaa0] sm:$0xf]  ;;  %v10602_v57 = vld [vmem:[#allocation5 + $0xaac] sm:$0xf0]  ;;  %v8103_v62 = vor.u32 %v10570_v55, %v8102_v53  ;;  %4975 = vmatpush.bf16.msra.mxu3 %v8375_v54 }
  0x70   :  { %v8358_v59 = vld [vmem:[#allocation5 + $0xba0] sm:$0xf]  ;;  %v10634_v60 = vld [vmem:[#allocation5 + $0xbac] sm:$0xf0]  ;;  %v8231_v63 = vor.u32 %v10602_v57, %v8230_v56  ;;  %4934 = vmatpush.bf16.msra.mxu0 %v7975_v61 }
  0x71   :  { %v7958_v0 = vld [vmem:[#allocation5 + $0x880] sm:$0xf]  ;;  %v10534_v2 = vld [vmem:[#allocation5 + $0x88c] sm:$0xf0]  ;;  %v8359_v4 = vor.u32 %v10634_v60, %v8358_v59  ;;  %4948 = vmatpush.bf16.msra.mxu1 %v8103_v62 }
  0x72   :  { %v8086_v3 = vld [vmem:[#allocation5 + $0x980] sm:$0xf]  ;;  %v10566_v5 = vld [vmem:[#allocation5 + $0x98c] sm:$0xf0]  ;;  %v7959_v11 = vor.u32 %v10534_v2, %v7958_v0  ;;  %4962 = vmatpush.bf16.msra.mxu2 %v8231_v63 }
  0x73   :  { %v8214_v6 = vld [vmem:[#allocation5 + $0xa80] sm:$0xf]  ;;  %v10598_v7 = vld [vmem:[#allocation5 + $0xa8c] sm:$0xf0]  ;;  %v8087_v12 = vor.u32 %v10566_v5, %v8086_v3  ;;  %4976 = vmatpush.bf16.msra.mxu3 %v8359_v4 }
  0x74   :  { %v8342_v8 = vld [vmem:[#allocation5 + $0xb80] sm:$0xf]  ;;  %v10630_v9 = vld [vmem:[#allocation5 + $0xb8c] sm:$0xf0]  ;;  %v8215_v13 = vor.u32 %v10598_v7, %v8214_v6  ;;  %4935 = vmatpush.bf16.msra.mxu0 %v7959_v11 }
  0x75   :  { %v7942_v14 = vld [vmem:[#allocation5 + $0x860] sm:$0xf]  ;;  %v10530_v15 = vld [vmem:[#allocation5 + $0x86c] sm:$0xf0]  ;;  %v8343_v18 = vor.u32 %v10630_v9, %v8342_v8  ;;  %4949 = vmatpush.bf16.msra.mxu1 %v8087_v12 }
  0x76   :  { %v8070_v16 = vld [vmem:[#allocation5 + $0x960] sm:$0xf]  ;;  %v10562_v19 = vld [vmem:[#allocation5 + $0x96c] sm:$0xf0]  ;;  %v7943_v24 = vor.u32 %v10530_v15, %v7942_v14  ;;  %4963 = vmatpush.bf16.msra.mxu2 %v8215_v13 }
  0x77   :  { %v8198_v20 = vld [vmem:[#allocation5 + $0xa60] sm:$0xf]  ;;  %v10594_v21 = vld [vmem:[#allocation5 + $0xa6c] sm:$0xf0]  ;;  %v8071_v25 = vor.u32 %v10562_v19, %v8070_v16  ;;  %4977 = vmatpush.bf16.msra.mxu3 %v8343_v18  ;;  %v139_v19 = vld [vmem:[#allocation2 + $0x48] sm:$0xff] }
  0x78   :  { %v8326_v22 = vld [vmem:[#allocation5 + $0xb60] sm:$0xf]  ;;  %v10626_v23 = vld [vmem:[#allocation5 + $0xb6c] sm:$0xf0]  ;;  %v8199_v26 = vor.u32 %v10594_v21, %v8198_v20  ;;  %4936 = vmatpush.bf16.msra.mxu0 %v7943_v24  ;;  %v165_v24 = vld [vmem:[#allocation2 + $0x118] sm:$0xff] }
  0x79   :  { %v7926_v27 = vld [vmem:[#allocation5 + $0x840] sm:$0xf]  ;;  %v10526_v28 = vld [vmem:[#allocation5 + $0x84c] sm:$0xf0]  ;;  %v8327_v30 = vor.u32 %v10626_v23, %v8326_v22  ;;  %4950 = vmatpush.bf16.msra.mxu1 %v8071_v25  ;;  %v163_v22 = vld [vmem:[#allocation2 + $0x108] sm:$0xff] }
  0x7a   :  { %v8054_v29 = vld [vmem:[#allocation5 + $0x940] sm:$0xf]  ;;  %v10558_v31 = vld [vmem:[#allocation5 + $0x94c] sm:$0xf0]  ;;  %v7927_v36 = vor.u32 %v10526_v28, %v7926_v27  ;;  %4964 = vmatpush.bf16.msra.mxu2 %v8199_v26  ;;  %v141_v23 = vld [vmem:[#allocation2 + $0x58] sm:$0xff] }
  0x7b   :  { %v8182_v32 = vld [vmem:[#allocation5 + $0xa40] sm:$0xf]  ;;  %v10590_v33 = vld [vmem:[#allocation5 + $0xa4c] sm:$0xf0]  ;;  %v8055_v38 = vor.u32 %v10558_v31, %v8054_v29  ;;  %4978 = vmatpush.bf16.msra.mxu3 %v8327_v30 }
  0x7c   :  { %v8310_v34 = vld [vmem:[#allocation5 + $0xb40] sm:$0xf]  ;;  %v10622_v35 = vld [vmem:[#allocation5 + $0xb4c] sm:$0xf0]  ;;  %v8183_v40 = vor.u32 %v10590_v33, %v8182_v32  ;;  %4937 = vmatpush.bf16.msra.mxu0 %v7927_v36  ;;  %v11438_v36 = vpack.c.bf16 %v163_v22, %v139_v19 }
  0x7d   :  { %v7910_v37 = vld [vmem:[#allocation5 + $0x820] sm:$0xf]  ;;  %v10522_v41 = vld [vmem:[#allocation5 + $0x82c] sm:$0xf0]  ;;  %v8311_v46 = vor.u32 %v10622_v35, %v8310_v34  ;;  %4951 = vmatpush.bf16.msra.mxu1 %v8055_v38 }
  0x7e   :  { %v8038_v42 = vld [vmem:[#allocation5 + $0x920] sm:$0xf]  ;;  %v10554_v45 = vld [vmem:[#allocation5 + $0x92c] sm:$0xf0]  ;;  %v7911_v54 = vor.u32 %v10522_v41, %v7910_v37  ;;  %4965 = vmatpush.bf16.msra.mxu2 %v8183_v40  ;;  %v11440_v40 = vpack.c.bf16 %v165_v24, %v141_v23 }
  0x7f   :  { %v8166_v48 = vld [vmem:[#allocation5 + $0xa20] sm:$0xf]  ;;  %v10586_v49 = vld [vmem:[#allocation5 + $0xa2c] sm:$0xf0]  ;;  %v8039_v60 = vor.u32 %v10554_v45, %v8038_v42  ;;  %4979 = vmatpush.bf16.msra.mxu3 %v8311_v46 }
  0x80   :  { %v8294_v50 = vld [vmem:[#allocation5 + $0xb20] sm:$0xf]  ;;  %v10618_v51 = vld [vmem:[#allocation5 + $0xb2c] sm:$0xf0]  ;;  %v8167_v61 = vor.u32 %v10586_v49, %v8166_v48  ;;  %4938 = vmatpush.bf16.msra.mxu0 %v7911_v54 }
  0x81   :  { %v7894_v52 = vld [vmem:[#allocation5 + $0x800] sm:$0xf]  ;;  %v10518_v53 = vld [vmem:[#allocation5 + $0x80c] sm:$0xf0]  ;;  %v8295_v2 = vor.u32 %v10618_v51, %v8294_v50  ;;  %4952 = vmatpush.bf16.msra.mxu1 %v8039_v60 }
  0x82   :  { %v8022_v55 = vld [vmem:[#allocation5 + $0x900] sm:$0xf]  ;;  %v10550_v56 = vld [vmem:[#allocation5 + $0x90c] sm:$0xf0]  ;;  %v7895_v9 = vor.u32 %v10518_v53, %v7894_v52  ;;  %4966 = vmatpush.bf16.msra.mxu2 %v8167_v61 }
  0x83   :  { %v8150_v57 = vld [vmem:[#allocation5 + $0xa00] sm:$0xf]  ;;  %v10582_v59 = vld [vmem:[#allocation5 + $0xa0c] sm:$0xf0]  ;;  %v8023_v14 = vor.u32 %v10550_v56, %v8022_v55  ;;  %4980 = vmatpush.bf16.msra.mxu3 %v8295_v2 }
  0x84   :  { %v8278_v62 = vld [vmem:[#allocation5 + $0xb00] sm:$0xf]  ;;  %v10614_v63 = vld [vmem:[#allocation5 + $0xb0c] sm:$0xf0]  ;;  %v8151_v15 = vor.u32 %v10582_v59, %v8150_v57  ;;  %4939 = vmatpush.bf16.msra.mxu0 %v7895_v9 }
  0x85   :  { %v8518_v0 = vld [vmem:[#allocation5 + $0xce0] sm:$0xf]  ;;  %v10674_v3 = vld [vmem:[#allocation5 + $0xcec] sm:$0xf0]  ;;  %v8279_v20 = vor.u32 %v10614_v63, %v8278_v62  ;;  %4953 = vmatpush.bf16.msra.mxu1 %v8023_v14 }
  0x86   :  { %v8646_v4 = vld [vmem:[#allocation5 + $0xde0] sm:$0xf]  ;;  %v10706_v5 = vld [vmem:[#allocation5 + $0xdec] sm:$0xf0]  ;;  %v8519_v21 = vor.u32 %v10674_v3, %v8518_v0  ;;  %4967 = vmatpush.bf16.msra.mxu2 %v8151_v15 }
  0x87   :  { %v8774_v6 = vld [vmem:[#allocation5 + $0xee0] sm:$0xf]  ;;  %v10738_v7 = vld [vmem:[#allocation5 + $0xeec] sm:$0xf0]  ;;  %v8647_v25 = vor.u32 %v10706_v5, %v8646_v4  ;;  %4981 = vmatpush.bf16.msra.mxu3 %v8279_v20 }
  0x88   :  { %v8902_v8 = vld [vmem:[#allocation5 + $0xfe0] sm:$0xf]  ;;  %v10770_v11 = vld [vmem:[#allocation5 + $0xfec] sm:$0xf0]  ;;  %v8775_v26 = vor.u32 %v10738_v7, %v8774_v6  ;;  %4988 = vmatpush.bf16.msrb.mxu0 %v8519_v21  ;;  %4954 = vmatmul.bf16.vlgmr.msra.gmra.mxu1 %v11438_v36 }
  0x89   :  { %v138_v12 = vld [vmem:[#allocation2 + $0x40] sm:$0xff]  ;;  %v140_v16 = vld [vmem:[#allocation2 + $0x50] sm:$0xff]  ;;  %v8903_v30 = vor.u32 %v10770_v11, %v8902_v8  ;;  %5002 = vmatpush.bf16.msrb.mxu1 %v8647_v25 }
  0x8a   :  { %v162_v13 = vld [vmem:[#allocation2 + $0x100] sm:$0xff]  ;;  %v164_v18 = vld [vmem:[#allocation2 + $0x110] sm:$0xff]  ;;  %5016 = vmatpush.bf16.msrb.mxu2 %v8775_v26  ;;  %4982 = vmatmul.bf16.vlgmr.msra.gmra.mxu3 %v11440_v40 }
  0x8b   :  { %v8502_v27 = vld [vmem:[#allocation5 + $0xcc0] sm:$0xf]  ;;  %v10670_v28 = vld [vmem:[#allocation5 + $0xccc] sm:$0xf0]  ;;  %v11434_v31 = vpack.c.bf16 %v162_v13, %v138_v12  ;;  %v11436_v35 = vpack.c.bf16 %v164_v18, %v140_v16  ;;  %5030 = vmatpush.bf16.msrb.mxu3 %v8903_v30 }
  0x8c   :  { %v8630_v29 = vld [vmem:[#allocation5 + $0xdc0] sm:$0xf]  ;;  %v10702_v32 = vld [vmem:[#allocation5 + $0xdcc] sm:$0xf0]  ;;  %v8503_v41 = vor.u32 %v10670_v28, %v8502_v27 }
  0x8d   :  { %v8758_v33 = vld [vmem:[#allocation5 + $0xec0] sm:$0xf]  ;;  %v10734_v34 = vld [vmem:[#allocation5 + $0xecc] sm:$0xf0]  ;;  %v8631_v42 = vor.u32 %v10702_v32, %v8630_v29  ;;  %4940 = vmatmul.bf16.vlgmr.msra.gmra.mxu0 %v11434_v31  ;;  %4968 = vmatmul.bf16.vlgmr.msra.gmra.mxu2 %v11436_v35 }
  0x8e   :  { %v8886_v37 = vld [vmem:[#allocation5 + $0xfc0] sm:$0xf]  ;;  %v10766_v38 = vld [vmem:[#allocation5 + $0xfcc] sm:$0xf0]  ;;  %v8759_v45 = vor.u32 %v10734_v34, %v8758_v33  ;;  %4989 = vmatpush.bf16.msrb.mxu0 %v8503_v41 }
  0x8f   :  { %v8486_v46 = vld [vmem:[#allocation5 + $0xca0] sm:$0xf]  ;;  %v10666_v48 = vld [vmem:[#allocation5 + $0xcac] sm:$0xf0]  ;;  %v8887_v50 = vor.u32 %v10766_v38, %v8886_v37  ;;  %5003 = vmatpush.bf16.msrb.mxu1 %v8631_v42 }
  0x90   :  { %v8614_v49 = vld [vmem:[#allocation5 + $0xda0] sm:$0xf]  ;;  %v10698_v51 = vld [vmem:[#allocation5 + $0xdac] sm:$0xf0]  ;;  %v8487_v56 = vor.u32 %v10666_v48, %v8486_v46  ;;  %5017 = vmatpush.bf16.msrb.mxu2 %v8759_v45 }
  0x91   :  { %v8742_v52 = vld [vmem:[#allocation5 + $0xea0] sm:$0xf]  ;;  %v10730_v53 = vld [vmem:[#allocation5 + $0xeac] sm:$0xf0]  ;;  %v8615_v57 = vor.u32 %v10698_v51, %v8614_v49  ;;  %5031 = vmatpush.bf16.msrb.mxu3 %v8887_v50 }
  0x92   :  { %v8870_v54 = vld [vmem:[#allocation5 + $0xfa0] sm:$0xf]  ;;  %v10762_v55 = vld [vmem:[#allocation5 + $0xfac] sm:$0xf0]  ;;  %v8743_v59 = vor.u32 %v10730_v53, %v8742_v52  ;;  %4990 = vmatpush.bf16.msrb.mxu0 %v8487_v56 }
  0x93   :  { %v8470_v60 = vld [vmem:[#allocation5 + $0xc80] sm:$0xf]  ;;  %v10662_v61 = vld [vmem:[#allocation5 + $0xc8c] sm:$0xf0]  ;;  %v8871_v63 = vor.u32 %v10762_v55, %v8870_v54  ;;  %5004 = vmatpush.bf16.msrb.mxu1 %v8615_v57 }
  0x94   :  { %v8598_v62 = vld [vmem:[#allocation5 + $0xd80] sm:$0xf]  ;;  %v10694_v0 = vld [vmem:[#allocation5 + $0xd8c] sm:$0xf0]  ;;  %v8471_v6 = vor.u32 %v10662_v61, %v8470_v60  ;;  %5018 = vmatpush.bf16.msrb.mxu2 %v8743_v59 }
  0x95   :  { %v8726_v2 = vld [vmem:[#allocation5 + $0xe80] sm:$0xf]  ;;  %v10726_v3 = vld [vmem:[#allocation5 + $0xe8c] sm:$0xf0]  ;;  %v8599_v7 = vor.u32 %v10694_v0, %v8598_v62  ;;  %5032 = vmatpush.bf16.msrb.mxu3 %v8871_v63 }
  0x96   :  { %v8854_v4 = vld [vmem:[#allocation5 + $0xf80] sm:$0xf]  ;;  %v10758_v5 = vld [vmem:[#allocation5 + $0xf8c] sm:$0xf0]  ;;  %v8727_v8 = vor.u32 %v10726_v3, %v8726_v2  ;;  %4991 = vmatpush.bf16.msrb.mxu0 %v8471_v6 }
  0x97   :  { %v8454_v9 = vld [vmem:[#allocation5 + $0xc60] sm:$0xf]  ;;  %v10658_v11 = vld [vmem:[#allocation5 + $0xc6c] sm:$0xf0]  ;;  %v8855_v13 = vor.u32 %v10758_v5, %v8854_v4  ;;  %5005 = vmatpush.bf16.msrb.mxu1 %v8599_v7 }
  0x98   :  { %v8582_v12 = vld [vmem:[#allocation5 + $0xd60] sm:$0xf]  ;;  %v10690_v14 = vld [vmem:[#allocation5 + $0xd6c] sm:$0xf0]  ;;  %v8455_v20 = vor.u32 %v10658_v11, %v8454_v9  ;;  %5019 = vmatpush.bf16.msrb.mxu2 %v8727_v8 }
  0x99   :  { %v8710_v15 = vld [vmem:[#allocation5 + $0xe60] sm:$0xf]  ;;  %v10722_v16 = vld [vmem:[#allocation5 + $0xe6c] sm:$0xf0]  ;;  %v8583_v21 = vor.u32 %v10690_v14, %v8582_v12  ;;  %5033 = vmatpush.bf16.msrb.mxu3 %v8855_v13 }
  0x9a   :  { %v8838_v18 = vld [vmem:[#allocation5 + $0xf60] sm:$0xf]  ;;  %v10754_v19 = vld [vmem:[#allocation5 + $0xf6c] sm:$0xf0]  ;;  %v8711_v22 = vor.u32 %v10722_v16, %v8710_v15  ;;  %4992 = vmatpush.bf16.msrb.mxu0 %v8455_v20 }
  0x9b   :  { %v8438_v23 = vld [vmem:[#allocation5 + $0xc40] sm:$0xf]  ;;  %v10654_v24 = vld [vmem:[#allocation5 + $0xc4c] sm:$0xf0]  ;;  %v8839_v26 = vor.u32 %v10754_v19, %v8838_v18  ;;  %5006 = vmatpush.bf16.msrb.mxu1 %v8583_v21  ;;  %v143_v19 = vld [vmem:[#allocation2 + $0x68] sm:$0xff] }
  0x9c   :  { %v8566_v25 = vld [vmem:[#allocation5 + $0xd40] sm:$0xf]  ;;  %v10686_v27 = vld [vmem:[#allocation5 + $0xd4c] sm:$0xf0]  ;;  %v8439_v33 = vor.u32 %v10654_v24, %v8438_v23  ;;  %5020 = vmatpush.bf16.msrb.mxu2 %v8711_v22  ;;  %v167_v22 = vld [vmem:[#allocation2 + $0x128] sm:$0xff] }
  0x9d   :  { %v8694_v28 = vld [vmem:[#allocation5 + $0xe40] sm:$0xf]  ;;  %v10718_v29 = vld [vmem:[#allocation5 + $0xe4c] sm:$0xf0]  ;;  %v8567_v38 = vor.u32 %v10686_v27, %v8566_v25  ;;  %5034 = vmatpush.bf16.msrb.mxu3 %v8839_v26  ;;  %v145_v23 = vld [vmem:[#allocation2 + $0x78] sm:$0xff] }
  0x9e   :  { %v8822_v30 = vld [vmem:[#allocation5 + $0xf40] sm:$0xf]  ;;  %v10750_v32 = vld [vmem:[#allocation5 + $0xf4c] sm:$0xf0]  ;;  %v8695_v41 = vor.u32 %v10718_v29, %v8694_v28  ;;  %4993 = vmatpush.bf16.msrb.mxu0 %v8439_v33  ;;  %v169_v24 = vld [vmem:[#allocation2 + $0x138] sm:$0xff] }
  0x9f   :  { %v8422_v34 = vld [vmem:[#allocation5 + $0xc20] sm:$0xf]  ;;  %v10650_v37 = vld [vmem:[#allocation5 + $0xc2c] sm:$0xf0]  ;;  %v8823_v48 = vor.u32 %v10750_v32, %v8822_v30  ;;  %5007 = vmatpush.bf16.msrb.mxu1 %v8567_v38 }
  0xa0   :  { %v8550_v42 = vld [vmem:[#allocation5 + $0xd20] sm:$0xf]  ;;  %v10682_v45 = vld [vmem:[#allocation5 + $0xd2c] sm:$0xf0]  ;;  %v8423_v54 = vor.u32 %v10650_v37, %v8422_v34  ;;  %5021 = vmatpush.bf16.msrb.mxu2 %v8695_v41  ;;  %v11450_v41 = vpack.c.bf16 %v167_v22, %v143_v19 }
  0xa1   :  { %v8678_v46 = vld [vmem:[#allocation5 + $0xe20] sm:$0xf]  ;;  %v10714_v49 = vld [vmem:[#allocation5 + $0xe2c] sm:$0xf0]  ;;  %v8551_v60 = vor.u32 %v10682_v45, %v8550_v42  ;;  %5035 = vmatpush.bf16.msrb.mxu3 %v8823_v48 }
  0xa2   :  { %v8806_v50 = vld [vmem:[#allocation5 + $0xf20] sm:$0xf]  ;;  %v10746_v51 = vld [vmem:[#allocation5 + $0xf2c] sm:$0xf0]  ;;  %v8679_v61 = vor.u32 %v10714_v49, %v8678_v46  ;;  %4994 = vmatpush.bf16.msrb.mxu0 %v8423_v54  ;;  %v11452_v46 = vpack.c.bf16 %v169_v24, %v145_v23 }
  0xa3   :  { %v8406_v52 = vld [vmem:[#allocation5 + $0xc00] sm:$0xf]  ;;  %v10646_v53 = vld [vmem:[#allocation5 + $0xc0c] sm:$0xf0]  ;;  %v8807_v2 = vor.u32 %v10746_v51, %v8806_v50  ;;  %5008 = vmatpush.bf16.msrb.mxu1 %v8551_v60 }
  0xa4   :  { %v8534_v55 = vld [vmem:[#allocation5 + $0xd00] sm:$0xf]  ;;  %v10678_v56 = vld [vmem:[#allocation5 + $0xd0c] sm:$0xf0]  ;;  %v8407_v9 = vor.u32 %v10646_v53, %v8406_v52  ;;  %5022 = vmatpush.bf16.msrb.mxu2 %v8679_v61 }
  0xa5   :  { %v8662_v57 = vld [vmem:[#allocation5 + $0xe00] sm:$0xf]  ;;  %v10710_v59 = vld [vmem:[#allocation5 + $0xe0c] sm:$0xf0]  ;;  %v8535_v14 = vor.u32 %v10678_v56, %v8534_v55  ;;  %5036 = vmatpush.bf16.msrb.mxu3 %v8807_v2 }
  0xa6   :  { %v8790_v62 = vld [vmem:[#allocation5 + $0xf00] sm:$0xf]  ;;  %v10742_v63 = vld [vmem:[#allocation5 + $0xf0c] sm:$0xf0]  ;;  %v8663_v15 = vor.u32 %v10710_v59, %v8662_v57  ;;  %4995 = vmatpush.bf16.msrb.mxu0 %v8407_v9 }
  0xa7   :  { %v9030_v0 = vld [vmem:[#allocation5 + $0x10e0] sm:$0xf]  ;;  %v10802_v3 = vld [vmem:[#allocation5 + $0x10ec] sm:$0xf0]  ;;  %v8791_v20 = vor.u32 %v10742_v63, %v8790_v62  ;;  %5009 = vmatpush.bf16.msrb.mxu1 %v8535_v14 }
  0xa8   :  { %v9158_v4 = vld [vmem:[#allocation5 + $0x11e0] sm:$0xf]  ;;  %v10834_v5 = vld [vmem:[#allocation5 + $0x11ec] sm:$0xf0]  ;;  %v9031_v21 = vor.u32 %v10802_v3, %v9030_v0  ;;  %5023 = vmatpush.bf16.msrb.mxu2 %v8663_v15 }
  0xa9   :  { %v9286_v6 = vld [vmem:[#allocation5 + $0x12e0] sm:$0xf]  ;;  %v10866_v7 = vld [vmem:[#allocation5 + $0x12ec] sm:$0xf0]  ;;  %v9159_v25 = vor.u32 %v10834_v5, %v9158_v4  ;;  %5037 = vmatpush.bf16.msrb.mxu3 %v8791_v20 }
  0xaa   :  { %v9414_v8 = vld [vmem:[#allocation5 + $0x13e0] sm:$0xf]  ;;  %v10898_v11 = vld [vmem:[#allocation5 + $0x13ec] sm:$0xf0]  ;;  %v9287_v26 = vor.u32 %v10866_v7, %v9286_v6  ;;  %5044 = vmatpush.bf16.msra.mxu0 %v9031_v21  ;;  %5010 = vmatmul.bf16.vlgmr.msrb.gmra.mxu1 %v11450_v41 }
  0xab   :  { %v142_v12 = vld [vmem:[#allocation2 + $0x60] sm:$0xff]  ;;  %v144_v16 = vld [vmem:[#allocation2 + $0x70] sm:$0xff]  ;;  %v9415_v30 = vor.u32 %v10898_v11, %v9414_v8  ;;  %5058 = vmatpush.bf16.msra.mxu1 %v9159_v25 }
  0xac   :  { %v166_v13 = vld [vmem:[#allocation2 + $0x120] sm:$0xff]  ;;  %v168_v18 = vld [vmem:[#allocation2 + $0x130] sm:$0xff]  ;;  %5072 = vmatpush.bf16.msra.mxu2 %v9287_v26  ;;  %5038 = vmatmul.bf16.vlgmr.msrb.gmra.mxu3 %v11452_v46 }
  0xad   :  { %v9014_v27 = vld [vmem:[#allocation5 + $0x10c0] sm:$0xf]  ;;  %v10798_v28 = vld [vmem:[#allocation5 + $0x10cc] sm:$0xf0]  ;;  %v11446_v32 = vpack.c.bf16 %v166_v13, %v142_v12  ;;  %v11448_v38 = vpack.c.bf16 %v168_v18, %v144_v16  ;;  %5086 = vmatpush.bf16.msra.mxu3 %v9415_v30 }
  0xae   :  { %v9142_v29 = vld [vmem:[#allocation5 + $0x11c0] sm:$0xf]  ;;  %v10830_v33 = vld [vmem:[#allocation5 + $0x11cc] sm:$0xf0]  ;;  %v9015_v48 = vor.u32 %v10798_v28, %v9014_v27 }
  0xaf   :  { %v9270_v34 = vld [vmem:[#allocation5 + $0x12c0] sm:$0xf]  ;;  %v10862_v37 = vld [vmem:[#allocation5 + $0x12cc] sm:$0xf0]  ;;  %v9143_v49 = vor.u32 %v10830_v33, %v9142_v29  ;;  %4996 = vmatmul.bf16.vlgmr.msrb.gmra.mxu0 %v11446_v32  ;;  %5024 = vmatmul.bf16.vlgmr.msrb.gmra.mxu2 %v11448_v38 }
  0xb0   :  { %v9398_v42 = vld [vmem:[#allocation5 + $0x13c0] sm:$0xf]  ;;  %v10894_v45 = vld [vmem:[#allocation5 + $0x13cc] sm:$0xf0]  ;;  %v9271_v50 = vor.u32 %v10862_v37, %v9270_v34  ;;  %5045 = vmatpush.bf16.msra.mxu0 %v9015_v48 }
  0xb1   :  { %v8998_v51 = vld [vmem:[#allocation5 + $0x10a0] sm:$0xf]  ;;  %v10794_v52 = vld [vmem:[#allocation5 + $0x10ac] sm:$0xf0]  ;;  %v9399_v54 = vor.u32 %v10894_v45, %v9398_v42  ;;  %5059 = vmatpush.bf16.msra.mxu1 %v9143_v49 }
  0xb2   :  { %v9126_v53 = vld [vmem:[#allocation5 + $0x11a0] sm:$0xf]  ;;  %v10826_v55 = vld [vmem:[#allocation5 + $0x11ac] sm:$0xf0]  ;;  %v8999_v61 = vor.u32 %v10794_v52, %v8998_v51  ;;  %5073 = vmatpush.bf16.msra.mxu2 %v9271_v50 }
  0xb3   :  { %v9254_v56 = vld [vmem:[#allocation5 + $0x12a0] sm:$0xf]  ;;  %v10858_v57 = vld [vmem:[#allocation5 + $0x12ac] sm:$0xf0]  ;;  %v9127_v62 = vor.u32 %v10826_v55, %v9126_v53  ;;  %5087 = vmatpush.bf16.msra.mxu3 %v9399_v54 }
  0xb4   :  { %v9382_v59 = vld [vmem:[#allocation5 + $0x13a0] sm:$0xf]  ;;  %v10890_v60 = vld [vmem:[#allocation5 + $0x13ac] sm:$0xf0]  ;;  %v9255_v63 = vor.u32 %v10858_v57, %v9254_v56  ;;  %5046 = vmatpush.bf16.msra.mxu0 %v8999_v61 }
  0xb5   :  { %v8982_v0 = vld [vmem:[#allocation5 + $0x1080] sm:$0xf]  ;;  %v10790_v2 = vld [vmem:[#allocation5 + $0x108c] sm:$0xf0]  ;;  %v9383_v4 = vor.u32 %v10890_v60, %v9382_v59  ;;  %5060 = vmatpush.bf16.msra.mxu1 %v9127_v62 }
  0xb6   :  { %v9110_v3 = vld [vmem:[#allocation5 + $0x1180] sm:$0xf]  ;;  %v10822_v5 = vld [vmem:[#allocation5 + $0x118c] sm:$0xf0]  ;;  %v8983_v11 = vor.u32 %v10790_v2, %v8982_v0  ;;  %5074 = vmatpush.bf16.msra.mxu2 %v9255_v63 }
  0xb7   :  { %v9238_v6 = vld [vmem:[#allocation5 + $0x1280] sm:$0xf]  ;;  %v10854_v7 = vld [vmem:[#allocation5 + $0x128c] sm:$0xf0]  ;;  %v9111_v12 = vor.u32 %v10822_v5, %v9110_v3  ;;  %5088 = vmatpush.bf16.msra.mxu3 %v9383_v4 }
  0xb8   :  { %v9366_v8 = vld [vmem:[#allocation5 + $0x1380] sm:$0xf]  ;;  %v10886_v9 = vld [vmem:[#allocation5 + $0x138c] sm:$0xf0]  ;;  %v9239_v13 = vor.u32 %v10854_v7, %v9238_v6  ;;  %5047 = vmatpush.bf16.msra.mxu0 %v8983_v11 }
  0xb9   :  { %v8966_v14 = vld [vmem:[#allocation5 + $0x1060] sm:$0xf]  ;;  %v10786_v15 = vld [vmem:[#allocation5 + $0x106c] sm:$0xf0]  ;;  %v9367_v18 = vor.u32 %v10886_v9, %v9366_v8  ;;  %5061 = vmatpush.bf16.msra.mxu1 %v9111_v12 }
  0xba   :  { %v9094_v16 = vld [vmem:[#allocation5 + $0x1160] sm:$0xf]  ;;  %v10818_v19 = vld [vmem:[#allocation5 + $0x116c] sm:$0xf0]  ;;  %v8967_v24 = vor.u32 %v10786_v15, %v8966_v14  ;;  %5075 = vmatpush.bf16.msra.mxu2 %v9239_v13 }
  0xbb   :  { %v9222_v20 = vld [vmem:[#allocation5 + $0x1260] sm:$0xf]  ;;  %v10850_v21 = vld [vmem:[#allocation5 + $0x126c] sm:$0xf0]  ;;  %v9095_v25 = vor.u32 %v10818_v19, %v9094_v16  ;;  %5089 = vmatpush.bf16.msra.mxu3 %v9367_v18 }
  0xbc   :  { %v9350_v22 = vld [vmem:[#allocation5 + $0x1360] sm:$0xf]  ;;  %v10882_v23 = vld [vmem:[#allocation5 + $0x136c] sm:$0xf0]  ;;  %v9223_v26 = vor.u32 %v10850_v21, %v9222_v20  ;;  %5048 = vmatpush.bf16.msra.mxu0 %v8967_v24 }
  0xbd   :  { %v8950_v27 = vld [vmem:[#allocation5 + $0x1040] sm:$0xf]  ;;  %v10782_v28 = vld [vmem:[#allocation5 + $0x104c] sm:$0xf0]  ;;  %v9351_v30 = vor.u32 %v10882_v23, %v9350_v22  ;;  %5062 = vmatpush.bf16.msra.mxu1 %v9095_v25 }
  0xbe   :  { %v9078_v29 = vld [vmem:[#allocation5 + $0x1140] sm:$0xf]  ;;  %v10814_v33 = vld [vmem:[#allocation5 + $0x114c] sm:$0xf0]  ;;  %v8951_v48 = vor.u32 %v10782_v28, %v8950_v27  ;;  %5076 = vmatpush.bf16.msra.mxu2 %v9223_v26  ;;  %v147_v27 = vld [vmem:[#allocation2 + $0x88] sm:$0xff] }
  0xbf   :  { %v9206_v34 = vld [vmem:[#allocation5 + $0x1240] sm:$0xf]  ;;  %v10846_v37 = vld [vmem:[#allocation5 + $0x124c] sm:$0xf0]  ;;  %v9079_v50 = vor.u32 %v10814_v33, %v9078_v29  ;;  %5090 = vmatpush.bf16.msra.mxu3 %v9351_v30  ;;  %v171_v30 = vld [vmem:[#allocation2 + $0x148] sm:$0xff] }
  0xc0   :  { %v9334_v42 = vld [vmem:[#allocation5 + $0x1340] sm:$0xf]  ;;  %v10878_v45 = vld [vmem:[#allocation5 + $0x134c] sm:$0xf0]  ;;  %v9207_v51 = vor.u32 %v10846_v37, %v9206_v34  ;;  %5049 = vmatpush.bf16.msra.mxu0 %v8951_v48  ;;  %v149_v33 = vld [vmem:[#allocation2 + $0x98] sm:$0xff] }
  0xc1   :  { %v8934_v49 = vld [vmem:[#allocation5 + $0x1020] sm:$0xf]  ;;  %v10778_v52 = vld [vmem:[#allocation5 + $0x102c] sm:$0xf0]  ;;  %v9335_v55 = vor.u32 %v10878_v45, %v9334_v42  ;;  %5063 = vmatpush.bf16.msra.mxu1 %v9079_v50  ;;  %v173_v34 = vld [vmem:[#allocation2 + $0x158] sm:$0xff] }
  0xc2   :  { %v9062_v53 = vld [vmem:[#allocation5 + $0x1120] sm:$0xf]  ;;  %v10810_v54 = vld [vmem:[#allocation5 + $0x112c] sm:$0xf0]  ;;  %v8935_v63 = vor.u32 %v10778_v52, %v8934_v49  ;;  %5077 = vmatpush.bf16.msra.mxu2 %v9207_v51 }
  0xc3   :  { %v9190_v56 = vld [vmem:[#allocation5 + $0x1220] sm:$0xf]  ;;  %v10842_v57 = vld [vmem:[#allocation5 + $0x122c] sm:$0xf0]  ;;  %v9063_v5 = vor.u32 %v10810_v54, %v9062_v53  ;;  %5091 = vmatpush.bf16.msra.mxu3 %v9335_v55 }
  0xc4   :  { %v9318_v59 = vld [vmem:[#allocation5 + $0x1320] sm:$0xf]  ;;  %v10874_v60 = vld [vmem:[#allocation5 + $0x132c] sm:$0xf0]  ;;  %v9191_v6 = vor.u32 %v10842_v57, %v9190_v56  ;;  %5050 = vmatpush.bf16.msra.mxu0 %v8935_v63  ;;  %v11462_v56 = vpack.c.bf16 %v171_v30, %v147_v27 }
  0xc5   :  { %v8918_v61 = vld [vmem:[#allocation5 + $0x1000] sm:$0xf]  ;;  %v10774_v62 = vld [vmem:[#allocation5 + $0x100c] sm:$0xf0]  ;;  %v9319_v11 = vor.u32 %v10874_v60, %v9318_v59  ;;  %5064 = vmatpush.bf16.msra.mxu1 %v9063_v5  ;;  %v11464_v60 = vpack.c.bf16 %v173_v34, %v149_v33 }
  0xc6   :  { %v9046_v0 = vld [vmem:[#allocation5 + $0x1100] sm:$0xf]  ;;  %v10806_v2 = vld [vmem:[#allocation5 + $0x110c] sm:$0xf0]  ;;  %v8919_v19 = vor.u32 %v10774_v62, %v8918_v61  ;;  %5078 = vmatpush.bf16.msra.mxu2 %v9191_v6 }
  0xc7   :  { %v9174_v3 = vld [vmem:[#allocation5 + $0x1200] sm:$0xf]  ;;  %v10838_v4 = vld [vmem:[#allocation5 + $0x120c] sm:$0xf0]  ;;  %v9047_v23 = vor.u32 %v10806_v2, %v9046_v0  ;;  %5092 = vmatpush.bf16.msra.mxu3 %v9319_v11 }
  0xc8   :  { %v9302_v7 = vld [vmem:[#allocation5 + $0x1300] sm:$0xf]  ;;  %v10870_v8 = vld [vmem:[#allocation5 + $0x130c] sm:$0xf0]  ;;  %v9175_v24 = vor.u32 %v10838_v4, %v9174_v3  ;;  %5051 = vmatpush.bf16.msra.mxu0 %v8919_v19 }
  0xc9   :  { %v9542_v9 = vld [vmem:[#allocation5 + $0x14e0] sm:$0xf]  ;;  %v10930_v12 = vld [vmem:[#allocation5 + $0x14ec] sm:$0xf0]  ;;  %v9303_v28 = vor.u32 %v10870_v8, %v9302_v7  ;;  %5065 = vmatpush.bf16.msra.mxu1 %v9047_v23 }
  0xca   :  { %v9670_v13 = vld [vmem:[#allocation5 + $0x15e0] sm:$0xf]  ;;  %v10962_v14 = vld [vmem:[#allocation5 + $0x15ec] sm:$0xf0]  ;;  %v9543_v29 = vor.u32 %v10930_v12, %v9542_v9  ;;  %5079 = vmatpush.bf16.msra.mxu2 %v9175_v24 }
  0xcb   :  { %v9798_v15 = vld [vmem:[#allocation5 + $0x16e0] sm:$0xf]  ;;  %v10994_v16 = vld [vmem:[#allocation5 + $0x16ec] sm:$0xf0]  ;;  %v9671_v37 = vor.u32 %v10962_v14, %v9670_v13  ;;  %5093 = vmatpush.bf16.msra.mxu3 %v9303_v28 }
  0xcc   :  { %v9926_v18 = vld [vmem:[#allocation5 + $0x17e0] sm:$0xf]  ;;  %v11026_v20 = vld [vmem:[#allocation5 + $0x17ec] sm:$0xf0]  ;;  %v9799_v42 = vor.u32 %v10994_v16, %v9798_v15  ;;  %5100 = vmatpush.bf16.msrb.mxu0 %v9543_v29  ;;  %5066 = vmatmul.bf16.vlgmr.msra.gmra.mxu1 %v11462_v56 }
  0xcd   :  { %v146_v21 = vld [vmem:[#allocation2 + $0x80] sm:$0xff]  ;;  %v148_v25 = vld [vmem:[#allocation2 + $0x90] sm:$0xff]  ;;  %v9927_v50 = vor.u32 %v11026_v20, %v9926_v18  ;;  %5114 = vmatpush.bf16.msrb.mxu1 %v9671_v37 }
  0xce   :  { %v170_v22 = vld [vmem:[#allocation2 + $0x140] sm:$0xff]  ;;  %v172_v26 = vld [vmem:[#allocation2 + $0x150] sm:$0xff]  ;;  %5128 = vmatpush.bf16.msrb.mxu2 %v9799_v42  ;;  %5094 = vmatmul.bf16.vlgmr.msra.gmra.mxu3 %v11464_v60 }
  0xcf   :  { %v9526_v45 = vld [vmem:[#allocation5 + $0x14c0] sm:$0xf]  ;;  %v10926_v48 = vld [vmem:[#allocation5 + $0x14cc] sm:$0xf0]  ;;  %v11458_v51 = vpack.c.bf16 %v170_v22, %v146_v21  ;;  %v11460_v55 = vpack.c.bf16 %v172_v26, %v148_v25  ;;  %5142 = vmatpush.bf16.msrb.mxu3 %v9927_v50  ;;  %v4829_v26 = vpop.f32.mrf.mxu0 }
  0xd0   :  { %v9654_v49 = vld [vmem:[#allocation5 + $0x15c0] sm:$0xf]  ;;  %v10958_v52 = vld [vmem:[#allocation5 + $0x15cc] sm:$0xf0]  ;;  %v9527_v61 = vor.u32 %v10926_v48, %v9526_v45 }
  0xd1   :  { %v9782_v53 = vld [vmem:[#allocation5 + $0x16c0] sm:$0xf]  ;;  %v10990_v54 = vld [vmem:[#allocation5 + $0x16cc] sm:$0xf0]  ;;  %v9655_v63 = vor.u32 %v10958_v52, %v9654_v49  ;;  %5052 = vmatmul.bf16.vlgmr.msra.gmra.mxu0 %v11458_v51  ;;  %5080 = vmatmul.bf16.vlgmr.msra.gmra.mxu2 %v11460_v55 }
  0xd2   :  { %v9910_v57 = vld [vmem:[#allocation5 + $0x17c0] sm:$0xf]  ;;  %v11022_v59 = vld [vmem:[#allocation5 + $0x17cc] sm:$0xf0]  ;;  %v9783_v0 = vor.u32 %v10990_v54, %v9782_v53  ;;  %5101 = vmatpush.bf16.msrb.mxu0 %v9527_v61  ;;  %v4843_v53 = vpop.f32.mrf.mxu1 }
  0xd3   :  { %v9510_v62 = vld [vmem:[#allocation5 + $0x14a0] sm:$0xf]  ;;  %v10922_v2 = vld [vmem:[#allocation5 + $0x14ac] sm:$0xf0]  ;;  %v9911_v5 = vor.u32 %v11022_v59, %v9910_v57  ;;  %5115 = vmatpush.bf16.msrb.mxu1 %v9655_v63 }
  0xd4   :  { %v9638_v3 = vld [vmem:[#allocation5 + $0x15a0] sm:$0xf]  ;;  %v10954_v6 = vld [vmem:[#allocation5 + $0x15ac] sm:$0xf0]  ;;  %v9511_v12 = vor.u32 %v10922_v2, %v9510_v62  ;;  %5129 = vmatpush.bf16.msrb.mxu2 %v9783_v0 }
  0xd5   :  { %v11466_v4 = vld [vmem:[#allocation7] sm:$0xf]  ;;  %v10986_v8 = vld [vmem:[#allocation5 + $0x16ac] sm:$0xf0]  ;;  %v9639_v14 = vor.u32 %v10954_v6, %v9638_v3  ;;  %5143 = vmatpush.bf16.msrb.mxu3 %v9911_v5 }
  0xd6   :  { %v9766_v7 = vld [vmem:[#allocation5 + $0x16a0] sm:$0xf]  ;;  %v11018_v11 = vld [vmem:[#allocation5 + $0x17ac] sm:$0xf0]  ;;  %v11906_v13 = vperm.slane %v11466_v4, 0  ;;  %5102 = vmatpush.bf16.msrb.mxu0 %v9511_v12 }
  0xd7   :  { %v9894_v9 = vld [vmem:[#allocation5 + $0x17a0] sm:$0xf]  ;;  %v9767_v15 = vor.u32 %v10986_v8, %v9766_v7  ;;  %v10918_v18 = vld [vmem:[#allocation5 + $0x148c] sm:$0xf0]  ;;  %5116 = vmatpush.bf16.msrb.mxu1 %v9639_v14  ;;  %v4857_v7 = vpop.f32.mrf.mxu2 }
  0xd8   :  { %v9494_v16 = vld [vmem:[#allocation5 + $0x1480] sm:$0xf]  ;;  %v9895_v20 = vor.u32 %v11018_v11, %v9894_v9  ;;  %v10950_v21 = vld [vmem:[#allocation5 + $0x158c] sm:$0xf0]  ;;  %v4830_v28 = vadd.f32 %v4829_v26, %v11906_v13  ;;  %v10572_v13 = vld [vmem:[#allocation5 + $0x9c4] sm:$0xf] }
  0xd9   :  { %v9622_v19 = vld [vmem:[#allocation5 + $0x1580] sm:$0xf]  ;;  %v10982_v23 = vld [vmem:[#allocation5 + $0x168c] sm:$0xf0]  ;;  %v9495_v27 = vor.u32 %v10918_v18, %v9494_v16  ;;  %5130 = vmatpush.bf16.msrb.mxu2 %v9767_v15 }
  0xda   :  { %v9750_v22 = vld [vmem:[#allocation5 + $0x1680] sm:$0xf]  ;;  %v11014_v25 = vld [vmem:[#allocation5 + $0x178c] sm:$0xf0]  ;;  %v9623_v29 = vor.u32 %v10950_v21, %v9622_v19  ;;  %5144 = vmatpush.bf16.msrb.mxu3 %v9895_v20  ;;  %v4844_v57 = vadd.f32 %v4843_v53, %v4830_v28 }
  0xdb   :  { %v9878_v24 = vld [vmem:[#allocation5 + $0x1780] sm:$0xf]  ;;  %v9751_v30 = vor.u32 %v10982_v23, %v9750_v22  ;;  %v10914_v34 = vld [vmem:[#allocation5 + $0x146c] sm:$0xf0]  ;;  %5103 = vmatpush.bf16.msrb.mxu0 %v9495_v27 }
  0xdc   :  { %v9478_v33 = vld [vmem:[#allocation5 + $0x1460] sm:$0xf]  ;;  %v9879_v42 = vor.u32 %v11014_v25, %v9878_v24  ;;  %v10946_v45 = vld [vmem:[#allocation5 + $0x156c] sm:$0xf0]  ;;  %5117 = vmatpush.bf16.msrb.mxu1 %v9623_v29  ;;  %v4858_v11 = vadd.f32 %v4857_v7, %v4844_v57  ;;  %v4871_v25 = vpop.f32.mrf.mxu3  ;;  %v10320_v57 = vld [vmem:[#allocation5 + $0x1e4] sm:$0xf] }
  0xdd   :  { %v9606_v37 = vld [vmem:[#allocation5 + $0x1560] sm:$0xf]  ;;  %v10978_v49 = vld [vmem:[#allocation5 + $0x166c] sm:$0xf0]  ;;  %v9479_v54 = vor.u32 %v10914_v34, %v9478_v33  ;;  %5131 = vmatpush.bf16.msrb.mxu2 %v9751_v30 }
  0xde   :  { %v9734_v48 = vld [vmem:[#allocation5 + $0x1660] sm:$0xf]  ;;  %v11010_v52 = vld [vmem:[#allocation5 + $0x176c] sm:$0xf0]  ;;  %v9607_v59 = vor.u32 %v10946_v45, %v9606_v37  ;;  %5145 = vmatpush.bf16.msrb.mxu3 %v9879_v42  ;;  %v11475_v29 = vadd.f32 %v4871_v25, %v4858_v11  ;;  %v151_v11 = vld [vmem:[#allocation2 + $0xa8] sm:$0xff] }
  0xdf   :  { %v9862_v50 = vld [vmem:[#allocation5 + $0x1760] sm:$0xf]  ;;  %v9735_v61 = vor.u32 %v10978_v49, %v9734_v48  ;;  %v10910_v63 = vld [vmem:[#allocation5 + $0x144c] sm:$0xf0]  ;;  %5104 = vmatpush.bf16.msrb.mxu0 %v9479_v54  ;;  %v6984_v54 = vld [vmem:[#allocation5 + $0xf0] sm:$0xf0] }
  0xe0   :  { %v9462_v62 = vld [vmem:[#allocation5 + $0x1440] sm:$0xf]  ;;  %v9863_v2 = vor.u32 %v11010_v52, %v9862_v50  ;;  %v10942_v3 = vld [vmem:[#allocation5 + $0x154c] sm:$0xf0]  ;;  %5118 = vmatpush.bf16.msrb.mxu1 %v9607_v59  ;;  %v10288_v52 = vld [vmem:[#allocation5 + $0xe4] sm:$0xf] }
  0xe1   :  { %v9590_v0 = vld [vmem:[#allocation5 + $0x1540] sm:$0xf]  ;;  %v10974_v6 = vld [vmem:[#allocation5 + $0x164c] sm:$0xf0]  ;;  %v9463_v12 = vor.u32 %v10910_v63, %v9462_v62  ;;  %5132 = vmatpush.bf16.msrb.mxu2 %v9735_v61  ;;  %v7112_v59 = vld [vmem:[#allocation5 + $0x1f0] sm:$0xf0] }
  0xe2   :  { %v9718_v5 = vld [vmem:[#allocation5 + $0x1640] sm:$0xf]  ;;  %v11006_v9 = vld [vmem:[#allocation5 + $0x174c] sm:$0xf0]  ;;  %v9591_v15 = vor.u32 %v10942_v3, %v9590_v0  ;;  %5146 = vmatpush.bf16.msrb.mxu3 %v9863_v2  ;;  %v10352_v61 = vld [vmem:[#allocation5 + $0x2e4] sm:$0xf] }
  0xe3   :  { %v9846_v8 = vld [vmem:[#allocation5 + $0x1740] sm:$0xf]  ;;  %v9719_v16 = vor.u32 %v10974_v6, %v9718_v5  ;;  %v10906_v18 = vld [vmem:[#allocation5 + $0x142c] sm:$0xf0]  ;;  %5105 = vmatpush.bf16.msrb.mxu0 %v9463_v12  ;;  %v7240_v62 = vld [vmem:[#allocation5 + $0x2f0] sm:$0xf0] }
  0xe4   :  { %v9446_v14 = vld [vmem:[#allocation5 + $0x1420] sm:$0xf]  ;;  %v10938_v20 = vld [vmem:[#allocation5 + $0x152c] sm:$0xf0]  ;;  %v9847_v21 = vor.u32 %v11006_v9, %v9846_v8  ;;  %5119 = vmatpush.bf16.msrb.mxu1 %v9591_v15  ;;  %v10384_v63 = vld [vmem:[#allocation5 + $0x3e4] sm:$0xf] }
  0xe5   :  { %v9574_v19 = vld [vmem:[#allocation5 + $0x1520] sm:$0xf]  ;;  %v10970_v23 = vld [vmem:[#allocation5 + $0x162c] sm:$0xf0]  ;;  %v9447_v30 = vor.u32 %v10906_v18, %v9446_v14  ;;  %5133 = vmatpush.bf16.msrb.mxu2 %v9719_v16  ;;  %v7368_v2 = vld [vmem:[#allocation5 + $0x3f0] sm:$0xf0]  ;;  %v6987_v14 = vor.u32 %v10288_v52, %v6984_v54 }
  0xe6   :  { %v9702_v22 = vld [vmem:[#allocation5 + $0x1620] sm:$0xf]  ;;  %v11002_v26 = vld [vmem:[#allocation5 + $0x172c] sm:$0xf0]  ;;  %v9575_v45 = vor.u32 %v10938_v20, %v9574_v19  ;;  %5147 = vmatpush.bf16.msrb.mxu3 %v9847_v21  ;;  %v175_v15 = vld [vmem:[#allocation2 + $0x168] sm:$0xff]  ;;  %v7115_v19 = vor.u32 %v10320_v57, %v7112_v59  ;;  %v7243_v20 = vor.u32 %v10352_v61, %v7240_v62  ;;  %v11477_v21 = vpop.f32.mrf.mxu0  ;;  %v7371_v25 = vor.u32 %v10384_v63, %v7368_v2 }
  0xe7   :  { %v9830_v24 = vld [vmem:[#allocation5 + $0x1720] sm:$0xf]  ;;  %v10902_v28 = vld [vmem:[#allocation5 + $0x140c] sm:$0xf0]  ;;  %v9703_v48 = vor.u32 %v10970_v23, %v9702_v22  ;;  %5106 = vmatpush.bf16.msrb.mxu0 %v9447_v30  ;;  %v153_v16 = vld [vmem:[#allocation2 + $0xb8] sm:$0xff] }
  0xe8   :  { %v9430_v27 = vld [vmem:[#allocation5 + $0x1400] sm:$0xf]  ;;  %v10934_v34 = vld [vmem:[#allocation5 + $0x150c] sm:$0xf0]  ;;  %v9831_v53 = vor.u32 %v11002_v26, %v9830_v24  ;;  %5120 = vmatpush.bf16.msrb.mxu1 %v9575_v45  ;;  %v177_v18 = vld [vmem:[#allocation2 + $0x178] sm:$0xff]  ;;  %v11485_v45 = vpop.f32.mrf.mxu1 }
  0xe9   :  { %v9558_v33 = vld [vmem:[#allocation5 + $0x1500] sm:$0xf]  ;;  %v10966_v42 = vld [vmem:[#allocation5 + $0x160c] sm:$0xf0]  ;;  %v9431_v0 = vor.u32 %v10902_v28, %v9430_v27  ;;  %5134 = vmatpush.bf16.msrb.mxu2 %v9703_v48  ;;  %v10284_v22 = vld [vmem:[#allocation5 + $0xc4] sm:$0xf]  ;;  %v11487_v48 = vpack.c.bf16 %v177_v18, %v153_v16 }
  0xea   :  { %v9686_v37 = vld [vmem:[#allocation5 + $0x1600] sm:$0xf]  ;;  %v10998_v50 = vld [vmem:[#allocation5 + $0x170c] sm:$0xf0]  ;;  %v9559_v6 = vor.u32 %v10934_v34, %v9558_v33  ;;  %5148 = vmatpush.bf16.msrb.mxu3 %v9831_v53  ;;  %v6968_v23 = vld [vmem:[#allocation5 + $0xd0] sm:$0xf0]  ;;  %v11483_v34 = vpack.c.bf16 %v175_v15, %v151_v11 }
  0xeb   :  { %v9814_v49 = vld [vmem:[#allocation5 + $0x1700] sm:$0xf]  ;;  %v9687_v7 = vor.u32 %v10966_v42, %v9686_v37  ;;  %v152_v8 = vld [vmem:[#allocation2 + $0xb0] sm:$0xff]  ;;  %v10316_v24 = vld [vmem:[#allocation5 + $0x1c4] sm:$0xf]  ;;  %5107 = vmatpush.bf16.msrb.mxu0 %v9431_v0 }
  0xec   :  { %v150_v3 = vld [vmem:[#allocation2 + $0xa0] sm:$0xff]  ;;  %v176_v9 = vld [vmem:[#allocation2 + $0x170] sm:$0xff]  ;;  %v9815_v12 = vor.u32 %v10998_v50, %v9814_v49  ;;  %5121 = vmatpush.bf16.msrb.mxu1 %v9559_v6  ;;  %v6971_v49 = vor.u32 %v10284_v22, %v6968_v23 }
  0xed   :  { %v174_v5 = vld [vmem:[#allocation2 + $0x160] sm:$0xff]  ;;  %v7096_v27 = vld [vmem:[#allocation5 + $0x1d0] sm:$0xf0]  ;;  %5135 = vmatpush.bf16.msrb.mxu2 %v9687_v7  ;;  %v11481_v33 = vpack.c.bf16 %v176_v9, %v152_v8 }
  0xee   :  { %v11479_v26 = vpack.c.bf16 %v174_v5, %v150_v3  ;;  %v10348_v28 = vld [vmem:[#allocation5 + $0x2c4] sm:$0xf]  ;;  %v7224_v30 = vld [vmem:[#allocation5 + $0x2d0] sm:$0xf0]  ;;  %5149 = vmatpush.bf16.msrb.mxu3 %v9815_v12  ;;  %v7099_v50 = vor.u32 %v10316_v24, %v7096_v27  ;;  %v11493_v5 = vpop.f32.mrf.mxu2 }
  0xef   :  { %v10380_v37 = vld [vmem:[#allocation5 + $0x3c4] sm:$0xf]  ;;  %v7352_v42 = vld [vmem:[#allocation5 + $0x3d0] sm:$0xf0]  ;;  %5156 = vmatpush.bf16.msra.mxu0 %v6987_v14  ;;  %v7227_v52 = vor.u32 %v10348_v28, %v7224_v30  ;;  %5122 = vmatmul.bf16.vlgmr.msrb.gmra.mxu1 %v11483_v34  ;;  %v11495_v14 = vpop.f32.mrf.mxu3 }
  0xf0   :  { %5170 = vmatpush.bf16.msra.mxu1 %v7115_v19  ;;  %v10280_v53 = vld [vmem:[#allocation5 + $0xa4] sm:$0xf]  ;;  %v6952_v54 = vld [vmem:[#allocation5 + $0xb0] sm:$0xf0]  ;;  %5108 = vmatmul.bf16.vlgmr.msrb.gmra.mxu0 %v11479_v26  ;;  %v7355_v59 = vor.u32 %v10380_v37, %v7352_v42  ;;  %11908 = vst [vmem:[#allocation20_spill] sm:$0xff] %v11495_v14  ;;  %v4885_v19 = vpop.f32.mrf.mxu0  ;;  %v4899_v28 = vpop.f32.mrf.mxu1 }
  0xf1   :  { %5184 = vmatpush.bf16.msra.mxu2 %v7243_v20  ;;  %v10312_v57 = vld [vmem:[#allocation5 + $0x1a4] sm:$0xf]  ;;  %v7080_v61 = vld [vmem:[#allocation5 + $0x1b0] sm:$0xf0]  ;;  %5150 = vmatmul.bf16.vlgmr.msrb.gmra.mxu3 %v11487_v48  ;;  %v6955_v3 = vor.u32 %v10280_v53, %v6952_v54  ;;  %v4886_v23 = vadd.f32 %v4885_v19, %v11475_v29  ;;  %v10479_v14 = vld [vmem:[#allocation5 + $0x6d4] sm:$0xf0] }
  0xf2   :  { %5198 = vmatpush.bf16.msra.mxu3 %v7371_v25  ;;  %v10344_v62 = vld [vmem:[#allocation5 + $0x2a4] sm:$0xf]  ;;  %v7208_v63 = vld [vmem:[#allocation5 + $0x2b0] sm:$0xf0]  ;;  %5136 = vmatmul.bf16.vlgmr.msrb.gmra.mxu2 %v11481_v33  ;;  %v7083_v6 = vor.u32 %v10312_v57, %v7080_v61 }
  0xf3   :  { %v10376_v0 = vld [vmem:[#allocation5 + $0x3a4] sm:$0xf]  ;;  %v7336_v2 = vld [vmem:[#allocation5 + $0x3b0] sm:$0xf0]  ;;  %5157 = vmatpush.bf16.msra.mxu0 %v6971_v49  ;;  %v7211_v7 = vor.u32 %v10344_v62, %v7208_v63 }
  0xf4   :  { %5171 = vmatpush.bf16.msra.mxu1 %v7099_v50  ;;  %v10276_v8 = vld [vmem:[#allocation5 + $0x84] sm:$0xf]  ;;  %v6936_v9 = vld [vmem:[#allocation5 + $0x90] sm:$0xf0]  ;;  %v7339_v12 = vor.u32 %v10376_v0, %v7336_v2  ;;  %v4900_v50 = vadd.f32 %v4899_v28, %v4886_v23 }
  0xf5   :  { %5185 = vmatpush.bf16.msra.mxu2 %v7227_v52  ;;  %v10308_v11 = vld [vmem:[#allocation5 + $0x184] sm:$0xf]  ;;  %v7064_v15 = vld [vmem:[#allocation5 + $0x190] sm:$0xf0]  ;;  %v6939_v24 = vor.u32 %v10276_v8, %v6936_v9 }
  0xf6   :  { %5199 = vmatpush.bf16.msra.mxu3 %v7355_v59  ;;  %v10340_v16 = vld [vmem:[#allocation5 + $0x284] sm:$0xf]  ;;  %v7192_v18 = vld [vmem:[#allocation5 + $0x290] sm:$0xf0]  ;;  %v7067_v25 = vor.u32 %v10308_v11, %v7064_v15 }
  0xf7   :  { %v10372_v20 = vld [vmem:[#allocation5 + $0x384] sm:$0xf]  ;;  %v7320_v22 = vld [vmem:[#allocation5 + $0x390] sm:$0xf0]  ;;  %5158 = vmatpush.bf16.msra.mxu0 %v6955_v3  ;;  %v7195_v27 = vor.u32 %v10340_v16, %v7192_v18  ;;  %v4927_v16 = vpop.f32.mrf.mxu3 }
  0xf8   :  { %5172 = vmatpush.bf16.msra.mxu1 %v7083_v6  ;;  %v10272_v30 = vld [vmem:[#allocation5 + $0x64] sm:$0xf]  ;;  %v6920_v37 = vld [vmem:[#allocation5 + $0x70] sm:$0xf0]  ;;  %v7323_v49 = vor.u32 %v10372_v20, %v7320_v22  ;;  %v4913_v6 = vpop.f32.mrf.mxu2 }
  0xf9   :  { %5186 = vmatpush.bf16.msra.mxu2 %v7211_v7  ;;  %v10304_v42 = vld [vmem:[#allocation5 + $0x164] sm:$0xf]  ;;  %v7048_v52 = vld [vmem:[#allocation5 + $0x170] sm:$0xf0]  ;;  %v6923_v61 = vor.u32 %v10272_v30, %v6920_v37  ;;  %v4914_v11 = vadd.f32 %v4913_v6, %v4900_v50 }
  0xfa   :  { %5200 = vmatpush.bf16.msra.mxu3 %v7339_v12  ;;  %v10336_v53 = vld [vmem:[#allocation5 + $0x264] sm:$0xf]  ;;  %v7176_v54 = vld [vmem:[#allocation5 + $0x270] sm:$0xf0]  ;;  %v7051_v29 = vor.u32 %v10304_v42, %v7048_v52 }
  0xfb   :  { %v10368_v57 = vld [vmem:[#allocation5 + $0x364] sm:$0xf]  ;;  %v7304_v59 = vld [vmem:[#allocation5 + $0x370] sm:$0xf0]  ;;  %5159 = vmatpush.bf16.msra.mxu0 %v6939_v24  ;;  %v7179_v62 = vor.u32 %v10336_v53, %v7176_v54  ;;  %v11498_v19 = vadd.f32 %v4927_v16, %v4914_v11 }
  0xfc   :  { %5173 = vmatpush.bf16.msra.mxu1 %v7067_v25  ;;  %v10268_v63 = vld [vmem:[#allocation5 + $0x44] sm:$0xf]  ;;  %v6904_v0 = vld [vmem:[#allocation5 + $0x50] sm:$0xf0]  ;;  %v7307_v3 = vor.u32 %v10368_v57, %v7304_v59 }
  0xfd   :  { %5187 = vmatpush.bf16.msra.mxu2 %v7195_v27  ;;  %v10300_v2 = vld [vmem:[#allocation5 + $0x144] sm:$0xf]  ;;  %v7032_v7 = vld [vmem:[#allocation5 + $0x150] sm:$0xf0]  ;;  %v6907_v18 = vor.u32 %v10268_v63, %v6904_v0 }
  0xfe   :  { %5201 = vmatpush.bf16.msra.mxu3 %v7323_v49  ;;  %v10332_v8 = vld [vmem:[#allocation5 + $0x244] sm:$0xf]  ;;  %v7160_v9 = vld [vmem:[#allocation5 + $0x250] sm:$0xf0]  ;;  %v7035_v20 = vor.u32 %v10300_v2, %v7032_v7 }
  0xff   :  { %v10364_v12 = vld [vmem:[#allocation5 + $0x344] sm:$0xf]  ;;  %v7288_v15 = vld [vmem:[#allocation5 + $0x350] sm:$0xf0]  ;;  %5160 = vmatpush.bf16.msra.mxu0 %v6923_v61  ;;  %v7163_v22 = vor.u32 %v10332_v8, %v7160_v9 }
 0x100   :  { %5174 = vmatpush.bf16.msra.mxu1 %v7051_v29  ;;  %v10264_v23 = vld [vmem:[#allocation5 + $0x24] sm:$0xf]  ;;  %v6888_v24 = vld [vmem:[#allocation5 + $0x30] sm:$0xf0]  ;;  %v7291_v27 = vor.u32 %v10364_v12, %v7288_v15 }
 0x101   :  { %5188 = vmatpush.bf16.msra.mxu2 %v7179_v62  ;;  %v10296_v25 = vld [vmem:[#allocation5 + $0x124] sm:$0xf]  ;;  %v7016_v28 = vld [vmem:[#allocation5 + $0x130] sm:$0xf0]  ;;  %v6891_v50 = vor.u32 %v10264_v23, %v6888_v24 }
 0x102   :  { %5202 = vmatpush.bf16.msra.mxu3 %v7307_v3  ;;  %v10328_v30 = vld [vmem:[#allocation5 + $0x224] sm:$0xf]  ;;  %v7144_v37 = vld [vmem:[#allocation5 + $0x230] sm:$0xf0]  ;;  %v7019_v54 = vor.u32 %v10296_v25, %v7016_v28 }
 0x103   :  { %v10360_v42 = vld [vmem:[#allocation5 + $0x324] sm:$0xf]  ;;  %v7272_v49 = vld [vmem:[#allocation5 + $0x330] sm:$0xf0]  ;;  %5161 = vmatpush.bf16.msra.mxu0 %v6907_v18  ;;  %v7147_v57 = vor.u32 %v10328_v30, %v7144_v37 }
 0x104   :  { %v10260_v52 = vld [vmem:[#allocation5 + $0x4] sm:$0xf]  ;;  %v6872_v53 = vld [vmem:[#allocation5 + $0x10] sm:$0xf0]  ;;  %5175 = vmatpush.bf16.msra.mxu1 %v7035_v20  ;;  %v7275_v62 = vor.u32 %v10360_v42, %v7272_v49 }
 0x105   :  { %5189 = vmatpush.bf16.msra.mxu2 %v7163_v22  ;;  %v10292_v59 = vld [vmem:[#allocation5 + $0x104] sm:$0xf]  ;;  %v7000_v61 = vld [vmem:[#allocation5 + $0x110] sm:$0xf0]  ;;  %v6875_v8 = vor.u32 %v10260_v52, %v6872_v53  ;;  %v11500_v52 = vpop.f32.mrf.mxu0 }
 0x106   :  { %v10324_v29 = vld [vmem:[#allocation5 + $0x204] sm:$0xf]  ;;  %5203 = vmatpush.bf16.msra.mxu3 %v7291_v27  ;;  %v7128_v63 = vld [vmem:[#allocation5 + $0x210] sm:$0xf0]  ;;  %v7003_v15 = vor.u32 %v10292_v59, %v7000_v61  ;;  %11909 = vst [vmem:[#allocation21_spill] sm:$0xff] %v11500_v52 }
 0x107   :  { %v10356_v0 = vld [vmem:[#allocation5 + $0x304] sm:$0xf]  ;;  %v7256_v2 = vld [vmem:[#allocation5 + $0x310] sm:$0xf0]  ;;  %5162 = vmatpush.bf16.msra.mxu0 %v6891_v50  ;;  %v7131_v16 = vor.u32 %v10324_v29, %v7128_v63  ;;  %v10415_v52 = vld [vmem:[#allocation5 + $0x4d4] sm:$0xf0] }
 0x108   :  { %v10416_v3 = vld [vmem:[#allocation5 + $0x4e4] sm:$0xf]  ;;  %v7496_v6 = vld [vmem:[#allocation5 + $0x4f0] sm:$0xf0]  ;;  %5176 = vmatpush.bf16.msra.mxu1 %v7019_v54  ;;  %v7259_v22 = vor.u32 %v10356_v0, %v7256_v2 }
 0x109   :  { %v10448_v7 = vld [vmem:[#allocation5 + $0x5e4] sm:$0xf]  ;;  %v7624_v9 = vld [vmem:[#allocation5 + $0x5f0] sm:$0xf0]  ;;  %5190 = vmatpush.bf16.msra.mxu2 %v7147_v57  ;;  %v7499_v23 = vor.u32 %v10416_v3, %v7496_v6  ;;  %v11502_v57 = vpop.f32.mrf.mxu1 }
 0x10a   :  { %v10480_v11 = vld [vmem:[#allocation5 + $0x6e4] sm:$0xf]  ;;  %v7752_v12 = vld [vmem:[#allocation5 + $0x6f0] sm:$0xf0]  ;;  %5204 = vmatpush.bf16.msra.mxu3 %v7275_v62  ;;  %v7627_v24 = vor.u32 %v10448_v7, %v7624_v9  ;;  %11910 = vst [vmem:[#allocation22_spill] sm:$0xff] %v11502_v57 }
 0x10b   :  { %v10512_v18 = vld [vmem:[#allocation5 + $0x7e4] sm:$0xf]  ;;  %v7880_v20 = vld [vmem:[#allocation5 + $0x7f0] sm:$0xf0]  ;;  %v7755_v25 = vor.u32 %v10480_v11, %v7752_v12  ;;  %5163 = vmatpush.bf16.msra.mxu0 %v6875_v8  ;;  %v10371_v57 = vld [vmem:[#allocation5 + $0x374] sm:$0xf0] }
 0x10c   :  { %v10412_v27 = vld [vmem:[#allocation5 + $0x4c4] sm:$0xf]  ;;  %v7480_v28 = vld [vmem:[#allocation5 + $0x4d0] sm:$0xf0]  ;;  %v7883_v37 = vor.u32 %v10512_v18, %v7880_v20  ;;  %5177 = vmatpush.bf16.msra.mxu1 %v7003_v15 }
 0x10d   :  { %v10444_v30 = vld [vmem:[#allocation5 + $0x5c4] sm:$0xf]  ;;  %v7608_v42 = vld [vmem:[#allocation5 + $0x5d0] sm:$0xf0]  ;;  %5191 = vmatpush.bf16.msra.mxu2 %v7131_v16  ;;  %v7483_v59 = vor.u32 %v10412_v27, %v7480_v28  ;;  %v11510_v28 = vpop.f32.mrf.mxu3 }
 0x10e   :  { %v10476_v49 = vld [vmem:[#allocation5 + $0x6c4] sm:$0xf]  ;;  %v7736_v50 = vld [vmem:[#allocation5 + $0x6d0] sm:$0xf0]  ;;  %5205 = vmatpush.bf16.msra.mxu3 %v7259_v22  ;;  %v7611_v61 = vor.u32 %v10444_v30, %v7608_v42  ;;  %5164 = vmatmul.bf16.vlgmr.msra.gmra.mxu0 %v11410_v58  ;;  %v11508_v22 = vpop.f32.mrf.mxu2  ;;  %11912 = vst [vmem:[#allocation24_spill] sm:$0xff] %v11510_v28  ;;  %v4941_v30 = vpop.f32.mrf.mxu0 }
 0x10f   :  { %v10508_v53 = vld [vmem:[#allocation5 + $0x7c4] sm:$0xf]  ;;  %v7864_v54 = vld [vmem:[#allocation5 + $0x7d0] sm:$0xf0]  ;;  %5212 = vmatpush.bf16.msrb.mxu0 %v7499_v23  ;;  %v7739_v29 = vor.u32 %v10476_v49, %v7736_v50  ;;  %5178 = vmatmul.bf16.vlgmr.msra.gmra.mxu1 %v11416_v10  ;;  %11911 = vst [vmem:[#allocation23_spill] sm:$0xff] %v11508_v22  ;;  %v4942_v49 = vadd.f32 %v4941_v30, %v11498_v19 }
 0x110   :  { %5226 = vmatpush.bf16.msrb.mxu1 %v7627_v24  ;;  %v10408_v62 = vld [vmem:[#allocation5 + $0x4a4] sm:$0xf]  ;;  %v7464_v63 = vld [vmem:[#allocation5 + $0x4b0] sm:$0xf0]  ;;  %v7867_v2 = vor.u32 %v10508_v53, %v7864_v54  ;;  %5192 = vmatmul.bf16.vlgmr.msra.gmra.mxu2 %v11412_v1 }
 0x111   :  { %5240 = vmatpush.bf16.msrb.mxu2 %v7755_v25  ;;  %v10440_v0 = vld [vmem:[#allocation5 + $0x5a4] sm:$0xf]  ;;  %v7592_v3 = vld [vmem:[#allocation5 + $0x5b0] sm:$0xf0]  ;;  %v7467_v11 = vor.u32 %v10408_v62, %v7464_v63  ;;  %5206 = vmatmul.bf16.vlgmr.msra.gmra.mxu3 %v11418_v17  ;;  %v4955_v53 = vpop.f32.mrf.mxu1 }
 0x112   :  { %5254 = vmatpush.bf16.msrb.mxu3 %v7883_v37  ;;  %v10472_v6 = vld [vmem:[#allocation5 + $0x6a4] sm:$0xf]  ;;  %v7720_v7 = vld [vmem:[#allocation5 + $0x6b0] sm:$0xf0]  ;;  %v7595_v12 = vor.u32 %v10440_v0, %v7592_v3  ;;  %v4956_v0 = vadd.f32 %v4955_v53, %v4942_v49 }
 0x113   :  { %v10504_v8 = vld [vmem:[#allocation5 + $0x7a4] sm:$0xf]  ;;  %v7848_v9 = vld [vmem:[#allocation5 + $0x7b0] sm:$0xf0]  ;;  %5213 = vmatpush.bf16.msrb.mxu0 %v7483_v59  ;;  %v7723_v15 = vor.u32 %v10472_v6, %v7720_v7 }
 0x114   :  { %5227 = vmatpush.bf16.msrb.mxu1 %v7611_v61  ;;  %v10404_v16 = vld [vmem:[#allocation5 + $0x484] sm:$0xf]  ;;  %v7448_v18 = vld [vmem:[#allocation5 + $0x490] sm:$0xf0]  ;;  %v7851_v23 = vor.u32 %v10504_v8, %v7848_v9 }
 0x115   :  { %5241 = vmatpush.bf16.msrb.mxu2 %v7739_v29  ;;  %v10436_v20 = vld [vmem:[#allocation5 + $0x584] sm:$0xf]  ;;  %v7576_v24 = vld [vmem:[#allocation5 + $0x590] sm:$0xf0]  ;;  %v7451_v50 = vor.u32 %v10404_v16, %v7448_v18  ;;  %v4983_v30 = vpop.f32.mrf.mxu3 }
 0x116   :  { %5255 = vmatpush.bf16.msrb.mxu3 %v7867_v2  ;;  %v10468_v25 = vld [vmem:[#allocation5 + $0x684] sm:$0xf]  ;;  %v7704_v27 = vld [vmem:[#allocation5 + $0x690] sm:$0xf0]  ;;  %v7579_v54 = vor.u32 %v10436_v20, %v7576_v24  ;;  %v4969_v20 = vpop.f32.mrf.mxu2  ;;  %v11515_v22 = vpop.f32.mrf.mxu0 }
 0x117   :  { %v10500_v37 = vld [vmem:[#allocation5 + $0x784] sm:$0xf]  ;;  %v7832_v42 = vld [vmem:[#allocation5 + $0x790] sm:$0xf0]  ;;  %5214 = vmatpush.bf16.msrb.mxu0 %v7467_v11  ;;  %v7707_v59 = vor.u32 %v10468_v25, %v7704_v27  ;;  %v4970_v27 = vadd.f32 %v4969_v20, %v4956_v0  ;;  %11913 = vst [vmem:[#allocation25_spill] sm:$0xff] %v11515_v22 }
 0x118   :  { %5228 = vmatpush.bf16.msrb.mxu1 %v7595_v12  ;;  %v10400_v61 = vld [vmem:[#allocation5 + $0x464] sm:$0xf]  ;;  %v7432_v29 = vld [vmem:[#allocation5 + $0x470] sm:$0xf0]  ;;  %v7835_v63 = vor.u32 %v10500_v37, %v7832_v42 }
 0x119   :  { %5242 = vmatpush.bf16.msrb.mxu2 %v7723_v15  ;;  %v10432_v62 = vld [vmem:[#allocation5 + $0x564] sm:$0xf]  ;;  %v7560_v2 = vld [vmem:[#allocation5 + $0x570] sm:$0xf0]  ;;  %v7435_v9 = vor.u32 %v10400_v61, %v7432_v29 }
 0x11a   :  { %5256 = vmatpush.bf16.msrb.mxu3 %v7851_v23  ;;  %v10464_v3 = vld [vmem:[#allocation5 + $0x664] sm:$0xf]  ;;  %v7688_v6 = vld [vmem:[#allocation5 + $0x670] sm:$0xf0]  ;;  %v7563_v19 = vor.u32 %v10432_v62, %v7560_v2 }
 0x11b   :  { %v10496_v7 = vld [vmem:[#allocation5 + $0x764] sm:$0xf]  ;;  %v7816_v8 = vld [vmem:[#allocation5 + $0x770] sm:$0xf0]  ;;  %5215 = vmatpush.bf16.msrb.mxu0 %v7451_v50  ;;  %v7691_v11 = vor.u32 %v10464_v3, %v7688_v6  ;;  %v11513_v50 = vadd.f32 %v4983_v30, %v4970_v27 }
 0x11c   :  { %5229 = vmatpush.bf16.msrb.mxu1 %v7579_v54  ;;  %v10396_v12 = vld [vmem:[#allocation5 + $0x444] sm:$0xf]  ;;  %v7416_v15 = vld [vmem:[#allocation5 + $0x450] sm:$0xf0]  ;;  %v7819_v18 = vor.u32 %v10496_v7, %v7816_v8 }
 0x11d   :  { %5243 = vmatpush.bf16.msrb.mxu2 %v7707_v59  ;;  %v10428_v16 = vld [vmem:[#allocation5 + $0x544] sm:$0xf]  ;;  %v7544_v23 = vld [vmem:[#allocation5 + $0x550] sm:$0xf0]  ;;  %v7419_v49 = vor.u32 %v10396_v12, %v7416_v15 }
 0x11e   :  { %5257 = vmatpush.bf16.msrb.mxu3 %v7835_v63  ;;  %v10460_v24 = vld [vmem:[#allocation5 + $0x644] sm:$0xf]  ;;  %v7672_v25 = vld [vmem:[#allocation5 + $0x650] sm:$0xf0]  ;;  %v7547_v53 = vor.u32 %v10428_v16, %v7544_v23 }
 0x11f   :  { %v10492_v37 = vld [vmem:[#allocation5 + $0x744] sm:$0xf]  ;;  %v7800_v42 = vld [vmem:[#allocation5 + $0x750] sm:$0xf0]  ;;  %5216 = vmatpush.bf16.msrb.mxu0 %v7435_v9  ;;  %v7675_v54 = vor.u32 %v10460_v24, %v7672_v25 }
 0x120   :  { %5230 = vmatpush.bf16.msrb.mxu1 %v7563_v19  ;;  %v10392_v59 = vld [vmem:[#allocation5 + $0x424] sm:$0xf]  ;;  %v7400_v61 = vld [vmem:[#allocation5 + $0x430] sm:$0xf0]  ;;  %v7803_v62 = vor.u32 %v10492_v37, %v7800_v42 }
 0x121   :  { %5244 = vmatpush.bf16.msrb.mxu2 %v7691_v11  ;;  %v10424_v29 = vld [vmem:[#allocation5 + $0x524] sm:$0xf]  ;;  %v7528_v63 = vld [vmem:[#allocation5 + $0x530] sm:$0xf0]  ;;  %v7403_v7 = vor.u32 %v10392_v59, %v7400_v61 }
 0x122   :  { %5258 = vmatpush.bf16.msrb.mxu3 %v7819_v18  ;;  %v10456_v2 = vld [vmem:[#allocation5 + $0x624] sm:$0xf]  ;;  %v7656_v3 = vld [vmem:[#allocation5 + $0x630] sm:$0xf0]  ;;  %v7531_v19 = vor.u32 %v10424_v29, %v7528_v63 }
 0x123   :  { %v10488_v0 = vld [vmem:[#allocation5 + $0x724] sm:$0xf]  ;;  %v7784_v6 = vld [vmem:[#allocation5 + $0x730] sm:$0xf0]  ;;  %5217 = vmatpush.bf16.msrb.mxu0 %v7419_v49  ;;  %v7659_v11 = vor.u32 %v10456_v2, %v7656_v3 }
 0x124   :  { %v10388_v8 = vld [vmem:[#allocation5 + $0x404] sm:$0xf]  ;;  %v7384_v9 = vld [vmem:[#allocation5 + $0x410] sm:$0xf0]  ;;  %5231 = vmatpush.bf16.msrb.mxu1 %v7547_v53  ;;  %v7787_v20 = vor.u32 %v10488_v0, %v7784_v6 }
 0x125   :  { %5245 = vmatpush.bf16.msrb.mxu2 %v7675_v54  ;;  %v10420_v12 = vld [vmem:[#allocation5 + $0x504] sm:$0xf]  ;;  %v7512_v15 = vld [vmem:[#allocation5 + $0x510] sm:$0xf0]  ;;  %v7387_v37 = vor.u32 %v10388_v8, %v7384_v9 }
 0x126   :  { %v10452_v16 = vld [vmem:[#allocation5 + $0x604] sm:$0xf]  ;;  %5259 = vmatpush.bf16.msrb.mxu3 %v7803_v62  ;;  %v7640_v18 = vld [vmem:[#allocation5 + $0x610] sm:$0xf0]  ;;  %v7515_v53 = vor.u32 %v10420_v12, %v7512_v15  ;;  %v11517_v12 = vpop.f32.mrf.mxu1 }
 0x127   :  { %v10484_v23 = vld [vmem:[#allocation5 + $0x704] sm:$0xf]  ;;  %v7768_v24 = vld [vmem:[#allocation5 + $0x710] sm:$0xf0]  ;;  %5218 = vmatpush.bf16.msrb.mxu0 %v7403_v7  ;;  %v7643_v54 = vor.u32 %v10452_v16, %v7640_v18  ;;  %11914 = vst [vmem:[#allocation26_spill] sm:$0xff] %v11517_v12 }
 0x128   :  { %v10544_v25 = vld [vmem:[#allocation5 + $0x8e4] sm:$0xf]  ;;  %v8008_v27 = vld [vmem:[#allocation5 + $0x8f0] sm:$0xf0]  ;;  %5232 = vmatpush.bf16.msrb.mxu1 %v7531_v19  ;;  %v7771_v62 = vor.u32 %v10484_v23, %v7768_v24 }
 0x129   :  { %v10576_v30 = vld [vmem:[#allocation5 + $0x9e4] sm:$0xf]  ;;  %v8136_v42 = vld [vmem:[#allocation5 + $0x9f0] sm:$0xf0]  ;;  %5246 = vmatpush.bf16.msrb.mxu2 %v7659_v11  ;;  %v8011_v63 = vor.u32 %v10544_v25, %v8008_v27 }
 0x12a   :  { %v10608_v49 = vld [vmem:[#allocation5 + $0xae4] sm:$0xf]  ;;  %v8264_v59 = vld [vmem:[#allocation5 + $0xaf0] sm:$0xf0]  ;;  %5260 = vmatpush.bf16.msrb.mxu3 %v7787_v20  ;;  %v8139_v2 = vor.u32 %v10576_v30, %v8136_v42 }
 0x12b   :  { %v10640_v61 = vld [vmem:[#allocation5 + $0xbe4] sm:$0xf]  ;;  %v8392_v29 = vld [vmem:[#allocation5 + $0xbf0] sm:$0xf0]  ;;  %v8267_v3 = vor.u32 %v10608_v49, %v8264_v59  ;;  %5219 = vmatpush.bf16.msrb.mxu0 %v7387_v37 }
 0x12c   :  { %v10540_v0 = vld [vmem:[#allocation5 + $0x8c4] sm:$0xf]  ;;  %v7992_v6 = vld [vmem:[#allocation5 + $0x8d0] sm:$0xf0]  ;;  %v8395_v7 = vor.u32 %v10640_v61, %v8392_v29  ;;  %5233 = vmatpush.bf16.msrb.mxu1 %v7515_v53  ;;  %v11523_v29 = vpop.f32.mrf.mxu2 }
 0x12d   :  { %v8120_v8 = vld [vmem:[#allocation5 + $0x9d0] sm:$0xf0]  ;;  %v10604_v9 = vld [vmem:[#allocation5 + $0xac4] sm:$0xf]  ;;  %5247 = vmatpush.bf16.msrb.mxu2 %v7643_v54  ;;  %v7995_v15 = vor.u32 %v10540_v0, %v7992_v6  ;;  %11915 = vst [vmem:[#allocation27_spill] sm:$0xff] %v11523_v29  ;;  %v11525_v0 = vpop.f32.mrf.mxu3  ;;  %v4997_v6 = vpop.f32.mrf.mxu0 }
 0x12e   :  { %v8248_v28 = vld [vmem:[#allocation5 + $0xad0] sm:$0xf0]  ;;  %v10636_v19 = vld [vmem:[#allocation5 + $0xbc4] sm:$0xf]  ;;  %5261 = vmatpush.bf16.msrb.mxu3 %v7771_v62  ;;  %v8123_v16 = vor.u32 %v10572_v13, %v8120_v8  ;;  %5220 = vmatmul.bf16.vlgmr.msrb.gmra.mxu0 %v11422_v39  ;;  %11916 = vst [vmem:[#allocation28_spill] sm:$0xff] %v11525_v0 }
 0x12f   :  { %v8376_v11 = vld [vmem:[#allocation5 + $0xbd0] sm:$0xf0]  ;;  %5268 = vmatpush.bf16.msra.mxu0 %v8011_v63  ;;  %v8251_v20 = vor.u32 %v10604_v9, %v8248_v28  ;;  %v10536_v18 = vld [vmem:[#allocation5 + $0x8a4] sm:$0xf]  ;;  %5234 = vmatmul.bf16.vlgmr.msrb.gmra.mxu1 %v11426_v44  ;;  %v4998_v9 = vadd.f32 %v4997_v6, %v11513_v50 }
 0x130   :  { %5282 = vmatpush.bf16.msra.mxu1 %v8139_v2  ;;  %v7976_v23 = vld [vmem:[#allocation5 + $0x8b0] sm:$0xf0]  ;;  %v10568_v24 = vld [vmem:[#allocation5 + $0x9a4] sm:$0xf]  ;;  %v8379_v25 = vor.u32 %v10636_v19, %v8376_v11  ;;  %5248 = vmatmul.bf16.vlgmr.msrb.gmra.mxu2 %v11424_v43  ;;  %v5011_v11 = vpop.f32.mrf.mxu1 }
 0x131   :  { %5296 = vmatpush.bf16.msra.mxu2 %v8267_v3  ;;  %v8104_v27 = vld [vmem:[#allocation5 + $0x9b0] sm:$0xf0]  ;;  %v10600_v30 = vld [vmem:[#allocation5 + $0xaa4] sm:$0xf]  ;;  %5262 = vmatmul.bf16.vlgmr.msrb.gmra.mxu3 %v11428_v47  ;;  %v7979_v13 = vor.u32 %v10536_v18, %v7976_v23 }
 0x132   :  { %5310 = vmatpush.bf16.msra.mxu3 %v8395_v7  ;;  %v8232_v37 = vld [vmem:[#allocation5 + $0xab0] sm:$0xf0]  ;;  %v10632_v42 = vld [vmem:[#allocation5 + $0xba4] sm:$0xf]  ;;  %v8107_v28 = vor.u32 %v10568_v24, %v8104_v27 }
 0x133   :  { %v8360_v49 = vld [vmem:[#allocation5 + $0xbb0] sm:$0xf0]  ;;  %5269 = vmatpush.bf16.msra.mxu0 %v7995_v15  ;;  %v8235_v59 = vor.u32 %v10600_v30, %v8232_v37  ;;  %v10532_v53 = vld [vmem:[#allocation5 + $0x884] sm:$0xf] }
 0x134   :  { %5283 = vmatpush.bf16.msra.mxu1 %v8123_v16  ;;  %v7960_v54 = vld [vmem:[#allocation5 + $0x890] sm:$0xf0]  ;;  %v10564_v61 = vld [vmem:[#allocation5 + $0x984] sm:$0xf]  ;;  %v8363_v62 = vor.u32 %v10632_v42, %v8360_v49 }
 0x135   :  { %5297 = vmatpush.bf16.msra.mxu2 %v8251_v20  ;;  %v8088_v63 = vld [vmem:[#allocation5 + $0x990] sm:$0xf0]  ;;  %v10596_v2 = vld [vmem:[#allocation5 + $0xa84] sm:$0xf]  ;;  %v7963_v19 = vor.u32 %v10532_v53, %v7960_v54  ;;  %v11530_v22 = vpop.f32.mrf.mxu0 }
 0x136   :  { %5311 = vmatpush.bf16.msra.mxu3 %v8379_v25  ;;  %v8216_v3 = vld [vmem:[#allocation5 + $0xa90] sm:$0xf0]  ;;  %v10628_v7 = vld [vmem:[#allocation5 + $0xb84] sm:$0xf]  ;;  %v8091_v15 = vor.u32 %v10564_v61, %v8088_v63  ;;  %v5012_v25 = vadd.f32 %v5011_v11, %v4998_v9  ;;  %v5025_v63 = vpop.f32.mrf.mxu2  ;;  %11917 = vst [vmem:[#allocation29_spill] sm:$0xff] %v11530_v22 }
 0x137   :  { %v8344_v8 = vld [vmem:[#allocation5 + $0xb90] sm:$0xf0]  ;;  %5270 = vmatpush.bf16.msra.mxu0 %v7979_v13  ;;  %v8219_v16 = vor.u32 %v10596_v2, %v8216_v3  ;;  %v10528_v20 = vld [vmem:[#allocation5 + $0x864] sm:$0xf] }
 0x138   :  { %5284 = vmatpush.bf16.msra.mxu1 %v8107_v28  ;;  %v7944_v18 = vld [vmem:[#allocation5 + $0x870] sm:$0xf0]  ;;  %v10560_v23 = vld [vmem:[#allocation5 + $0x964] sm:$0xf]  ;;  %v8347_v24 = vor.u32 %v10628_v7, %v8344_v8  ;;  %v5026_v6 = vadd.f32 %v5025_v63, %v5012_v25  ;;  %v5039_v7 = vpop.f32.mrf.mxu3 }
 0x139   :  { %5298 = vmatpush.bf16.msra.mxu2 %v8235_v59  ;;  %v8072_v27 = vld [vmem:[#allocation5 + $0x970] sm:$0xf0]  ;;  %v10592_v30 = vld [vmem:[#allocation5 + $0xa64] sm:$0xf]  ;;  %v7947_v13 = vor.u32 %v10528_v20, %v7944_v18 }
 0x13a   :  { %5312 = vmatpush.bf16.msra.mxu3 %v8363_v62  ;;  %v8200_v37 = vld [vmem:[#allocation5 + $0xa70] sm:$0xf0]  ;;  %v10624_v42 = vld [vmem:[#allocation5 + $0xb64] sm:$0xf]  ;;  %v8075_v50 = vor.u32 %v10560_v23, %v8072_v27  ;;  %v11528_v11 = vadd.f32 %v5039_v7, %v5026_v6 }
 0x13b   :  { %v8328_v49 = vld [vmem:[#allocation5 + $0xb70] sm:$0xf0]  ;;  %5271 = vmatpush.bf16.msra.mxu0 %v7963_v19  ;;  %v8203_v28 = vor.u32 %v10592_v30, %v8200_v37  ;;  %v10524_v59 = vld [vmem:[#allocation5 + $0x844] sm:$0xf] }
 0x13c   :  { %5285 = vmatpush.bf16.msra.mxu1 %v8091_v15  ;;  %v7928_v53 = vld [vmem:[#allocation5 + $0x850] sm:$0xf0]  ;;  %v10556_v54 = vld [vmem:[#allocation5 + $0x944] sm:$0xf]  ;;  %v8331_v61 = vor.u32 %v10624_v42, %v8328_v49 }
 0x13d   :  { %5299 = vmatpush.bf16.msra.mxu2 %v8219_v16  ;;  %v8056_v62 = vld [vmem:[#allocation5 + $0x950] sm:$0xf0]  ;;  %v10588_v2 = vld [vmem:[#allocation5 + $0xa44] sm:$0xf]  ;;  %v7931_v19 = vor.u32 %v10524_v59, %v7928_v53 }
 0x13e   :  { %5313 = vmatpush.bf16.msra.mxu3 %v8347_v24  ;;  %v8184_v3 = vld [vmem:[#allocation5 + $0xa50] sm:$0xf0]  ;;  %v10620_v8 = vld [vmem:[#allocation5 + $0xb44] sm:$0xf]  ;;  %v8059_v15 = vor.u32 %v10556_v54, %v8056_v62 }
 0x13f   :  { %v8312_v9 = vld [vmem:[#allocation5 + $0xb50] sm:$0xf0]  ;;  %5272 = vmatpush.bf16.msra.mxu0 %v7947_v13  ;;  %v8187_v16 = vor.u32 %v10588_v2, %v8184_v3  ;;  %v10520_v20 = vld [vmem:[#allocation5 + $0x824] sm:$0xf] }
 0x140   :  { %5286 = vmatpush.bf16.msra.mxu1 %v8075_v50  ;;  %v7912_v18 = vld [vmem:[#allocation5 + $0x830] sm:$0xf0]  ;;  %v10552_v23 = vld [vmem:[#allocation5 + $0x924] sm:$0xf]  ;;  %v8315_v24 = vor.u32 %v10620_v8, %v8312_v9 }
 0x141   :  { %5300 = vmatpush.bf16.msra.mxu2 %v8203_v28  ;;  %v8040_v27 = vld [vmem:[#allocation5 + $0x930] sm:$0xf0]  ;;  %v10584_v30 = vld [vmem:[#allocation5 + $0xa24] sm:$0xf]  ;;  %v7915_v49 = vor.u32 %v10520_v20, %v7912_v18 }
 0x142   :  { %5314 = vmatpush.bf16.msra.mxu3 %v8331_v61  ;;  %v8168_v37 = vld [vmem:[#allocation5 + $0xa30] sm:$0xf0]  ;;  %v10616_v25 = vld [vmem:[#allocation5 + $0xb24] sm:$0xf]  ;;  %v8043_v50 = vor.u32 %v10552_v23, %v8040_v27 }
 0x143   :  { %v8296_v42 = vld [vmem:[#allocation5 + $0xb30] sm:$0xf0]  ;;  %5273 = vmatpush.bf16.msra.mxu0 %v7931_v19  ;;  %v10516_v13 = vld [vmem:[#allocation5 + $0x804] sm:$0xf]  ;;  %v8171_v28 = vor.u32 %v10584_v30, %v8168_v37 }
 0x144   :  { %v7896_v59 = vld [vmem:[#allocation5 + $0x810] sm:$0xf0]  ;;  %5287 = vmatpush.bf16.msra.mxu1 %v8059_v15  ;;  %v10548_v53 = vld [vmem:[#allocation5 + $0x904] sm:$0xf]  ;;  %v8299_v62 = vor.u32 %v10616_v25, %v8296_v42 }
 0x145   :  { %5301 = vmatpush.bf16.msra.mxu2 %v8187_v16  ;;  %v8024_v54 = vld [vmem:[#allocation5 + $0x910] sm:$0xf0]  ;;  %v10580_v63 = vld [vmem:[#allocation5 + $0xa04] sm:$0xf]  ;;  %v7899_v9 = vor.u32 %v10516_v13, %v7896_v59 }
 0x146   :  { %5315 = vmatpush.bf16.msra.mxu3 %v8315_v24  ;;  %v8152_v61 = vld [vmem:[#allocation5 + $0xa10] sm:$0xf0]  ;;  %v10612_v2 = vld [vmem:[#allocation5 + $0xb04] sm:$0xf]  ;;  %v8027_v15 = vor.u32 %v10548_v53, %v8024_v54  ;;  %v11532_v53 = vpop.f32.mrf.mxu1 }
 0x147   :  { %v8280_v3 = vld [vmem:[#allocation5 + $0xb10] sm:$0xf0]  ;;  %v10672_v6 = vld [vmem:[#allocation5 + $0xce4] sm:$0xf]  ;;  %5274 = vmatpush.bf16.msra.mxu0 %v7915_v49  ;;  %v8155_v16 = vor.u32 %v10580_v63, %v8152_v61  ;;  %11918 = vst [vmem:[#allocation30_spill] sm:$0xff] %v11532_v53 }
 0x148   :  { %v8520_v7 = vld [vmem:[#allocation5 + $0xcf0] sm:$0xf0]  ;;  %v10704_v8 = vld [vmem:[#allocation5 + $0xde4] sm:$0xf]  ;;  %5288 = vmatpush.bf16.msra.mxu1 %v8043_v50  ;;  %v8283_v24 = vor.u32 %v10612_v2, %v8280_v3 }
 0x149   :  { %v8648_v19 = vld [vmem:[#allocation5 + $0xdf0] sm:$0xf0]  ;;  %v10736_v20 = vld [vmem:[#allocation5 + $0xee4] sm:$0xf]  ;;  %5302 = vmatpush.bf16.msra.mxu2 %v8171_v28  ;;  %v8523_v30 = vor.u32 %v10672_v6, %v8520_v7 }
 0x14a   :  { %v8776_v18 = vld [vmem:[#allocation5 + $0xef0] sm:$0xf0]  ;;  %v10768_v23 = vld [vmem:[#allocation5 + $0xfe4] sm:$0xf]  ;;  %5316 = vmatpush.bf16.msra.mxu3 %v8299_v62  ;;  %v8651_v37 = vor.u32 %v10704_v8, %v8648_v19 }
 0x14b   :  { %v8904_v27 = vld [vmem:[#allocation5 + $0xff0] sm:$0xf0]  ;;  %v8779_v25 = vor.u32 %v10736_v20, %v8776_v18  ;;  %v10668_v42 = vld [vmem:[#allocation5 + $0xcc4] sm:$0xf]  ;;  %5275 = vmatpush.bf16.msra.mxu0 %v7899_v9 }
 0x14c   :  { %v8504_v0 = vld [vmem:[#allocation5 + $0xcd0] sm:$0xf0]  ;;  %v10700_v29 = vld [vmem:[#allocation5 + $0xdc4] sm:$0xf]  ;;  %v8907_v49 = vor.u32 %v10768_v23, %v8904_v27  ;;  %5289 = vmatpush.bf16.msra.mxu1 %v8027_v15  ;;  %v11538_v23 = vpop.f32.mrf.mxu2 }
 0x14d   :  { %v8632_v13 = vld [vmem:[#allocation5 + $0xdd0] sm:$0xf0]  ;;  %v10732_v59 = vld [vmem:[#allocation5 + $0xec4] sm:$0xf]  ;;  %5303 = vmatpush.bf16.msra.mxu2 %v8155_v16  ;;  %v8507_v54 = vor.u32 %v10668_v42, %v8504_v0  ;;  %11919 = vst [vmem:[#allocation31_spill] sm:$0xff] %v11538_v23 }
 0x14e   :  { %v8760_v12 = vld [vmem:[#allocation5 + $0xed0] sm:$0xf0]  ;;  %v10764_v50 = vld [vmem:[#allocation5 + $0xfc4] sm:$0xf]  ;;  %5317 = vmatpush.bf16.msra.mxu3 %v8283_v24  ;;  %v8635_v63 = vor.u32 %v10700_v29, %v8632_v13  ;;  %5276 = vmatmul.bf16.vlgmr.msra.gmra.mxu0 %v11434_v31  ;;  %v5053_v42 = vpop.f32.mrf.mxu0 }
 0x14f   :  { %v8888_v28 = vld [vmem:[#allocation5 + $0xfd0] sm:$0xf0]  ;;  %5324 = vmatpush.bf16.msrb.mxu0 %v8523_v30  ;;  %v8763_v62 = vor.u32 %v10732_v59, %v8760_v12  ;;  %v10664_v61 = vld [vmem:[#allocation5 + $0xca4] sm:$0xf]  ;;  %5290 = vmatmul.bf16.vlgmr.msra.gmra.mxu1 %v11438_v36  ;;  %v5054_v59 = vadd.f32 %v5053_v42, %v11528_v11 }
 0x150   :  { %5338 = vmatpush.bf16.msrb.mxu1 %v8651_v37  ;;  %v8488_v2 = vld [vmem:[#allocation5 + $0xcb0] sm:$0xf0]  ;;  %v10696_v3 = vld [vmem:[#allocation5 + $0xda4] sm:$0xf]  ;;  %v8891_v6 = vor.u32 %v10764_v50, %v8888_v28  ;;  %5304 = vmatmul.bf16.vlgmr.msra.gmra.mxu2 %v11436_v35  ;;  %v5067_v28 = vpop.f32.mrf.mxu1 }
 0x151   :  { %5352 = vmatpush.bf16.msrb.mxu2 %v8779_v25  ;;  %v8616_v7 = vld [vmem:[#allocation5 + $0xdb0] sm:$0xf0]  ;;  %v10728_v8 = vld [vmem:[#allocation5 + $0xea4] sm:$0xf]  ;;  %5318 = vmatmul.bf16.vlgmr.msra.gmra.mxu3 %v11440_v40  ;;  %v8491_v12 = vor.u32 %v10664_v61, %v8488_v2  ;;  %v11540_v25 = vpop.f32.mrf.mxu3 }
 0x152   :  { %5366 = vmatpush.bf16.msrb.mxu3 %v8907_v49  ;;  %v8744_v9 = vld [vmem:[#allocation5 + $0xeb0] sm:$0xf0]  ;;  %v10760_v19 = vld [vmem:[#allocation5 + $0xfa4] sm:$0xf]  ;;  %v8619_v29 = vor.u32 %v10696_v3, %v8616_v7  ;;  %11920 = vst [vmem:[#allocation32_spill] sm:$0xff] %v11540_v25 }
 0x153   :  { %v8872_v0 = vld [vmem:[#allocation5 + $0xfb0] sm:$0xf0]  ;;  %5325 = vmatpush.bf16.msrb.mxu0 %v8507_v54  ;;  %v8747_v20 = vor.u32 %v10728_v8, %v8744_v9  ;;  %v10660_v18 = vld [vmem:[#allocation5 + $0xc84] sm:$0xf] }
 0x154   :  { %5339 = vmatpush.bf16.msrb.mxu1 %v8635_v63  ;;  %v8472_v15 = vld [vmem:[#allocation5 + $0xc90] sm:$0xf0]  ;;  %v10692_v16 = vld [vmem:[#allocation5 + $0xd84] sm:$0xf]  ;;  %v8875_v27 = vor.u32 %v10760_v19, %v8872_v0 }
 0x155   :  { %5353 = vmatpush.bf16.msrb.mxu2 %v8763_v62  ;;  %v8600_v24 = vld [vmem:[#allocation5 + $0xd90] sm:$0xf0]  ;;  %v10724_v30 = vld [vmem:[#allocation5 + $0xe84] sm:$0xf]  ;;  %v8475_v50 = vor.u32 %v10660_v18, %v8472_v15 }
 0x156   :  { %5367 = vmatpush.bf16.msrb.mxu3 %v8891_v6  ;;  %v8728_v37 = vld [vmem:[#allocation5 + $0xe90] sm:$0xf0]  ;;  %v10756_v49 = vld [vmem:[#allocation5 + $0xf84] sm:$0xf]  ;;  %v8603_v54 = vor.u32 %v10692_v16, %v8600_v24  ;;  %v5068_v6 = vadd.f32 %v5067_v28, %v5054_v59  ;;  %v5081_v24 = vpop.f32.mrf.mxu2  ;;  %v11545_v22 = vpop.f32.mrf.mxu0 }
 0x157   :  { %v8856_v13 = vld [vmem:[#allocation5 + $0xf90] sm:$0xf0]  ;;  %5326 = vmatpush.bf16.msrb.mxu0 %v8491_v12  ;;  %v8731_v63 = vor.u32 %v10724_v30, %v8728_v37  ;;  %v10656_v62 = vld [vmem:[#allocation5 + $0xc64] sm:$0xf]  ;;  %11921 = vst [vmem:[#allocation33_spill] sm:$0xff] %v11545_v22 }
 0x158   :  { %5340 = vmatpush.bf16.msrb.mxu1 %v8619_v29  ;;  %v8456_v61 = vld [vmem:[#allocation5 + $0xc70] sm:$0xf0]  ;;  %v10688_v2 = vld [vmem:[#allocation5 + $0xd64] sm:$0xf]  ;;  %v8859_v3 = vor.u32 %v10756_v49, %v8856_v13  ;;  %v5082_v42 = vadd.f32 %v5081_v24, %v5068_v6  ;;  %v7230_v22 = vld [vmem:[#allocation5 + $0x2c8] sm:$0xf] }
 0x159   :  { %5354 = vmatpush.bf16.msrb.mxu2 %v8747_v20  ;;  %v8584_v7 = vld [vmem:[#allocation5 + $0xd70] sm:$0xf0]  ;;  %v10720_v8 = vld [vmem:[#allocation5 + $0xe64] sm:$0xf]  ;;  %v8459_v12 = vor.u32 %v10656_v62, %v8456_v61  ;;  %v5095_v49 = vpop.f32.mrf.mxu3 }
 0x15a   :  { %5368 = vmatpush.bf16.msrb.mxu3 %v8875_v27  ;;  %v8712_v9 = vld [vmem:[#allocation5 + $0xe70] sm:$0xf0]  ;;  %v10752_v19 = vld [vmem:[#allocation5 + $0xf64] sm:$0xf]  ;;  %v8587_v11 = vor.u32 %v10688_v2, %v8584_v7  ;;  %v11543_v28 = vadd.f32 %v5095_v49, %v5082_v42 }
 0x15b   :  { %v8840_v0 = vld [vmem:[#allocation5 + $0xf70] sm:$0xf0]  ;;  %5327 = vmatpush.bf16.msrb.mxu0 %v8475_v50  ;;  %v8715_v29 = vor.u32 %v10720_v8, %v8712_v9  ;;  %v10652_v20 = vld [vmem:[#allocation5 + $0xc44] sm:$0xf] }
 0x15c   :  { %5341 = vmatpush.bf16.msrb.mxu1 %v8603_v54  ;;  %v8440_v18 = vld [vmem:[#allocation5 + $0xc50] sm:$0xf0]  ;;  %v10684_v15 = vld [vmem:[#allocation5 + $0xd44] sm:$0xf]  ;;  %v8843_v16 = vor.u32 %v10752_v19, %v8840_v0 }
 0x15d   :  { %5355 = vmatpush.bf16.msrb.mxu2 %v8731_v63  ;;  %v8568_v27 = vld [vmem:[#allocation5 + $0xd50] sm:$0xf0]  ;;  %v10716_v30 = vld [vmem:[#allocation5 + $0xe44] sm:$0xf]  ;;  %v8443_v50 = vor.u32 %v10652_v20, %v8440_v18 }
 0x15e   :  { %5369 = vmatpush.bf16.msrb.mxu3 %v8859_v3  ;;  %v8696_v37 = vld [vmem:[#allocation5 + $0xe50] sm:$0xf0]  ;;  %v10748_v13 = vld [vmem:[#allocation5 + $0xf44] sm:$0xf]  ;;  %v8571_v54 = vor.u32 %v10684_v15, %v8568_v27 }
 0x15f   :  { %v8824_v59 = vld [vmem:[#allocation5 + $0xf50] sm:$0xf0]  ;;  %5328 = vmatpush.bf16.msrb.mxu0 %v8459_v12  ;;  %v8699_v63 = vor.u32 %v10716_v30, %v8696_v37  ;;  %v10648_v62 = vld [vmem:[#allocation5 + $0xc24] sm:$0xf] }
 0x160   :  { %5342 = vmatpush.bf16.msrb.mxu1 %v8587_v11  ;;  %v8424_v61 = vld [vmem:[#allocation5 + $0xc30] sm:$0xf0]  ;;  %v10680_v2 = vld [vmem:[#allocation5 + $0xd24] sm:$0xf]  ;;  %v8827_v3 = vor.u32 %v10748_v13, %v8824_v59 }
 0x161   :  { %5356 = vmatpush.bf16.msrb.mxu2 %v8715_v29  ;;  %v8552_v7 = vld [vmem:[#allocation5 + $0xd30] sm:$0xf0]  ;;  %v10712_v8 = vld [vmem:[#allocation5 + $0xe24] sm:$0xf]  ;;  %v8427_v0 = vor.u32 %v10648_v62, %v8424_v61 }
 0x162   :  { %5370 = vmatpush.bf16.msrb.mxu3 %v8843_v16  ;;  %v8680_v9 = vld [vmem:[#allocation5 + $0xe30] sm:$0xf0]  ;;  %v10744_v6 = vld [vmem:[#allocation5 + $0xf24] sm:$0xf]  ;;  %v8555_v11 = vor.u32 %v10680_v2, %v8552_v7 }
 0x163   :  { %v8808_v19 = vld [vmem:[#allocation5 + $0xf30] sm:$0xf0]  ;;  %5329 = vmatpush.bf16.msrb.mxu0 %v8443_v50  ;;  %v10644_v12 = vld [vmem:[#allocation5 + $0xc04] sm:$0xf]  ;;  %v8683_v29 = vor.u32 %v10712_v8, %v8680_v9 }
 0x164   :  { %v8408_v20 = vld [vmem:[#allocation5 + $0xc10] sm:$0xf0]  ;;  %5343 = vmatpush.bf16.msrb.mxu1 %v8571_v54  ;;  %v10676_v18 = vld [vmem:[#allocation5 + $0xd04] sm:$0xf]  ;;  %v8811_v27 = vor.u32 %v10744_v6, %v8808_v19 }
 0x165   :  { %5357 = vmatpush.bf16.msrb.mxu2 %v8699_v63  ;;  %v8536_v15 = vld [vmem:[#allocation5 + $0xd10] sm:$0xf0]  ;;  %v10708_v24 = vld [vmem:[#allocation5 + $0xe04] sm:$0xf]  ;;  %v8411_v59 = vor.u32 %v10644_v12, %v8408_v20 }
 0x166   :  { %5371 = vmatpush.bf16.msrb.mxu3 %v8827_v3  ;;  %v8664_v16 = vld [vmem:[#allocation5 + $0xe10] sm:$0xf0]  ;;  %v10740_v30 = vld [vmem:[#allocation5 + $0xf04] sm:$0xf]  ;;  %v8539_v54 = vor.u32 %v10676_v18, %v8536_v15  ;;  %v11547_v18 = vpop.f32.mrf.mxu1 }
 0x167   :  { %v8792_v37 = vld [vmem:[#allocation5 + $0xf10] sm:$0xf0]  ;;  %v10800_v42 = vld [vmem:[#allocation5 + $0x10e4] sm:$0xf]  ;;  %5330 = vmatpush.bf16.msrb.mxu0 %v8427_v0  ;;  %v8667_v63 = vor.u32 %v10708_v24, %v8664_v16  ;;  %11922 = vst [vmem:[#allocation34_spill] sm:$0xff] %v11547_v18 }
 0x168   :  { %v9032_v49 = vld [vmem:[#allocation5 + $0x10f0] sm:$0xf0]  ;;  %v10832_v13 = vld [vmem:[#allocation5 + $0x11e4] sm:$0xf]  ;;  %5344 = vmatpush.bf16.msrb.mxu1 %v8555_v11  ;;  %v8795_v3 = vor.u32 %v10740_v30, %v8792_v37 }
 0x169   :  { %v9160_v50 = vld [vmem:[#allocation5 + $0x11f0] sm:$0xf0]  ;;  %v10864_v62 = vld [vmem:[#allocation5 + $0x12e4] sm:$0xf]  ;;  %5358 = vmatpush.bf16.msrb.mxu2 %v8683_v29  ;;  %v9035_v8 = vor.u32 %v10800_v42, %v9032_v49 }
 0x16a   :  { %v9288_v61 = vld [vmem:[#allocation5 + $0x12f0] sm:$0xf0]  ;;  %v10896_v2 = vld [vmem:[#allocation5 + $0x13e4] sm:$0xf]  ;;  %5372 = vmatpush.bf16.msrb.mxu3 %v8811_v27  ;;  %v9163_v9 = vor.u32 %v10832_v13, %v9160_v50 }
 0x16b   :  { %v9416_v7 = vld [vmem:[#allocation5 + $0x13f0] sm:$0xf0]  ;;  %v9291_v6 = vor.u32 %v10864_v62, %v9288_v61  ;;  %v10796_v19 = vld [vmem:[#allocation5 + $0x10c4] sm:$0xf]  ;;  %5331 = vmatpush.bf16.msrb.mxu0 %v8411_v59 }
 0x16c   :  { %v9016_v25 = vld [vmem:[#allocation5 + $0x10d0] sm:$0xf0]  ;;  %v10828_v23 = vld [vmem:[#allocation5 + $0x11c4] sm:$0xf]  ;;  %v9419_v0 = vor.u32 %v10896_v2, %v9416_v7  ;;  %5345 = vmatpush.bf16.msrb.mxu1 %v8539_v54  ;;  %v11553_v2 = vpop.f32.mrf.mxu2 }
 0x16d   :  { %v9144_v12 = vld [vmem:[#allocation5 + $0x11d0] sm:$0xf0]  ;;  %v10860_v20 = vld [vmem:[#allocation5 + $0x12c4] sm:$0xf]  ;;  %5359 = vmatpush.bf16.msrb.mxu2 %v8667_v63  ;;  %v9019_v15 = vor.u32 %v10796_v19, %v9016_v25  ;;  %11923 = vst [vmem:[#allocation35_spill] sm:$0xff] %v11553_v2  ;;  %v5109_v19 = vpop.f32.mrf.mxu0 }
 0x16e   :  { %v9272_v53 = vld [vmem:[#allocation5 + $0x12d0] sm:$0xf0]  ;;  %v10892_v11 = vld [vmem:[#allocation5 + $0x13c4] sm:$0xf]  ;;  %5373 = vmatpush.bf16.msrb.mxu3 %v8795_v3  ;;  %v9147_v24 = vor.u32 %v10828_v23, %v9144_v12  ;;  %5332 = vmatmul.bf16.vlgmr.msrb.gmra.mxu0 %v11446_v32 }
 0x16f   :  { %v9400_v29 = vld [vmem:[#allocation5 + $0x13d0] sm:$0xf0]  ;;  %5380 = vmatpush.bf16.msra.mxu0 %v9035_v8  ;;  %v9275_v27 = vor.u32 %v10860_v20, %v9272_v53  ;;  %v10792_v16 = vld [vmem:[#allocation5 + $0x10a4] sm:$0xf]  ;;  %5346 = vmatmul.bf16.vlgmr.msrb.gmra.mxu1 %v11450_v41  ;;  %v5110_v20 = vadd.f32 %v5109_v19, %v11543_v28 }
 0x170   :  { %5394 = vmatpush.bf16.msra.mxu1 %v9163_v9  ;;  %v9000_v30 = vld [vmem:[#allocation5 + $0x10b0] sm:$0xf0]  ;;  %v10824_v37 = vld [vmem:[#allocation5 + $0x11a4] sm:$0xf]  ;;  %v9403_v42 = vor.u32 %v10892_v11, %v9400_v29  ;;  %5360 = vmatmul.bf16.vlgmr.msrb.gmra.mxu2 %v11448_v38  ;;  %v5123_v29 = vpop.f32.mrf.mxu1 }
 0x171   :  { %5408 = vmatpush.bf16.msra.mxu2 %v9291_v6  ;;  %v9128_v49 = vld [vmem:[#allocation5 + $0x11b0] sm:$0xf0]  ;;  %v10856_v13 = vld [vmem:[#allocation5 + $0x12a4] sm:$0xf]  ;;  %5374 = vmatmul.bf16.vlgmr.msrb.gmra.mxu3 %v11452_v46  ;;  %v9003_v53 = vor.u32 %v10792_v16, %v9000_v30  ;;  %v11555_v6 = vpop.f32.mrf.mxu3 }
 0x172   :  { %5422 = vmatpush.bf16.msra.mxu3 %v9419_v0  ;;  %v9256_v59 = vld [vmem:[#allocation5 + $0x12b0] sm:$0xf0]  ;;  %v10888_v50 = vld [vmem:[#allocation5 + $0x13a4] sm:$0xf]  ;;  %v9131_v23 = vor.u32 %v10824_v37, %v9128_v49  ;;  %11924 = vst [vmem:[#allocation36_spill] sm:$0xff] %v11555_v6 }
 0x173   :  { %v9384_v25 = vld [vmem:[#allocation5 + $0x13b0] sm:$0xf0]  ;;  %5381 = vmatpush.bf16.msra.mxu0 %v9019_v15  ;;  %v9259_v62 = vor.u32 %v10856_v13, %v9256_v59  ;;  %v10788_v61 = vld [vmem:[#allocation5 + $0x1084] sm:$0xf] }
 0x174   :  { %5395 = vmatpush.bf16.msra.mxu1 %v9147_v24  ;;  %v8984_v54 = vld [vmem:[#allocation5 + $0x1090] sm:$0xf0]  ;;  %v10820_v63 = vld [vmem:[#allocation5 + $0x1184] sm:$0xf]  ;;  %v9387_v7 = vor.u32 %v10888_v50, %v9384_v25 }
 0x175   :  { %5409 = vmatpush.bf16.msra.mxu2 %v9275_v27  ;;  %v9112_v3 = vld [vmem:[#allocation5 + $0x1190] sm:$0xf0]  ;;  %v10852_v8 = vld [vmem:[#allocation5 + $0x1284] sm:$0xf]  ;;  %v8987_v11 = vor.u32 %v10788_v61, %v8984_v54  ;;  %v11560_v18 = vpop.f32.mrf.mxu0 }
 0x176   :  { %5423 = vmatpush.bf16.msra.mxu3 %v9403_v42  ;;  %v9240_v9 = vld [vmem:[#allocation5 + $0x1290] sm:$0xf0]  ;;  %v10884_v0 = vld [vmem:[#allocation5 + $0x1384] sm:$0xf]  ;;  %v9115_v15 = vor.u32 %v10820_v63, %v9112_v3  ;;  %v5124_v42 = vadd.f32 %v5123_v29, %v5110_v20  ;;  %v5137_v3 = vpop.f32.mrf.mxu2  ;;  %11926 = vst [vmem:[#allocation38_spill] sm:$0xff] %v11560_v18 }
 0x177   :  { %v9368_v12 = vld [vmem:[#allocation5 + $0x1390] sm:$0xf0]  ;;  %5382 = vmatpush.bf16.msra.mxu0 %v9003_v53  ;;  %v9243_v24 = vor.u32 %v10852_v8, %v9240_v9  ;;  %v10784_v27 = vld [vmem:[#allocation5 + $0x1064] sm:$0xf]  ;;  %v10287_v18 = vld [vmem:[#allocation5 + $0xd4] sm:$0xf0] }
 0x178   :  { %5396 = vmatpush.bf16.msra.mxu1 %v9131_v23  ;;  %v8968_v16 = vld [vmem:[#allocation5 + $0x1070] sm:$0xf0]  ;;  %v10816_v30 = vld [vmem:[#allocation5 + $0x1164] sm:$0xf]  ;;  %v9371_v37 = vor.u32 %v10884_v0, %v9368_v12  ;;  %v5138_v19 = vadd.f32 %v5137_v3, %v5124_v42 }
 0x179   :  { %5410 = vmatpush.bf16.msra.mxu2 %v9259_v62  ;;  %v9096_v49 = vld [vmem:[#allocation5 + $0x1170] sm:$0xf0]  ;;  %v10848_v13 = vld [vmem:[#allocation5 + $0x1264] sm:$0xf]  ;;  %v8971_v53 = vor.u32 %v10784_v27, %v8968_v16  ;;  %v5151_v0 = vpop.f32.mrf.mxu3 }
 0x17a   :  { %5424 = vmatpush.bf16.msra.mxu3 %v9387_v7  ;;  %v9224_v59 = vld [vmem:[#allocation5 + $0x1270] sm:$0xf0]  ;;  %v10880_v50 = vld [vmem:[#allocation5 + $0x1364] sm:$0xf]  ;;  %v9099_v28 = vor.u32 %v10816_v30, %v9096_v49  ;;  %v11558_v29 = vadd.f32 %v5151_v0, %v5138_v19 }
 0x17b   :  { %v9352_v25 = vld [vmem:[#allocation5 + $0x1370] sm:$0xf0]  ;;  %5383 = vmatpush.bf16.msra.mxu0 %v8987_v11  ;;  %v9227_v23 = vor.u32 %v10848_v13, %v9224_v59  ;;  %v10780_v62 = vld [vmem:[#allocation5 + $0x1044] sm:$0xf] }
 0x17c   :  { %5397 = vmatpush.bf16.msra.mxu1 %v9115_v15  ;;  %v8952_v61 = vld [vmem:[#allocation5 + $0x1050] sm:$0xf0]  ;;  %v10812_v54 = vld [vmem:[#allocation5 + $0x1144] sm:$0xf]  ;;  %v9355_v63 = vor.u32 %v10880_v50, %v9352_v25  ;;  %11925 = vst [vmem:[#allocation37_spill] sm:$0xff] %v11558_v29 }
 0x17d   :  { %5411 = vmatpush.bf16.msra.mxu2 %v9243_v24  ;;  %v9080_v7 = vld [vmem:[#allocation5 + $0x1150] sm:$0xf0]  ;;  %v10844_v8 = vld [vmem:[#allocation5 + $0x1244] sm:$0xf]  ;;  %v8955_v11 = vor.u32 %v10780_v62, %v8952_v61 }
 0x17e   :  { %5425 = vmatpush.bf16.msra.mxu3 %v9371_v37  ;;  %v9208_v9 = vld [vmem:[#allocation5 + $0x1250] sm:$0xf0]  ;;  %v10876_v12 = vld [vmem:[#allocation5 + $0x1344] sm:$0xf]  ;;  %v9083_v15 = vor.u32 %v10812_v54, %v9080_v7 }
 0x17f   :  { %v9336_v20 = vld [vmem:[#allocation5 + $0x1350] sm:$0xf0]  ;;  %5384 = vmatpush.bf16.msra.mxu0 %v8971_v53  ;;  %v9211_v24 = vor.u32 %v10844_v8, %v9208_v9  ;;  %v10776_v27 = vld [vmem:[#allocation5 + $0x1024] sm:$0xf] }
 0x180   :  { %5398 = vmatpush.bf16.msra.mxu1 %v9099_v28  ;;  %v8936_v16 = vld [vmem:[#allocation5 + $0x1030] sm:$0xf0]  ;;  %v10808_v30 = vld [vmem:[#allocation5 + $0x1124] sm:$0xf]  ;;  %v9339_v37 = vor.u32 %v10876_v12, %v9336_v20 }
 0x181   :  { %5412 = vmatpush.bf16.msra.mxu2 %v9227_v23  ;;  %v9064_v49 = vld [vmem:[#allocation5 + $0x1130] sm:$0xf0]  ;;  %v10840_v13 = vld [vmem:[#allocation5 + $0x1224] sm:$0xf]  ;;  %v8939_v25 = vor.u32 %v10776_v27, %v8936_v16 }
 0x182   :  { %5426 = vmatpush.bf16.msra.mxu3 %v9355_v63  ;;  %v9192_v59 = vld [vmem:[#allocation5 + $0x1230] sm:$0xf0]  ;;  %v10872_v42 = vld [vmem:[#allocation5 + $0x1324] sm:$0xf]  ;;  %v9067_v28 = vor.u32 %v10808_v30, %v9064_v49 }
 0x183   :  { %v9320_v50 = vld [vmem:[#allocation5 + $0x1330] sm:$0xf0]  ;;  %5385 = vmatpush.bf16.msra.mxu0 %v8955_v11  ;;  %v10772_v53 = vld [vmem:[#allocation5 + $0x1004] sm:$0xf]  ;;  %v9195_v23 = vor.u32 %v10840_v13, %v9192_v59 }
 0x184   :  { %v8920_v62 = vld [vmem:[#allocation5 + $0x1010] sm:$0xf0]  ;;  %5399 = vmatpush.bf16.msra.mxu1 %v9083_v15  ;;  %v10804_v61 = vld [vmem:[#allocation5 + $0x1104] sm:$0xf]  ;;  %v9323_v7 = vor.u32 %v10872_v42, %v9320_v50 }
 0x185   :  { %5413 = vmatpush.bf16.msra.mxu2 %v9211_v24  ;;  %v9048_v54 = vld [vmem:[#allocation5 + $0x1110] sm:$0xf0]  ;;  %v10836_v3 = vld [vmem:[#allocation5 + $0x1204] sm:$0xf]  ;;  %v8923_v20 = vor.u32 %v10772_v53, %v8920_v62 }
 0x186   :  { %5427 = vmatpush.bf16.msra.mxu3 %v9339_v37  ;;  %v9176_v63 = vld [vmem:[#allocation5 + $0x1210] sm:$0xf0]  ;;  %v10868_v8 = vld [vmem:[#allocation5 + $0x1304] sm:$0xf]  ;;  %v9051_v15 = vor.u32 %v10804_v61, %v9048_v54  ;;  %v11562_v54 = vpop.f32.mrf.mxu1 }
 0x187   :  { %v9304_v9 = vld [vmem:[#allocation5 + $0x1310] sm:$0xf0]  ;;  %v10928_v19 = vld [vmem:[#allocation5 + $0x14e4] sm:$0xf]  ;;  %5386 = vmatpush.bf16.msra.mxu0 %v8939_v25  ;;  %v9179_v24 = vor.u32 %v10836_v3, %v9176_v63  ;;  %11927 = vst [vmem:[#allocation39_spill] sm:$0xff] %v11562_v54 }
 0x188   :  { %v9544_v0 = vld [vmem:[#allocation5 + $0x14f0] sm:$0xf0]  ;;  %v10960_v12 = vld [vmem:[#allocation5 + $0x15e4] sm:$0xf]  ;;  %5400 = vmatpush.bf16.msra.mxu1 %v9067_v28  ;;  %v9307_v37 = vor.u32 %v10868_v8, %v9304_v9  ;;  %v6974_v54 = vld [vmem:[#allocation5 + $0xc8] sm:$0xf] }
 0x189   :  { %v9672_v11 = vld [vmem:[#allocation5 + $0x15f0] sm:$0xf0]  ;;  %v10992_v27 = vld [vmem:[#allocation5 + $0x16e4] sm:$0xf]  ;;  %5414 = vmatpush.bf16.msra.mxu2 %v9195_v23  ;;  %v9547_v13 = vor.u32 %v10928_v19, %v9544_v0 }
 0x18a   :  { %v9800_v16 = vld [vmem:[#allocation5 + $0x16f0] sm:$0xf0]  ;;  %v11024_v30 = vld [vmem:[#allocation5 + $0x17e4] sm:$0xf]  ;;  %5428 = vmatpush.bf16.msra.mxu3 %v9323_v7  ;;  %v9675_v59 = vor.u32 %v10960_v12, %v9672_v11 }
 0x18b   :  { %v9928_v49 = vld [vmem:[#allocation5 + $0x17f0] sm:$0xf0]  ;;  %v9803_v42 = vor.u32 %v10992_v27, %v9800_v16  ;;  %v10924_v50 = vld [vmem:[#allocation5 + $0x14c4] sm:$0xf]  ;;  %5387 = vmatpush.bf16.msra.mxu0 %v8923_v20 }
 0x18c   :  { %v9528_v29 = vld [vmem:[#allocation5 + $0x14d0] sm:$0xf0]  ;;  %v10956_v6 = vld [vmem:[#allocation5 + $0x15c4] sm:$0xf]  ;;  %v9931_v25 = vor.u32 %v11024_v30, %v9928_v49  ;;  %5401 = vmatpush.bf16.msra.mxu1 %v9051_v15 }
 0x18d   :  { %v9656_v53 = vld [vmem:[#allocation5 + $0x15d0] sm:$0xf0]  ;;  %v10988_v62 = vld [vmem:[#allocation5 + $0x16c4] sm:$0xf]  ;;  %5415 = vmatpush.bf16.msra.mxu2 %v9179_v24  ;;  %v9531_v61 = vor.u32 %v10924_v50, %v9528_v29 }
 0x18e   :  { %v9784_v2 = vld [vmem:[#allocation5 + $0x16d0] sm:$0xf0]  ;;  %v11020_v28 = vld [vmem:[#allocation5 + $0x17c4] sm:$0xf]  ;;  %5429 = vmatpush.bf16.msra.mxu3 %v9307_v37  ;;  %v9659_v3 = vor.u32 %v10956_v6, %v9656_v53  ;;  %5388 = vmatmul.bf16.vlgmr.msra.gmra.mxu0 %v11458_v51  ;;  %v11568_v6 = vld [vmem:[#allocation7] sm:$0xf]  ;;  %v11571_v37 = vpop.f32.mrf.mxu2 }
 0x18f   :  { %v9912_v23 = vld [vmem:[#allocation5 + $0x17d0] sm:$0xf0]  ;;  %5436 = vmatpush.bf16.msrb.mxu0 %v9547_v13  ;;  %v9787_v7 = vor.u32 %v10988_v62, %v9784_v2  ;;  %v10920_v63 = vld [vmem:[#allocation5 + $0x14a4] sm:$0xf]  ;;  %5402 = vmatmul.bf16.vlgmr.msra.gmra.mxu1 %v11462_v56  ;;  %v11907_v27 = vperm.slane %v11568_v6, 1  ;;  %11928 = vst [vmem:[#allocation40_spill] sm:$0xff] %v11571_v37  ;;  %v5165_v62 = vpop.f32.mrf.mxu0 }
 0x190   :  { %5450 = vmatpush.bf16.msrb.mxu1 %v9675_v59  ;;  %v9512_v8 = vld [vmem:[#allocation5 + $0x14b0] sm:$0xf0]  ;;  %v10952_v9 = vld [vmem:[#allocation5 + $0x15a4] sm:$0xf]  ;;  %v9915_v19 = vor.u32 %v11020_v28, %v9912_v23  ;;  %5416 = vmatmul.bf16.vlgmr.msra.gmra.mxu2 %v11460_v55  ;;  %v11573_v28 = vpop.f32.mrf.mxu3 }
 0x191   :  { %5464 = vmatpush.bf16.msrb.mxu2 %v9803_v42  ;;  %v9640_v0 = vld [vmem:[#allocation5 + $0x15b0] sm:$0xf0]  ;;  %v10984_v12 = vld [vmem:[#allocation5 + $0x16a4] sm:$0xf]  ;;  %5430 = vmatmul.bf16.vlgmr.msra.gmra.mxu3 %v11464_v60  ;;  %v9515_v2 = vor.u32 %v10920_v63, %v9512_v8  ;;  %11929 = vst [vmem:[#allocation41_spill] sm:$0xff] %v11573_v28 }
 0x192   :  { %5478 = vmatpush.bf16.msrb.mxu3 %v9931_v25  ;;  %v9768_v20 = vld [vmem:[#allocation5 + $0x16b0] sm:$0xf0]  ;;  %v11016_v29 = vld [vmem:[#allocation5 + $0x17a4] sm:$0xf]  ;;  %v9643_v16 = vor.u32 %v10952_v9, %v9640_v0 }
 0x193   :  { %v9896_v11 = vld [vmem:[#allocation5 + $0x17b0] sm:$0xf0]  ;;  %5437 = vmatpush.bf16.msrb.mxu0 %v9531_v61  ;;  %v9771_v15 = vor.u32 %v10984_v12, %v9768_v20  ;;  %v10916_v24 = vld [vmem:[#allocation5 + $0x1484] sm:$0xf]  ;;  %v5166_v61 = vadd.f32 %v5165_v62, %v11907_v27 }
 0x194   :  { %5451 = vmatpush.bf16.msrb.mxu1 %v9659_v3  ;;  %v9496_v30 = vld [vmem:[#allocation5 + $0x1490] sm:$0xf0]  ;;  %v10948_v49 = vld [vmem:[#allocation5 + $0x1584] sm:$0xf]  ;;  %v9899_v13 = vor.u32 %v11016_v29, %v9896_v11 }
 0x195   :  { %5465 = vmatpush.bf16.msrb.mxu2 %v9787_v7  ;;  %v9624_v59 = vld [vmem:[#allocation5 + $0x1590] sm:$0xf0]  ;;  %v10980_v42 = vld [vmem:[#allocation5 + $0x1684] sm:$0xf]  ;;  %v9499_v23 = vor.u32 %v10916_v24, %v9496_v30 }
 0x196   :  { %5479 = vmatpush.bf16.msrb.mxu3 %v9915_v19  ;;  %v9752_v50 = vld [vmem:[#allocation5 + $0x1690] sm:$0xf0]  ;;  %v11012_v25 = vld [vmem:[#allocation5 + $0x1784] sm:$0xf]  ;;  %v9627_v3 = vor.u32 %v10948_v49, %v9624_v59  ;;  %v5179_v19 = vpop.f32.mrf.mxu1 }
 0x197   :  { %v9880_v53 = vld [vmem:[#allocation5 + $0x1790] sm:$0xf0]  ;;  %5438 = vmatpush.bf16.msrb.mxu0 %v9515_v2  ;;  %v9755_v7 = vor.u32 %v10980_v42, %v9752_v50  ;;  %v10912_v63 = vld [vmem:[#allocation5 + $0x1464] sm:$0xf]  ;;  %v5180_v11 = vadd.f32 %v5179_v19, %v5166_v61 }
 0x198   :  { %5452 = vmatpush.bf16.msrb.mxu1 %v9643_v16  ;;  %v9480_v8 = vld [vmem:[#allocation5 + $0x1470] sm:$0xf0]  ;;  %v10944_v9 = vld [vmem:[#allocation5 + $0x1564] sm:$0xf]  ;;  %v9883_v0 = vor.u32 %v11012_v25, %v9880_v53  ;;  %v5193_v53 = vpop.f32.mrf.mxu2 }
 0x199   :  { %5466 = vmatpush.bf16.msrb.mxu2 %v9771_v15  ;;  %v9608_v12 = vld [vmem:[#allocation5 + $0x1570] sm:$0xf0]  ;;  %v10976_v20 = vld [vmem:[#allocation5 + $0x1664] sm:$0xf]  ;;  %v9483_v24 = vor.u32 %v10912_v63, %v9480_v8  ;;  %v5194_v61 = vadd.f32 %v5193_v53, %v5180_v11  ;;  %v6990_v53 = vld [vmem:[#allocation5 + $0xe8] sm:$0xf] }
 0x19a   :  { %5480 = vmatpush.bf16.msrb.mxu3 %v9899_v13  ;;  %v9736_v29 = vld [vmem:[#allocation5 + $0x1670] sm:$0xf0]  ;;  %v11008_v28 = vld [vmem:[#allocation5 + $0x1764] sm:$0xf]  ;;  %v9611_v16 = vor.u32 %v10944_v9, %v9608_v12 }
 0x19b   :  { %v9864_v2 = vld [vmem:[#allocation5 + $0x1770] sm:$0xf0]  ;;  %5439 = vmatpush.bf16.msrb.mxu0 %v9499_v23  ;;  %v9739_v15 = vor.u32 %v10976_v20, %v9736_v29  ;;  %v10908_v30 = vld [vmem:[#allocation5 + $0x1444] sm:$0xf]  ;;  %v5207_v23 = vpop.f32.mrf.mxu3 }
 0x19c   :  { %5453 = vmatpush.bf16.msrb.mxu1 %v9627_v3  ;;  %v9464_v49 = vld [vmem:[#allocation5 + $0x1450] sm:$0xf0]  ;;  %v10940_v59 = vld [vmem:[#allocation5 + $0x1544] sm:$0xf]  ;;  %v9867_v42 = vor.u32 %v11008_v28, %v9864_v2  ;;  %v11577_v12 = vadd.f32 %v5207_v23, %v5194_v61  ;;  %v7118_v61 = vld [vmem:[#allocation5 + $0x1e8] sm:$0xf] }
 0x19d   :  { %5467 = vmatpush.bf16.msrb.mxu2 %v9755_v7  ;;  %v9592_v50 = vld [vmem:[#allocation5 + $0x1550] sm:$0xf0]  ;;  %v10972_v13 = vld [vmem:[#allocation5 + $0x1644] sm:$0xf]  ;;  %v9467_v19 = vor.u32 %v10908_v30, %v9464_v49  ;;  %v10323_v23 = vld [vmem:[#allocation5 + $0x1f4] sm:$0xf0] }
 0x19e   :  { %5481 = vmatpush.bf16.msrb.mxu3 %v9883_v0  ;;  %v9720_v25 = vld [vmem:[#allocation5 + $0x1650] sm:$0xf0]  ;;  %v11004_v62 = vld [vmem:[#allocation5 + $0x1744] sm:$0xf]  ;;  %v9595_v3 = vor.u32 %v10940_v59, %v9592_v50 }
 0x19f   :  { %v9848_v27 = vld [vmem:[#allocation5 + $0x1750] sm:$0xf0]  ;;  %5440 = vmatpush.bf16.msrb.mxu0 %v9483_v24  ;;  %v9723_v7 = vor.u32 %v10972_v13, %v9720_v25  ;;  %v10904_v63 = vld [vmem:[#allocation5 + $0x1424] sm:$0xf] }
 0x1a0   :  { %5454 = vmatpush.bf16.msrb.mxu1 %v9611_v16  ;;  %v9448_v8 = vld [vmem:[#allocation5 + $0x1430] sm:$0xf0]  ;;  %v10936_v9 = vld [vmem:[#allocation5 + $0x1524] sm:$0xf]  ;;  %v9851_v28 = vor.u32 %v11004_v62, %v9848_v27  ;;  %v10291_v62 = vld [vmem:[#allocation5 + $0xf4] sm:$0xf0] }
 0x1a1   :  { %5468 = vmatpush.bf16.msrb.mxu2 %v9739_v15  ;;  %v9576_v0 = vld [vmem:[#allocation5 + $0x1530] sm:$0xf0]  ;;  %v10968_v20 = vld [vmem:[#allocation5 + $0x1624] sm:$0xf]  ;;  %v9451_v11 = vor.u32 %v10904_v63, %v9448_v8  ;;  %v7246_v63 = vld [vmem:[#allocation5 + $0x2e8] sm:$0xf] }
 0x1a2   :  { %5482 = vmatpush.bf16.msrb.mxu3 %v9867_v42  ;;  %v9704_v29 = vld [vmem:[#allocation5 + $0x1630] sm:$0xf0]  ;;  %v11000_v2 = vld [vmem:[#allocation5 + $0x1724] sm:$0xf]  ;;  %v9579_v16 = vor.u32 %v10936_v9, %v9576_v0  ;;  %v10355_v8 = vld [vmem:[#allocation5 + $0x2f4] sm:$0xf0] }
 0x1a3   :  { %v9832_v37 = vld [vmem:[#allocation5 + $0x1730] sm:$0xf0]  ;;  %5441 = vmatpush.bf16.msrb.mxu0 %v9467_v19  ;;  %v10900_v24 = vld [vmem:[#allocation5 + $0x1404] sm:$0xf]  ;;  %v9707_v15 = vor.u32 %v10968_v20, %v9704_v29  ;;  %v7374_v9 = vld [vmem:[#allocation5 + $0x3e8] sm:$0xf]  ;;  %v7119_v20 = vor.u32 %v10323_v23, %v7118_v61  ;;  %v7247_v29 = vor.u32 %v10355_v8, %v7246_v63 }
 0x1a4   :  { %v9432_v30 = vld [vmem:[#allocation5 + $0x1410] sm:$0xf0]  ;;  %5455 = vmatpush.bf16.msrb.mxu1 %v9595_v3  ;;  %v10932_v49 = vld [vmem:[#allocation5 + $0x1504] sm:$0xf]  ;;  %v9835_v13 = vor.u32 %v11000_v2, %v9832_v37  ;;  %v10387_v0 = vld [vmem:[#allocation5 + $0x3f4] sm:$0xf0]  ;;  %v6991_v37 = vor.u32 %v10291_v62, %v6990_v53  ;;  %v11579_v2 = vpop.f32.mrf.mxu0 }
 0x1a5   :  { %5469 = vmatpush.bf16.msrb.mxu2 %v9723_v7  ;;  %v9560_v59 = vld [vmem:[#allocation5 + $0x1510] sm:$0xf0]  ;;  %v10964_v50 = vld [vmem:[#allocation5 + $0x1604] sm:$0xf]  ;;  %v9435_v19 = vor.u32 %v10900_v24, %v9432_v30  ;;  %v7375_v24 = vor.u32 %v10387_v0, %v7374_v9  ;;  %v10319_v30 = vld [vmem:[#allocation5 + $0x1d4] sm:$0xf0] }
 0x1a6   :  { %5483 = vmatpush.bf16.msrb.mxu3 %v9851_v28  ;;  %v9688_v42 = vld [vmem:[#allocation5 + $0x1610] sm:$0xf0]  ;;  %v10996_v27 = vld [vmem:[#allocation5 + $0x1704] sm:$0xf]  ;;  %v9563_v3 = vor.u32 %v10932_v49, %v9560_v59  ;;  %v10383_v49 = vld [vmem:[#allocation5 + $0x3d4] sm:$0xf0]  ;;  %v11581_v59 = vpop.f32.mrf.mxu1 }
 0x1a7   :  { %v9816_v25 = vld [vmem:[#allocation5 + $0x1710] sm:$0xf0]  ;;  %5442 = vmatpush.bf16.msrb.mxu0 %v9451_v11  ;;  %v9691_v7 = vor.u32 %v10964_v50, %v9688_v42  ;;  %v7102_v11 = vld [vmem:[#allocation5 + $0x1c8] sm:$0xf]  ;;  %v6975_v50 = vor.u32 %v10287_v18, %v6974_v54  ;;  %v10315_v61 = vld [vmem:[#allocation5 + $0x1b4] sm:$0xf0]  ;;  %v11587_v54 = vpop.f32.mrf.mxu2 }
 0x1a8   :  { %5456 = vmatpush.bf16.msrb.mxu1 %v9579_v16  ;;  %v9819_v28 = vor.u32 %v10996_v27, %v9816_v25  ;;  %v10351_v16 = vld [vmem:[#allocation5 + $0x2d4] sm:$0xf0]  ;;  %v6958_v27 = vld [vmem:[#allocation5 + $0xa8] sm:$0xf]  ;;  %11930 = vst [vmem:[#allocation42_spill] sm:$0xff] %v11587_v54 }
 0x1a9   :  { %5470 = vmatpush.bf16.msrb.mxu2 %v9707_v15  ;;  %v7358_v15 = vld [vmem:[#allocation5 + $0x3c8] sm:$0xf]  ;;  %v7231_v42 = vor.u32 %v10351_v16, %v7230_v22  ;;  %v10283_v25 = vld [vmem:[#allocation5 + $0xb4] sm:$0xf0] }
 0x1aa   :  { %5484 = vmatpush.bf16.msrb.mxu3 %v9835_v13  ;;  %v7103_v13 = vor.u32 %v10319_v30, %v7102_v11  ;;  %v7086_v53 = vld [vmem:[#allocation5 + $0x1a8] sm:$0xf]  ;;  %v7359_v62 = vor.u32 %v10383_v49, %v7358_v15  ;;  %v10347_v23 = vld [vmem:[#allocation5 + $0x2b4] sm:$0xf0]  ;;  %v6959_v22 = vor.u32 %v10283_v25, %v6958_v27 }
 0x1ab   :  { %5443 = vmatpush.bf16.msrb.mxu0 %v9435_v19  ;;  %v7214_v19 = vld [vmem:[#allocation5 + $0x2a8] sm:$0xf]  ;;  %v10379_v18 = vld [vmem:[#allocation5 + $0x3b4] sm:$0xf0]  ;;  %v7087_v8 = vor.u32 %v10315_v61, %v7086_v53 }
 0x1ac   :  { %5457 = vmatpush.bf16.msrb.mxu1 %v9563_v3  ;;  %v7342_v63 = vld [vmem:[#allocation5 + $0x3a8] sm:$0xf]  ;;  %v7215_v3 = vor.u32 %v10347_v23, %v7214_v19  ;;  %v10279_v9 = vld [vmem:[#allocation5 + $0x94] sm:$0xf0] }
 0x1ad   :  { %5471 = vmatpush.bf16.msrb.mxu2 %v9691_v7  ;;  %v6942_v7 = vld [vmem:[#allocation5 + $0x88] sm:$0xf]  ;;  %v10343_v11 = vld [vmem:[#allocation5 + $0x294] sm:$0xf0] }
 0x1ae   :  { %5485 = vmatpush.bf16.msrb.mxu3 %v9819_v28  ;;  %5444 = vmatmul.bf16.vlgmr.msrb.gmra.mxu0 %v11479_v26  ;;  %v7070_v0 = vld [vmem:[#allocation5 + $0x188] sm:$0xf]  ;;  %v7343_v28 = vor.u32 %v10379_v18, %v7342_v63  ;;  %v10375_v16 = vld [vmem:[#allocation5 + $0x394] sm:$0xf0]  ;;  %v6943_v49 = vor.u32 %v10279_v9, %v6942_v7 }
 0x1af   :  { %5492 = vmatpush.bf16.msra.mxu0 %v6991_v37  ;;  %5458 = vmatmul.bf16.vlgmr.msrb.gmra.mxu1 %v11483_v34  ;;  %v11589_v37 = vpop.f32.mrf.mxu3  ;;  %v7326_v30 = vld [vmem:[#allocation5 + $0x388] sm:$0xf]  ;;  %v10275_v25 = vld [vmem:[#allocation5 + $0x74] sm:$0xf0] }
 0x1b0   :  { %5506 = vmatpush.bf16.msra.mxu1 %v7119_v20  ;;  %5472 = vmatmul.bf16.vlgmr.msrb.gmra.mxu2 %v11481_v33  ;;  %11931 = vst [vmem:[#allocation43_spill] sm:$0xff] %v11589_v37  ;;  %v10311_v20 = vld [vmem:[#allocation5 + $0x194] sm:$0xf0]  ;;  %v6926_v27 = vld [vmem:[#allocation5 + $0x68] sm:$0xf] }
 0x1b1   :  { %5520 = vmatpush.bf16.msra.mxu2 %v7247_v29  ;;  %5486 = vmatmul.bf16.vlgmr.msrb.gmra.mxu3 %v11487_v48  ;;  %v7198_v29 = vld [vmem:[#allocation5 + $0x288] sm:$0xf]  ;;  %v10307_v19 = vld [vmem:[#allocation5 + $0x174] sm:$0xf0] }
 0x1b2   :  { %5534 = vmatpush.bf16.msra.mxu3 %v7375_v24  ;;  %v5221_v24 = vpop.f32.mrf.mxu0  ;;  %v7054_v53 = vld [vmem:[#allocation5 + $0x168] sm:$0xf]  ;;  %v10339_v63 = vld [vmem:[#allocation5 + $0x274] sm:$0xf0] }
 0x1b3   :  { %5493 = vmatpush.bf16.msra.mxu0 %v6975_v50  ;;  %v5222_v15 = vadd.f32 %v5221_v24, %v11577_v12  ;;  %v7071_v50 = vor.u32 %v10311_v20, %v7070_v0  ;;  %v7182_v23 = vld [vmem:[#allocation5 + $0x268] sm:$0xf]  ;;  %v7055_v12 = vor.u32 %v10307_v19, %v7054_v53  ;;  %v10271_v7 = vld [vmem:[#allocation5 + $0x54] sm:$0xf0]  ;;  %v5249_v20 = vpop.f32.mrf.mxu2 }
 0x1b4   :  { %5507 = vmatpush.bf16.msra.mxu1 %v7103_v13  ;;  %v7199_v13 = vor.u32 %v10343_v11, %v7198_v29  ;;  %v7310_v18 = vld [vmem:[#allocation5 + $0x368] sm:$0xf]  ;;  %v10335_v11 = vld [vmem:[#allocation5 + $0x254] sm:$0xf0] }
 0x1b5   :  { %5521 = vmatpush.bf16.msra.mxu2 %v7231_v42  ;;  %v5235_v42 = vpop.f32.mrf.mxu1  ;;  %v7038_v9 = vld [vmem:[#allocation5 + $0x148] sm:$0xf]  ;;  %v7311_v0 = vor.u32 %v10371_v57, %v7310_v18 }
 0x1b6   :  { %5535 = vmatpush.bf16.msra.mxu3 %v7359_v62  ;;  %v7327_v62 = vor.u32 %v10375_v16, %v7326_v30  ;;  %v5236_v61 = vadd.f32 %v5235_v42, %v5222_v15  ;;  %v7166_v29 = vld [vmem:[#allocation5 + $0x248] sm:$0xf]  ;;  %v10367_v16 = vld [vmem:[#allocation5 + $0x354] sm:$0xf0] }
 0x1b7   :  { %5494 = vmatpush.bf16.msra.mxu0 %v6959_v22  ;;  %v6927_v22 = vor.u32 %v10275_v25, %v6926_v27  ;;  %v7294_v30 = vld [vmem:[#allocation5 + $0x348] sm:$0xf]  ;;  %v5263_v15 = vpop.f32.mrf.mxu3  ;;  %v7167_v42 = vor.u32 %v10335_v11, %v7166_v29  ;;  %v10267_v25 = vld [vmem:[#allocation5 + $0x34] sm:$0xf0] }
 0x1b8   :  { %5508 = vmatpush.bf16.msra.mxu1 %v7087_v8  ;;  %v7183_v8 = vor.u32 %v10339_v63, %v7182_v23  ;;  %v5250_v24 = vadd.f32 %v5249_v20, %v5236_v61  ;;  %v6894_v27 = vld [vmem:[#allocation5 + $0x28] sm:$0xf]  ;;  %v7295_v57 = vor.u32 %v10367_v16, %v7294_v30  ;;  %v10331_v23 = vld [vmem:[#allocation5 + $0x234] sm:$0xf0] }
 0x1b9   :  { %5522 = vmatpush.bf16.msra.mxu2 %v7215_v3  ;;  %v6910_v3 = vld [vmem:[#allocation5 + $0x48] sm:$0xf]  ;;  %v10363_v63 = vld [vmem:[#allocation5 + $0x334] sm:$0xf0]  ;;  %v6895_v18 = vor.u32 %v10267_v25, %v6894_v27 }
 0x1ba   :  { %5536 = vmatpush.bf16.msra.mxu3 %v7343_v28  ;;  %v10303_v28 = vld [vmem:[#allocation5 + $0x154] sm:$0xf0]  ;;  %v7022_v53 = vld [vmem:[#allocation5 + $0x128] sm:$0xf]  ;;  %v11594_v54 = vpop.f32.mrf.mxu0 }
 0x1bb   :  { %5495 = vmatpush.bf16.msra.mxu0 %v6943_v49  ;;  %v6911_v49 = vor.u32 %v10271_v7, %v6910_v3  ;;  %v7150_v19 = vld [vmem:[#allocation5 + $0x228] sm:$0xf]  ;;  %v10263_v3 = vld [vmem:[#allocation5 + $0x14] sm:$0xf0]  ;;  %11932 = vst [vmem:[#allocation44_spill] sm:$0xff] %v11594_v54 }
 0x1bc   :  { %5509 = vmatpush.bf16.msra.mxu1 %v7071_v50  ;;  %v11592_v50 = vadd.f32 %v5263_v15, %v5250_v24  ;;  %v7278_v61 = vld [vmem:[#allocation5 + $0x328] sm:$0xf]  ;;  %v10359_v11 = vld [vmem:[#allocation5 + $0x314] sm:$0xf0] }
 0x1bd   :  { %5523 = vmatpush.bf16.msra.mxu2 %v7199_v13  ;;  %v7039_v13 = vor.u32 %v10303_v28, %v7038_v9  ;;  %v7006_v7 = vld [vmem:[#allocation5 + $0x108] sm:$0xf]  ;;  %v10295_v9 = vld [vmem:[#allocation5 + $0x114] sm:$0xf0]  ;;  %v7279_v28 = vor.u32 %v10363_v63, %v7278_v61 }
 0x1be   :  { %5537 = vmatpush.bf16.msra.mxu3 %v7327_v62  ;;  %v10299_v62 = vld [vmem:[#allocation5 + $0x134] sm:$0xf0]  ;;  %v7134_v20 = vld [vmem:[#allocation5 + $0x208] sm:$0xf] }
 0x1bf   :  { %5496 = vmatpush.bf16.msra.mxu0 %v6927_v22  ;;  %v6878_v22 = vld [vmem:[#allocation5 + $0x8] sm:$0xf]  ;;  %v10419_v30 = vld [vmem:[#allocation5 + $0x4f4] sm:$0xf0] }
 0x1c0   :  { %5510 = vmatpush.bf16.msra.mxu1 %v7055_v12  ;;  %v7023_v12 = vor.u32 %v10299_v62, %v7022_v53  ;;  %v7262_v29 = vld [vmem:[#allocation5 + $0x308] sm:$0xf]  ;;  %v6879_v15 = vor.u32 %v10263_v3, %v6878_v22  ;;  %v10483_v25 = vld [vmem:[#allocation5 + $0x6f4] sm:$0xf0] }
 0x1c1   :  { %5524 = vmatpush.bf16.msra.mxu2 %v7183_v8  ;;  %v7151_v8 = vor.u32 %v10331_v23, %v7150_v19  ;;  %v7502_v24 = vld [vmem:[#allocation5 + $0x4e8] sm:$0xf]  ;;  %v10515_v62 = vld [vmem:[#allocation5 + $0x7f4] sm:$0xf0] }
 0x1c2   :  { %5538 = vmatpush.bf16.msra.mxu3 %v7311_v0  ;;  %v10327_v0 = vld [vmem:[#allocation5 + $0x214] sm:$0xf0]  ;;  %v7630_v16 = vld [vmem:[#allocation5 + $0x5e8] sm:$0xf]  ;;  %v7503_v19 = vor.u32 %v10419_v30, %v7502_v24 }
 0x1c3   :  { %5497 = vmatpush.bf16.msra.mxu0 %v6911_v49  ;;  %v10451_v49 = vld [vmem:[#allocation5 + $0x5f4] sm:$0xf0]  ;;  %v7758_v27 = vld [vmem:[#allocation5 + $0x6e8] sm:$0xf] }
 0x1c4   :  { %5511 = vmatpush.bf16.msra.mxu1 %v7039_v13  ;;  %v7007_v13 = vor.u32 %v10295_v9, %v7006_v7  ;;  %v7886_v53 = vld [vmem:[#allocation5 + $0x7e8] sm:$0xf]  ;;  %v7631_v23 = vor.u32 %v10451_v49, %v7630_v16  ;;  %v7759_v61 = vor.u32 %v10483_v25, %v7758_v27  ;;  %v10447_v22 = vld [vmem:[#allocation5 + $0x5d4] sm:$0xf0]  ;;  %v11596_v7 = vpop.f32.mrf.mxu1 }
 0x1c5   :  { %5525 = vmatpush.bf16.msra.mxu2 %v7167_v42  ;;  %v7135_v42 = vor.u32 %v10327_v0, %v7134_v20  ;;  %v7486_v63 = vld [vmem:[#allocation5 + $0x4c8] sm:$0xf]  ;;  %11933 = vst [vmem:[#allocation45_spill] sm:$0xff] %v11596_v7  ;;  %v10443_v30 = vld [vmem:[#allocation5 + $0x5b4] sm:$0xf0] }
 0x1c6   :  { %5539 = vmatpush.bf16.msra.mxu3 %v7295_v57  ;;  %v7263_v57 = vor.u32 %v10359_v11, %v7262_v29  ;;  %v7614_v37 = vld [vmem:[#allocation5 + $0x5c8] sm:$0xf]  ;;  %v7487_v9 = vor.u32 %v10415_v52, %v7486_v63  ;;  %v10411_v29 = vld [vmem:[#allocation5 + $0x4b4] sm:$0xf0] }
 0x1c7   :  { %5498 = vmatpush.bf16.msra.mxu0 %v6895_v18  ;;  %v7887_v18 = vor.u32 %v10515_v62, %v7886_v53  ;;  %v7742_v3 = vld [vmem:[#allocation5 + $0x6c8] sm:$0xf]  ;;  %v7615_v20 = vor.u32 %v10447_v22, %v7614_v37  ;;  %v10507_v27 = vld [vmem:[#allocation5 + $0x7b4] sm:$0xf0]  ;;  %v11602_v53 = vpop.f32.mrf.mxu2 }
 0x1c8   :  { %5512 = vmatpush.bf16.msra.mxu1 %v7023_v12  ;;  %v7870_v12 = vld [vmem:[#allocation5 + $0x7c8] sm:$0xf]  ;;  %11934 = vst [vmem:[#allocation46_spill] sm:$0xff] %v11602_v53  ;;  %v10503_v22 = vld [vmem:[#allocation5 + $0x794] sm:$0xf0] }
 0x1c9   :  { %5526 = vmatpush.bf16.msra.mxu2 %v7151_v8  ;;  %v10511_v8 = vld [vmem:[#allocation5 + $0x7d4] sm:$0xf0]  ;;  %v7470_v0 = vld [vmem:[#allocation5 + $0x4a8] sm:$0xf] }
 0x1ca   :  { %5540 = vmatpush.bf16.msra.mxu3 %v7279_v28  ;;  %v7743_v28 = vor.u32 %v10479_v14, %v7742_v3  ;;  %v7598_v11 = vld [vmem:[#allocation5 + $0x5a8] sm:$0xf]  ;;  %v7871_v24 = vor.u32 %v10511_v8, %v7870_v12  ;;  %v7471_v52 = vor.u32 %v10411_v29, %v7470_v0  ;;  %v10403_v0 = vld [vmem:[#allocation5 + $0x474] sm:$0xf0] }
 0x1cb   :  { %5499 = vmatpush.bf16.msra.mxu0 %v6879_v15  ;;  %v7726_v16 = vld [vmem:[#allocation5 + $0x6a8] sm:$0xf]  ;;  %v10475_v15 = vld [vmem:[#allocation5 + $0x6b4] sm:$0xf0]  ;;  %v7599_v14 = vor.u32 %v10443_v30, %v7598_v11  ;;  %v5277_v63 = vpop.f32.mrf.mxu0 }
 0x1cc   :  { %5513 = vmatpush.bf16.msra.mxu1 %v7007_v13  ;;  %v7854_v49 = vld [vmem:[#allocation5 + $0x7a8] sm:$0xf]  ;;  %v7727_v37 = vor.u32 %v10475_v15, %v7726_v16  ;;  %v10407_v13 = vld [vmem:[#allocation5 + $0x494] sm:$0xf0]  ;;  %v5278_v3 = vadd.f32 %v5277_v63, %v11592_v50  ;;  %v5291_v8 = vpop.f32.mrf.mxu1 }
 0x1cd   :  { %5527 = vmatpush.bf16.msra.mxu2 %v7135_v42  ;;  %v7454_v25 = vld [vmem:[#allocation5 + $0x488] sm:$0xf]  ;;  %v7855_v62 = vor.u32 %v10507_v27, %v7854_v49  ;;  %v10435_v30 = vld [vmem:[#allocation5 + $0x574] sm:$0xf0] }
 0x1ce   :  { %5541 = vmatpush.bf16.msra.mxu3 %v7263_v57  ;;  %5500 = vmatmul.bf16.vlgmr.msra.gmra.mxu0 %v11410_v58  ;;  %v7582_v42 = vld [vmem:[#allocation5 + $0x588] sm:$0xf]  ;;  %v10439_v57 = vld [vmem:[#allocation5 + $0x594] sm:$0xf0]  ;;  %v7455_v12 = vor.u32 %v10407_v13, %v7454_v25 }
 0x1cf   :  { %5548 = vmatpush.bf16.msrb.mxu0 %v7503_v19  ;;  %5514 = vmatmul.bf16.vlgmr.msra.gmra.mxu1 %v11416_v10  ;;  %v7710_v19 = vld [vmem:[#allocation5 + $0x688] sm:$0xf]  ;;  %v10467_v15 = vld [vmem:[#allocation5 + $0x674] sm:$0xf0] }
 0x1d0   :  { %5562 = vmatpush.bf16.msrb.mxu1 %v7631_v23  ;;  %5528 = vmatmul.bf16.vlgmr.msra.gmra.mxu2 %v11412_v1  ;;  %v10471_v23 = vld [vmem:[#allocation5 + $0x694] sm:$0xf0]  ;;  %v7566_v29 = vld [vmem:[#allocation5 + $0x568] sm:$0xf] }
 0x1d1   :  { %5576 = vmatpush.bf16.msrb.mxu2 %v7759_v61  ;;  %5542 = vmatmul.bf16.vlgmr.msra.gmra.mxu3 %v11418_v17  ;;  %v11604_v61 = vpop.f32.mrf.mxu3  ;;  %v7694_v16 = vld [vmem:[#allocation5 + $0x668] sm:$0xf]  ;;  %v10499_v27 = vld [vmem:[#allocation5 + $0x774] sm:$0xf0]  ;;  %v7567_v50 = vor.u32 %v10435_v30, %v7566_v29 }
 0x1d2   :  { %5590 = vmatpush.bf16.msrb.mxu3 %v7887_v18  ;;  %11935 = vst [vmem:[#allocation47_spill] sm:$0xff] %v11604_v61  ;;  %v7838_v18 = vld [vmem:[#allocation5 + $0x788] sm:$0xf]  ;;  %v10399_v25 = vld [vmem:[#allocation5 + $0x454] sm:$0xf0] }
 0x1d3   :  { %5549 = vmatpush.bf16.msrb.mxu0 %v7487_v9  ;;  %v7583_v9 = vor.u32 %v10439_v57, %v7582_v42  ;;  %v7839_v11 = vor.u32 %v10503_v22, %v7838_v18  ;;  %v7822_v49 = vld [vmem:[#allocation5 + $0x768] sm:$0xf]  ;;  %v5305_v57 = vpop.f32.mrf.mxu2  ;;  %v10427_v30 = vld [vmem:[#allocation5 + $0x534] sm:$0xf0]  ;;  %v11609_v54 = vpop.f32.mrf.mxu0 }
 0x1d4   :  { %5563 = vmatpush.bf16.msrb.mxu1 %v7615_v20  ;;  %v7711_v20 = vor.u32 %v10471_v23, %v7710_v19  ;;  %v7550_v13 = vld [vmem:[#allocation5 + $0x548] sm:$0xf]  ;;  %v7823_v42 = vor.u32 %v10499_v27, %v7822_v49  ;;  %v10463_v23 = vld [vmem:[#allocation5 + $0x654] sm:$0xf0]  ;;  %11936 = vst [vmem:[#allocation48_spill] sm:$0xff] %v11609_v54 }
 0x1d5   :  { %5577 = vmatpush.bf16.msrb.mxu2 %v7743_v28  ;;  %v7438_v28 = vld [vmem:[#allocation5 + $0x468] sm:$0xf]  ;;  %v10491_v49 = vld [vmem:[#allocation5 + $0x734] sm:$0xf0] }
 0x1d6   :  { %5591 = vmatpush.bf16.msrb.mxu3 %v7871_v24  ;;  %v5292_v24 = vadd.f32 %v5291_v8, %v5278_v3  ;;  %v7678_v19 = vld [vmem:[#allocation5 + $0x648] sm:$0xf]  ;;  %v10495_v3 = vld [vmem:[#allocation5 + $0x754] sm:$0xf0] }
 0x1d7   :  { %5550 = vmatpush.bf16.msrb.mxu0 %v7471_v52  ;;  %v7439_v52 = vor.u32 %v10403_v0, %v7438_v28  ;;  %v7806_v22 = vld [vmem:[#allocation5 + $0x748] sm:$0xf]  ;;  %v10395_v0 = vld [vmem:[#allocation5 + $0x434] sm:$0xf0] }
 0x1d8   :  { %5564 = vmatpush.bf16.msrb.mxu1 %v7599_v14  ;;  %v7695_v14 = vor.u32 %v10467_v15, %v7694_v16  ;;  %v5306_v63 = vadd.f32 %v5305_v57, %v5292_v24  ;;  %v7406_v28 = vld [vmem:[#allocation5 + $0x428] sm:$0xf]  ;;  %v10459_v15 = vld [vmem:[#allocation5 + $0x634] sm:$0xf0] }
 0x1d9   :  { %5578 = vmatpush.bf16.msrb.mxu2 %v7727_v37  ;;  %v7422_v37 = vld [vmem:[#allocation5 + $0x448] sm:$0xf]  ;;  %v5319_v18 = vpop.f32.mrf.mxu3  ;;  %v7407_v27 = vor.u32 %v10395_v0, %v7406_v28  ;;  %v10611_v0 = vld [vmem:[#allocation5 + $0xaf4] sm:$0xf0] }
 0x1da   :  { %5592 = vmatpush.bf16.msrb.mxu3 %v7855_v62  ;;  %v10431_v62 = vld [vmem:[#allocation5 + $0x554] sm:$0xf0]  ;;  %v11607_v8 = vadd.f32 %v5319_v18, %v5306_v63  ;;  %v7534_v29 = vld [vmem:[#allocation5 + $0x528] sm:$0xf] }
 0x1db   :  { %5551 = vmatpush.bf16.msrb.mxu0 %v7455_v12  ;;  %v7423_v12 = vor.u32 %v10399_v25, %v7422_v37  ;;  %v7662_v16 = vld [vmem:[#allocation5 + $0x628] sm:$0xf]  ;;  %v10391_v37 = vld [vmem:[#allocation5 + $0x414] sm:$0xf0] }
 0x1dc   :  { %5565 = vmatpush.bf16.msrb.mxu1 %v7583_v9  ;;  %v7551_v9 = vor.u32 %v10431_v62, %v7550_v13  ;;  %v7790_v24 = vld [vmem:[#allocation5 + $0x728] sm:$0xf]  ;;  %v10423_v13 = vld [vmem:[#allocation5 + $0x514] sm:$0xf0] }
 0x1dd   :  { %5579 = vmatpush.bf16.msrb.mxu2 %v7711_v20  ;;  %v7679_v20 = vor.u32 %v10463_v23, %v7678_v19  ;;  %v7518_v25 = vld [vmem:[#allocation5 + $0x508] sm:$0xf]  ;;  %v7791_v62 = vor.u32 %v10491_v49, %v7790_v24  ;;  %v10487_v23 = vld [vmem:[#allocation5 + $0x714] sm:$0xf0] }
 0x1de   :  { %5593 = vmatpush.bf16.msrb.mxu3 %v7839_v11  ;;  %v7807_v11 = vor.u32 %v10495_v3, %v7806_v22  ;;  %v7646_v57 = vld [vmem:[#allocation5 + $0x608] sm:$0xf]  ;;  %v10547_v18 = vld [vmem:[#allocation5 + $0x8f4] sm:$0xf0] }
 0x1df   :  { %5552 = vmatpush.bf16.msrb.mxu0 %v7439_v52  ;;  %v7390_v52 = vld [vmem:[#allocation5 + $0x408] sm:$0xf]  ;;  %v10543_v61 = vld [vmem:[#allocation5 + $0x8d4] sm:$0xf0] }
 0x1e0   :  { %5566 = vmatpush.bf16.msrb.mxu1 %v7567_v50  ;;  %v7535_v50 = vor.u32 %v10427_v30, %v7534_v29  ;;  %v7774_v19 = vld [vmem:[#allocation5 + $0x708] sm:$0xf]  ;;  %v7391_v3 = vor.u32 %v10391_v37, %v7390_v52  ;;  %v10643_v30 = vld [vmem:[#allocation5 + $0xbf4] sm:$0xf0] }
 0x1e1   :  { %5580 = vmatpush.bf16.msrb.mxu2 %v7695_v14  ;;  %v7663_v14 = vor.u32 %v10459_v15, %v7662_v16  ;;  %v8014_v63 = vld [vmem:[#allocation5 + $0x8e8] sm:$0xf]  ;;  %v10575_v52 = vld [vmem:[#allocation5 + $0x9d4] sm:$0xf0] }
 0x1e2   :  { %5594 = vmatpush.bf16.msrb.mxu3 %v7823_v42  ;;  %v10455_v42 = vld [vmem:[#allocation5 + $0x614] sm:$0xf0]  ;;  %v8142_v22 = vld [vmem:[#allocation5 + $0x9e8] sm:$0xf]  ;;  %v8015_v16 = vor.u32 %v10547_v18, %v8014_v63 }
 0x1e3   :  { %5553 = vmatpush.bf16.msrb.mxu0 %v7423_v12  ;;  %v10579_v12 = vld [vmem:[#allocation5 + $0x9f4] sm:$0xf0]  ;;  %v8270_v28 = vld [vmem:[#allocation5 + $0xae8] sm:$0xf] }
 0x1e4   :  { %5567 = vmatpush.bf16.msrb.mxu1 %v7551_v9  ;;  %v7519_v9 = vor.u32 %v10423_v13, %v7518_v25  ;;  %v8398_v29 = vld [vmem:[#allocation5 + $0xbe8] sm:$0xf]  ;;  %v8143_v15 = vor.u32 %v10579_v12, %v8142_v22  ;;  %v8271_v24 = vor.u32 %v10611_v0, %v8270_v28  ;;  %v10607_v7 = vld [vmem:[#allocation5 + $0xad4] sm:$0xf0]  ;;  %v11611_v25 = vpop.f32.mrf.mxu1 }
 0x1e5   :  { %5581 = vmatpush.bf16.msrb.mxu2 %v7679_v20  ;;  %v7647_v20 = vor.u32 %v10455_v42, %v7646_v57  ;;  %v7998_v49 = vld [vmem:[#allocation5 + $0x8c8] sm:$0xf]  ;;  %11937 = vst [vmem:[#allocation49_spill] sm:$0xff] %v11611_v25  ;;  %v10571_v18 = vld [vmem:[#allocation5 + $0x9b4] sm:$0xf0] }
 0x1e6   :  { %5595 = vmatpush.bf16.msrb.mxu3 %v7807_v11  ;;  %v7775_v11 = vor.u32 %v10487_v23, %v7774_v19  ;;  %v8126_v53 = vld [vmem:[#allocation5 + $0x9c8] sm:$0xf]  ;;  %v7999_v13 = vor.u32 %v10543_v61, %v7998_v49  ;;  %v10539_v19 = vld [vmem:[#allocation5 + $0x8b4] sm:$0xf0] }
 0x1e7   :  { %5554 = vmatpush.bf16.msrb.mxu0 %v7407_v27  ;;  %v8399_v27 = vor.u32 %v10643_v30, %v8398_v29  ;;  %v8254_v37 = vld [vmem:[#allocation5 + $0xac8] sm:$0xf]  ;;  %v8127_v57 = vor.u32 %v10575_v52, %v8126_v53  ;;  %v10635_v61 = vld [vmem:[#allocation5 + $0xbb4] sm:$0xf0]  ;;  %v11617_v29 = vpop.f32.mrf.mxu2 }
 0x1e8   :  { %5568 = vmatpush.bf16.msrb.mxu1 %v7535_v50  ;;  %v8382_v50 = vld [vmem:[#allocation5 + $0xbc8] sm:$0xf]  ;;  %11938 = vst [vmem:[#allocation50_spill] sm:$0xff] %v11617_v29  ;;  %v10631_v52 = vld [vmem:[#allocation5 + $0xb94] sm:$0xf0] }
 0x1e9   :  { %5582 = vmatpush.bf16.msrb.mxu2 %v7663_v14  ;;  %v10639_v14 = vld [vmem:[#allocation5 + $0xbd4] sm:$0xf0]  ;;  %v7982_v42 = vld [vmem:[#allocation5 + $0x8a8] sm:$0xf] }
 0x1ea   :  { %5596 = vmatpush.bf16.msrb.mxu3 %v7791_v62  ;;  %v8255_v62 = vor.u32 %v10607_v7, %v8254_v37  ;;  %v8110_v23 = vld [vmem:[#allocation5 + $0x9a8] sm:$0xf]  ;;  %v8383_v63 = vor.u32 %v10639_v14, %v8382_v50  ;;  %v7983_v7 = vor.u32 %v10539_v19, %v7982_v42  ;;  %v10531_v42 = vld [vmem:[#allocation5 + $0x874] sm:$0xf0] }
 0x1eb   :  { %5555 = vmatpush.bf16.msrb.mxu0 %v7391_v3  ;;  %v8238_v22 = vld [vmem:[#allocation5 + $0xaa8] sm:$0xf]  ;;  %v10603_v3 = vld [vmem:[#allocation5 + $0xab4] sm:$0xf0]  ;;  %v8111_v53 = vor.u32 %v10571_v18, %v8110_v23  ;;  %v5333_v49 = vpop.f32.mrf.mxu0 }
 0x1ec   :  { %5569 = vmatpush.bf16.msrb.mxu1 %v7519_v9  ;;  %v8366_v12 = vld [vmem:[#allocation5 + $0xba8] sm:$0xf]  ;;  %v8239_v28 = vor.u32 %v10603_v3, %v8238_v22  ;;  %v10535_v9 = vld [vmem:[#allocation5 + $0x894] sm:$0xf0]  ;;  %v5334_v37 = vadd.f32 %v5333_v49, %v11607_v8  ;;  %v5347_v14 = vpop.f32.mrf.mxu1 }
 0x1ed   :  { %5583 = vmatpush.bf16.msrb.mxu2 %v7647_v20  ;;  %v7966_v0 = vld [vmem:[#allocation5 + $0x888] sm:$0xf]  ;;  %v8367_v30 = vor.u32 %v10635_v61, %v8366_v12  ;;  %v10563_v18 = vld [vmem:[#allocation5 + $0x974] sm:$0xf0] }
 0x1ee   :  { %5597 = vmatpush.bf16.msrb.mxu3 %v7775_v11  ;;  %5556 = vmatmul.bf16.vlgmr.msrb.gmra.mxu0 %v11422_v39  ;;  %v8094_v20 = vld [vmem:[#allocation5 + $0x988] sm:$0xf]  ;;  %v10567_v11 = vld [vmem:[#allocation5 + $0x994] sm:$0xf0]  ;;  %v7967_v50 = vor.u32 %v10535_v9, %v7966_v0 }
 0x1ef   :  { %5604 = vmatpush.bf16.msra.mxu0 %v8015_v16  ;;  %5570 = vmatmul.bf16.vlgmr.msrb.gmra.mxu1 %v11426_v44  ;;  %v8222_v16 = vld [vmem:[#allocation5 + $0xa88] sm:$0xf]  ;;  %v10595_v3 = vld [vmem:[#allocation5 + $0xa74] sm:$0xf0] }
 0x1f0   :  { %5618 = vmatpush.bf16.msra.mxu1 %v8143_v15  ;;  %5584 = vmatmul.bf16.vlgmr.msrb.gmra.mxu2 %v11424_v43  ;;  %v10599_v15 = vld [vmem:[#allocation5 + $0xa94] sm:$0xf0]  ;;  %v8078_v19 = vld [vmem:[#allocation5 + $0x968] sm:$0xf] }
 0x1f1   :  { %5632 = vmatpush.bf16.msra.mxu2 %v8271_v24  ;;  %5598 = vmatmul.bf16.vlgmr.msrb.gmra.mxu3 %v11428_v47  ;;  %v11619_v24 = vpop.f32.mrf.mxu3  ;;  %v8206_v22 = vld [vmem:[#allocation5 + $0xa68] sm:$0xf]  ;;  %v10627_v61 = vld [vmem:[#allocation5 + $0xb74] sm:$0xf0]  ;;  %v8079_v8 = vor.u32 %v10563_v18, %v8078_v19 }
 0x1f2   :  { %5646 = vmatpush.bf16.msra.mxu3 %v8399_v27  ;;  %11939 = vst [vmem:[#allocation51_spill] sm:$0xff] %v11619_v24  ;;  %v8350_v27 = vld [vmem:[#allocation5 + $0xb88] sm:$0xf]  ;;  %v10527_v0 = vld [vmem:[#allocation5 + $0x854] sm:$0xf0] }
 0x1f3   :  { %5605 = vmatpush.bf16.msra.mxu0 %v7999_v13  ;;  %v8095_v13 = vor.u32 %v10567_v11, %v8094_v20  ;;  %v8351_v23 = vor.u32 %v10631_v52, %v8350_v27  ;;  %v8334_v12 = vld [vmem:[#allocation5 + $0xb68] sm:$0xf]  ;;  %v5361_v11 = vpop.f32.mrf.mxu2  ;;  %v10555_v18 = vld [vmem:[#allocation5 + $0x934] sm:$0xf0]  ;;  %v11624_v54 = vpop.f32.mrf.mxu0 }
 0x1f4   :  { %5619 = vmatpush.bf16.msra.mxu1 %v8127_v57  ;;  %v8223_v57 = vor.u32 %v10599_v15, %v8222_v16  ;;  %v8062_v9 = vld [vmem:[#allocation5 + $0x948] sm:$0xf]  ;;  %v8335_v20 = vor.u32 %v10627_v61, %v8334_v12  ;;  %v10591_v15 = vld [vmem:[#allocation5 + $0xa54] sm:$0xf0]  ;;  %11940 = vst [vmem:[#allocation52_spill] sm:$0xff] %v11624_v54 }
 0x1f5   :  { %5633 = vmatpush.bf16.msra.mxu2 %v8255_v62  ;;  %v7950_v62 = vld [vmem:[#allocation5 + $0x868] sm:$0xf]  ;;  %v10619_v12 = vld [vmem:[#allocation5 + $0xb34] sm:$0xf0] }
 0x1f6   :  { %5647 = vmatpush.bf16.msra.mxu3 %v8383_v63  ;;  %v5348_v63 = vadd.f32 %v5347_v14, %v5334_v37  ;;  %v8190_v16 = vld [vmem:[#allocation5 + $0xa48] sm:$0xf]  ;;  %v10623_v37 = vld [vmem:[#allocation5 + $0xb54] sm:$0xf0] }
 0x1f7   :  { %5606 = vmatpush.bf16.msra.mxu0 %v7983_v7  ;;  %v7951_v7 = vor.u32 %v10531_v42, %v7950_v62  ;;  %v8318_v52 = vld [vmem:[#allocation5 + $0xb48] sm:$0xf]  ;;  %v10523_v42 = vld [vmem:[#allocation5 + $0x834] sm:$0xf0] }
 0x1f8   :  { %5620 = vmatpush.bf16.msra.mxu1 %v8111_v53  ;;  %v8207_v53 = vor.u32 %v10595_v3, %v8206_v22  ;;  %v5362_v49 = vadd.f32 %v5361_v11, %v5348_v63  ;;  %v7918_v62 = vld [vmem:[#allocation5 + $0x828] sm:$0xf]  ;;  %v10587_v3 = vld [vmem:[#allocation5 + $0xa34] sm:$0xf0] }
 0x1f9   :  { %5634 = vmatpush.bf16.msra.mxu2 %v8239_v28  ;;  %v7934_v28 = vld [vmem:[#allocation5 + $0x848] sm:$0xf]  ;;  %v5375_v27 = vpop.f32.mrf.mxu3  ;;  %v7919_v61 = vor.u32 %v10523_v42, %v7918_v62  ;;  %v10739_v42 = vld [vmem:[#allocation5 + $0xef4] sm:$0xf0] }
 0x1fa   :  { %5648 = vmatpush.bf16.msra.mxu3 %v8367_v30  ;;  %v10559_v30 = vld [vmem:[#allocation5 + $0x954] sm:$0xf0]  ;;  %v11622_v14 = vadd.f32 %v5375_v27, %v5362_v49  ;;  %v8046_v19 = vld [vmem:[#allocation5 + $0x928] sm:$0xf] }
 0x1fb   :  { %5607 = vmatpush.bf16.msra.mxu0 %v7967_v50  ;;  %v7935_v50 = vor.u32 %v10527_v0, %v7934_v28  ;;  %v8174_v22 = vld [vmem:[#allocation5 + $0xa28] sm:$0xf]  ;;  %v10519_v28 = vld [vmem:[#allocation5 + $0x814] sm:$0xf0] }
 0x1fc   :  { %5621 = vmatpush.bf16.msra.mxu1 %v8095_v13  ;;  %v8063_v13 = vor.u32 %v10559_v30, %v8062_v9  ;;  %v8302_v63 = vld [vmem:[#allocation5 + $0xb28] sm:$0xf]  ;;  %v10551_v9 = vld [vmem:[#allocation5 + $0x914] sm:$0xf0] }
 0x1fd   :  { %5635 = vmatpush.bf16.msra.mxu2 %v8223_v57  ;;  %v8191_v57 = vor.u32 %v10591_v15, %v8190_v16  ;;  %v8030_v0 = vld [vmem:[#allocation5 + $0x908] sm:$0xf]  ;;  %v8303_v30 = vor.u32 %v10619_v12, %v8302_v63  ;;  %v10615_v15 = vld [vmem:[#allocation5 + $0xb14] sm:$0xf0] }
 0x1fe   :  { %5649 = vmatpush.bf16.msra.mxu3 %v8351_v23  ;;  %v8319_v23 = vor.u32 %v10623_v37, %v8318_v52  ;;  %v8158_v11 = vld [vmem:[#allocation5 + $0xa08] sm:$0xf]  ;;  %v10675_v27 = vld [vmem:[#allocation5 + $0xcf4] sm:$0xf0] }
 0x1ff   :  { %5608 = vmatpush.bf16.msra.mxu0 %v7951_v7  ;;  %v7902_v7 = vld [vmem:[#allocation5 + $0x808] sm:$0xf]  ;;  %v10671_v24 = vld [vmem:[#allocation5 + $0xcd4] sm:$0xf0] }
 0x200   :  { %5622 = vmatpush.bf16.msra.mxu1 %v8079_v8  ;;  %v8047_v8 = vor.u32 %v10555_v18, %v8046_v19  ;;  %v8286_v16 = vld [vmem:[#allocation5 + $0xb08] sm:$0xf]  ;;  %v7903_v37 = vor.u32 %v10519_v28, %v7902_v7  ;;  %v10771_v18 = vld [vmem:[#allocation5 + $0xff4] sm:$0xf0] }
 0x201   :  { %5636 = vmatpush.bf16.msra.mxu2 %v8207_v53  ;;  %v8175_v53 = vor.u32 %v10587_v3, %v8174_v22  ;;  %v8526_v49 = vld [vmem:[#allocation5 + $0xce8] sm:$0xf]  ;;  %v10703_v7 = vld [vmem:[#allocation5 + $0xdd4] sm:$0xf0] }
 0x202   :  { %5650 = vmatpush.bf16.msra.mxu3 %v8335_v20  ;;  %v10583_v20 = vld [vmem:[#allocation5 + $0xa14] sm:$0xf0]  ;;  %v8654_v52 = vld [vmem:[#allocation5 + $0xde8] sm:$0xf]  ;;  %v8527_v22 = vor.u32 %v10675_v27, %v8526_v49 }
 0x203   :  { %5609 = vmatpush.bf16.msra.mxu0 %v7935_v50  ;;  %v10707_v50 = vld [vmem:[#allocation5 + $0xdf4] sm:$0xf0]  ;;  %v8782_v62 = vld [vmem:[#allocation5 + $0xee8] sm:$0xf] }
 0x204   :  { %5623 = vmatpush.bf16.msra.mxu1 %v8063_v13  ;;  %v8031_v13 = vor.u32 %v10551_v9, %v8030_v0  ;;  %v8910_v19 = vld [vmem:[#allocation5 + $0xfe8] sm:$0xf]  ;;  %v8655_v3 = vor.u32 %v10707_v50, %v8654_v52  ;;  %v8783_v63 = vor.u32 %v10739_v42, %v8782_v62  ;;  %v10735_v25 = vld [vmem:[#allocation5 + $0xed4] sm:$0xf0]  ;;  %v11626_v0 = vpop.f32.mrf.mxu1 }
 0x205   :  { %5637 = vmatpush.bf16.msra.mxu2 %v8191_v57  ;;  %v8159_v57 = vor.u32 %v10583_v20, %v8158_v11  ;;  %v8510_v12 = vld [vmem:[#allocation5 + $0xcc8] sm:$0xf]  ;;  %11941 = vst [vmem:[#allocation53_spill] sm:$0xff] %v11626_v0  ;;  %v10699_v27 = vld [vmem:[#allocation5 + $0xdb4] sm:$0xf0] }
 0x206   :  { %5651 = vmatpush.bf16.msra.mxu3 %v8319_v23  ;;  %v8287_v23 = vor.u32 %v10615_v15, %v8286_v16  ;;  %v8638_v29 = vld [vmem:[#allocation5 + $0xdc8] sm:$0xf]  ;;  %v8511_v9 = vor.u32 %v10671_v24, %v8510_v12  ;;  %v10667_v16 = vld [vmem:[#allocation5 + $0xcb4] sm:$0xf0] }
 0x207   :  { %5610 = vmatpush.bf16.msra.mxu0 %v7919_v61  ;;  %v8911_v61 = vor.u32 %v10771_v18, %v8910_v19  ;;  %v8766_v28 = vld [vmem:[#allocation5 + $0xec8] sm:$0xf]  ;;  %v8639_v11 = vor.u32 %v10703_v7, %v8638_v29  ;;  %v10763_v24 = vld [vmem:[#allocation5 + $0xfb4] sm:$0xf0]  ;;  %v11632_v19 = vpop.f32.mrf.mxu2 }
 0x208   :  { %5624 = vmatpush.bf16.msra.mxu1 %v8047_v8  ;;  %v8894_v8 = vld [vmem:[#allocation5 + $0xfc8] sm:$0xf]  ;;  %11942 = vst [vmem:[#allocation54_spill] sm:$0xff] %v11632_v19  ;;  %v10759_v7 = vld [vmem:[#allocation5 + $0xf94] sm:$0xf0] }
 0x209   :  { %5638 = vmatpush.bf16.msra.mxu2 %v8175_v53  ;;  %v10767_v53 = vld [vmem:[#allocation5 + $0xfd4] sm:$0xf0]  ;;  %v8494_v20 = vld [vmem:[#allocation5 + $0xca8] sm:$0xf] }
 0x20a   :  { %5652 = vmatpush.bf16.msra.mxu3 %v8303_v30  ;;  %v8767_v30 = vor.u32 %v10735_v25, %v8766_v28  ;;  %v8622_v15 = vld [vmem:[#allocation5 + $0xda8] sm:$0xf]  ;;  %v8895_v49 = vor.u32 %v10767_v53, %v8894_v8  ;;  %v8495_v25 = vor.u32 %v10667_v16, %v8494_v20  ;;  %v10659_v20 = vld [vmem:[#allocation5 + $0xc74] sm:$0xf0] }
 0x20b   :  { %5611 = vmatpush.bf16.msra.mxu0 %v7903_v37  ;;  %v8750_v52 = vld [vmem:[#allocation5 + $0xea8] sm:$0xf]  ;;  %v10731_v37 = vld [vmem:[#allocation5 + $0xeb4] sm:$0xf0]  ;;  %v8623_v29 = vor.u32 %v10699_v27, %v8622_v15  ;;  %v5389_v12 = vpop.f32.mrf.mxu0 }
 0x20c   :  { %5625 = vmatpush.bf16.msra.mxu1 %v8031_v13  ;;  %v8878_v50 = vld [vmem:[#allocation5 + $0xfa8] sm:$0xf]  ;;  %v8751_v62 = vor.u32 %v10731_v37, %v8750_v52  ;;  %v10663_v13 = vld [vmem:[#allocation5 + $0xc94] sm:$0xf0]  ;;  %v5390_v28 = vadd.f32 %v5389_v12, %v11622_v14  ;;  %v5403_v53 = vpop.f32.mrf.mxu1 }
 0x20d   :  { %5639 = vmatpush.bf16.msra.mxu2 %v8159_v57  ;;  %v8478_v42 = vld [vmem:[#allocation5 + $0xc88] sm:$0xf]  ;;  %v8879_v18 = vor.u32 %v10763_v24, %v8878_v50  ;;  %v10691_v27 = vld [vmem:[#allocation5 + $0xd74] sm:$0xf0] }
 0x20e   :  { %5653 = vmatpush.bf16.msra.mxu3 %v8287_v23  ;;  %5612 = vmatmul.bf16.vlgmr.msra.gmra.mxu0 %v11434_v31  ;;  %v8606_v57 = vld [vmem:[#allocation5 + $0xd88] sm:$0xf]  ;;  %v10695_v23 = vld [vmem:[#allocation5 + $0xd94] sm:$0xf0]  ;;  %v8479_v8 = vor.u32 %v10663_v13, %v8478_v42 }
 0x20f   :  { %5660 = vmatpush.bf16.msrb.mxu0 %v8527_v22  ;;  %5626 = vmatmul.bf16.vlgmr.msra.gmra.mxu1 %v11438_v36  ;;  %v8734_v22 = vld [vmem:[#allocation5 + $0xe88] sm:$0xf]  ;;  %v10723_v37 = vld [vmem:[#allocation5 + $0xe74] sm:$0xf0] }
 0x210   :  { %5674 = vmatpush.bf16.msrb.mxu1 %v8655_v3  ;;  %5640 = vmatmul.bf16.vlgmr.msra.gmra.mxu2 %v11436_v35  ;;  %v10727_v3 = vld [vmem:[#allocation5 + $0xe94] sm:$0xf0]  ;;  %v8590_v16 = vld [vmem:[#allocation5 + $0xd68] sm:$0xf] }
 0x211   :  { %5688 = vmatpush.bf16.msrb.mxu2 %v8783_v63  ;;  %5654 = vmatmul.bf16.vlgmr.msra.gmra.mxu3 %v11440_v40  ;;  %v11634_v63 = vpop.f32.mrf.mxu3  ;;  %v8718_v52 = vld [vmem:[#allocation5 + $0xe68] sm:$0xf]  ;;  %v10755_v24 = vld [vmem:[#allocation5 + $0xf74] sm:$0xf0]  ;;  %v8591_v14 = vor.u32 %v10691_v27, %v8590_v16 }
 0x212   :  { %5702 = vmatpush.bf16.msrb.mxu3 %v8911_v61  ;;  %11943 = vst [vmem:[#allocation55_spill] sm:$0xff] %v11634_v63  ;;  %v8862_v61 = vld [vmem:[#allocation5 + $0xf88] sm:$0xf]  ;;  %v10655_v42 = vld [vmem:[#allocation5 + $0xc54] sm:$0xf0] }
 0x213   :  { %5661 = vmatpush.bf16.msrb.mxu0 %v8511_v9  ;;  %v8607_v9 = vor.u32 %v10695_v23, %v8606_v57  ;;  %v8863_v15 = vor.u32 %v10759_v7, %v8862_v61  ;;  %v8846_v50 = vld [vmem:[#allocation5 + $0xf68] sm:$0xf]  ;;  %v5417_v23 = vpop.f32.mrf.mxu2  ;;  %v10683_v27 = vld [vmem:[#allocation5 + $0xd34] sm:$0xf0]  ;;  %v11639_v54 = vpop.f32.mrf.mxu0 }
 0x214   :  { %5675 = vmatpush.bf16.msrb.mxu1 %v8639_v11  ;;  %v8735_v11 = vor.u32 %v10727_v3, %v8734_v22  ;;  %v8574_v13 = vld [vmem:[#allocation5 + $0xd48] sm:$0xf]  ;;  %v8847_v57 = vor.u32 %v10755_v24, %v8846_v50  ;;  %v10719_v3 = vld [vmem:[#allocation5 + $0xe54] sm:$0xf0] }
 0x215   :  { %5689 = vmatpush.bf16.msrb.mxu2 %v8767_v30  ;;  %v8462_v30 = vld [vmem:[#allocation5 + $0xc68] sm:$0xf]  ;;  %v10747_v50 = vld [vmem:[#allocation5 + $0xf34] sm:$0xf0] }
 0x216   :  { %5703 = vmatpush.bf16.msrb.mxu3 %v8895_v49  ;;  %v5404_v49 = vadd.f32 %v5403_v53, %v5390_v28  ;;  %v8702_v22 = vld [vmem:[#allocation5 + $0xe48] sm:$0xf]  ;;  %v10751_v28 = vld [vmem:[#allocation5 + $0xf54] sm:$0xf0] }
 0x217   :  { %5662 = vmatpush.bf16.msrb.mxu0 %v8495_v25  ;;  %v8463_v25 = vor.u32 %v10659_v20, %v8462_v30  ;;  %v8830_v7 = vld [vmem:[#allocation5 + $0xf48] sm:$0xf]  ;;  %v10651_v20 = vld [vmem:[#allocation5 + $0xc34] sm:$0xf0] }
 0x218   :  { %5676 = vmatpush.bf16.msrb.mxu1 %v8623_v29  ;;  %v8719_v29 = vor.u32 %v10723_v37, %v8718_v52  ;;  %v5418_v12 = vadd.f32 %v5417_v23, %v5404_v49  ;;  %v8430_v30 = vld [vmem:[#allocation5 + $0xc28] sm:$0xf]  ;;  %v10715_v37 = vld [vmem:[#allocation5 + $0xe34] sm:$0xf0] }
 0x219   :  { %5690 = vmatpush.bf16.msrb.mxu2 %v8751_v62  ;;  %v8446_v62 = vld [vmem:[#allocation5 + $0xc48] sm:$0xf]  ;;  %v5431_v61 = vpop.f32.mrf.mxu3  ;;  %v8431_v24 = vor.u32 %v10651_v20, %v8430_v30  ;;  %v10867_v20 = vld [vmem:[#allocation5 + $0x12f4] sm:$0xf0] }
 0x21a   :  { %5704 = vmatpush.bf16.msrb.mxu3 %v8879_v18  ;;  %v10687_v18 = vld [vmem:[#allocation5 + $0xd54] sm:$0xf0]  ;;  %v11637_v53 = vadd.f32 %v5431_v61, %v5418_v12  ;;  %v8558_v16 = vld [vmem:[#allocation5 + $0xd28] sm:$0xf] }
 0x21b   :  { %5663 = vmatpush.bf16.msrb.mxu0 %v8479_v8  ;;  %v8447_v8 = vor.u32 %v10655_v42, %v8446_v62  ;;  %v8686_v52 = vld [vmem:[#allocation5 + $0xe28] sm:$0xf]  ;;  %v10647_v62 = vld [vmem:[#allocation5 + $0xc14] sm:$0xf0] }
 0x21c   :  { %5677 = vmatpush.bf16.msrb.mxu1 %v8607_v9  ;;  %v8575_v9 = vor.u32 %v10687_v18, %v8574_v13  ;;  %v8814_v49 = vld [vmem:[#allocation5 + $0xf28] sm:$0xf]  ;;  %v10679_v13 = vld [vmem:[#allocation5 + $0xd14] sm:$0xf0] }
 0x21d   :  { %5691 = vmatpush.bf16.msrb.mxu2 %v8735_v11  ;;  %v8703_v11 = vor.u32 %v10719_v3, %v8702_v22  ;;  %v8542_v42 = vld [vmem:[#allocation5 + $0xd08] sm:$0xf]  ;;  %v8815_v18 = vor.u32 %v10747_v50, %v8814_v49  ;;  %v10743_v3 = vld [vmem:[#allocation5 + $0xf14] sm:$0xf0] }
 0x21e   :  { %5705 = vmatpush.bf16.msrb.mxu3 %v8863_v15  ;;  %v8831_v15 = vor.u32 %v10751_v28, %v8830_v7  ;;  %v8670_v23 = vld [vmem:[#allocation5 + $0xe08] sm:$0xf]  ;;  %v10803_v61 = vld [vmem:[#allocation5 + $0x10f4] sm:$0xf0] }
 0x21f   :  { %5664 = vmatpush.bf16.msrb.mxu0 %v8463_v25  ;;  %v8414_v25 = vld [vmem:[#allocation5 + $0xc08] sm:$0xf]  ;;  %v10799_v63 = vld [vmem:[#allocation5 + $0x10d4] sm:$0xf0] }
 0x220   :  { %5678 = vmatpush.bf16.msrb.mxu1 %v8591_v14  ;;  %v8559_v14 = vor.u32 %v10683_v27, %v8558_v16  ;;  %v8798_v22 = vld [vmem:[#allocation5 + $0xf08] sm:$0xf]  ;;  %v8415_v28 = vor.u32 %v10647_v62, %v8414_v25  ;;  %v10899_v27 = vld [vmem:[#allocation5 + $0x13f4] sm:$0xf0] }
 0x221   :  { %5692 = vmatpush.bf16.msrb.mxu2 %v8719_v29  ;;  %v8687_v29 = vor.u32 %v10715_v37, %v8686_v52  ;;  %v9038_v12 = vld [vmem:[#allocation5 + $0x10e8] sm:$0xf]  ;;  %v10831_v25 = vld [vmem:[#allocation5 + $0x11d4] sm:$0xf0] }
 0x222   :  { %5706 = vmatpush.bf16.msrb.mxu3 %v8847_v57  ;;  %v10711_v57 = vld [vmem:[#allocation5 + $0xe14] sm:$0xf0]  ;;  %v9166_v7 = vld [vmem:[#allocation5 + $0x11e8] sm:$0xf]  ;;  %v9039_v52 = vor.u32 %v10803_v61, %v9038_v12 }
 0x223   :  { %5665 = vmatpush.bf16.msrb.mxu0 %v8447_v8  ;;  %v10835_v8 = vld [vmem:[#allocation5 + $0x11f4] sm:$0xf0]  ;;  %v9294_v30 = vld [vmem:[#allocation5 + $0x12e8] sm:$0xf] }
 0x224   :  { %5679 = vmatpush.bf16.msrb.mxu1 %v8575_v9  ;;  %v8543_v9 = vor.u32 %v10679_v13, %v8542_v42  ;;  %v9422_v16 = vld [vmem:[#allocation5 + $0x13e8] sm:$0xf]  ;;  %v9167_v37 = vor.u32 %v10835_v8, %v9166_v7  ;;  %v9295_v49 = vor.u32 %v10867_v20, %v9294_v30  ;;  %v10863_v0 = vld [vmem:[#allocation5 + $0x12d4] sm:$0xf0]  ;;  %v11641_v42 = vpop.f32.mrf.mxu1 }
 0x225   :  { %5693 = vmatpush.bf16.msrb.mxu2 %v8703_v11  ;;  %v8671_v11 = vor.u32 %v10711_v57, %v8670_v23  ;;  %v9022_v50 = vld [vmem:[#allocation5 + $0x10c8] sm:$0xf]  ;;  %v10827_v61 = vld [vmem:[#allocation5 + $0x11b4] sm:$0xf0] }
 0x226   :  { %5707 = vmatpush.bf16.msrb.mxu3 %v8831_v15  ;;  %v8799_v15 = vor.u32 %v10743_v3, %v8798_v22  ;;  %v9150_v19 = vld [vmem:[#allocation5 + $0x11c8] sm:$0xf]  ;;  %v9023_v13 = vor.u32 %v10799_v63, %v9022_v50  ;;  %v10795_v22 = vld [vmem:[#allocation5 + $0x10b4] sm:$0xf0] }
 0x227   :  { %5666 = vmatpush.bf16.msrb.mxu0 %v8431_v24  ;;  %v9423_v24 = vor.u32 %v10899_v27, %v9422_v16  ;;  %v9278_v62 = vld [vmem:[#allocation5 + $0x12c8] sm:$0xf]  ;;  %v9151_v23 = vor.u32 %v10831_v25, %v9150_v19  ;;  %v10891_v63 = vld [vmem:[#allocation5 + $0x13b4] sm:$0xf0]  ;;  %v11647_v16 = vpop.f32.mrf.mxu2 }
 0x228   :  { %5680 = vmatpush.bf16.msrb.mxu1 %v8559_v14  ;;  %v9406_v14 = vld [vmem:[#allocation5 + $0x13c8] sm:$0xf]  ;;  %11944 = vst [vmem:[#allocation56_spill] sm:$0xff] %v11647_v16  ;;  %v10887_v25 = vld [vmem:[#allocation5 + $0x1394] sm:$0xf0] }
 0x229   :  { %5694 = vmatpush.bf16.msrb.mxu2 %v8687_v29  ;;  %v10895_v29 = vld [vmem:[#allocation5 + $0x13d4] sm:$0xf0]  ;;  %v9006_v57 = vld [vmem:[#allocation5 + $0x10a8] sm:$0xf] }
 0x22a   :  { %5708 = vmatpush.bf16.msrb.mxu3 %v8815_v18  ;;  %v9279_v18 = vor.u32 %v10863_v0, %v9278_v62  ;;  %v9134_v3 = vld [vmem:[#allocation5 + $0x11a8] sm:$0xf]  ;;  %v9407_v12 = vor.u32 %v10895_v29, %v9406_v14  ;;  %v9007_v0 = vor.u32 %v10795_v22, %v9006_v57  ;;  %v10787_v57 = vld [vmem:[#allocation5 + $0x1074] sm:$0xf0] }
 0x22b   :  { %5667 = vmatpush.bf16.msrb.mxu0 %v8415_v28  ;;  %v9262_v7 = vld [vmem:[#allocation5 + $0x12a8] sm:$0xf]  ;;  %v10859_v28 = vld [vmem:[#allocation5 + $0x12b4] sm:$0xf0]  ;;  %v9135_v19 = vor.u32 %v10827_v61, %v9134_v3  ;;  %v5445_v50 = vpop.f32.mrf.mxu0 }
 0x22c   :  { %5681 = vmatpush.bf16.msrb.mxu1 %v8543_v9  ;;  %v9390_v8 = vld [vmem:[#allocation5 + $0x13a8] sm:$0xf]  ;;  %v9263_v30 = vor.u32 %v10859_v28, %v9262_v7  ;;  %v10791_v9 = vld [vmem:[#allocation5 + $0x1094] sm:$0xf0]  ;;  %v5446_v62 = vadd.f32 %v5445_v50, %v11637_v53  ;;  %v5459_v29 = vpop.f32.mrf.mxu1 }
 0x22d   :  { %5695 = vmatpush.bf16.msrb.mxu2 %v8671_v11  ;;  %v8990_v20 = vld [vmem:[#allocation5 + $0x1088] sm:$0xf]  ;;  %v9391_v27 = vor.u32 %v10891_v63, %v9390_v8  ;;  %v10819_v61 = vld [vmem:[#allocation5 + $0x1174] sm:$0xf0] }
 0x22e   :  { %5709 = vmatpush.bf16.msrb.mxu3 %v8799_v15  ;;  %5668 = vmatmul.bf16.vlgmr.msrb.gmra.mxu0 %v11446_v32  ;;  %v9118_v11 = vld [vmem:[#allocation5 + $0x1188] sm:$0xf]  ;;  %v10823_v15 = vld [vmem:[#allocation5 + $0x1194] sm:$0xf0]  ;;  %v8991_v14 = vor.u32 %v10791_v9, %v8990_v20 }
 0x22f   :  { %5716 = vmatpush.bf16.msra.mxu0 %v9039_v52  ;;  %5682 = vmatmul.bf16.vlgmr.msrb.gmra.mxu1 %v11450_v41  ;;  %v9246_v52 = vld [vmem:[#allocation5 + $0x1288] sm:$0xf]  ;;  %v10851_v28 = vld [vmem:[#allocation5 + $0x1274] sm:$0xf0] }
 0x230   :  { %5730 = vmatpush.bf16.msra.mxu1 %v9167_v37  ;;  %5696 = vmatmul.bf16.vlgmr.msrb.gmra.mxu2 %v11448_v38  ;;  %v10855_v37 = vld [vmem:[#allocation5 + $0x1294] sm:$0xf0]  ;;  %v9102_v22 = vld [vmem:[#allocation5 + $0x1168] sm:$0xf] }
 0x231   :  { %5744 = vmatpush.bf16.msra.mxu2 %v9295_v49  ;;  %5710 = vmatmul.bf16.vlgmr.msrb.gmra.mxu3 %v11452_v46  ;;  %v11649_v49 = vpop.f32.mrf.mxu3  ;;  %v9230_v7 = vld [vmem:[#allocation5 + $0x1268] sm:$0xf]  ;;  %v10883_v63 = vld [vmem:[#allocation5 + $0x1374] sm:$0xf0]  ;;  %v9103_v53 = vor.u32 %v10819_v61, %v9102_v22 }
 0x232   :  { %5758 = vmatpush.bf16.msra.mxu3 %v9423_v24  ;;  %11945 = vst [vmem:[#allocation57_spill] sm:$0xff] %v11649_v49  ;;  %v9374_v24 = vld [vmem:[#allocation5 + $0x1388] sm:$0xf]  ;;  %v10783_v20 = vld [vmem:[#allocation5 + $0x1054] sm:$0xf0] }
 0x233   :  { %5717 = vmatpush.bf16.msra.mxu0 %v9023_v13  ;;  %v9119_v13 = vor.u32 %v10823_v15, %v9118_v11  ;;  %v9375_v3 = vor.u32 %v10887_v25, %v9374_v24  ;;  %v9358_v8 = vld [vmem:[#allocation5 + $0x1368] sm:$0xf]  ;;  %v5473_v15 = vpop.f32.mrf.mxu2  ;;  %v10811_v61 = vld [vmem:[#allocation5 + $0x1134] sm:$0xf0] }
 0x234   :  { %5731 = vmatpush.bf16.msra.mxu1 %v9151_v23  ;;  %v9247_v23 = vor.u32 %v10855_v37, %v9246_v52  ;;  %v9086_v9 = vld [vmem:[#allocation5 + $0x1148] sm:$0xf]  ;;  %v9359_v11 = vor.u32 %v10883_v63, %v9358_v8  ;;  %v10847_v37 = vld [vmem:[#allocation5 + $0x1254] sm:$0xf0] }
 0x235   :  { %5745 = vmatpush.bf16.msra.mxu2 %v9279_v18  ;;  %v8974_v18 = vld [vmem:[#allocation5 + $0x1068] sm:$0xf]  ;;  %v10875_v8 = vld [vmem:[#allocation5 + $0x1334] sm:$0xf0] }
 0x236   :  { %5759 = vmatpush.bf16.msra.mxu3 %v9407_v12  ;;  %v5460_v12 = vadd.f32 %v5459_v29, %v5446_v62  ;;  %v9214_v52 = vld [vmem:[#allocation5 + $0x1248] sm:$0xf]  ;;  %v10879_v62 = vld [vmem:[#allocation5 + $0x1354] sm:$0xf0] }
 0x237   :  { %5718 = vmatpush.bf16.msra.mxu0 %v9007_v0  ;;  %v8975_v0 = vor.u32 %v10787_v57, %v8974_v18  ;;  %v9342_v25 = vld [vmem:[#allocation5 + $0x1348] sm:$0xf]  ;;  %v10779_v57 = vld [vmem:[#allocation5 + $0x1034] sm:$0xf0] }
 0x238   :  { %5732 = vmatpush.bf16.msra.mxu1 %v9135_v19  ;;  %v9231_v19 = vor.u32 %v10851_v28, %v9230_v7  ;;  %v5474_v50 = vadd.f32 %v5473_v15, %v5460_v12  ;;  %v8942_v18 = vld [vmem:[#allocation5 + $0x1028] sm:$0xf]  ;;  %v10843_v28 = vld [vmem:[#allocation5 + $0x1234] sm:$0xf0] }
 0x239   :  { %5746 = vmatpush.bf16.msra.mxu2 %v9263_v30  ;;  %v8958_v30 = vld [vmem:[#allocation5 + $0x1048] sm:$0xf]  ;;  %v5487_v24 = vpop.f32.mrf.mxu3  ;;  %v8943_v63 = vor.u32 %v10779_v57, %v8942_v18  ;;  %v10995_v57 = vld [vmem:[#allocation5 + $0x16f4] sm:$0xf0] }
 0x23a   :  { %5760 = vmatpush.bf16.msra.mxu3 %v9391_v27  ;;  %v10815_v27 = vld [vmem:[#allocation5 + $0x1154] sm:$0xf0]  ;;  %v11652_v29 = vadd.f32 %v5487_v24, %v5474_v50  ;;  %v9070_v22 = vld [vmem:[#allocation5 + $0x1128] sm:$0xf] }
 0x23b   :  { %5719 = vmatpush.bf16.msra.mxu0 %v8991_v14  ;;  %v8959_v14 = vor.u32 %v10783_v20, %v8958_v30  ;;  %v9198_v7 = vld [vmem:[#allocation5 + $0x1228] sm:$0xf]  ;;  %v10775_v30 = vld [vmem:[#allocation5 + $0x1014] sm:$0xf0] }
 0x23c   :  { %5733 = vmatpush.bf16.msra.mxu1 %v9119_v13  ;;  %11946 = vst [vmem:[#allocation58_spill] sm:$0xff] %v11652_v29  ;;  %v9087_v13 = vor.u32 %v10815_v27, %v9086_v9  ;;  %v9326_v12 = vld [vmem:[#allocation5 + $0x1328] sm:$0xf]  ;;  %v10807_v9 = vld [vmem:[#allocation5 + $0x1114] sm:$0xf0] }
 0x23d   :  { %5747 = vmatpush.bf16.msra.mxu2 %v9247_v23  ;;  %v9215_v23 = vor.u32 %v10847_v37, %v9214_v52  ;;  %v9054_v20 = vld [vmem:[#allocation5 + $0x1108] sm:$0xf]  ;;  %v9327_v27 = vor.u32 %v10875_v8, %v9326_v12  ;;  %v10871_v37 = vld [vmem:[#allocation5 + $0x1314] sm:$0xf0] }
 0x23e   :  { %5761 = vmatpush.bf16.msra.mxu3 %v9375_v3  ;;  %v9343_v3 = vor.u32 %v10879_v62, %v9342_v25  ;;  %v9182_v15 = vld [vmem:[#allocation5 + $0x1208] sm:$0xf]  ;;  %v10931_v24 = vld [vmem:[#allocation5 + $0x14f4] sm:$0xf0] }
 0x23f   :  { %5720 = vmatpush.bf16.msra.mxu0 %v8975_v0  ;;  %v8926_v0 = vld [vmem:[#allocation5 + $0x1008] sm:$0xf]  ;;  %v10927_v29 = vld [vmem:[#allocation5 + $0x14d4] sm:$0xf0] }
 0x240   :  { %5734 = vmatpush.bf16.msra.mxu1 %v9103_v53  ;;  %v9071_v53 = vor.u32 %v10811_v61, %v9070_v22  ;;  %v9310_v52 = vld [vmem:[#allocation5 + $0x1308] sm:$0xf]  ;;  %v8927_v62 = vor.u32 %v10775_v30, %v8926_v0  ;;  %v11027_v61 = vld [vmem:[#allocation5 + $0x17f4] sm:$0xf0] }
 0x241   :  { %5748 = vmatpush.bf16.msra.mxu2 %v9231_v19  ;;  %v9199_v19 = vor.u32 %v10843_v28, %v9198_v7  ;;  %v9550_v50 = vld [vmem:[#allocation5 + $0x14e8] sm:$0xf]  ;;  %v10959_v0 = vld [vmem:[#allocation5 + $0x15d4] sm:$0xf0] }
 0x242   :  { %5762 = vmatpush.bf16.msra.mxu3 %v9359_v11  ;;  %v10839_v11 = vld [vmem:[#allocation5 + $0x1214] sm:$0xf0]  ;;  %v9678_v25 = vld [vmem:[#allocation5 + $0x15e8] sm:$0xf]  ;;  %v9551_v7 = vor.u32 %v10931_v24, %v9550_v50 }
 0x243   :  { %5721 = vmatpush.bf16.msra.mxu0 %v8959_v14  ;;  %v10963_v14 = vld [vmem:[#allocation5 + $0x15f4] sm:$0xf0]  ;;  %v9806_v18 = vld [vmem:[#allocation5 + $0x16e8] sm:$0xf] }
 0x244   :  { %5735 = vmatpush.bf16.msra.mxu1 %v9087_v13  ;;  %v9055_v13 = vor.u32 %v10807_v9, %v9054_v20  ;;  %v9934_v22 = vld [vmem:[#allocation5 + $0x17e8] sm:$0xf]  ;;  %v9679_v28 = vor.u32 %v10963_v14, %v9678_v25  ;;  %v9807_v12 = vor.u32 %v10995_v57, %v9806_v18  ;;  %v10991_v16 = vld [vmem:[#allocation5 + $0x16d4] sm:$0xf0] }
 0x245   :  { %5749 = vmatpush.bf16.msra.mxu2 %v9215_v23  ;;  %v9183_v23 = vor.u32 %v10839_v11, %v9182_v15  ;;  %v9534_v8 = vld [vmem:[#allocation5 + $0x14c8] sm:$0xf]  ;;  %v10923_v11 = vld [vmem:[#allocation5 + $0x14b4] sm:$0xf0] }
 0x246   :  { %5763 = vmatpush.bf16.msra.mxu3 %v9343_v3  ;;  %v9311_v3 = vor.u32 %v10871_v37, %v9310_v52  ;;  %v9662_v49 = vld [vmem:[#allocation5 + $0x15c8] sm:$0xf]  ;;  %v9535_v20 = vor.u32 %v10927_v29, %v9534_v8  ;;  %v10955_v50 = vld [vmem:[#allocation5 + $0x15b4] sm:$0xf0] }
 0x247   :  { %5722 = vmatpush.bf16.msra.mxu0 %v8943_v63  ;;  %v9935_v63 = vor.u32 %v11027_v61, %v9934_v22  ;;  %v9790_v30 = vld [vmem:[#allocation5 + $0x16c8] sm:$0xf]  ;;  %v9663_v9 = vor.u32 %v10959_v0, %v9662_v49  ;;  %v10987_v25 = vld [vmem:[#allocation5 + $0x16b4] sm:$0xf0] }
 0x248   :  { %5736 = vmatpush.bf16.msra.mxu1 %v9071_v53  ;;  %v9918_v53 = vld [vmem:[#allocation5 + $0x17c8] sm:$0xf]  ;;  %v9791_v15 = vor.u32 %v10991_v16, %v9790_v30  ;;  %v11019_v29 = vld [vmem:[#allocation5 + $0x17b4] sm:$0xf0] }
 0x249   :  { %5750 = vmatpush.bf16.msra.mxu2 %v9199_v19  ;;  %v11023_v19 = vld [vmem:[#allocation5 + $0x17d4] sm:$0xf0]  ;;  %v9646_v52 = vld [vmem:[#allocation5 + $0x15a8] sm:$0xf] }
 0x24a   :  { %5764 = vmatpush.bf16.msra.mxu3 %v9327_v27  ;;  %v9518_v27 = vld [vmem:[#allocation5 + $0x14a8] sm:$0xf]  ;;  %v9919_v37 = vor.u32 %v11023_v19, %v9918_v53  ;;  %v9647_v49 = vor.u32 %v10955_v50, %v9646_v52  ;;  %v10919_v57 = vld [vmem:[#allocation5 + $0x1494] sm:$0xf0] }
 0x24b   :  { %5723 = vmatpush.bf16.msra.mxu0 %v8927_v62  ;;  %v9774_v24 = vld [vmem:[#allocation5 + $0x16a8] sm:$0xf]  ;;  %v9519_v16 = vor.u32 %v10923_v11, %v9518_v27  ;;  %v10951_v22 = vld [vmem:[#allocation5 + $0x1594] sm:$0xf0] }
 0x24c   :  { %5737 = vmatpush.bf16.msra.mxu1 %v9055_v13  ;;  %v9902_v62 = vld [vmem:[#allocation5 + $0x17a8] sm:$0xf]  ;;  %v9775_v14 = vor.u32 %v10987_v25, %v9774_v24  ;;  %v10915_v30 = vld [vmem:[#allocation5 + $0x1474] sm:$0xf0] }
 0x24d   :  { %5751 = vmatpush.bf16.msra.mxu2 %v9183_v23  ;;  %v9502_v18 = vld [vmem:[#allocation5 + $0x1488] sm:$0xf]  ;;  %v9903_v23 = vor.u32 %v11019_v29, %v9902_v62  ;;  %v11011_v11 = vld [vmem:[#allocation5 + $0x1774] sm:$0xf0] }
 0x24e   :  { %5765 = vmatpush.bf16.msra.mxu3 %v9311_v3  ;;  %5724 = vmatmul.bf16.vlgmr.msra.gmra.mxu0 %v11458_v51  ;;  %v9630_v13 = vld [vmem:[#allocation5 + $0x1588] sm:$0xf]  ;;  %v10983_v3 = vld [vmem:[#allocation5 + $0x1694] sm:$0xf0] }
 0x24f   :  { %5772 = vmatpush.bf16.msrb.mxu0 %v9551_v7  ;;  %5738 = vmatmul.bf16.vlgmr.msra.gmra.mxu1 %v11462_v56  ;;  %v9758_v61 = vld [vmem:[#allocation5 + $0x1688] sm:$0xf]  ;;  %v9631_v8 = vor.u32 %v10951_v22, %v9630_v13  ;;  %v10911_v25 = vld [vmem:[#allocation5 + $0x1454] sm:$0xf0] }
 0x250   :  { %5786 = vmatpush.bf16.msrb.mxu1 %v9679_v28  ;;  %5752 = vmatmul.bf16.vlgmr.msra.gmra.mxu2 %v11460_v55  ;;  %v9886_v7 = vld [vmem:[#allocation5 + $0x1788] sm:$0xf]  ;;  %v11015_v28 = vld [vmem:[#allocation5 + $0x1794] sm:$0xf0] }
 0x251   :  { %5800 = vmatpush.bf16.msrb.mxu2 %v9807_v12  ;;  %5766 = vmatmul.bf16.vlgmr.msra.gmra.mxu3 %v11464_v60  ;;  %v9503_v12 = vor.u32 %v10919_v57, %v9502_v18  ;;  %v9486_v0 = vld [vmem:[#allocation5 + $0x1468] sm:$0xf]  ;;  %v9887_v19 = vor.u32 %v11015_v28, %v9886_v7  ;;  %v11007_v57 = vld [vmem:[#allocation5 + $0x1754] sm:$0xf0] }
 0x252   :  { %5814 = vmatpush.bf16.msrb.mxu3 %v9935_v63  ;;  %v9759_v63 = vor.u32 %v10983_v3, %v9758_v61  ;;  %v9614_v53 = vld [vmem:[#allocation5 + $0x1568] sm:$0xf]  ;;  %v9487_v52 = vor.u32 %v10915_v30, %v9486_v0  ;;  %v10907_v3 = vld [vmem:[#allocation5 + $0x1434] sm:$0xf0] }
 0x253   :  { %5773 = vmatpush.bf16.msrb.mxu0 %v9535_v20  ;;  %v10947_v20 = vld [vmem:[#allocation5 + $0x1574] sm:$0xf0]  ;;  %v9870_v27 = vld [vmem:[#allocation5 + $0x1768] sm:$0xf] }
 0x254   :  { %5787 = vmatpush.bf16.msrb.mxu1 %v9663_v9  ;;  %v9742_v9 = vld [vmem:[#allocation5 + $0x1668] sm:$0xf]  ;;  %v9871_v29 = vor.u32 %v11011_v11, %v9870_v27  ;;  %v11003_v30 = vld [vmem:[#allocation5 + $0x1734] sm:$0xf0] }
 0x255   :  { %5801 = vmatpush.bf16.msrb.mxu2 %v9791_v15  ;;  %v10979_v15 = vld [vmem:[#allocation5 + $0x1674] sm:$0xf0]  ;;  %v9470_v24 = vld [vmem:[#allocation5 + $0x1448] sm:$0xf] }
 0x256   :  { %5815 = vmatpush.bf16.msrb.mxu3 %v9919_v37  ;;  %v9615_v37 = vor.u32 %v10947_v20, %v9614_v53  ;;  %v9743_v50 = vor.u32 %v10979_v15, %v9742_v9  ;;  %v9598_v62 = vld [vmem:[#allocation5 + $0x1548] sm:$0xf]  ;;  %v9471_v13 = vor.u32 %v10911_v25, %v9470_v24  ;;  %v10903_v20 = vld [vmem:[#allocation5 + $0x1414] sm:$0xf0] }
 0x257   :  { %5774 = vmatpush.bf16.msrb.mxu0 %v9519_v16  ;;  %v10943_v16 = vld [vmem:[#allocation5 + $0x1554] sm:$0xf0]  ;;  %v9854_v18 = vld [vmem:[#allocation5 + $0x1748] sm:$0xf] }
 0x258   :  { %5788 = vmatpush.bf16.msrb.mxu1 %v9647_v49  ;;  %v9726_v49 = vld [vmem:[#allocation5 + $0x1648] sm:$0xf]  ;;  %v9855_v28 = vor.u32 %v11007_v57, %v9854_v18  ;;  %v10935_v11 = vld [vmem:[#allocation5 + $0x1514] sm:$0xf0]  ;;  %v10353_v18 = vld [vmem:[#allocation5 + $0x2ec] sm:$0xf] }
 0x259   :  { %5802 = vmatpush.bf16.msrb.mxu2 %v9775_v14  ;;  %v10975_v14 = vld [vmem:[#allocation5 + $0x1654] sm:$0xf0]  ;;  %v9454_v61 = vld [vmem:[#allocation5 + $0x1428] sm:$0xf]  ;;  %v7248_v57 = vld [vmem:[#allocation5 + $0x2f8] sm:$0xf0] }
 0x25a   :  { %5816 = vmatpush.bf16.msrb.mxu3 %v9903_v23  ;;  %v9599_v23 = vor.u32 %v10943_v16, %v9598_v62  ;;  %v9727_v22 = vor.u32 %v10975_v14, %v9726_v49  ;;  %v9582_v7 = vld [vmem:[#allocation5 + $0x1528] sm:$0xf]  ;;  %v9455_v53 = vor.u32 %v10907_v3, %v9454_v61  ;;  %v10999_v25 = vld [vmem:[#allocation5 + $0x1714] sm:$0xf0]  ;;  %v10289_v62 = vld [vmem:[#allocation5 + $0xec] sm:$0xf] }
 0x25b   :  { %5775 = vmatpush.bf16.msrb.mxu0 %v9503_v12  ;;  %v10939_v12 = vld [vmem:[#allocation5 + $0x1534] sm:$0xf0]  ;;  %v9838_v0 = vld [vmem:[#allocation5 + $0x1728] sm:$0xf]  ;;  %v10321_v16 = vld [vmem:[#allocation5 + $0x1ec] sm:$0xf] }
 0x25c   :  { %5789 = vmatpush.bf16.msrb.mxu1 %v9631_v8  ;;  %v9710_v8 = vld [vmem:[#allocation5 + $0x1628] sm:$0xf]  ;;  %v9583_v9 = vor.u32 %v10939_v12, %v9582_v7  ;;  %v7120_v14 = vld [vmem:[#allocation5 + $0x1f8] sm:$0xf0]  ;;  %v7251_v12 = vor.u32 %v10353_v18, %v7248_v57 }
 0x25d   :  { %5803 = vmatpush.bf16.msrb.mxu2 %v9759_v63  ;;  %v10971_v63 = vld [vmem:[#allocation5 + $0x1634] sm:$0xf0]  ;;  %v9566_v27 = vld [vmem:[#allocation5 + $0x1508] sm:$0xf]  ;;  %v7376_v61 = vld [vmem:[#allocation5 + $0x3f8] sm:$0xf0] }
 0x25e   :  { %5817 = vmatpush.bf16.msrb.mxu3 %v9887_v19  ;;  %v9438_v19 = vld [vmem:[#allocation5 + $0x1408] sm:$0xf]  ;;  %v9711_v15 = vor.u32 %v10971_v63, %v9710_v8  ;;  %v10285_v8 = vld [vmem:[#allocation5 + $0xcc] sm:$0xf]  ;;  %v6976_v63 = vld [vmem:[#allocation5 + $0xd8] sm:$0xf0] }
 0x25f   :  { %5776 = vmatpush.bf16.msrb.mxu0 %v9487_v52  ;;  %v9694_v52 = vld [vmem:[#allocation5 + $0x1608] sm:$0xf]  ;;  %v9439_v49 = vor.u32 %v10903_v20, %v9438_v19  ;;  %v10349_v19 = vld [vmem:[#allocation5 + $0x2cc] sm:$0xf]  ;;  %v7232_v20 = vld [vmem:[#allocation5 + $0x2d8] sm:$0xf0] }
 0x260   :  { %5790 = vmatpush.bf16.msrb.mxu1 %v9615_v37  ;;  %v9839_v37 = vor.u32 %v11003_v30, %v9838_v0  ;;  %v9822_v24 = vld [vmem:[#allocation5 + $0x1708] sm:$0xf]  ;;  %v10317_v0 = vld [vmem:[#allocation5 + $0x1cc] sm:$0xf] }
 0x261   :  { %5804 = vmatpush.bf16.msrb.mxu2 %v9743_v50  ;;  %v10967_v50 = vld [vmem:[#allocation5 + $0x1614] sm:$0xf0]  ;;  %v9823_v3 = vor.u32 %v10999_v25, %v9822_v24  ;;  %v10313_v24 = vld [vmem:[#allocation5 + $0x1ac] sm:$0xf] }
 0x262   :  { %5818 = vmatpush.bf16.msrb.mxu3 %v9871_v29  ;;  %v6992_v29 = vld [vmem:[#allocation5 + $0xf8] sm:$0xf0] }
 0x263   :  { %5777 = vmatpush.bf16.msrb.mxu0 %v9471_v13  ;;  %v9567_v13 = vor.u32 %v10935_v11, %v9566_v27  ;;  %v6995_v7 = vor.u32 %v10289_v62, %v6992_v29  ;;  %v6979_v27 = vor.u32 %v10285_v8, %v6976_v63  ;;  %v7088_v62 = vld [vmem:[#allocation5 + $0x1b8] sm:$0xf0]  ;;  %v10345_v29 = vld [vmem:[#allocation5 + $0x2ac] sm:$0xf] }
 0x264   :  { %5791 = vmatpush.bf16.msrb.mxu1 %v9599_v23  ;;  %v9695_v23 = vor.u32 %v10967_v50, %v9694_v52  ;;  %v7235_v52 = vor.u32 %v10349_v19, %v7232_v20  ;;  %v6960_v50 = vld [vmem:[#allocation5 + $0xb8] sm:$0xf0]  ;;  %v7091_v57 = vor.u32 %v10313_v24, %v7088_v62  ;;  %v10373_v8 = vld [vmem:[#allocation5 + $0x38c] sm:$0xf] }
 0x265   :  { %5805 = vmatpush.bf16.msrb.mxu2 %v9727_v22  ;;  %v10385_v22 = vld [vmem:[#allocation5 + $0x3ec] sm:$0xf]  ;;  %v7328_v63 = vld [vmem:[#allocation5 + $0x398] sm:$0xf0] }
 0x266   :  { %5819 = vmatpush.bf16.msrb.mxu3 %v9855_v28  ;;  %v7123_v28 = vor.u32 %v10321_v16, %v7120_v14  ;;  %v7379_v30 = vor.u32 %v10385_v22, %v7376_v61  ;;  %v7216_v16 = vld [vmem:[#allocation5 + $0x2b8] sm:$0xf0]  ;;  %v10309_v61 = vld [vmem:[#allocation5 + $0x18c] sm:$0xf] }
 0x267   :  { %5778 = vmatpush.bf16.msrb.mxu0 %v9455_v53  ;;  %v7104_v53 = vld [vmem:[#allocation5 + $0x1d8] sm:$0xf0]  ;;  %v10273_v19 = vld [vmem:[#allocation5 + $0x6c] sm:$0xf] }
 0x268   :  { %5792 = vmatpush.bf16.msrb.mxu1 %v9583_v9  ;;  %v10381_v9 = vld [vmem:[#allocation5 + $0x3cc] sm:$0xf]  ;;  %v7107_v11 = vor.u32 %v10317_v0, %v7104_v53  ;;  %v7344_v14 = vld [vmem:[#allocation5 + $0x3b8] sm:$0xf0] }
 0x269   :  { %5806 = vmatpush.bf16.msrb.mxu2 %v9711_v15  ;;  %v7360_v15 = vld [vmem:[#allocation5 + $0x3d8] sm:$0xf0] }
 0x26a   :  { %5820 = vmatpush.bf16.msrb.mxu3 %v9839_v37  ;;  %v10281_v37 = vld [vmem:[#allocation5 + $0xac] sm:$0xf]  ;;  %v7363_v25 = vor.u32 %v10381_v9, %v7360_v15  ;;  %v6944_v22 = vld [vmem:[#allocation5 + $0x98] sm:$0xf0]  ;;  %v7331_v15 = vor.u32 %v10373_v8, %v7328_v63 }
 0x26b   :  { %5779 = vmatpush.bf16.msrb.mxu0 %v9439_v49  ;;  %v10377_v49 = vld [vmem:[#allocation5 + $0x3ac] sm:$0xf]  ;;  %v6963_v18 = vor.u32 %v10281_v37, %v6960_v50  ;;  %v6928_v20 = vld [vmem:[#allocation5 + $0x78] sm:$0xf0] }
 0x26c   :  { %5793 = vmatpush.bf16.msrb.mxu1 %v9567_v13  ;;  %v7219_v13 = vor.u32 %v10345_v29, %v7216_v16  ;;  %v10305_v9 = vld [vmem:[#allocation5 + $0x16c] sm:$0xf]  ;;  %v7312_v50 = vld [vmem:[#allocation5 + $0x378] sm:$0xf0]  ;;  %v6931_v24 = vor.u32 %v10273_v19, %v6928_v20 }
 0x26d   :  { %5807 = vmatpush.bf16.msrb.mxu2 %v9695_v23  ;;  %v10277_v23 = vld [vmem:[#allocation5 + $0x8c] sm:$0xf]  ;;  %v6912_v16 = vld [vmem:[#allocation5 + $0x58] sm:$0xf0] }
 0x26e   :  { %5821 = vmatpush.bf16.msrb.mxu3 %v9823_v3  ;;  %5780 = vmatmul.bf16.vlgmr.msrb.gmra.mxu0 %v11479_v26  ;;  %v7347_v3 = vor.u32 %v10377_v49, %v7344_v14  ;;  %v6947_v0 = vor.u32 %v10277_v23, %v6944_v22  ;;  %v10369_v37 = vld [vmem:[#allocation5 + $0x36c] sm:$0xf]  ;;  %v7296_v22 = vld [vmem:[#allocation5 + $0x358] sm:$0xf0] }
 0x26f   :  { %5828 = vmatpush.bf16.msra.mxu0 %v6995_v7  ;;  %5794 = vmatmul.bf16.vlgmr.msrb.gmra.mxu1 %v11483_v34  ;;  %v7072_v7 = vld [vmem:[#allocation5 + $0x198] sm:$0xf0]  ;;  %v10269_v29 = vld [vmem:[#allocation5 + $0x4c] sm:$0xf]  ;;  %v7315_v14 = vor.u32 %v10369_v37, %v7312_v50 }
 0x270   :  { %5842 = vmatpush.bf16.msra.mxu1 %v7123_v28  ;;  %5808 = vmatmul.bf16.vlgmr.msrb.gmra.mxu2 %v11481_v33  ;;  %v10341_v28 = vld [vmem:[#allocation5 + $0x28c] sm:$0xf]  ;;  %v7280_v20 = vld [vmem:[#allocation5 + $0x338] sm:$0xf0] }
 0x271   :  { %5856 = vmatpush.bf16.msra.mxu2 %v7251_v12  ;;  %5822 = vmatmul.bf16.vlgmr.msrb.gmra.mxu3 %v11487_v48  ;;  %v7200_v12 = vld [vmem:[#allocation5 + $0x298] sm:$0xf0]  ;;  %v10301_v49 = vld [vmem:[#allocation5 + $0x14c] sm:$0xf] }
 0x272   :  { %5870 = vmatpush.bf16.msra.mxu3 %v7379_v30  ;;  %v7075_v30 = vor.u32 %v10309_v61, %v7072_v7  ;;  %v7203_v53 = vor.u32 %v10341_v28, %v7200_v12  ;;  %v10365_v23 = vld [vmem:[#allocation5 + $0x34c] sm:$0xf]  ;;  %v6915_v61 = vor.u32 %v10269_v29, %v6912_v16  ;;  %v6896_v12 = vld [vmem:[#allocation5 + $0x38] sm:$0xf0] }
 0x273   :  { %5829 = vmatpush.bf16.msra.mxu0 %v6979_v27  ;;  %v7056_v27 = vld [vmem:[#allocation5 + $0x178] sm:$0xf0]  ;;  %v10265_v28 = vld [vmem:[#allocation5 + $0x2c] sm:$0xf]  ;;  %v7299_v63 = vor.u32 %v10365_v23, %v7296_v22 }
 0x274   :  { %5843 = vmatpush.bf16.msra.mxu1 %v7107_v11  ;;  %v10337_v11 = vld [vmem:[#allocation5 + $0x26c] sm:$0xf]  ;;  %v7008_v50 = vld [vmem:[#allocation5 + $0x118] sm:$0xf0] }
 0x275   :  { %5857 = vmatpush.bf16.msra.mxu2 %v7235_v52  ;;  %v7184_v52 = vld [vmem:[#allocation5 + $0x278] sm:$0xf0]  ;;  %v10297_v8 = vld [vmem:[#allocation5 + $0x12c] sm:$0xf] }
 0x276   :  { %5871 = vmatpush.bf16.msra.mxu3 %v7363_v25  ;;  %v7059_v25 = vor.u32 %v10305_v9, %v7056_v27  ;;  %v7187_v62 = vor.u32 %v10337_v11, %v7184_v52  ;;  %v10361_v19 = vld [vmem:[#allocation5 + $0x32c] sm:$0xf]  ;;  %v6899_v9 = vor.u32 %v10265_v28, %v6896_v12  ;;  %v6880_v27 = vld [vmem:[#allocation5 + $0x18] sm:$0xf0] }
 0x277   :  { %5830 = vmatpush.bf16.msra.mxu0 %v6963_v18  ;;  %v7040_v18 = vld [vmem:[#allocation5 + $0x158] sm:$0xf0]  ;;  %v10293_v37 = vld [vmem:[#allocation5 + $0x10c] sm:$0xf] }
 0x278   :  { %5844 = vmatpush.bf16.msra.mxu1 %v7091_v57  ;;  %v10333_v57 = vld [vmem:[#allocation5 + $0x24c] sm:$0xf]  ;;  %v7264_v16 = vld [vmem:[#allocation5 + $0x318] sm:$0xf0] }
 0x279   :  { %5858 = vmatpush.bf16.msra.mxu2 %v7219_v13  ;;  %v7168_v13 = vld [vmem:[#allocation5 + $0x258] sm:$0xf0]  ;;  %v10357_v29 = vld [vmem:[#allocation5 + $0x30c] sm:$0xf] }
 0x27a   :  { %5872 = vmatpush.bf16.msra.mxu3 %v7347_v3  ;;  %v7043_v3 = vor.u32 %v10301_v49, %v7040_v18  ;;  %v7171_v7 = vor.u32 %v10333_v57, %v7168_v13  ;;  %v10417_v49 = vld [vmem:[#allocation5 + $0x4ec] sm:$0xf]  ;;  %v7632_v13 = vld [vmem:[#allocation5 + $0x5f8] sm:$0xf0]  ;;  %v7267_v12 = vor.u32 %v10357_v29, %v7264_v16 }
 0x27b   :  { %5831 = vmatpush.bf16.msra.mxu0 %v6947_v0  ;;  %v7024_v0 = vld [vmem:[#allocation5 + $0x138] sm:$0xf0]  ;;  %v10449_v18 = vld [vmem:[#allocation5 + $0x5ec] sm:$0xf] }
 0x27c   :  { %5845 = vmatpush.bf16.msra.mxu1 %v7075_v30  ;;  %v10329_v30 = vld [vmem:[#allocation5 + $0x22c] sm:$0xf]  ;;  %v7027_v11 = vor.u32 %v10297_v8, %v7024_v0  ;;  %v7760_v22 = vld [vmem:[#allocation5 + $0x6f8] sm:$0xf0] }
 0x27d   :  { %5859 = vmatpush.bf16.msra.mxu2 %v7203_v53  ;;  %v7152_v53 = vld [vmem:[#allocation5 + $0x238] sm:$0xf0]  ;;  %v10481_v23 = vld [vmem:[#allocation5 + $0x6ec] sm:$0xf] }
 0x27e   :  { %5873 = vmatpush.bf16.msra.mxu3 %v7331_v15  ;;  %v10261_v15 = vld [vmem:[#allocation5 + $0xc] sm:$0xf]  ;;  %v7155_v52 = vor.u32 %v10329_v30, %v7152_v53  ;;  %v7888_v28 = vld [vmem:[#allocation5 + $0x7f8] sm:$0xf0]  ;;  %v7763_v0 = vor.u32 %v10481_v23, %v7760_v22 }
 0x27f   :  { %5832 = vmatpush.bf16.msra.mxu0 %v6931_v24  ;;  %v10325_v24 = vld [vmem:[#allocation5 + $0x20c] sm:$0xf]  ;;  %v6883_v57 = vor.u32 %v10261_v15, %v6880_v27  ;;  %v7488_v53 = vld [vmem:[#allocation5 + $0x4d8] sm:$0xf0] }
 0x280   :  { %5846 = vmatpush.bf16.msra.mxu1 %v7059_v25  ;;  %v7283_v25 = vor.u32 %v10361_v19, %v7280_v20  ;;  %v10413_v30 = vld [vmem:[#allocation5 + $0x4cc] sm:$0xf]  ;;  %v7744_v27 = vld [vmem:[#allocation5 + $0x6d8] sm:$0xf0] }
 0x281   :  { %5860 = vmatpush.bf16.msra.mxu2 %v7187_v62  ;;  %v7136_v62 = vld [vmem:[#allocation5 + $0x218] sm:$0xf0]  ;;  %v10445_v19 = vld [vmem:[#allocation5 + $0x5cc] sm:$0xf] }
 0x282   :  { %5874 = vmatpush.bf16.msra.mxu3 %v7315_v14  ;;  %v7504_v14 = vld [vmem:[#allocation5 + $0x4f8] sm:$0xf0]  ;;  %v10477_v15 = vld [vmem:[#allocation5 + $0x6cc] sm:$0xf] }
 0x283   :  { %5833 = vmatpush.bf16.msra.mxu0 %v6915_v61  ;;  %v7011_v61 = vor.u32 %v10293_v37, %v7008_v50  ;;  %v7507_v8 = vor.u32 %v10417_v49, %v7504_v14  ;;  %v7491_v37 = vor.u32 %v10413_v30, %v7488_v53  ;;  %v10441_v29 = vld [vmem:[#allocation5 + $0x5ac] sm:$0xf]  ;;  %v7600_v49 = vld [vmem:[#allocation5 + $0x5b8] sm:$0xf0] }
 0x284   :  { %5847 = vmatpush.bf16.msra.mxu1 %v7043_v3  ;;  %v7139_v3 = vor.u32 %v10325_v24, %v7136_v62  ;;  %v7747_v24 = vor.u32 %v10477_v15, %v7744_v27  ;;  %v7472_v62 = vld [vmem:[#allocation5 + $0x4b8] sm:$0xf0]  ;;  %v10473_v14 = vld [vmem:[#allocation5 + $0x6ac] sm:$0xf]  ;;  %v7603_v22 = vor.u32 %v10441_v29, %v7600_v49 }
 0x285   :  { %5861 = vmatpush.bf16.msra.mxu2 %v7171_v7  ;;  %v10513_v7 = vld [vmem:[#allocation5 + $0x7ec] sm:$0xf]  ;;  %v7568_v15 = vld [vmem:[#allocation5 + $0x578] sm:$0xf0] }
 0x286   :  { %5875 = vmatpush.bf16.msra.mxu3 %v7299_v63  ;;  %v7635_v63 = vor.u32 %v10449_v18, %v7632_v13  ;;  %v7891_v20 = vor.u32 %v10513_v7, %v7888_v28  ;;  %v7728_v18 = vld [vmem:[#allocation5 + $0x6b8] sm:$0xf0]  ;;  %v10437_v28 = vld [vmem:[#allocation5 + $0x58c] sm:$0xf] }
 0x287   :  { %5834 = vmatpush.bf16.msra.mxu0 %v6899_v9  ;;  %v7616_v9 = vld [vmem:[#allocation5 + $0x5d8] sm:$0xf0]  ;;  %v10401_v53 = vld [vmem:[#allocation5 + $0x46c] sm:$0xf] }
 0x288   :  { %5848 = vmatpush.bf16.msra.mxu1 %v7027_v11  ;;  %v10509_v11 = vld [vmem:[#allocation5 + $0x7cc] sm:$0xf]  ;;  %v7619_v50 = vor.u32 %v10445_v19, %v7616_v9  ;;  %v7856_v13 = vld [vmem:[#allocation5 + $0x7b8] sm:$0xf0] }
 0x289   :  { %5862 = vmatpush.bf16.msra.mxu2 %v7155_v52  ;;  %v7872_v52 = vld [vmem:[#allocation5 + $0x7d8] sm:$0xf0]  ;;  %v10465_v27 = vld [vmem:[#allocation5 + $0x66c] sm:$0xf] }
 0x28a   :  { %5876 = vmatpush.bf16.msra.mxu3 %v7283_v25  ;;  %v10409_v25 = vld [vmem:[#allocation5 + $0x4ac] sm:$0xf]  ;;  %v7875_v16 = vor.u32 %v10509_v11, %v7872_v52  ;;  %v7456_v7 = vld [vmem:[#allocation5 + $0x498] sm:$0xf0] }
 0x28b   :  { %5835 = vmatpush.bf16.msra.mxu0 %v6883_v57  ;;  %v10505_v57 = vld [vmem:[#allocation5 + $0x7ac] sm:$0xf]  ;;  %v7475_v23 = vor.u32 %v10409_v25, %v7472_v62  ;;  %v7440_v19 = vld [vmem:[#allocation5 + $0x478] sm:$0xf0] }
 0x28c   :  { %5849 = vmatpush.bf16.msra.mxu1 %v7011_v61  ;;  %v7731_v61 = vor.u32 %v10473_v14, %v7728_v18  ;;  %v7696_v11 = vld [vmem:[#allocation5 + $0x678] sm:$0xf0]  ;;  %v10497_v52 = vld [vmem:[#allocation5 + $0x76c] sm:$0xf] }
 0x28d   :  { %5863 = vmatpush.bf16.msra.mxu2 %v7139_v3  ;;  %v10405_v3 = vld [vmem:[#allocation5 + $0x48c] sm:$0xf]  ;;  %v7699_v25 = vor.u32 %v10465_v27, %v7696_v11  ;;  %v7424_v29 = vld [vmem:[#allocation5 + $0x458] sm:$0xf0] }
 0x28e   :  { %5877 = vmatpush.bf16.msra.mxu3 %v7267_v12  ;;  %5836 = vmatmul.bf16.vlgmr.msra.gmra.mxu0 %v11410_v58  ;;  %v7859_v12 = vor.u32 %v10505_v57, %v7856_v13  ;;  %v7584_v58 = vld [vmem:[#allocation5 + $0x598] sm:$0xf0]  ;;  %v10397_v62 = vld [vmem:[#allocation5 + $0x44c] sm:$0xf] }
 0x28f   :  { %5884 = vmatpush.bf16.msrb.mxu0 %v7507_v8  ;;  %5850 = vmatmul.bf16.vlgmr.msra.gmra.mxu1 %v11416_v10  ;;  %v10469_v8 = vld [vmem:[#allocation5 + $0x68c] sm:$0xf]  ;;  %v7459_v10 = vor.u32 %v10405_v3, %v7456_v7  ;;  %v7587_v30 = vor.u32 %v10437_v28, %v7584_v58  ;;  %v7552_v14 = vld [vmem:[#allocation5 + $0x558] sm:$0xf0] }
 0x290   :  { %5898 = vmatpush.bf16.msrb.mxu1 %v7635_v63  ;;  %5864 = vmatmul.bf16.vlgmr.msra.gmra.mxu2 %v11412_v1  ;;  %v7712_v63 = vld [vmem:[#allocation5 + $0x698] sm:$0xf0]  ;;  %v10461_v18 = vld [vmem:[#allocation5 + $0x64c] sm:$0xf] }
 0x291   :  { %5912 = vmatpush.bf16.msrb.mxu2 %v7763_v0  ;;  %5878 = vmatmul.bf16.vlgmr.msra.gmra.mxu3 %v11418_v17  ;;  %v10501_v0 = vld [vmem:[#allocation5 + $0x78c] sm:$0xf]  ;;  %v7840_v1 = vld [vmem:[#allocation5 + $0x798] sm:$0xf0]  ;;  %v7715_v17 = vor.u32 %v10469_v8, %v7712_v63 }
 0x292   :  { %5926 = vmatpush.bf16.msrb.mxu3 %v7891_v20  ;;  %v10433_v20 = vld [vmem:[#allocation5 + $0x56c] sm:$0xf]  ;;  %v7843_v9 = vor.u32 %v10501_v0, %v7840_v1  ;;  %v7680_v57 = vld [vmem:[#allocation5 + $0x658] sm:$0xf0] }
 0x293   :  { %5885 = vmatpush.bf16.msrb.mxu0 %v7491_v37  ;;  %v7824_v37 = vld [vmem:[#allocation5 + $0x778] sm:$0xf0]  ;;  %v10493_v13 = vld [vmem:[#allocation5 + $0x74c] sm:$0xf]  ;;  %v7683_v3 = vor.u32 %v10461_v18, %v7680_v57 }
 0x294   :  { %5899 = vmatpush.bf16.msrb.mxu1 %v7619_v50  ;;  %v7443_v50 = vor.u32 %v10401_v53, %v7440_v19  ;;  %v7827_v49 = vor.u32 %v10497_v52, %v7824_v37  ;;  %v10393_v7 = vld [vmem:[#allocation5 + $0x42c] sm:$0xf]  ;;  %v7408_v28 = vld [vmem:[#allocation5 + $0x438] sm:$0xf0] }
 0x295   :  { %5913 = vmatpush.bf16.msrb.mxu2 %v7747_v24  ;;  %v7571_v24 = vor.u32 %v10433_v20, %v7568_v15  ;;  %v7536_v8 = vld [vmem:[#allocation5 + $0x538] sm:$0xf0]  ;;  %v10457_v63 = vld [vmem:[#allocation5 + $0x62c] sm:$0xf] }
 0x296   :  { %5927 = vmatpush.bf16.msrb.mxu3 %v7875_v16  ;;  %v10429_v16 = vld [vmem:[#allocation5 + $0x54c] sm:$0xf]  ;;  %v7664_v0 = vld [vmem:[#allocation5 + $0x638] sm:$0xf0] }
 0x297   :  { %5886 = vmatpush.bf16.msrb.mxu0 %v7475_v23  ;;  %v7808_v23 = vld [vmem:[#allocation5 + $0x758] sm:$0xf0]  ;;  %v10489_v1 = vld [vmem:[#allocation5 + $0x72c] sm:$0xf]  ;;  %v7667_v20 = vor.u32 %v10457_v63, %v7664_v0 }
 0x298   :  { %5900 = vmatpush.bf16.msrb.mxu1 %v7603_v22  ;;  %v7427_v22 = vor.u32 %v10397_v62, %v7424_v29  ;;  %v7811_v58 = vor.u32 %v10493_v13, %v7808_v23  ;;  %v7392_v53 = vld [vmem:[#allocation5 + $0x418] sm:$0xf0]  ;;  %v10453_v27 = vld [vmem:[#allocation5 + $0x60c] sm:$0xf] }
 0x299   :  { %5914 = vmatpush.bf16.msrb.mxu2 %v7731_v61  ;;  %v7555_v61 = vor.u32 %v10429_v16, %v7552_v14  ;;  %v7520_v15 = vld [vmem:[#allocation5 + $0x518] sm:$0xf0]  ;;  %v10485_v37 = vld [vmem:[#allocation5 + $0x70c] sm:$0xf] }
 0x29a   :  { %5928 = vmatpush.bf16.msrb.mxu3 %v7859_v12  ;;  %v10425_v12 = vld [vmem:[#allocation5 + $0x52c] sm:$0xf]  ;;  %v7648_v52 = vld [vmem:[#allocation5 + $0x618] sm:$0xf0] }
 0x29b   :  { %5887 = vmatpush.bf16.msrb.mxu0 %v7459_v10  ;;  %v7792_v10 = vld [vmem:[#allocation5 + $0x738] sm:$0xf0]  ;;  %v7539_v19 = vor.u32 %v10425_v12, %v7536_v8  ;;  %v10577_v62 = vld [vmem:[#allocation5 + $0x9ec] sm:$0xf]  ;;  %v7651_v57 = vor.u32 %v10453_v27, %v7648_v52 }
 0x29c   :  { %5901 = vmatpush.bf16.msrb.mxu1 %v7587_v30  ;;  %v7411_v30 = vor.u32 %v10393_v7, %v7408_v28  ;;  %v7795_v11 = vor.u32 %v10489_v1, %v7792_v10  ;;  %v8144_v16 = vld [vmem:[#allocation5 + $0x9f8] sm:$0xf0]  ;;  %v10641_v13 = vld [vmem:[#allocation5 + $0xbec] sm:$0xf] }
 0x29d   :  { %5915 = vmatpush.bf16.msrb.mxu2 %v7715_v17  ;;  %v10389_v17 = vld [vmem:[#allocation5 + $0x40c] sm:$0xf]  ;;  %v8272_v14 = vld [vmem:[#allocation5 + $0xaf8] sm:$0xf0] }
 0x29e   :  { %5929 = vmatpush.bf16.msrb.mxu3 %v7843_v9  ;;  %v10421_v9 = vld [vmem:[#allocation5 + $0x50c] sm:$0xf]  ;;  %v7395_v29 = vor.u32 %v10389_v17, %v7392_v53  ;;  %v8400_v23 = vld [vmem:[#allocation5 + $0xbf8] sm:$0xf0] }
 0x29f   :  { %5888 = vmatpush.bf16.msrb.mxu0 %v7443_v50  ;;  %v7776_v50 = vld [vmem:[#allocation5 + $0x718] sm:$0xf0]  ;;  %v7523_v18 = vor.u32 %v10421_v9, %v7520_v15  ;;  %v10541_v28 = vld [vmem:[#allocation5 + $0x8cc] sm:$0xf]  ;;  %v8403_v8 = vor.u32 %v10641_v13, %v8400_v23 }
 0x2a0   :  { %5902 = vmatpush.bf16.msrb.mxu1 %v7571_v24  ;;  %v10545_v24 = vld [vmem:[#allocation5 + $0x8ec] sm:$0xf]  ;;  %v8000_v12 = vld [vmem:[#allocation5 + $0x8d8] sm:$0xf0] }
 0x2a1   :  { %5916 = vmatpush.bf16.msrb.mxu2 %v7699_v25  ;;  %v8016_v25 = vld [vmem:[#allocation5 + $0x8f8] sm:$0xf0]  ;;  %v10605_v0 = vld [vmem:[#allocation5 + $0xacc] sm:$0xf]  ;;  %v8003_v17 = vor.u32 %v10541_v28, %v8000_v12 }
 0x2a2   :  { %5930 = vmatpush.bf16.msrb.mxu3 %v7827_v49  ;;  %v10609_v49 = vld [vmem:[#allocation5 + $0xaec] sm:$0xf]  ;;  %v8128_v63 = vld [vmem:[#allocation5 + $0x9d8] sm:$0xf0] }
 0x2a3   :  { %5889 = vmatpush.bf16.msrb.mxu0 %v7427_v22  ;;  %v7779_v22 = vor.u32 %v10485_v37, %v7776_v50  ;;  %v8275_v7 = vor.u32 %v10609_v49, %v8272_v14  ;;  %v8256_v1 = vld [vmem:[#allocation5 + $0xad8] sm:$0xf0]  ;;  %v10637_v10 = vld [vmem:[#allocation5 + $0xbcc] sm:$0xf] }
 0x2a4   :  { %5903 = vmatpush.bf16.msrb.mxu1 %v7555_v61  ;;  %v8019_v61 = vor.u32 %v10545_v24, %v8016_v25  ;;  %v7984_v9 = vld [vmem:[#allocation5 + $0x8b8] sm:$0xf0]  ;;  %v10569_v15 = vld [vmem:[#allocation5 + $0x9ac] sm:$0xf] }
 0x2a5   :  { %5917 = vmatpush.bf16.msrb.mxu2 %v7683_v3  ;;  %v8147_v3 = vor.u32 %v10577_v62, %v8144_v16  ;;  %v10601_v52 = vld [vmem:[#allocation5 + $0xaac] sm:$0xf]  ;;  %v8240_v37 = vld [vmem:[#allocation5 + $0xab8] sm:$0xf0] }
 0x2a6   :  { %5931 = vmatpush.bf16.msrb.mxu3 %v7811_v58  ;;  %v10573_v58 = vld [vmem:[#allocation5 + $0x9cc] sm:$0xf]  ;;  %v8368_v24 = vld [vmem:[#allocation5 + $0xbb8] sm:$0xf0] }
 0x2a7   :  { %5890 = vmatpush.bf16.msrb.mxu0 %v7411_v30  ;;  %v8384_v30 = vld [vmem:[#allocation5 + $0xbd8] sm:$0xf0]  ;;  %v8131_v53 = vor.u32 %v10573_v58, %v8128_v63  ;;  %v10633_v50 = vld [vmem:[#allocation5 + $0xbac] sm:$0xf] }
 0x2a8   :  { %5904 = vmatpush.bf16.msrb.mxu1 %v7539_v19  ;;  %v8259_v19 = vor.u32 %v10605_v0, %v8256_v1  ;;  %v8387_v27 = vor.u32 %v10637_v10, %v8384_v30  ;;  %v10533_v16 = vld [vmem:[#allocation5 + $0x88c] sm:$0xf]  ;;  %v8371_v14 = vor.u32 %v10633_v50, %v8368_v24  ;;  %v8080_v12 = vld [vmem:[#allocation5 + $0x978] sm:$0xf0] }
 0x2a9   :  { %5918 = vmatpush.bf16.msrb.mxu2 %v7667_v20  ;;  %v10537_v20 = vld [vmem:[#allocation5 + $0x8ac] sm:$0xf]  ;;  %v8336_v0 = vld [vmem:[#allocation5 + $0xb78] sm:$0xf0] }
 0x2aa   :  { %5932 = vmatpush.bf16.msrb.mxu3 %v7795_v11  ;;  %v8112_v11 = vld [vmem:[#allocation5 + $0x9b8] sm:$0xf0]  ;;  %v7987_v25 = vor.u32 %v10537_v20, %v7984_v9  ;;  %v10565_v49 = vld [vmem:[#allocation5 + $0x98c] sm:$0xf] }
 0x2ab   :  { %5891 = vmatpush.bf16.msrb.mxu0 %v7395_v29  ;;  %v8115_v62 = vor.u32 %v10569_v15, %v8112_v11  ;;  %v8243_v29 = vor.u32 %v10601_v52, %v8240_v37  ;;  %v10629_v13 = vld [vmem:[#allocation5 + $0xb8c] sm:$0xf]  ;;  %v8064_v9 = vld [vmem:[#allocation5 + $0x958] sm:$0xf0] }
 0x2ac   :  { %5905 = vmatpush.bf16.msrb.mxu1 %v7523_v18  ;;  %v8096_v18 = vld [vmem:[#allocation5 + $0x998] sm:$0xf0]  ;;  %v10593_v58 = vld [vmem:[#allocation5 + $0xa6c] sm:$0xf] }
 0x2ad   :  { %5919 = vmatpush.bf16.msrb.mxu2 %v7651_v57  ;;  %v10597_v57 = vld [vmem:[#allocation5 + $0xa8c] sm:$0xf]  ;;  %v8320_v52 = vld [vmem:[#allocation5 + $0xb58] sm:$0xf0] }
 0x2ae   :  { %5933 = vmatpush.bf16.msrb.mxu3 %v7779_v22  ;;  %5892 = vmatmul.bf16.vlgmr.msrb.gmra.mxu0 %v11422_v39  ;;  %v7968_v39 = vld [vmem:[#allocation5 + $0x898] sm:$0xf0]  ;;  %v10625_v63 = vld [vmem:[#allocation5 + $0xb6c] sm:$0xf] }
 0x2af   :  { %5940 = vmatpush.bf16.msra.mxu0 %v8019_v61  ;;  %5906 = vmatmul.bf16.vlgmr.msrb.gmra.mxu1 %v11426_v44  ;;  %v8352_v44 = vld [vmem:[#allocation5 + $0xb98] sm:$0xf0]  ;;  %v7971_v23 = vor.u32 %v10533_v16, %v7968_v39  ;;  %v10529_v61 = vld [vmem:[#allocation5 + $0x86c] sm:$0xf]  ;;  %v8339_v20 = vor.u32 %v10625_v63, %v8336_v0  ;;  %v11672_v63 = vpop.f32.mrf.mxu1 }
 0x2b0   :  { %5954 = vmatpush.bf16.msra.mxu1 %v8147_v3  ;;  %5920 = vmatmul.bf16.vlgmr.msrb.gmra.mxu2 %v11424_v43  ;;  %v8224_v43 = vld [vmem:[#allocation5 + $0xa98] sm:$0xf0]  ;;  %v8355_v28 = vor.u32 %v10629_v13, %v8352_v44  ;;  %v10589_v15 = vld [vmem:[#allocation5 + $0xa4c] sm:$0xf] }
 0x2b1   :  { %5968 = vmatpush.bf16.msra.mxu2 %v8275_v7  ;;  %5934 = vmatmul.bf16.vlgmr.msrb.gmra.mxu3 %v11428_v47  ;;  %v8099_v47 = vor.u32 %v10565_v49, %v8096_v18  ;;  %v8227_v22 = vor.u32 %v10597_v57, %v8224_v43  ;;  %v7952_v3 = vld [vmem:[#allocation5 + $0x878] sm:$0xf0]  ;;  %v10561_v7 = vld [vmem:[#allocation5 + $0x96c] sm:$0xf]  ;;  %v11670_v18 = vpop.f32.mrf.mxu0 }
 0x2b2   :  { %5982 = vmatpush.bf16.msra.mxu3 %v8403_v8  ;;  %v8208_v8 = vld [vmem:[#allocation5 + $0xa78] sm:$0xf0]  ;;  %v7955_v1 = vor.u32 %v10529_v61, %v7952_v3  ;;  %v8083_v10 = vor.u32 %v10561_v7, %v8080_v12  ;;  %v10621_v11 = vld [vmem:[#allocation5 + $0xb4c] sm:$0xf] }
 0x2b3   :  { %5941 = vmatpush.bf16.msra.mxu0 %v8003_v17  ;;  %v8211_v30 = vor.u32 %v10593_v58, %v8208_v8  ;;  %v10525_v17 = vld [vmem:[#allocation5 + $0x84c] sm:$0xf]  ;;  %v8323_v16 = vor.u32 %v10621_v11, %v8320_v52  ;;  %v8048_v39 = vld [vmem:[#allocation5 + $0x938] sm:$0xf0] }
 0x2b4   :  { %5955 = vmatpush.bf16.msra.mxu1 %v8131_v53  ;;  %v7936_v53 = vld [vmem:[#allocation5 + $0x858] sm:$0xf0]  ;;  %v10585_v49 = vld [vmem:[#allocation5 + $0xa2c] sm:$0xf] }
 0x2b5   :  { %5969 = vmatpush.bf16.msra.mxu2 %v8259_v19  ;;  %v10557_v19 = vld [vmem:[#allocation5 + $0x94c] sm:$0xf]  ;;  %v7939_v37 = vor.u32 %v10525_v17, %v7936_v53  ;;  %v8304_v43 = vld [vmem:[#allocation5 + $0xb38] sm:$0xf0] }
 0x2b6   :  { %5983 = vmatpush.bf16.msra.mxu3 %v8387_v27  ;;  %v8192_v27 = vld [vmem:[#allocation5 + $0xa58] sm:$0xf0]  ;;  %v8067_v50 = vor.u32 %v10557_v19, %v8064_v9  ;;  %v10617_v57 = vld [vmem:[#allocation5 + $0xb2c] sm:$0xf] }
 0x2b7   :  { %5942 = vmatpush.bf16.msra.mxu0 %v7987_v25  ;;  %v8195_v24 = vor.u32 %v10589_v15, %v8192_v27  ;;  %v10521_v25 = vld [vmem:[#allocation5 + $0x82c] sm:$0xf]  ;;  %v8032_v3 = vld [vmem:[#allocation5 + $0x918] sm:$0xf0] }
 0x2b8   :  { %5956 = vmatpush.bf16.msra.mxu1 %v8115_v62  ;;  %v7920_v62 = vld [vmem:[#allocation5 + $0x838] sm:$0xf0]  ;;  %v10517_v44 = vld [vmem:[#allocation5 + $0x80c] sm:$0xf] }
 0x2b9   :  { %5970 = vmatpush.bf16.msra.mxu2 %v8243_v29  ;;  %v10553_v29 = vld [vmem:[#allocation5 + $0x92c] sm:$0xf]  ;;  %v7923_v13 = vor.u32 %v10521_v25, %v7920_v62  ;;  %v8160_v12 = vld [vmem:[#allocation5 + $0xa18] sm:$0xf0] }
 0x2ba   :  { %5984 = vmatpush.bf16.msra.mxu3 %v8371_v14  ;;  %v8176_v14 = vld [vmem:[#allocation5 + $0xa38] sm:$0xf0]  ;;  %v10549_v61 = vld [vmem:[#allocation5 + $0x90c] sm:$0xf] }
 0x2bb   :  { %5943 = vmatpush.bf16.msra.mxu0 %v7971_v23  ;;  %v7904_v23 = vld [vmem:[#allocation5 + $0x818] sm:$0xf0]  ;;  %v10581_v7 = vld [vmem:[#allocation5 + $0xa0c] sm:$0xf]  ;;  %v8035_v9 = vor.u32 %v10549_v61, %v8032_v3 }
 0x2bc   :  { %5957 = vmatpush.bf16.msra.mxu1 %v8099_v47  ;;  %v8051_v47 = vor.u32 %v10553_v29, %v8048_v39  ;;  %v10613_v58 = vld [vmem:[#allocation5 + $0xb0c] sm:$0xf]  ;;  %v8288_v8 = vld [vmem:[#allocation5 + $0xb18] sm:$0xf0]  ;;  %v8163_v15 = vor.u32 %v10581_v7, %v8160_v12 }
 0x2bd   :  { %5971 = vmatpush.bf16.msra.mxu2 %v8227_v22  ;;  %v8179_v22 = vor.u32 %v10585_v49, %v8176_v14  ;;  %v10673_v0 = vld [vmem:[#allocation5 + $0xcec] sm:$0xf]  ;;  %v8656_v17 = vld [vmem:[#allocation5 + $0xdf8] sm:$0xf0]  ;;  %v8291_v52 = vor.u32 %v10613_v58, %v8288_v8 }
 0x2be   :  { %5985 = vmatpush.bf16.msra.mxu3 %v8355_v28  ;;  %v8307_v28 = vor.u32 %v10617_v57, %v8304_v43  ;;  %v10737_v53 = vld [vmem:[#allocation5 + $0xeec] sm:$0xf]  ;;  %v8784_v19 = vld [vmem:[#allocation5 + $0xef8] sm:$0xf0]  ;;  %v11678_v43 = vpop.f32.mrf.mxu3 }
 0x2bf   :  { %5944 = vmatpush.bf16.msra.mxu0 %v7955_v1  ;;  %v8528_v1 = vld [vmem:[#allocation5 + $0xcf8] sm:$0xf0]  ;;  %v10769_v27 = vld [vmem:[#allocation5 + $0xfec] sm:$0xf]  ;;  %v8787_v25 = vor.u32 %v10737_v53, %v8784_v19  ;;  %11948 = vst [vmem:[#allocation60_spill] sm:$0xff] %v11678_v43 }
 0x2c0   :  { %5958 = vmatpush.bf16.msra.mxu1 %v8083_v10  ;;  %v10705_v10 = vld [vmem:[#allocation5 + $0xdec] sm:$0xf]  ;;  %v8912_v11 = vld [vmem:[#allocation5 + $0xff8] sm:$0xf0] }
 0x2c1   :  { %5972 = vmatpush.bf16.msra.mxu2 %v8211_v30  ;;  %v7907_v30 = vor.u32 %v10517_v44, %v7904_v23  ;;  %v10669_v62 = vld [vmem:[#allocation5 + $0xccc] sm:$0xf]  ;;  %v8512_v29 = vld [vmem:[#allocation5 + $0xcd8] sm:$0xf0]  ;;  %v8915_v39 = vor.u32 %v10769_v27, %v8912_v11 }
 0x2c2   :  { %5986 = vmatpush.bf16.msra.mxu3 %v8339_v20  ;;  %v11674_v20 = vpop.f32.mrf.mxu2  ;;  %v8640_v49 = vld [vmem:[#allocation5 + $0xdd8] sm:$0xf0]  ;;  %v10733_v14 = vld [vmem:[#allocation5 + $0xecc] sm:$0xf]  ;;  %v8515_v23 = vor.u32 %v10669_v62, %v8512_v29 }
 0x2c3   :  { %5945 = vmatpush.bf16.msra.mxu0 %v7939_v37  ;;  %11947 = vst [vmem:[#allocation59_spill] sm:$0xff] %v11674_v20  ;;  %v8531_v37 = vor.u32 %v10673_v0, %v8528_v1  ;;  %v8768_v57 = vld [vmem:[#allocation5 + $0xed8] sm:$0xf0]  ;;  %v10665_v3 = vld [vmem:[#allocation5 + $0xcac] sm:$0xf] }
 0x2c4   :  { %5959 = vmatpush.bf16.msra.mxu1 %v8067_v50  ;;  %v11676_v50 = vpop.f32.mrf.mxu0  ;;  %v8896_v44 = vld [vmem:[#allocation5 + $0xfd8] sm:$0xf0]  ;;  %v8771_v61 = vor.u32 %v10733_v14, %v8768_v57  ;;  %v10729_v8 = vld [vmem:[#allocation5 + $0xeac] sm:$0xf] }
 0x2c5   :  { %5973 = vmatpush.bf16.msra.mxu2 %v8195_v24  ;;  %v8659_v24 = vor.u32 %v10705_v10, %v8656_v17  ;;  %v8496_v7 = vld [vmem:[#allocation5 + $0xcb8] sm:$0xf0]  ;;  %v10761_v10 = vld [vmem:[#allocation5 + $0xfac] sm:$0xf] }
 0x2c6   :  { %5987 = vmatpush.bf16.msra.mxu3 %v8323_v16  ;;  %v10701_v16 = vld [vmem:[#allocation5 + $0xdcc] sm:$0xf]  ;;  %v8624_v58 = vld [vmem:[#allocation5 + $0xdb8] sm:$0xf0]  ;;  %v8499_v17 = vor.u32 %v10665_v3, %v8496_v7 }
 0x2c7   :  { %5946 = vmatpush.bf16.msra.mxu0 %v7923_v13  ;;  %v10765_v13 = vld [vmem:[#allocation5 + $0xfcc] sm:$0xf]  ;;  %v8752_v0 = vld [vmem:[#allocation5 + $0xeb8] sm:$0xf0] }
 0x2c8   :  { %5960 = vmatpush.bf16.msra.mxu1 %v8051_v47  ;;  %v11680_v47 = vpop.f32.mrf.mxu1  ;;  %v8899_v12 = vor.u32 %v10765_v13, %v8896_v44  ;;  %v10661_v19 = vld [vmem:[#allocation5 + $0xc8c] sm:$0xf]  ;;  %v8608_v11 = vld [vmem:[#allocation5 + $0xd98] sm:$0xf0] }
 0x2c9   :  { %5974 = vmatpush.bf16.msra.mxu2 %v8179_v22  ;;  %v8643_v22 = vor.u32 %v10701_v16, %v8640_v49  ;;  %v10657_v16 = vld [vmem:[#allocation5 + $0xc6c] sm:$0xf]  ;;  %v8592_v57 = vld [vmem:[#allocation5 + $0xd78] sm:$0xf0] }
 0x2ca   :  { %5988 = vmatpush.bf16.msra.mxu3 %v8307_v28  ;;  %v10697_v28 = vld [vmem:[#allocation5 + $0xdac] sm:$0xf]  ;;  %v11683_v1 = vpop.f32.mrf.mxu2  ;;  %v8720_v44 = vld [vmem:[#allocation5 + $0xe78] sm:$0xf0] }
 0x2cb   :  { %5947 = vmatpush.bf16.msra.mxu0 %v7907_v30  ;;  %v8880_v30 = vld [vmem:[#allocation5 + $0xfb8] sm:$0xf0]  ;;  %v8627_v53 = vor.u32 %v10697_v28, %v8624_v58  ;;  %v10689_v49 = vld [vmem:[#allocation5 + $0xd6c] sm:$0xf] }
 0x2cc   :  { %5961 = vmatpush.bf16.msra.mxu1 %v8035_v9  ;;  %v8480_v9 = vld [vmem:[#allocation5 + $0xc98] sm:$0xf0]  ;;  %v8883_v27 = vor.u32 %v10761_v10, %v8880_v30  ;;  %v10721_v13 = vld [vmem:[#allocation5 + $0xe6c] sm:$0xf]  ;;  %v8595_v28 = vor.u32 %v10689_v49, %v8592_v57 }
 0x2cd   :  { %5975 = vmatpush.bf16.msra.mxu2 %v8163_v15  ;;  %v10693_v15 = vld [vmem:[#allocation5 + $0xd8c] sm:$0xf]  ;;  %v8576_v30 = vld [vmem:[#allocation5 + $0xd58] sm:$0xf0] }
 0x2ce   :  { %5989 = vmatpush.bf16.msra.mxu3 %v8291_v52  ;;  %5948 = vmatmul.bf16.vlgmr.msra.gmra.mxu0 %v11434_v31  ;;  %v8755_v31 = vor.u32 %v10729_v8, %v8752_v0  ;;  %v10725_v52 = vld [vmem:[#allocation5 + $0xe8c] sm:$0xf]  ;;  %v8611_v62 = vor.u32 %v10693_v15, %v8608_v11  ;;  %v8448_v8 = vld [vmem:[#allocation5 + $0xc58] sm:$0xf0] }
 0x2cf   :  { %5996 = vmatpush.bf16.msrb.mxu0 %v8531_v37  ;;  %5962 = vmatmul.bf16.vlgmr.msra.gmra.mxu1 %v11438_v36  ;;  %v11688_v37 = vpop.f32.mrf.mxu0  ;;  %v11690_v36 = vpop.f32.mrf.mxu3  ;;  %v10653_v58 = vld [vmem:[#allocation5 + $0xc4c] sm:$0xf]  ;;  %v8816_v49 = vld [vmem:[#allocation5 + $0xf38] sm:$0xf0] }
 0x2d0   :  { %6010 = vmatpush.bf16.msrb.mxu1 %v8659_v24  ;;  %5976 = vmatmul.bf16.vlgmr.msra.gmra.mxu2 %v11436_v35  ;;  %v8736_v35 = vld [vmem:[#allocation5 + $0xe98] sm:$0xf0]  ;;  %v10757_v24 = vld [vmem:[#allocation5 + $0xf8c] sm:$0xf] }
 0x2d1   :  { %6024 = vmatpush.bf16.msrb.mxu2 %v8787_v25  ;;  %5990 = vmatmul.bf16.vlgmr.msra.gmra.mxu3 %v11440_v40  ;;  %v8864_v40 = vld [vmem:[#allocation5 + $0xf98] sm:$0xf0]  ;;  %v8483_v25 = vor.u32 %v10661_v19, %v8480_v9  ;;  %v8739_v29 = vor.u32 %v10725_v52, %v8736_v35  ;;  %v10685_v0 = vld [vmem:[#allocation5 + $0xd4c] sm:$0xf]  ;;  %v8451_v9 = vor.u32 %v10653_v58, %v8448_v8 }
 0x2d2   :  { %6038 = vmatpush.bf16.msrb.mxu3 %v8915_v39  ;;  %v8464_v39 = vld [vmem:[#allocation5 + $0xc78] sm:$0xf0]  ;;  %v8867_v14 = vor.u32 %v10757_v24, %v8864_v40  ;;  %v11694_v7 = vpop.f32.mrf.mxu2  ;;  %v8579_v11 = vor.u32 %v10685_v0, %v8576_v30  ;;  %v10649_v35 = vld [vmem:[#allocation5 + $0xc2c] sm:$0xf] }
 0x2d3   :  { %5997 = vmatpush.bf16.msrb.mxu0 %v8515_v23  ;;  %v11692_v23 = vpop.f32.mrf.mxu1  ;;  %v8467_v3 = vor.u32 %v10657_v16, %v8464_v39  ;;  %v8832_v19 = vld [vmem:[#allocation5 + $0xf58] sm:$0xf0]  ;;  %v10681_v40 = vld [vmem:[#allocation5 + $0xd2c] sm:$0xf] }
 0x2d4   :  { %6011 = vmatpush.bf16.msrb.mxu1 %v8643_v22  ;;  %v10753_v22 = vld [vmem:[#allocation5 + $0xf6c] sm:$0xf]  ;;  %v8432_v24 = vld [vmem:[#allocation5 + $0xc38] sm:$0xf0] }
 0x2d5   :  { %6025 = vmatpush.bf16.msrb.mxu2 %v8771_v61  ;;  %v8848_v61 = vld [vmem:[#allocation5 + $0xf78] sm:$0xf0]  ;;  %v10745_v39 = vld [vmem:[#allocation5 + $0xf2c] sm:$0xf] }
 0x2d6   :  { %6039 = vmatpush.bf16.msrb.mxu3 %v8899_v12  ;;  %v8723_v12 = vor.u32 %v10721_v13, %v8720_v44  ;;  %v8851_v10 = vor.u32 %v10753_v22, %v8848_v61  ;;  %v8688_v16 = vld [vmem:[#allocation5 + $0xe38] sm:$0xf0]  ;;  %v10645_v57 = vld [vmem:[#allocation5 + $0xc0c] sm:$0xf]  ;;  %v8819_v58 = vor.u32 %v10745_v39, %v8816_v49 }
 0x2d7   :  { %5998 = vmatpush.bf16.msrb.mxu0 %v8499_v17  ;;  %v10717_v17 = vld [vmem:[#allocation5 + $0xe4c] sm:$0xf]  ;;  %v11696_v15 = vpop.f32.mrf.mxu3  ;;  %v8416_v13 = vld [vmem:[#allocation5 + $0xc18] sm:$0xf0] }
 0x2d8   :  { %6012 = vmatpush.bf16.msrb.mxu1 %v8627_v53  ;;  %v8704_v53 = vld [vmem:[#allocation5 + $0xe58] sm:$0xf0]  ;;  %v10741_v0 = vld [vmem:[#allocation5 + $0xf0c] sm:$0xf] }
 0x2d9   :  { %6026 = vmatpush.bf16.msrb.mxu2 %v8755_v31  ;;  %v10749_v31 = vld [vmem:[#allocation5 + $0xf4c] sm:$0xf]  ;;  %v8707_v52 = vor.u32 %v10717_v17, %v8704_v53  ;;  %v8672_v8 = vld [vmem:[#allocation5 + $0xe18] sm:$0xf0] }
 0x2da   :  { %6040 = vmatpush.bf16.msrb.mxu3 %v8883_v27  ;;  %v11698_v27 = vpop.f32.mrf.mxu0  ;;  %v11702_v30 = vpop.f32.mrf.mxu2  ;;  %v10801_v17 = vld [vmem:[#allocation5 + $0x10ec] sm:$0xf]  ;;  %v9040_v53 = vld [vmem:[#allocation5 + $0x10f8] sm:$0xf0] }
 0x2db   :  { %5999 = vmatpush.bf16.msrb.mxu0 %v8483_v25  ;;  %v8835_v25 = vor.u32 %v10749_v31, %v8832_v19  ;;  %v11700_v44 = vpop.f32.mrf.mxu1  ;;  %v10833_v31 = vld [vmem:[#allocation5 + $0x11ec] sm:$0xf]  ;;  %v8419_v19 = vor.u32 %v10645_v57, %v8416_v13  ;;  %v9024_v57 = vld [vmem:[#allocation5 + $0x10d8] sm:$0xf0] }
 0x2dc   :  { %6013 = vmatpush.bf16.msrb.mxu1 %v8611_v62  ;;  %v8560_v62 = vld [vmem:[#allocation5 + $0xd38] sm:$0xf0]  ;;  %v10829_v13 = vld [vmem:[#allocation5 + $0x11cc] sm:$0xf] }
 0x2dd   :  { %6027 = vmatpush.bf16.msrb.mxu2 %v8739_v29  ;;  %v10713_v29 = vld [vmem:[#allocation5 + $0xe2c] sm:$0xf]  ;;  %v8563_v22 = vor.u32 %v10681_v40, %v8560_v62 }
 0x2de   :  { %6041 = vmatpush.bf16.msrb.mxu3 %v8867_v14  ;;  %v8435_v14 = vor.u32 %v10649_v35, %v8432_v24  ;;  %v8691_v61 = vor.u32 %v10713_v29, %v8688_v16  ;;  %v10897_v40 = vld [vmem:[#allocation5 + $0x13ec] sm:$0xf]  ;;  %v9043_v29 = vor.u32 %v10801_v17, %v9040_v53  ;;  %v9008_v53 = vld [vmem:[#allocation5 + $0x10b8] sm:$0xf0] }
 0x2df   :  { %6000 = vmatpush.bf16.msrb.mxu0 %v8467_v3  ;;  %v10677_v3 = vld [vmem:[#allocation5 + $0xd0c] sm:$0xf]  ;;  %v11706_v39 = vpop.f32.mrf.mxu3 }
 0x2e0   :  { %6014 = vmatpush.bf16.msrb.mxu1 %v8595_v28  ;;  %v8544_v28 = vld [vmem:[#allocation5 + $0xd18] sm:$0xf0]  ;;  %v10793_v17 = vld [vmem:[#allocation5 + $0x10ac] sm:$0xf] }
 0x2e1   :  { %6028 = vmatpush.bf16.msrb.mxu2 %v8723_v12  ;;  %v10709_v12 = vld [vmem:[#allocation5 + $0xe0c] sm:$0xf]  ;;  %v8547_v35 = vor.u32 %v10677_v3, %v8544_v28  ;;  %v9280_v3 = vld [vmem:[#allocation5 + $0x12d8] sm:$0xf0] }
 0x2e2   :  { %6042 = vmatpush.bf16.msrb.mxu3 %v8851_v10  ;;  %v8800_v10 = vld [vmem:[#allocation5 + $0xf18] sm:$0xf0]  ;;  %v8675_v24 = vor.u32 %v10709_v12, %v8672_v8  ;;  %v11704_v16 = vpop.f32.mrf.mxu0  ;;  %v10893_v28 = vld [vmem:[#allocation5 + $0x13cc] sm:$0xf] }
 0x2e3   :  { %6001 = vmatpush.bf16.msrb.mxu0 %v8451_v9  ;;  %v9168_v9 = vld [vmem:[#allocation5 + $0x11f8] sm:$0xf0]  ;;  %v8803_v62 = vor.u32 %v10741_v0, %v8800_v10  ;;  %v11708_v8 = vpop.f32.mrf.mxu1 }
 0x2e4   :  { %6015 = vmatpush.bf16.msrb.mxu1 %v8579_v11  ;;  %v10865_v11 = vld [vmem:[#allocation5 + $0x12ec] sm:$0xf]  ;;  %v9171_v49 = vor.u32 %v10833_v31, %v9168_v9  ;;  %v9408_v12 = vld [vmem:[#allocation5 + $0x13d8] sm:$0xf0] }
 0x2e5   :  { %6029 = vmatpush.bf16.msrb.mxu2 %v8707_v52  ;;  %v9296_v52 = vld [vmem:[#allocation5 + $0x12f8] sm:$0xf0]  ;;  %v10825_v31 = vld [vmem:[#allocation5 + $0x11ac] sm:$0xf] }
 0x2e6   :  { %6043 = vmatpush.bf16.msrb.mxu3 %v8835_v25  ;;  %v9424_v25 = vld [vmem:[#allocation5 + $0x13f8] sm:$0xf0]  ;;  %v9299_v43 = vor.u32 %v10865_v11, %v9296_v52  ;;  %v10857_v11 = vld [vmem:[#allocation5 + $0x12ac] sm:$0xf] }
 0x2e7   :  { %6002 = vmatpush.bf16.msrb.mxu0 %v8435_v14  ;;  %v10797_v14 = vld [vmem:[#allocation5 + $0x10cc] sm:$0xf]  ;;  %v9427_v20 = vor.u32 %v10897_v40, %v9424_v25  ;;  %v9136_v9 = vld [vmem:[#allocation5 + $0x11b8] sm:$0xf0]  ;;  %v11126_v40 = vld [vmem:[#allocation7] sm:$0xf] }
 0x2e8   :  { %6016 = vmatpush.bf16.msrb.mxu1 %v8563_v22  ;;  %v9152_v22 = vld [vmem:[#allocation5 + $0x11d8] sm:$0xf0]  ;;  %v974_v25 = vperm.slane %v11126_v40, 2  ;;  %v10881_v40 = vld [vmem:[#allocation5 + $0x136c] sm:$0xf] }
 0x2e9   :  { %6030 = vmatpush.bf16.msrb.mxu2 %v8691_v61  ;;  %v10861_v61 = vld [vmem:[#allocation5 + $0x12cc] sm:$0xf]  ;;  %v9155_v0 = vor.u32 %v10829_v13, %v9152_v22  ;;  %v9264_v52 = vld [vmem:[#allocation5 + $0x12b8] sm:$0xf0] }
 0x2ea   :  { %6044 = vmatpush.bf16.msrb.mxu3 %v8819_v58  ;;  %v9027_v58 = vor.u32 %v10797_v14, %v9024_v57  ;;  %v9283_v10 = vor.u32 %v10861_v61, %v9280_v3  ;;  %v8992_v14 = vld [vmem:[#allocation5 + $0x1098] sm:$0xf0]  ;;  %v10821_v57 = vld [vmem:[#allocation5 + $0x118c] sm:$0xf]  ;;  %v11950_v3 = vperm.slane %v11568_v6, 1 }
 0x2eb   :  { %6003 = vmatpush.bf16.msrb.mxu0 %v8419_v19  ;;  %v9411_v19 = vor.u32 %v10893_v28, %v9408_v12  ;;  %v9120_v22 = vld [vmem:[#allocation5 + $0x1198] sm:$0xf0]  ;;  %v10853_v61 = vld [vmem:[#allocation5 + $0x128c] sm:$0xf]  ;;  %v11724_v12 = vpop.f32.mrf.mxu3 }
 0x2ec   :  { %6017 = vmatpush.bf16.msrb.mxu1 %v8547_v35  ;;  %v11711_v35 = vpop.f32.mrf.mxu2  ;;  %v5168_v28 = vadd.f32 %v11579_v2, %v11950_v3  ;;  %v8976_v6 = vld [vmem:[#allocation5 + $0x1078] sm:$0xf0] }
 0x2ed   :  { %6031 = vmatpush.bf16.msrb.mxu2 %v8675_v24  ;;  %v10889_v24 = vld [vmem:[#allocation5 + $0x13ac] sm:$0xf] }
 0x2ee   :  { %6045 = vmatpush.bf16.msrb.mxu3 %v8803_v62  ;;  %6004 = vmatmul.bf16.vlgmr.msrb.gmra.mxu0 %v11446_v32  ;;  %v11716_v62 = vpop.f32.mrf.mxu0  ;;  %v9139_v32 = vor.u32 %v10825_v31, %v9136_v9  ;;  %v10817_v9 = vld [vmem:[#allocation5 + $0x116c] sm:$0xf] }
 0x2ef   :  { %6052 = vmatpush.bf16.msra.mxu0 %v9043_v29  ;;  %6018 = vmatmul.bf16.vlgmr.msrb.gmra.mxu1 %v11450_v41  ;;  %v9267_v29 = vor.u32 %v10857_v11, %v9264_v52  ;;  %v9104_v52 = vld [vmem:[#allocation5 + $0x1178] sm:$0xf0] }
 0x2f0   :  { %6066 = vmatpush.bf16.msra.mxu1 %v9171_v49  ;;  %6032 = vmatmul.bf16.vlgmr.msrb.gmra.mxu2 %v11448_v38  ;;  %v10789_v49 = vld [vmem:[#allocation5 + $0x108c] sm:$0xf]  ;;  %v11949_v38 = vperm.slane %v11466_v4, 0 }
 0x2f1   :  { %6080 = vmatpush.bf16.msra.mxu2 %v9299_v43  ;;  %v9392_v43 = vld [vmem:[#allocation5 + $0x13b8] sm:$0xf0]  ;;  %6046 = vmatmul.bf16.vlgmr.msrb.gmra.mxu3 %v11452_v46  ;;  %v8995_v4 = vor.u32 %v10789_v49, %v8992_v14  ;;  %v10781_v14 = vld [vmem:[#allocation5 + $0x104c] sm:$0xf] }
 0x2f2   :  { %6094 = vmatpush.bf16.msra.mxu3 %v9427_v20  ;;  %v9011_v20 = vor.u32 %v10793_v17, %v9008_v53  ;;  %v4832_v41 = vadd.f32 %v11477_v21, %v11949_v38  ;;  %v9395_v13 = vor.u32 %v10889_v24, %v9392_v43  ;;  %v9248_v46 = vld [vmem:[#allocation5 + $0x1298] sm:$0xf0]  ;;  %v5504_v17 = vadd.f32 %v11688_v37, %v974_v25  ;;  %v11728_v21 = vpop.f32.mrf.mxu1  ;;  %v10849_v24 = vld [vmem:[#allocation5 + $0x126c] sm:$0xf] }
 0x2f3   :  { %6053 = vmatpush.bf16.msra.mxu0 %v9027_v58  ;;  %v10885_v58 = vld [vmem:[#allocation5 + $0x138c] sm:$0xf]  ;;  %v9123_v53 = vor.u32 %v10821_v57, %v9120_v22  ;;  %v9251_v31 = vor.u32 %v10853_v61, %v9248_v46  ;;  %v5182_v37 = vadd.f32 %v11581_v59, %v5168_v28  ;;  %v8960_v57 = vld [vmem:[#allocation5 + $0x1058] sm:$0xf0] }
 0x2f4   :  { %6067 = vmatpush.bf16.msra.mxu1 %v9155_v0  ;;  %v9376_v0 = vld [vmem:[#allocation5 + $0x1398] sm:$0xf0]  ;;  %v4846_v2 = vadd.f32 %v11485_v45, %v4832_v41  ;;  %v11732_v43 = vpop.f32.mrf.mxu2  ;;  %v9107_v45 = vor.u32 %v10817_v9, %v9104_v52  ;;  %v10813_v38 = vld [vmem:[#allocation5 + $0x114c] sm:$0xf] }
 0x2f5   :  { %6081 = vmatpush.bf16.msra.mxu2 %v9283_v10  ;;  %v5502_v10 = vadd.f32 %v11676_v50, %v974_v25  ;;  %v9379_v11 = vor.u32 %v10885_v58, %v9376_v0  ;;  %v9232_v50 = vld [vmem:[#allocation5 + $0x1278] sm:$0xf0]  ;;  %v10845_v22 = vld [vmem:[#allocation5 + $0x124c] sm:$0xf] }
 0x2f6   :  { %6095 = vmatpush.bf16.msra.mxu3 %v9411_v19  ;;  %v10785_v19 = vld [vmem:[#allocation5 + $0x106c] sm:$0xf]  ;;  %v9360_v25 = vld [vmem:[#allocation5 + $0x1378] sm:$0xf0]  ;;  %v9235_v49 = vor.u32 %v10849_v24, %v9232_v50  ;;  %v4860_v41 = vadd.f32 %v11493_v5, %v4846_v2  ;;  %v11738_v3 = vpop.f32.mrf.mxu0  ;;  %v11953_v50 = vld [vmem:[#allocation43_spill] sm:$0xff] }
 0x2f7   :  { %6054 = vmatpush.bf16.msra.mxu0 %v9011_v20  ;;  %v5516_v20 = vadd.f32 %v11680_v47, %v5502_v10  ;;  %v9363_v59 = vor.u32 %v10881_v40, %v9360_v25  ;;  %v9216_v61 = vld [vmem:[#allocation5 + $0x1258] sm:$0xf0]  ;;  %v11951_v46 = vld [vmem:[#allocation42_spill] sm:$0xff] }
 0x2f8   :  { %6068 = vmatpush.bf16.msra.mxu1 %v9139_v32  ;;  %v5518_v32 = vadd.f32 %v11692_v23, %v5504_v17  ;;  %v5196_v47 = vadd.f32 %v11951_v46, %v5182_v37  ;;  %v11740_v23 = vpop.f32.mrf.mxu3  ;;  %v10877_v28 = vld [vmem:[#allocation5 + $0x134c] sm:$0xf]  ;;  %v9344_v58 = vld [vmem:[#allocation5 + $0x1358] sm:$0xf0]  ;;  %v8963_v17 = vor.u32 %v10781_v14, %v8960_v57 }
 0x2f9   :  { %6082 = vmatpush.bf16.msra.mxu2 %v9267_v29  ;;  %v8979_v29 = vor.u32 %v10785_v19, %v8976_v6  ;;  %v5530_v0 = vadd.f32 %v11683_v1, %v5516_v20  ;;  %v10809_v19 = vld [vmem:[#allocation5 + $0x112c] sm:$0xf]  ;;  %v11952_v6 = vld [vmem:[#allocation20_spill] sm:$0xff]  ;;  %v9347_v2 = vor.u32 %v10877_v28, %v9344_v58 }
 0x2fa   :  { %6096 = vmatpush.bf16.msra.mxu3 %v9395_v13  ;;  %v9088_v13 = vld [vmem:[#allocation5 + $0x1158] sm:$0xf0]  ;;  %v5532_v10 = vadd.f32 %v11694_v7, %v5518_v32  ;;  %v4874_v9 = vadd.f32 %v11952_v6, %v4860_v41  ;;  %v10841_v52 = vld [vmem:[#allocation5 + $0x122c] sm:$0xf]  ;;  %v5210_v1 = vadd.f32 %v11953_v50, %v5196_v47  ;;  %v11746_v37 = vpop.f32.mrf.mxu1 }
 0x2fb   :  { %6055 = vmatpush.bf16.msra.mxu0 %v8995_v4  ;;  %v9091_v5 = vor.u32 %v10813_v38, %v9088_v13  ;;  %v9219_v4 = vor.u32 %v10845_v22, %v9216_v61  ;;  %v9200_v24 = vld [vmem:[#allocation5 + $0x1238] sm:$0xf0]  ;;  %v10873_v7 = vld [vmem:[#allocation5 + $0x132c] sm:$0xf]  ;;  %v5544_v25 = vadd.f32 %v11690_v36, %v5530_v0  ;;  %v11954_v13 = vld [vmem:[#allocation21_spill] sm:$0xff] }
 0x2fc   :  { %6069 = vmatpush.bf16.msra.mxu1 %v9123_v53  ;;  %v10777_v53 = vld [vmem:[#allocation5 + $0x102c] sm:$0xf]  ;;  %v9328_v40 = vld [vmem:[#allocation5 + $0x1338] sm:$0xf0]  ;;  %v5546_v20 = vadd.f32 %v11696_v15, %v5532_v10  ;;  %v9203_v57 = vor.u32 %v10841_v52, %v9200_v24  ;;  %v4888_v22 = vadd.f32 %v11954_v13, %v4874_v9 }
 0x2fd   :  { %6083 = vmatpush.bf16.msra.mxu2 %v9251_v31  ;;  %v8944_v31 = vld [vmem:[#allocation5 + $0x1038] sm:$0xf0]  ;;  %v10805_v38 = vld [vmem:[#allocation5 + $0x110c] sm:$0xf]  ;;  %v9331_v61 = vor.u32 %v10873_v7, %v9328_v40  ;;  %v11957_v40 = vld [vmem:[#allocation45_spill] sm:$0xff] }
 0x2fe   :  { %6097 = vmatpush.bf16.msra.mxu3 %v9379_v11  ;;  %v9072_v11 = vld [vmem:[#allocation5 + $0x1138] sm:$0xf0]  ;;  %v8947_v32 = vor.u32 %v10777_v53, %v8944_v31  ;;  %v10869_v46 = vld [vmem:[#allocation5 + $0x130c] sm:$0xf]  ;;  %v11754_v58 = vpop.f32.mrf.mxu0 }
 0x2ff   :  { %6056 = vmatpush.bf16.msra.mxu0 %v8979_v29  ;;  %v10773_v29 = vld [vmem:[#allocation5 + $0x100c] sm:$0xf]  ;;  %v9075_v14 = vor.u32 %v10809_v19, %v9072_v11  ;;  %v9056_v41 = vld [vmem:[#allocation5 + $0x1118] sm:$0xf0] }
 0x300   :  { %6070 = vmatpush.bf16.msra.mxu1 %v9107_v45  ;;  %v8928_v45 = vld [vmem:[#allocation5 + $0x1018] sm:$0xf0]  ;;  %v10929_v0 = vld [vmem:[#allocation5 + $0x14ec] sm:$0xf]  ;;  %v11758_v9 = vpop.f32.mrf.mxu3 }
 0x301   :  { %6084 = vmatpush.bf16.msra.mxu2 %v9235_v49  ;;  %v11750_v49 = vpop.f32.mrf.mxu2  ;;  %v9184_v36 = vld [vmem:[#allocation5 + $0x1218] sm:$0xf0]  ;;  %v8931_v53 = vor.u32 %v10773_v29, %v8928_v45  ;;  %v10993_v19 = vld [vmem:[#allocation5 + $0x16ec] sm:$0xf] }
 0x302   :  { %6098 = vmatpush.bf16.msra.mxu3 %v9363_v59  ;;  %v10837_v59 = vld [vmem:[#allocation5 + $0x120c] sm:$0xf]  ;;  %v9312_v15 = vld [vmem:[#allocation5 + $0x1318] sm:$0xf0] }
 0x303   :  { %6057 = vmatpush.bf16.msra.mxu0 %v8963_v17  ;;  %v11955_v47 = vld [vmem:[#allocation44_spill] sm:$0xff]  ;;  %v10961_v17 = vld [vmem:[#allocation5 + $0x15ec] sm:$0xf]  ;;  %v9187_v11 = vor.u32 %v10837_v59, %v9184_v36  ;;  %v9315_v7 = vor.u32 %v10869_v46, %v9312_v15 }
 0x304   :  { %6071 = vmatpush.bf16.msra.mxu1 %v9091_v5  ;;  %v5224_v28 = vadd.f32 %v11955_v47, %v5210_v1  ;;  %v9552_v10 = vld [vmem:[#allocation5 + $0x14f8] sm:$0xf0]  ;;  %v5558_v5 = vadd.f32 %v11698_v27, %v5544_v25  ;;  %v11025_v52 = vld [vmem:[#allocation5 + $0x17ec] sm:$0xf]  ;;  %v11762_v25 = vpop.f32.mrf.mxu1 }
 0x305   :  { %6085 = vmatpush.bf16.msra.mxu2 %v9219_v4  ;;  %v5560_v4 = vadd.f32 %v11704_v16, %v5546_v20  ;;  %v9680_v31 = vld [vmem:[#allocation5 + $0x15f8] sm:$0xf0]  ;;  %v11956_v50 = vld [vmem:[#allocation22_spill] sm:$0xff]  ;;  %v9555_v27 = vor.u32 %v10929_v0, %v9552_v10 }
 0x306   :  { %6099 = vmatpush.bf16.msra.mxu3 %v9347_v2  ;;  %v9808_v6 = vld [vmem:[#allocation5 + $0x16f8] sm:$0xf0]  ;;  %v9059_v2 = vor.u32 %v10805_v38, %v9056_v41  ;;  %v4902_v1 = vadd.f32 %v11956_v50, %v4888_v22  ;;  %v5238_v16 = vadd.f32 %v11957_v40, %v5224_v28  ;;  %v9683_v20 = vor.u32 %v10961_v17, %v9680_v31  ;;  %v10925_v29 = vld [vmem:[#allocation5 + $0x14cc] sm:$0xf] }
 0x307   :  { %6058 = vmatpush.bf16.msra.mxu0 %v8947_v32  ;;  %v9936_v24 = vld [vmem:[#allocation5 + $0x17f8] sm:$0xf0]  ;;  %v9811_v32 = vor.u32 %v10993_v19, %v9808_v6  ;;  %v10957_v13 = vld [vmem:[#allocation5 + $0x15cc] sm:$0xf]  ;;  %v5572_v38 = vadd.f32 %v11700_v44, %v5558_v5  ;;  %v5574_v41 = vadd.f32 %v11708_v8, %v5560_v4 }
 0x308   :  { %6072 = vmatpush.bf16.msra.mxu1 %v9075_v14  ;;  %v9536_v45 = vld [vmem:[#allocation5 + $0x14d8] sm:$0xf0]  ;;  %v11958_v14 = vld [vmem:[#allocation23_spill] sm:$0xff]  ;;  %v9939_v59 = vor.u32 %v11025_v52, %v9936_v24  ;;  %v11959_v46 = vld [vmem:[#allocation46_spill] sm:$0xff] }
 0x309   :  { %6086 = vmatpush.bf16.msra.mxu2 %v9203_v57  ;;  %v4916_v57 = vadd.f32 %v11958_v14, %v4902_v1  ;;  %v9664_v22 = vld [vmem:[#allocation5 + $0x15d8] sm:$0xf0]  ;;  %v5252_v15 = vadd.f32 %v11959_v46, %v5238_v16  ;;  %v11768_v47 = vpop.f32.mrf.mxu2  ;;  %v11021_v28 = vld [vmem:[#allocation5 + $0x17cc] sm:$0xf]  ;;  %v5588_v10 = vadd.f32 %v11711_v35, %v5574_v41  ;;  %v9539_v44 = vor.u32 %v10925_v29, %v9536_v45  ;;  %v11961_v24 = vld [vmem:[#allocation47_spill] sm:$0xff]  ;;  %v11775_v1 = vpop.f32.mrf.mxu0 }
 0x30a   :  { %6100 = vmatpush.bf16.msra.mxu3 %v9331_v61  ;;  %v10989_v61 = vld [vmem:[#allocation5 + $0x16cc] sm:$0xf]  ;;  %v9792_v36 = vld [vmem:[#allocation5 + $0x16d8] sm:$0xf0]  ;;  %v9667_v8 = vor.u32 %v10957_v13, %v9664_v22  ;;  %v5586_v6 = vadd.f32 %v11702_v30, %v5572_v38  ;;  %v11962_v30 = vld [vmem:[#allocation25_spill] sm:$0xff] }
 0x30b   :  { %6059 = vmatpush.bf16.msra.mxu0 %v8931_v53  ;;  %v9920_v0 = vld [vmem:[#allocation5 + $0x17d8] sm:$0xf0]  ;;  %v9795_v17 = vor.u32 %v10989_v61, %v9792_v36  ;;  %v10921_v5 = vld [vmem:[#allocation5 + $0x14ac] sm:$0xf]  ;;  %v5266_v50 = vadd.f32 %v11961_v24, %v5252_v15 }
 0x30c   :  { %6073 = vmatpush.bf16.msra.mxu1 %v9059_v2  ;;  %v9520_v4 = vld [vmem:[#allocation5 + $0x14b8] sm:$0xf0]  ;;  %v10953_v53 = vld [vmem:[#allocation5 + $0x15ac] sm:$0xf]  ;;  %v9923_v2 = vor.u32 %v11021_v28, %v9920_v0  ;;  %v11787_v22 = vpop.f32.mrf.mxu1 }
 0x30d   :  { %6087 = vmatpush.bf16.msra.mxu2 %v9187_v11  ;;  %v11960_v31 = vld [vmem:[#allocation24_spill] sm:$0xff]  ;;  %v10985_v35 = vld [vmem:[#allocation5 + $0x16ac] sm:$0xf] }
 0x30e   :  { %6101 = vmatpush.bf16.msra.mxu3 %v9315_v7  ;;  %v4930_v19 = vadd.f32 %v11960_v31, %v4916_v57  ;;  %6060 = vmatmul.bf16.vlgmr.msra.gmra.mxu0 %v11458_v51  ;;  %v9648_v11 = vld [vmem:[#allocation5 + $0x15b8] sm:$0xf0]  ;;  %v11777_v7 = vpop.f32.mrf.mxu3  ;;  %v5602_v51 = vadd.f32 %v11724_v12, %v5588_v10  ;;  %v10917_v14 = vld [vmem:[#allocation5 + $0x148c] sm:$0xf]  ;;  %v11965_v10 = vld [vmem:[#allocation49_spill] sm:$0xff] }
 0x30f   :  { %6108 = vmatpush.bf16.msrb.mxu0 %v9555_v27  ;;  %v9776_v52 = vld [vmem:[#allocation5 + $0x16b8] sm:$0xf0]  ;;  %6074 = vmatmul.bf16.vlgmr.msra.gmra.mxu1 %v11462_v56  ;;  %v11017_v27 = vld [vmem:[#allocation5 + $0x17ac] sm:$0xf]  ;;  %v9651_v45 = vor.u32 %v10953_v53, %v9648_v11  ;;  %v5600_v56 = vadd.f32 %v11706_v39, %v5586_v6  ;;  %v11966_v53 = vld [vmem:[#allocation27_spill] sm:$0xff] }
 0x310   :  { %6122 = vmatpush.bf16.msrb.mxu1 %v9683_v20  ;;  %6088 = vmatmul.bf16.vlgmr.msra.gmra.mxu2 %v11460_v55  ;;  %v9904_v40 = vld [vmem:[#allocation5 + $0x17b8] sm:$0xf0]  ;;  %v4944_v16 = vadd.f32 %v11962_v30, %v4930_v19  ;;  %v9523_v20 = vor.u32 %v10921_v5, %v9520_v4  ;;  %v9779_v13 = vor.u32 %v10985_v35, %v9776_v52  ;;  %v10949_v57 = vld [vmem:[#allocation5 + $0x158c] sm:$0xf] }
 0x311   :  { %6136 = vmatpush.bf16.msrb.mxu2 %v9811_v32  ;;  %6102 = vmatmul.bf16.vlgmr.msra.gmra.mxu3 %v11464_v60  ;;  %v11963_v32 = vld [vmem:[#allocation48_spill] sm:$0xff]  ;;  %v5616_v38 = vadd.f32 %v11738_v3, %v5602_v51  ;;  %v9907_v41 = vor.u32 %v11017_v27, %v9904_v40  ;;  %v11013_v61 = vld [vmem:[#allocation5 + $0x178c] sm:$0xf]  ;;  %v5614_v28 = vadd.f32 %v11716_v62, %v5600_v56  ;;  %v11792_v39 = vpop.f32.mrf.mxu2  ;;  %v11797_v24 = vpop.f32.mrf.mxu0 }
 0x312   :  { %6150 = vmatpush.bf16.msrb.mxu3 %v9939_v59  ;;  %v5280_v29 = vadd.f32 %v11963_v32, %v5266_v50  ;;  %v9504_v55 = vld [vmem:[#allocation5 + $0x1498] sm:$0xf0]  ;;  %v10981_v59 = vld [vmem:[#allocation5 + $0x168c] sm:$0xf] }
 0x313   :  { %6109 = vmatpush.bf16.msrb.mxu0 %v9539_v44  ;;  %v9632_v12 = vld [vmem:[#allocation5 + $0x1598] sm:$0xf0]  ;;  %v11964_v46 = vld [vmem:[#allocation26_spill] sm:$0xff]  ;;  %v9507_v0 = vor.u32 %v10917_v14, %v9504_v55  ;;  %v5630_v19 = vadd.f32 %v11746_v37, %v5616_v38  ;;  %v5628_v40 = vadd.f32 %v11728_v21, %v5614_v28  ;;  %v11969_v38 = vld [vmem:[#allocation51_spill] sm:$0xff] }
 0x314   :  { %6123 = vmatpush.bf16.msrb.mxu1 %v9667_v8  ;;  %v9760_v60 = vld [vmem:[#allocation5 + $0x1698] sm:$0xf0]  ;;  %v4958_v15 = vadd.f32 %v11964_v46, %v4944_v16  ;;  %v5294_v44 = vadd.f32 %v11965_v10, %v5280_v29  ;;  %v9635_v3 = vor.u32 %v10949_v57, %v9632_v12  ;;  %v10945_v4 = vld [vmem:[#allocation5 + $0x156c] sm:$0xf]  ;;  %v11806_v12 = vpop.f32.mrf.mxu1 }
 0x315   :  { %6137 = vmatpush.bf16.msrb.mxu2 %v9795_v17  ;;  %v9888_v36 = vld [vmem:[#allocation5 + $0x1798] sm:$0xf0]  ;;  %v9763_v8 = vor.u32 %v10981_v59, %v9760_v60  ;;  %v10913_v17 = vld [vmem:[#allocation5 + $0x146c] sm:$0xf]  ;;  %v5644_v30 = vadd.f32 %v11750_v49, %v5630_v19  ;;  %v5642_v55 = vadd.f32 %v11732_v43, %v5628_v40  ;;  %v11973_v40 = vld [vmem:[#allocation53_spill] sm:$0xff] }
 0x316   :  { %6151 = vmatpush.bf16.msrb.mxu3 %v9923_v2  ;;  %v9488_v5 = vld [vmem:[#allocation5 + $0x1478] sm:$0xf0]  ;;  %v4972_v31 = vadd.f32 %v11966_v53, %v4958_v15  ;;  %v9891_v6 = vor.u32 %v11013_v61, %v9888_v36  ;;  %v10977_v2 = vld [vmem:[#allocation5 + $0x166c] sm:$0xf]  ;;  %v11801_v51 = vpop.f32.mrf.mxu3  ;;  %v11970_v61 = vld [vmem:[#allocation29_spill] sm:$0xff] }
 0x317   :  { %6110 = vmatpush.bf16.msrb.mxu0 %v9523_v20  ;;  %v9616_v62 = vld [vmem:[#allocation5 + $0x1578] sm:$0xf0]  ;;  %v11967_v35 = vld [vmem:[#allocation50_spill] sm:$0xff]  ;;  %v9491_v16 = vor.u32 %v10913_v17, %v9488_v5  ;;  %v5658_v46 = vadd.f32 %v11758_v9, %v5644_v30  ;;  %v5656_v5 = vadd.f32 %v11740_v23, %v5642_v55 }
 0x318   :  { %6124 = vmatpush.bf16.msrb.mxu1 %v9651_v45  ;;  %v9744_v11 = vld [vmem:[#allocation5 + $0x1678] sm:$0xf0]  ;;  %v5308_v52 = vadd.f32 %v11967_v35, %v5294_v44  ;;  %v11009_v50 = vld [vmem:[#allocation5 + $0x176c] sm:$0xf]  ;;  %v9619_v37 = vor.u32 %v10945_v4, %v9616_v62 }
 0x319   :  { %6138 = vmatpush.bf16.msrb.mxu2 %v9779_v13  ;;  %v9872_v27 = vld [vmem:[#allocation5 + $0x1778] sm:$0xf0]  ;;  %v9747_v20 = vor.u32 %v10977_v2, %v9744_v11  ;;  %v10909_v32 = vld [vmem:[#allocation5 + $0x144c] sm:$0xf]  ;;  %v11811_v43 = vpop.f32.mrf.mxu2  ;;  %v5672_v4 = vadd.f32 %v11775_v1, %v5658_v46  ;;  %v5670_v35 = vadd.f32 %v11754_v58, %v5656_v5  ;;  %v5727_v23 = vpop.f32.mrf.mxu0 }
 0x31a   :  { %6152 = vmatpush.bf16.msrb.mxu3 %v9907_v41  ;;  %v9472_v29 = vld [vmem:[#allocation5 + $0x1458] sm:$0xf0]  ;;  %v10941_v45 = vld [vmem:[#allocation5 + $0x154c] sm:$0xf]  ;;  %v9875_v57 = vor.u32 %v11009_v50, %v9872_v27  ;;  %v5322_v41 = vadd.f32 %v11969_v38, %v5308_v52  ;;  %v9998_v38 = vld [vmem:[#allocation8 + $0x70] sm:$0xf] }
 0x31b   :  { %6111 = vmatpush.bf16.msrb.mxu0 %v9507_v0  ;;  %v11968_v13 = vld [vmem:[#allocation28_spill] sm:$0xff]  ;;  %v10973_v56 = vld [vmem:[#allocation5 + $0x164c] sm:$0xf]  ;;  %v9475_v15 = vor.u32 %v10909_v32, %v9472_v29  ;;  %v5686_v58 = vadd.f32 %v11787_v22, %v5672_v4 }
 0x31c   :  { %6125 = vmatpush.bf16.msrb.mxu1 %v9635_v3  ;;  %v4986_v14 = vadd.f32 %v11968_v13, %v4972_v31  ;;  %v9600_v21 = vld [vmem:[#allocation5 + $0x1558] sm:$0xf0]  ;;  %v11005_v59 = vld [vmem:[#allocation5 + $0x174c] sm:$0xf]  ;;  %v5741_v22 = vpop.f32.mrf.mxu1 }
 0x31d   :  { %6139 = vmatpush.bf16.msrb.mxu2 %v9763_v8  ;;  %v9728_v49 = vld [vmem:[#allocation5 + $0x1658] sm:$0xf0]  ;;  %v9603_v10 = vor.u32 %v10941_v45, %v9600_v21  ;;  %v10905_v3 = vld [vmem:[#allocation5 + $0x142c] sm:$0xf]  ;;  %v11974_v45 = vld [vmem:[#allocation31_spill] sm:$0xff] }
 0x31e   :  { %6153 = vmatpush.bf16.msrb.mxu3 %v9891_v6  ;;  %v9856_v60 = vld [vmem:[#allocation5 + $0x1758] sm:$0xf0]  ;;  %v5000_v36 = vadd.f32 %v11970_v61, %v4986_v14  ;;  %v9731_v44 = vor.u32 %v10973_v56, %v9728_v49  ;;  %v10937_v17 = vld [vmem:[#allocation5 + $0x152c] sm:$0xf]  ;;  %v5700_v61 = vadd.f32 %v11792_v39, %v5686_v58 }
 0x31f   :  { %6112 = vmatpush.bf16.msrb.mxu0 %v9491_v16  ;;  %v11971_v28 = vld [vmem:[#allocation52_spill] sm:$0xff]  ;;  %v9859_v53 = vor.u32 %v11005_v59, %v9856_v60  ;;  %v10969_v31 = vld [vmem:[#allocation5 + $0x162c] sm:$0xf]  ;;  %v11818_v16 = vpop.f32.mrf.mxu3  ;;  %v10062_v59 = vld [vmem:[#allocation8 + $0xf0] sm:$0xf]  ;;  %v5684_v60 = vadd.f32 %v11762_v25, %v5670_v35 }
 0x320   :  { %v5336_v0 = vadd.f32 %v11971_v28, %v5322_v41  ;;  %6126 = vmatpush.bf16.msrb.mxu1 %v9619_v37  ;;  %v9456_v8 = vld [vmem:[#allocation5 + $0x1438] sm:$0xf0]  ;;  %v11001_v6 = vld [vmem:[#allocation5 + $0x172c] sm:$0xf]  ;;  %v11977_v25 = vld [vmem:[#allocation55_spill] sm:$0xff] }
 0x321   :  { %6140 = vmatpush.bf16.msrb.mxu2 %v9747_v20  ;;  %v9584_v9 = vld [vmem:[#allocation5 + $0x1538] sm:$0xf0]  ;;  %v11972_v2 = vld [vmem:[#allocation30_spill] sm:$0xff]  ;;  %v9459_v52 = vor.u32 %v10905_v3, %v9456_v8  ;;  %v5698_v8 = vadd.f32 %v11768_v47, %v5684_v60  ;;  %v5755_v39 = vpop.f32.mrf.mxu2 }
 0x322   :  { %6154 = vmatpush.bf16.msrb.mxu3 %v9875_v57  ;;  %v9712_v19 = vld [vmem:[#allocation5 + $0x1638] sm:$0xf0]  ;;  %v5014_v11 = vadd.f32 %v11972_v2, %v5000_v36  ;;  %v10901_v50 = vld [vmem:[#allocation5 + $0x140c] sm:$0xf]  ;;  %v5350_v30 = vadd.f32 %v11973_v40, %v5336_v0  ;;  %v9587_v1 = vor.u32 %v10937_v17, %v9584_v9 }
 0x323   :  { %v9840_v62 = vld [vmem:[#allocation5 + $0x1738] sm:$0xf0]  ;;  %6113 = vmatpush.bf16.msrb.mxu0 %v9475_v15  ;;  %v9715_v37 = vor.u32 %v10969_v31, %v9712_v19  ;;  %v10933_v20 = vld [vmem:[#allocation5 + $0x150c] sm:$0xf]  ;;  %v10126_v15 = vld [vmem:[#allocation8 + $0x170] sm:$0xf]  ;;  %v5712_v40 = vadd.f32 %v11777_v7, %v5698_v8 }
 0x324   :  { %v9440_v27 = vld [vmem:[#allocation5 + $0x1418] sm:$0xf0]  ;;  %6127 = vmatpush.bf16.msrb.mxu1 %v9603_v10  ;;  %v10965_v29 = vld [vmem:[#allocation5 + $0x160c] sm:$0xf]  ;;  %v5028_v13 = vadd.f32 %v11974_v45, %v5014_v11  ;;  %v9843_v14 = vor.u32 %v11001_v6, %v9840_v62  ;;  %v9990_v31 = vld [vmem:[#allocation8 + $0x60] sm:$0xf]  ;;  %v5714_v11 = vadd.f32 %v11801_v51, %v5700_v61 }
 0x325   :  { %6141 = vmatpush.bf16.msrb.mxu2 %v9731_v44  ;;  %v9568_v32 = vld [vmem:[#allocation5 + $0x1518] sm:$0xf0]  ;;  %v10997_v57 = vld [vmem:[#allocation5 + $0x170c] sm:$0xf]  ;;  %v9443_v36 = vor.u32 %v10901_v50, %v9440_v27  ;;  %v10054_v6 = vld [vmem:[#allocation8 + $0xe0] sm:$0xf]  ;;  %v11831_v27 = vpop.f32.mrf.mxu0  ;;  %v5726_v58 = vadd.f32 %v11797_v24, %v5712_v40 }
 0x326   :  { %6155 = vmatpush.bf16.msrb.mxu3 %v9859_v53  ;;  %v9696_v55 = vld [vmem:[#allocation5 + $0x1618] sm:$0xf0]  ;;  %v11975_v56 = vld [vmem:[#allocation54_spill] sm:$0xff]  ;;  %v9571_v0 = vor.u32 %v10933_v20, %v9568_v32  ;;  %v11978_v62 = vld [vmem:[#allocation33_spill] sm:$0xff] }
 0x327   :  { %v9824_v21 = vld [vmem:[#allocation5 + $0x1718] sm:$0xf0]  ;;  %v5364_v49 = vadd.f32 %v11975_v56, %v5350_v30  ;;  %6114 = vmatpush.bf16.msrb.mxu0 %v9459_v52  ;;  %v9699_v10 = vor.u32 %v10965_v29, %v9696_v55  ;;  %v11041_v19 = vld [vmem:[#allocation8 + $0x64] sm:$0xf0]  ;;  %v10118_v52 = vld [vmem:[#allocation8 + $0x160] sm:$0xf]  ;;  %v5728_v30 = vadd.f32 %v5727_v23, %v5714_v11 }
 0x328   :  { %v11043_v41 = vld [vmem:[#allocation8 + $0x74] sm:$0xf0]  ;;  %6128 = vmatpush.bf16.msrb.mxu1 %v9587_v1  ;;  %v9827_v17 = vor.u32 %v10997_v57, %v9824_v21  ;;  %v11057_v35 = vld [vmem:[#allocation8 + $0xe4] sm:$0xf0]  ;;  %v9991_v1 = vor.u32 %v11041_v19, %v9990_v31  ;;  %v9982_v32 = vld [vmem:[#allocation8 + $0x50] sm:$0xf]  ;;  %v11839_v57 = vpop.f32.mrf.mxu1 }
 0x329   :  { %v11059_v46 = vld [vmem:[#allocation8 + $0xf4] sm:$0xf0]  ;;  %6142 = vmatpush.bf16.msrb.mxu2 %v9715_v37  ;;  %v9999_v5 = vor.u32 %v11043_v41, %v9998_v38  ;;  %v5378_v4 = vadd.f32 %v11977_v25, %v5364_v49  ;;  %v11073_v50 = vld [vmem:[#allocation8 + $0x164] sm:$0xf0]  ;;  %v5769_v37 = vpop.f32.mrf.mxu3  ;;  %v10055_v51 = vor.u32 %v11057_v35, %v10054_v6  ;;  %v10046_v45 = vld [vmem:[#allocation8 + $0xd0] sm:$0xf]  ;;  %v5742_v49 = vadd.f32 %v5741_v22, %v5728_v30  ;;  %v11845_v41 = vpop.f32.mrf.mxu2 }
 0x32a   :  { %v11075_v28 = vld [vmem:[#allocation8 + $0x174] sm:$0xf0]  ;;  %6156 = vmatpush.bf16.msrb.mxu3 %v9843_v14  ;;  %v10063_v53 = vor.u32 %v11059_v46, %v10062_v59  ;;  %v10119_v20 = vor.u32 %v11073_v50, %v10118_v52  ;;  %v10110_v23 = vld [vmem:[#allocation8 + $0x150] sm:$0xf]  ;;  %v11037_v60 = vld [vmem:[#allocation8 + $0x44] sm:$0xf0] }
 0x32b   :  { %v11976_v44 = vld [vmem:[#allocation32_spill] sm:$0xff]  ;;  %v10127_v9 = vor.u32 %v11075_v28, %v10126_v15  ;;  %6115 = vmatpush.bf16.msrb.mxu0 %v9443_v36  ;;  %v5392_v47 = vadd.f32 %v11639_v54, %v5378_v4  ;;  %v11980_v21 = vld [vmem:[#allocation35_spill] sm:$0xff]  ;;  %v10038_v61 = vld [vmem:[#allocation8 + $0xc0] sm:$0xf]  ;;  %v5756_v36 = vadd.f32 %v5755_v39, %v5742_v49 }
 0x32c   :  { %v5042_v3 = vadd.f32 %v11976_v44, %v5028_v13  ;;  %6129 = vmatpush.bf16.msrb.mxu1 %v9571_v0  ;;  %v11039_v29 = vld [vmem:[#allocation8 + $0x54] sm:$0xf0]  ;;  %v11979_v13 = vld [vmem:[#allocation34_spill] sm:$0xff]  ;;  %v10102_v46 = vld [vmem:[#allocation8 + $0x140] sm:$0xf] }
 0x32d   :  { %6143 = vmatpush.bf16.msrb.mxu2 %v9699_v10  ;;  %v11055_v7 = vld [vmem:[#allocation8 + $0xd4] sm:$0xf0]  ;;  %v5406_v55 = vadd.f32 %v11641_v42, %v5392_v47  ;;  %v9983_v24 = vor.u32 %v11039_v29, %v9982_v32  ;;  %v9974_v42 = vld [vmem:[#allocation8 + $0x40] sm:$0xf]  ;;  %v11069_v15 = vld [vmem:[#allocation8 + $0x144] sm:$0xf0]  ;;  %v5783_v8 = vpop.f32.mrf.mxu0  ;;  %v5770_v31 = vadd.f32 %v5769_v37, %v5756_v36 }
 0x32e   :  { %v5056_v2 = vadd.f32 %v11978_v62, %v5042_v3  ;;  %6157 = vmatpush.bf16.msrb.mxu3 %v9827_v17  ;;  %6116 = vmatmul.bf16.vlgmr.msrb.gmra.mxu0 %v11479_v26  ;;  %v11071_v14 = vld [vmem:[#allocation8 + $0x154] sm:$0xf0]  ;;  %v9975_v10 = vor.u32 %v11037_v60, %v9974_v42  ;;  %v11983_v44 = vld [vmem:[#allocation57_spill] sm:$0xff]  ;;  %v10103_v25 = vor.u32 %v11069_v15, %v10102_v46  ;;  %v10030_v39 = vld [vmem:[#allocation8 + $0xb0] sm:$0xf] }
 0x32f   :  { %6566 = vmatpush.bf16.msra.mxu0 %v9999_v5  ;;  %6130 = vmatmul.bf16.vlgmr.msrb.gmra.mxu1 %v11483_v34  ;;  %v11981_v38 = vld [vmem:[#allocation56_spill] sm:$0xff]  ;;  %v10047_v34 = vor.u32 %v11055_v7, %v10046_v45  ;;  %v10111_v59 = vor.u32 %v11071_v14, %v10110_v23  ;;  %v10094_v6 = vld [vmem:[#allocation8 + $0x130] sm:$0xf]  ;;  %v5784_v11 = vadd.f32 %v5783_v8, %v5770_v31  ;;  %v9958_v40 = vld [vmem:[#allocation8 + $0x20] sm:$0xf] }
 0x330   :  { %6580 = vmatpush.bf16.msra.mxu1 %v10063_v53  ;;  %v5070_v54 = vadd.f32 %v11979_v13, %v5056_v2  ;;  %6144 = vmatmul.bf16.vlgmr.msrb.gmra.mxu2 %v11481_v33  ;;  %v5420_v26 = vadd.f32 %v11981_v38, %v5406_v55  ;;  %v5740_v33 = vadd.f32 %v11806_v12, %v5726_v58  ;;  %v11982_v28 = vld [vmem:[#allocation36_spill] sm:$0xff]  ;;  %v9966_v12 = vld [vmem:[#allocation8 + $0x30] sm:$0xf]  ;;  %v11984_v53 = vld [vmem:[#allocation38_spill] sm:$0xff]  ;;  %v5797_v52 = vpop.f32.mrf.mxu1 }
 0x331   :  { %6594 = vmatpush.bf16.msra.mxu2 %v10127_v9  ;;  %6158 = vmatmul.bf16.vlgmr.msrb.gmra.mxu3 %v11487_v48  ;;  %v11053_v48 = vld [vmem:[#allocation8 + $0xc4] sm:$0xf0]  ;;  %v11851_v17 = vpop.f32.mrf.mxu3  ;;  %v11035_v4 = vld [vmem:[#allocation8 + $0x34] sm:$0xf0]  ;;  %v10086_v29 = vld [vmem:[#allocation8 + $0x120] sm:$0xf]  ;;  %v5811_v45 = vpop.f32.mrf.mxu2  ;;  %v5798_v58 = vadd.f32 %v5797_v52, %v5784_v11 }
 0x332   :  { %v5084_v56 = vadd.f32 %v11980_v21, %v5070_v54  ;;  %v5754_v0 = vadd.f32 %v11811_v43, %v5740_v33  ;;  %v5434_v3 = vadd.f32 %v11983_v44, %v5420_v26  ;;  %v10039_v5 = vor.u32 %v11053_v48, %v10038_v61  ;;  %v11051_v19 = vld [vmem:[#allocation8 + $0xb4] sm:$0xf0]  ;;  %v11033_v30 = vld [vmem:[#allocation8 + $0x24] sm:$0xf0]  ;;  %v11987_v23 = vld [vmem:[#allocation59_spill] sm:$0xff] }
 0x333   :  { %6567 = vmatpush.bf16.msra.mxu0 %v9991_v1  ;;  %v11067_v43 = vld [vmem:[#allocation8 + $0x134] sm:$0xf0]  ;;  %v9967_v35 = vor.u32 %v11035_v4, %v9966_v12  ;;  %v10031_v50 = vor.u32 %v11051_v19, %v10030_v39  ;;  %v10022_v1 = vld [vmem:[#allocation8 + $0xa0] sm:$0xf]  ;;  %v11049_v32 = vld [vmem:[#allocation8 + $0xa4] sm:$0xf0]  ;;  %v9959_v7 = vor.u32 %v11033_v30, %v9958_v40  ;;  %v5812_v38 = vadd.f32 %v5811_v45, %v5798_v58 }
 0x334   :  { %6581 = vmatpush.bf16.msra.mxu1 %v10055_v51  ;;  %v5098_v22 = vadd.f32 %v11982_v28, %v5084_v56  ;;  %v5448_v62 = vadd.f32 %v11670_v18, %v5434_v3  ;;  %v5768_v2 = vadd.f32 %v11818_v16, %v5754_v0  ;;  %v10095_v47 = vor.u32 %v11067_v43, %v10094_v6  ;;  %v11985_v51 = vld [vmem:[#allocation39_spill] sm:$0xff]  ;;  %v11065_v18 = vld [vmem:[#allocation8 + $0x124] sm:$0xf0]  ;;  %v11986_v13 = vld [vmem:[#allocation40_spill] sm:$0xff] }
 0x335   :  { %6595 = vmatpush.bf16.msra.mxu2 %v10119_v20  ;;  %v10023_v55 = vor.u32 %v11049_v32, %v10022_v1  ;;  %v10087_v21 = vor.u32 %v11065_v18, %v10086_v29  ;;  %v9950_v56 = vld [vmem:[#allocation8 + $0x10] sm:$0xf]  ;;  %v11031_v49 = vld [vmem:[#allocation8 + $0x14] sm:$0xf0]  ;;  %v11988_v42 = vld [vmem:[#allocation41_spill] sm:$0xff] }
 0x336   :  { %v5112_v9 = vadd.f32 %v11984_v53, %v5098_v22  ;;  %v5782_v20 = vadd.f32 %v11831_v27, %v5768_v2  ;;  %v5462_v16 = vadd.f32 %v11672_v63, %v5448_v62  ;;  %v10014_v27 = vld [vmem:[#allocation8 + $0x90] sm:$0xf]  ;;  %v11047_v26 = vld [vmem:[#allocation8 + $0x94] sm:$0xf0]  ;;  %v9951_v33 = vor.u32 %v11031_v49, %v9950_v56  ;;  %v9942_v36 = vld [vmem:[#allocation8] sm:$0xf] }
 0x337   :  { %6568 = vmatpush.bf16.msra.mxu0 %v9983_v24  ;;  %v10078_v63 = vld [vmem:[#allocation8 + $0x110] sm:$0xf]  ;;  %v11989_v48 = vld [vmem:[#allocation60_spill] sm:$0xff]  ;;  %v10015_v15 = vor.u32 %v11047_v26, %v10014_v27  ;;  %v11029_v22 = vld [vmem:[#allocation8 + $0x4] sm:$0xf0]  ;;  %v11877_v27 = vpop.f32.mrf.mxu0 }
 0x338   :  { %6582 = vmatpush.bf16.msra.mxu1 %v10047_v34  ;;  %v5126_v37 = vadd.f32 %v11985_v51, %v5112_v9  ;;  %v5476_v14 = vadd.f32 %v11987_v23, %v5462_v16  ;;  %v5796_v24 = vadd.f32 %v11839_v57, %v5782_v20  ;;  %v11063_v34 = vld [vmem:[#allocation8 + $0x114] sm:$0xf0]  ;;  %v10006_v57 = vld [vmem:[#allocation8 + $0x80] sm:$0xf]  ;;  %v11045_v0 = vld [vmem:[#allocation8 + $0x84] sm:$0xf0]  ;;  %v9943_v53 = vor.u32 %v11029_v22, %v9942_v36 }
 0x339   :  { %6596 = vmatpush.bf16.msra.mxu2 %v10111_v59  ;;  %v5825_v59 = vpop.f32.mrf.mxu3  ;;  %v10079_v28 = vor.u32 %v11063_v34, %v10078_v63  ;;  %v10070_v44 = vld [vmem:[#allocation8 + $0x100] sm:$0xf]  ;;  %v11061_v3 = vld [vmem:[#allocation8 + $0x104] sm:$0xf0]  ;;  %v11042_v8 = vld [vmem:[#allocation8 + $0x74] sm:$0xf]  ;;  %v10007_v43 = vor.u32 %v11045_v0, %v10006_v57  ;;  %v11881_v57 = vpop.f32.mrf.mxu2 }
 0x33a   :  { %v5140_v54 = vadd.f32 %v11986_v13, %v5126_v37  ;;  %v5810_v61 = vadd.f32 %v11845_v41, %v5796_v24  ;;  %v5490_v46 = vadd.f32 %v11989_v48, %v5476_v14  ;;  %v10064_v12 = vld [vmem:[#allocation8 + $0xf8] sm:$0xf0]  ;;  %v11074_v9 = vld [vmem:[#allocation8 + $0x174] sm:$0xf]  ;;  %v10071_v62 = vor.u32 %v11061_v3, %v10070_v44  ;;  %v11991_v2 = vld [vmem:[#allocation58_spill] sm:$0xff] }
 0x33b   :  { %6569 = vmatpush.bf16.msra.mxu0 %v9975_v10  ;;  %v5826_v10 = vadd.f32 %v5825_v59, %v5812_v38  ;;  %v11990_v41 = vld [vmem:[#allocation37_spill] sm:$0xff]  ;;  %v6165_v11 = vmax.f32 %v11991_v2, 0.0  ;;  %v9992_v30 = vld [vmem:[#allocation8 + $0x68] sm:$0xf0]  ;;  %v11056_v1 = vld [vmem:[#allocation8 + $0xe4] sm:$0xf] }
 0x33c   :  { %6583 = vmatpush.bf16.msra.mxu1 %v10039_v5  ;;  %v5154_v60 = vadd.f32 %v11988_v42, %v5140_v54  ;;  %v10000_v5 = vld [vmem:[#allocation8 + $0x78] sm:$0xf0]  ;;  %v6164_v4 = vmax.f32 %v11990_v41, 0.0  ;;  %v5824_v39 = vadd.f32 %v11851_v17, %v5810_v61  ;;  %v6169_v6 = vmax.f32 %v5490_v46, 0.0  ;;  %v10056_v17 = vld [vmem:[#allocation8 + $0xe8] sm:$0xf0]  ;;  %v11879_v42 = vpop.f32.mrf.mxu1 }
 0x33d   :  { %6597 = vmatpush.bf16.msra.mxu2 %v10103_v25  ;;  %v11058_v25 = vld [vmem:[#allocation8 + $0xf4] sm:$0xf]  ;;  %v10128_v31 = vld [vmem:[#allocation8 + $0x178] sm:$0xf0]  ;;  %v10003_v52 = vor.u32 %v11042_v8, %v10000_v5  ;;  %v11072_v37 = vld [vmem:[#allocation8 + $0x164] sm:$0xf]  ;;  %v10059_v45 = vor.u32 %v11056_v1, %v10056_v17 }
 0x33e   :  { %v6168_v19 = vmax.f32 %v5154_v60, 0.0  ;;  %v10131_v40 = vor.u32 %v11074_v9, %v10128_v31  ;;  %v6166_v51 = vmax.f32 %v5824_v39, 0.0  ;;  %v10120_v20 = vld [vmem:[#allocation8 + $0x168] sm:$0xf0]  ;;  %v11870_v29 = vpack.c.bf16 %v6169_v6, %v6165_v11  ;;  %v11038_v13 = vld [vmem:[#allocation8 + $0x54] sm:$0xf] }
 0x33f   :  { %6570 = vmatpush.bf16.msra.mxu0 %v9967_v35  ;;  %v6170_v35 = vmax.f32 %v5826_v10, 0.0  ;;  %v10123_v54 = vor.u32 %v11072_v37, %v10120_v20  ;;  %v9984_v58 = vld [vmem:[#allocation8 + $0x58] sm:$0xf0]  ;;  %v11070_v14 = vld [vmem:[#allocation8 + $0x154] sm:$0xf]  ;;  %v5839_v39 = vpop.f32.mrf.mxu0 }
 0x340   :  { %6584 = vmatpush.bf16.msra.mxu1 %v10031_v50  ;;  %v10067_v50 = vor.u32 %v11058_v25, %v10064_v12  ;;  %v11868_v32 = vpack.c.bf16 %v6168_v19, %v6164_v4  ;;  %v10048_v23 = vld [vmem:[#allocation8 + $0xd8] sm:$0xf0]  ;;  %v11036_v49 = vld [vmem:[#allocation8 + $0x44] sm:$0xf]  ;;  %v9976_v38 = vld [vmem:[#allocation8 + $0x48] sm:$0xf0] }
 0x341   :  { %6598 = vmatpush.bf16.msra.mxu2 %v10095_v47  ;;  %v11040_v47 = vld [vmem:[#allocation8 + $0x64] sm:$0xf]  ;;  %v11872_v18 = vpack.c.bf16 %v6170_v35, %v6166_v51  ;;  %v10040_v63 = vld [vmem:[#allocation8 + $0xc8] sm:$0xf0]  ;;  %v9979_v60 = vor.u32 %v11036_v49, %v9976_v38  ;;  %v9968_v48 = vld [vmem:[#allocation8 + $0x38] sm:$0xf0]  ;;  %v11883_v0 = vpop.f32.mrf.mxu3  ;;  %v5867_v51 = vpop.f32.mrf.mxu2 }
 0x342   :  { %v9995_v16 = vor.u32 %v11040_v47, %v9992_v30  ;;  %v11052_v26 = vld [vmem:[#allocation8 + $0xc4] sm:$0xf]  ;;  %v10104_v59 = vld [vmem:[#allocation8 + $0x148] sm:$0xf0]  ;;  %v11050_v46 = vld [vmem:[#allocation8 + $0xb4] sm:$0xf] }
 0x343   :  { %6571 = vmatpush.bf16.msra.mxu0 %v9959_v7  ;;  %v11054_v7 = vld [vmem:[#allocation8 + $0xd4] sm:$0xf]  ;;  %v11068_v34 = vld [vmem:[#allocation8 + $0x144] sm:$0xf]  ;;  %v10043_v61 = vor.u32 %v11052_v26, %v10040_v63  ;;  %v10096_v22 = vld [vmem:[#allocation8 + $0x138] sm:$0xf0] }
 0x344   :  { %6585 = vmatpush.bf16.msra.mxu1 %v10023_v55  ;;  %v10112_v55 = vld [vmem:[#allocation8 + $0x158] sm:$0xf0]  ;;  %v10051_v56 = vor.u32 %v11054_v7, %v10048_v23  ;;  %v10107_v36 = vor.u32 %v11068_v34, %v10104_v59  ;;  %v11032_v3 = vld [vmem:[#allocation8 + $0x24] sm:$0xf]  ;;  %v9960_v5 = vld [vmem:[#allocation8 + $0x28] sm:$0xf0]  ;;  %v5853_v2 = vpop.f32.mrf.mxu1 }
 0x345   :  { %6599 = vmatpush.bf16.msra.mxu2 %v10087_v21  ;;  %v9987_v21 = vor.u32 %v11038_v13, %v9984_v58  ;;  %v10115_v24 = vor.u32 %v11070_v14, %v10112_v55  ;;  %v11048_v25 = vld [vmem:[#allocation8 + $0xa4] sm:$0xf]  ;;  %v10024_v12 = vld [vmem:[#allocation8 + $0xa8] sm:$0xf0]  ;;  %v11030_v31 = vld [vmem:[#allocation8 + $0x14] sm:$0xf] }
 0x346   :  { %v11064_v41 = vld [vmem:[#allocation8 + $0x124] sm:$0xf]  ;;  %v10088_v4 = vld [vmem:[#allocation8 + $0x128] sm:$0xf0]  ;;  %v10027_v9 = vor.u32 %v11048_v25, %v10024_v12  ;;  %v9952_v6 = vld [vmem:[#allocation8 + $0x18] sm:$0xf0] }
 0x347   :  { %6572 = vmatpush.bf16.msra.mxu0 %v9951_v33  ;;  %v11034_v33 = vld [vmem:[#allocation8 + $0x34] sm:$0xf]  ;;  %v10091_v19 = vor.u32 %v11064_v41, %v10088_v4  ;;  %v10080_v35 = vld [vmem:[#allocation8 + $0x118] sm:$0xf0]  ;;  %v11028_v47 = vld [vmem:[#allocation8 + $0x4] sm:$0xf] }
 0x348   :  { %6586 = vmatpush.bf16.msra.mxu1 %v10015_v15  ;;  %v10032_v15 = vld [vmem:[#allocation8 + $0xb8] sm:$0xf0]  ;;  %v9971_v10 = vor.u32 %v11034_v33, %v9968_v48  ;;  %v11062_v11 = vld [vmem:[#allocation8 + $0x114] sm:$0xf]  ;;  %v9944_v30 = vld [vmem:[#allocation8 + $0x8] sm:$0xf0] }
 0x349   :  { %6600 = vmatpush.bf16.msra.mxu2 %v10079_v28  ;;  %v11066_v28 = vld [vmem:[#allocation8 + $0x134] sm:$0xf]  ;;  %v10035_v44 = vor.u32 %v11050_v46, %v10032_v15  ;;  %v11044_v1 = vld [vmem:[#allocation8 + $0x84] sm:$0xf]  ;;  %v10008_v17 = vld [vmem:[#allocation8 + $0x88] sm:$0xf0]  ;;  %v5881_v37 = vpop.f32.mrf.mxu3  ;;  %v5921_v23 = vpop.f32.mrf.mxu2 }
 0x34a   :  { %v10099_v8 = vor.u32 %v11066_v28, %v10096_v22  ;;  %v11060_v20 = vld [vmem:[#allocation8 + $0x104] sm:$0xf]  ;;  %v10011_v13 = vor.u32 %v11044_v1, %v10008_v17  ;;  %v11127_v55 = vld [vmem:[#allocation7] sm:$0xf]  ;;  %v10174_v22 = vld [vmem:[#allocation8 + $0x1d0] sm:$0xf] }
 0x34b   :  { %6573 = vmatpush.bf16.msra.mxu0 %v9943_v53  ;;  %v9963_v53 = vor.u32 %v11032_v3, %v9960_v5  ;;  %v10166_v5 = vld [vmem:[#allocation8 + $0x1c0] sm:$0xf]  ;;  %v11085_v25 = vld [vmem:[#allocation8 + $0x1c4] sm:$0xf0]  ;;  %v10158_v41 = vld [vmem:[#allocation8 + $0x1b0] sm:$0xf] }
 0x34c   :  { %6587 = vmatpush.bf16.msra.mxu1 %v10007_v43  ;;  %v11046_v43 = vld [vmem:[#allocation8 + $0x94] sm:$0xf]  ;;  %v5907_v7 = vpop.f32.mrf.mxu1  ;;  %v11083_v4 = vld [vmem:[#allocation8 + $0x1b4] sm:$0xf0] }
 0x34d   :  { %6601 = vmatpush.bf16.msra.mxu2 %v10071_v62  ;;  %v10016_v62 = vld [vmem:[#allocation8 + $0x98] sm:$0xf0]  ;;  %v11079_v1 = vld [vmem:[#allocation8 + $0x194] sm:$0xf0] }
 0x34e   :  { %6574 = vmatmul.bf16.vlgmr.msra.gmra.mxu0 %v11868_v32 }
 0x34f   :  { %6622 = vmatpush.bf16.msrb.mxu0 %v10003_v52  ;;  %6588 = vmatmul.bf16.vlgmr.msra.gmra.mxu1 %v11870_v29  ;;  %v9955_v52 = vor.u32 %v11030_v31, %v9952_v6  ;;  %v10150_v31 = vld [vmem:[#allocation8 + $0x1a0] sm:$0xf] }
 0x350   :  { %6636 = vmatpush.bf16.msrb.mxu1 %v10067_v50  ;;  %6602 = vmatmul.bf16.vlgmr.msra.gmra.mxu2 %v11872_v18  ;;  %v10019_v50 = vor.u32 %v11046_v43, %v10016_v62 }
 0x351   :  { %6650 = vmatpush.bf16.msrb.mxu2 %v10131_v40  ;;  %v10083_v40 = vor.u32 %v11062_v11, %v10080_v35  ;;  %v5935_v14 = vpop.f32.mrf.mxu3  ;;  %v5923_v26 = vpop.f32.mrf.mxu2 }
 0x353   :  { %6623 = vmatpush.bf16.msrb.mxu0 %v9995_v16  ;;  %v10072_v16 = vld [vmem:[#allocation8 + $0x108] sm:$0xf0] }
 0x354   :  { %6637 = vmatpush.bf16.msrb.mxu1 %v10059_v45  ;;  %v9947_v45 = vor.u32 %v11028_v47, %v9944_v30  ;;  %v10075_v58 = vor.u32 %v11060_v20, %v10072_v16  ;;  %v10142_v30 = vld [vmem:[#allocation8 + $0x190] sm:$0xf] }
 0x355   :  { %6651 = vmatpush.bf16.msrb.mxu2 %v10123_v54  ;;  %v5893_v54 = vpop.f32.mrf.mxu0 }
 0x357   :  { %6624 = vmatpush.bf16.msrb.mxu0 %v9987_v21  ;;  %v975_v21 = vperm.slane %v11127_v55, 3  ;;  %v10192_v55 = vld [vmem:[#allocation8 + $0x1f8] sm:$0xf0] }
 0x358   :  { %6638 = vmatpush.bf16.msrb.mxu1 %v10051_v56 }
 0x359   :  { %6652 = vmatpush.bf16.msrb.mxu2 %v10115_v24  ;;  %v5838_v49 = vadd.f32 %v11877_v27, %v975_v21  ;;  %v5909_v24 = vpop.f32.mrf.mxu1  ;;  %v5937_v63 = vpop.f32.mrf.mxu3  ;;  %v5840_v34 = vadd.f32 %v5839_v39, %v975_v21 }
 0x35a   :  { %v5977_v15 = vpop.f32.mrf.mxu2 }
 0x35b   :  { %6625 = vmatpush.bf16.msrb.mxu0 %v9979_v60  ;;  %v5852_v38 = vadd.f32 %v11879_v42, %v5838_v49  ;;  %v10190_v60 = vld [vmem:[#allocation8 + $0x1f0] sm:$0xf]  ;;  %v5854_v48 = vadd.f32 %v5853_v2, %v5840_v34 }
 0x35c   :  { %6639 = vmatpush.bf16.msrb.mxu1 %v10043_v61 }
 0x35d   :  { %6653 = vmatpush.bf16.msrb.mxu2 %v10107_v36  ;;  %v5895_v56 = vpop.f32.mrf.mxu0  ;;  %v11089_v36 = vld [vmem:[#allocation8 + $0x1e4] sm:$0xf0]  ;;  %v5868_v42 = vadd.f32 %v5867_v51, %v5854_v48 }
 0x35f   :  { %6626 = vmatpush.bf16.msrb.mxu0 %v9971_v10  ;;  %v11087_v10 = vld [vmem:[#allocation8 + $0x1d4] sm:$0xf0]  ;;  %v5882_v12 = vadd.f32 %v5881_v37, %v5868_v42  ;;  %v10143_v37 = vor.u32 %v11079_v1, %v10142_v30  ;;  %v10168_v42 = vld [vmem:[#allocation8 + $0x1c8] sm:$0xf0]  ;;  %v11076_v30 = vld [vmem:[#allocation8 + $0x184] sm:$0xf] }
 0x360   :  { %6640 = vmatpush.bf16.msrb.mxu1 %v10035_v44  ;;  %v10175_v44 = vor.u32 %v11087_v10, %v10174_v22  ;;  %v10136_v1 = vld [vmem:[#allocation8 + $0x188] sm:$0xf0] }
 0x361   :  { %6654 = vmatpush.bf16.msrb.mxu2 %v10099_v8  ;;  %v5963_v33 = vpop.f32.mrf.mxu1  ;;  %v5991_v28 = vpop.f32.mrf.mxu3 }
 0x362   :  { %v5979_v6 = vpop.f32.mrf.mxu2 }
 0x363   :  { %6627 = vmatpush.bf16.msrb.mxu0 %v9963_v53 }
 0x364   :  { %6641 = vmatpush.bf16.msrb.mxu1 %v10027_v9  ;;  %v5896_v9 = vadd.f32 %v5895_v56, %v5882_v12 }
 0x365   :  { %6655 = vmatpush.bf16.msrb.mxu2 %v10091_v19  ;;  %v5949_v59 = vpop.f32.mrf.mxu0  ;;  %v11081_v19 = vld [vmem:[#allocation8 + $0x1a4] sm:$0xf0] }
 0x366   :  { %v10151_v11 = vor.u32 %v11081_v19, %v10150_v31  ;;  %v5910_v35 = vadd.f32 %v5909_v24, %v5896_v9  ;;  %v11088_v24 = vld [vmem:[#allocation8 + $0x1e4] sm:$0xf] }
 0x367   :  { %6628 = vmatpush.bf16.msrb.mxu0 %v9955_v52 }
 0x368   :  { %6642 = vmatpush.bf16.msrb.mxu1 %v10019_v50  ;;  %v5924_v47 = vadd.f32 %v5923_v26, %v5910_v35 }
 0x369   :  { %6656 = vmatpush.bf16.msrb.mxu2 %v10083_v40  ;;  %v5965_v39 = vpop.f32.mrf.mxu1  ;;  %v5993_v43 = vpop.f32.mrf.mxu3 }
 0x36a   :  { %v5938_v20 = vadd.f32 %v5937_v63, %v5924_v47 }
 0x36b   :  { %6629 = vmatpush.bf16.msrb.mxu0 %v9947_v45 }
 0x36c   :  { %6643 = vmatpush.bf16.msrb.mxu1 %v10011_v13 }
 0x36d   :  { %6657 = vmatpush.bf16.msrb.mxu2 %v10075_v58  ;;  %v5951_v8 = vpop.f32.mrf.mxu0  ;;  %v11077_v58 = vld [vmem:[#allocation8 + $0x184] sm:$0xf0] }
 0x36e   :  { %6630 = vmatmul.bf16.vlgmr.msrb.gmra.mxu0 %v11868_v32  ;;  %v11091_v32 = vld [vmem:[#allocation8 + $0x1f4] sm:$0xf0]  ;;  %v5952_v45 = vadd.f32 %v5951_v8, %v5938_v20  ;;  %v11082_v8 = vld [vmem:[#allocation8 + $0x1b4] sm:$0xf] }
 0x36f   :  { %6644 = vmatmul.bf16.vlgmr.msrb.gmra.mxu1 %v11870_v29  ;;  %v10191_v61 = vor.u32 %v11091_v32, %v10190_v60  ;;  %v5866_v29 = vadd.f32 %v11881_v57, %v5852_v38  ;;  %v10167_v57 = vor.u32 %v11085_v25, %v10166_v5  ;;  %v10184_v38 = vld [vmem:[#allocation8 + $0x1e8] sm:$0xf0]  ;;  %v10160_v5 = vld [vmem:[#allocation8 + $0x1b8] sm:$0xf0] }
 0x370   :  { %6658 = vmatmul.bf16.vlgmr.msrb.gmra.mxu2 %v11872_v18  ;;  %v10182_v18 = vld [vmem:[#allocation8 + $0x1e0] sm:$0xf]  ;;  %v5966_v49 = vadd.f32 %v5965_v39, %v5952_v45  ;;  %v10187_v63 = vor.u32 %v11088_v24, %v10184_v38  ;;  %v10152_v39 = vld [vmem:[#allocation8 + $0x1a8] sm:$0xf0] }
 0x371   :  { %6608 = vmatpush.bf16.msra.mxu3 %v10191_v61  ;;  %v10183_v46 = vor.u32 %v11089_v36, %v10182_v18  ;;  %v5880_v27 = vadd.f32 %v11883_v0, %v5866_v29  ;;  %v10159_v0 = vor.u32 %v11083_v4, %v10158_v41  ;;  %v6019_v52 = vpop.f32.mrf.mxu1  ;;  %v11086_v29 = vld [vmem:[#allocation8 + $0x1d4] sm:$0xf]  ;;  %v10163_v41 = vor.u32 %v11082_v8, %v10160_v5  ;;  %v11080_v4 = vld [vmem:[#allocation8 + $0x1a4] sm:$0xf] }
 0x372   :  { %v5980_v34 = vadd.f32 %v5979_v6, %v5966_v49 }
 0x373   :  { %v5894_v3 = vadd.f32 %v5893_v54, %v5880_v27  ;;  %v6033_v17 = vpop.f32.mrf.mxu2  ;;  %v10134_v54 = vld [vmem:[#allocation8 + $0x180] sm:$0xf] }
 0x374   :  { %v6047_v51 = vpop.f32.mrf.mxu3  ;;  %v5994_v18 = vadd.f32 %v5993_v43, %v5980_v34 }
 0x375   :  { %6609 = vmatpush.bf16.msra.mxu3 %v10183_v46  ;;  %v5908_v53 = vadd.f32 %v5907_v7, %v5894_v3  ;;  %v6005_v2 = vpop.f32.mrf.mxu0  ;;  %v10135_v7 = vor.u32 %v11077_v58, %v10134_v54 }
 0x377   :  { %v5922_v62 = vadd.f32 %v5921_v23, %v5908_v53  ;;  %v11090_v23 = vld [vmem:[#allocation8 + $0x1f4] sm:$0xf] }
 0x379   :  { %6610 = vmatpush.bf16.msra.mxu3 %v10175_v44  ;;  %v5936_v50 = vadd.f32 %v5935_v14, %v5922_v62  ;;  %v10195_v14 = vor.u32 %v11090_v23, %v10192_v55  ;;  %v6021_v56 = vpop.f32.mrf.mxu1 }
 0x37b   :  { %v5950_v40 = vadd.f32 %v5949_v59, %v5936_v50  ;;  %v6035_v59 = vpop.f32.mrf.mxu2 }
 0x37c   :  { %v6049_v60 = vpop.f32.mrf.mxu3 }
 0x37d   :  { %6611 = vmatpush.bf16.msra.mxu3 %v10167_v57  ;;  %v5964_v16 = vadd.f32 %v5963_v33, %v5950_v40  ;;  %v6007_v13 = vpop.f32.mrf.mxu0  ;;  %v10176_v33 = vld [vmem:[#allocation8 + $0x1d8] sm:$0xf0] }
 0x37e   :  { %v10179_v36 = vor.u32 %v11086_v29, %v10176_v33  ;;  %v6008_v27 = vadd.f32 %v6007_v13, %v5994_v18  ;;  %v11095_v29 = vld [vmem:[#allocation11 + $0x18] sm:$0xff]  ;;  %v11094_v18 = vld [vmem:[#allocation11 + $0x10] sm:$0xff] }
 0x37f   :  { %v5978_v21 = vadd.f32 %v5977_v15, %v5964_v16  ;;  %v11084_v15 = vld [vmem:[#allocation8 + $0x1c4] sm:$0xf]  ;;  %v11107_v33 = vld [vmem:[#allocation11 + $0x78] sm:$0xff] }
 0x380   :  { %v10171_v10 = vor.u32 %v11084_v15, %v10168_v42  ;;  %v6022_v3 = vadd.f32 %v6021_v56, %v6008_v27  ;;  %6830 = vmatpush.bf16.msra.mxu1 %v11107_v33  ;;  %v11092_v27 = vld [vmem:[#allocation11] sm:$0xff]  ;;  %v11103_v42 = vld [vmem:[#allocation11 + $0x58] sm:$0xff] }
 0x381   :  { %6612 = vmatpush.bf16.msra.mxu3 %v10159_v0  ;;  %v5992_v26 = vadd.f32 %v5991_v28, %v5978_v21  ;;  %v10155_v0 = vor.u32 %v11080_v4, %v10152_v39  ;;  %v11104_v15 = vld [vmem:[#allocation11 + $0x60] sm:$0xff] }
 0x382   :  { %v6036_v57 = vadd.f32 %v6035_v59, %v6022_v3  ;;  %v11099_v59 = vld [vmem:[#allocation11 + $0x38] sm:$0xff] }
 0x383   :  { %v6006_v32 = vadd.f32 %v6005_v2, %v5992_v26  ;;  %v11078_v2 = vld [vmem:[#allocation8 + $0x194] sm:$0xf]  ;;  %6816 = vmatpush.bf16.msra.mxu0 %v11099_v59 }
 0x384   :  { %v6050_v31 = vadd.f32 %v6049_v60, %v6036_v57  ;;  %v11098_v60 = vld [vmem:[#allocation11 + $0x30] sm:$0xff] }
 0x385   :  { %6613 = vmatpush.bf16.msra.mxu3 %v10151_v11  ;;  %v6020_v46 = vadd.f32 %v6019_v52, %v6006_v32  ;;  %v10144_v11 = vld [vmem:[#allocation8 + $0x198] sm:$0xf0]  ;;  %v11097_v32 = vld [vmem:[#allocation11 + $0x28] sm:$0xff] }
 0x386   :  { %v10147_v50 = vor.u32 %v11078_v2, %v10144_v11 }
 0x387   :  { %v6034_v22 = vadd.f32 %v6033_v17, %v6020_v46  ;;  %6817 = vmatpush.bf16.msra.mxu0 %v11098_v60  ;;  %v11105_v46 = vld [vmem:[#allocation11 + $0x68] sm:$0xff] }
 0x389   :  { %6614 = vmatpush.bf16.msra.mxu3 %v10143_v37  ;;  %v6048_v25 = vadd.f32 %v6047_v51, %v6034_v22  ;;  %v10139_v37 = vor.u32 %v11076_v30, %v10136_v1 }
 0x38b   :  { %v6061_v61 = vpop.f32.mrf.mxu0  ;;  %6818 = vmatpush.bf16.msra.mxu0 %v11097_v32 }
 0x38c   :  { %v6075_v48 = vpop.f32.mrf.mxu1  ;;  %v6062_v53 = vadd.f32 %v6061_v61, %v6048_v25  ;;  %v11096_v61 = vld [vmem:[#allocation11 + $0x20] sm:$0xff] }
 0x38d   :  { %6615 = vmatpush.bf16.msra.mxu3 %v10135_v7  ;;  %v11100_v25 = vld [vmem:[#allocation11 + $0x40] sm:$0xff] }
 0x38e   :  { %v6076_v19 = vadd.f32 %v6075_v48, %v6062_v53  ;;  %v11093_v48 = vld [vmem:[#allocation11 + $0x8] sm:$0xff] }
 0x38f   :  { %6819 = vmatpush.bf16.msra.mxu0 %v11096_v61 }
 0x391   :  { %6664 = vmatpush.bf16.msrb.mxu3 %v10195_v14 }
 0x393   :  { %v6089_v28 = vpop.f32.mrf.mxu2  ;;  %v6063_v12 = vpop.f32.mrf.mxu0  ;;  %6820 = vmatpush.bf16.msra.mxu0 %v11095_v29 }
 0x394   :  { %v6103_v44 = vpop.f32.mrf.mxu3  ;;  %v6077_v9 = vpop.f32.mrf.mxu1  ;;  %v6064_v6 = vadd.f32 %v6063_v12, %v6050_v31  ;;  %v6090_v35 = vadd.f32 %v6089_v28, %v6076_v19  ;;  %v11101_v28 = vld [vmem:[#allocation11 + $0x48] sm:$0xff] }
 0x395   :  { %6665 = vmatpush.bf16.msrb.mxu3 %v10187_v63 }
 0x396   :  { %v6078_v47 = vadd.f32 %v6077_v9, %v6064_v6  ;;  %v6104_v17 = vadd.f32 %v6103_v44, %v6090_v35  ;;  %v6240_v44 = vld [vmem:[#allocation10] sm:$0x3] }
 0x397   :  { %6821 = vmatpush.bf16.msra.mxu0 %v11094_v18  ;;  %v6242_v5 = vperm.slane %v6240_v44, 0 }
 0x399   :  { %6666 = vmatpush.bf16.msrb.mxu3 %v10179_v36  ;;  %v11106_v36 = vld [vmem:[#allocation11 + $0x70] sm:$0xff] }
 0x39a   :  { %6831 = vmatpush.bf16.msra.mxu1 %v11106_v36 }
 0x39b   :  { %v6091_v43 = vpop.f32.mrf.mxu2  ;;  %6822 = vmatpush.bf16.msra.mxu0 %v11093_v48 }
 0x39c   :  { %v6105_v62 = vpop.f32.mrf.mxu3  ;;  %v6092_v51 = vadd.f32 %v6091_v43, %v6078_v47 }
 0x39d   :  { %6667 = vmatpush.bf16.msrb.mxu3 %v10171_v10  ;;  %v11102_v10 = vld [vmem:[#allocation11 + $0x50] sm:$0xff] }
 0x39e   :  { %v6106_v13 = vadd.f32 %v6105_v62, %v6092_v51  ;;  %6832 = vmatpush.bf16.msra.mxu1 %v11105_v46 }
 0x39f   :  { %6823 = vmatpush.bf16.msra.mxu0 %v11092_v27 }
 0x3a1   :  { %6668 = vmatpush.bf16.msrb.mxu3 %v10163_v41 }
 0x3a2   :  { %6833 = vmatpush.bf16.msra.mxu1 %v11104_v15 }
 0x3a5   :  { %6669 = vmatpush.bf16.msrb.mxu3 %v10155_v0 }
 0x3a6   :  { %6834 = vmatpush.bf16.msra.mxu1 %v11103_v42 }
 0x3a9   :  { %6670 = vmatpush.bf16.msrb.mxu3 %v10147_v50 }
 0x3aa   :  { %6835 = vmatpush.bf16.msra.mxu1 %v11102_v10 }
 0x3ab   :  { %v6117_v52 = vpop.f32.mrf.mxu0 }
 0x3ac   :  { %v6131_v40 = vpop.f32.mrf.mxu1  ;;  %v6118_v20 = vadd.f32 %v6117_v52, %v6104_v17  ;;  %v6243_v52 = vperm.slane %v6240_v44, 1 }
 0x3ad   :  { %6671 = vmatpush.bf16.msrb.mxu3 %v10139_v37 }
 0x3ae   :  { %v6132_v58 = vadd.f32 %v6131_v40, %v6118_v20  ;;  %6836 = vmatpush.bf16.msra.mxu1 %v11101_v28 }
 0x3b2   :  { %6837 = vmatpush.bf16.msra.mxu1 %v11100_v25 }
 0x3b3   :  { %v6145_v16 = vpop.f32.mrf.mxu2  ;;  %v6119_v54 = vpop.f32.mrf.mxu0 }
 0x3b4   :  { %v6159_v45 = vpop.f32.mrf.mxu3  ;;  %v6120_v7 = vadd.f32 %v6119_v54, %v6106_v13  ;;  %v6146_v23 = vadd.f32 %v6145_v16, %v6132_v58  ;;  %v6133_v55 = vpop.f32.mrf.mxu1 }
 0x3b6   :  { %v6134_v21 = vadd.f32 %v6133_v55, %v6120_v7  ;;  %v6160_v56 = vadd.f32 %v6159_v45, %v6146_v23 }
 0x3b8   :  { %v6167_v26 = vmax.f32 %v6160_v56, 0.0 }
 0x3bb   :  { %v6147_v14 = vpop.f32.mrf.mxu2 }
 0x3bc   :  { %v6148_v49 = vadd.f32 %v6147_v14, %v6134_v21  ;;  %v6161_v24 = vpop.f32.mrf.mxu3 }
 0x3be   :  { %v6162_v38 = vadd.f32 %v6161_v24, %v6148_v49  ;;  %v11124_v49 = vld [vmem:[#allocation13] ss:$0 sm:$0xff] }
 0x3c0   :  { %v6171_v34 = vmax.f32 %v6162_v38, 0.0 }
 0x3c2   :  { %v6175_v63 = vpack.c.bf16 %v6171_v34, %v6167_v26 }
 0x3c4   :  { %6616 = vmatmul.bf16.vlgmr.msra.gmra.mxu3 %v6175_v63 }
 0x3cb   :  { %v6575_v22 = vpop.f32.mrf.mxu0 }
 0x3cc   :  { %v6589_v3 = vpop.f32.mrf.mxu1  ;;  %v6576_v12 = vadd.f32 %v6575_v22, %v6242_v5 }
 0x3ce   :  { %v6590_v0 = vadd.f32 %v6589_v3, %v6576_v12 }
 0x3d3   :  { %v6603_v8 = vpop.f32.mrf.mxu2  ;;  %v6577_v57 = vpop.f32.mrf.mxu0 }
 0x3d4   :  { %6672 = vmatmul.bf16.vlgmr.msrb.gmra.mxu3 %v6175_v63  ;;  %v6578_v4 = vadd.f32 %v6577_v57, %v6242_v5  ;;  %v6591_v39 = vpop.f32.mrf.mxu1  ;;  %v6604_v31 = vadd.f32 %v6603_v8, %v6590_v0 }
 0x3d6   :  { %v6592_v19 = vadd.f32 %v6591_v39, %v6578_v4 }
 0x3db   :  { %v6605_v53 = vpop.f32.mrf.mxu2 }
 0x3dc   :  { %v6606_v6 = vadd.f32 %v6605_v53, %v6592_v19 }
 0x3eb   :  { %v6631_v9 = vpop.f32.mrf.mxu0 }
 0x3ec   :  { %v6645_v11 = vpop.f32.mrf.mxu1  ;;  %v6632_v1 = vadd.f32 %v6631_v9, %v6243_v52 }
 0x3ee   :  { %v6646_v37 = vadd.f32 %v6645_v11, %v6632_v1 }
 0x3f3   :  { %v6659_v35 = vpop.f32.mrf.mxu2  ;;  %v6633_v30 = vpop.f32.mrf.mxu0 }
 0x3f4   :  { %v6634_v51 = vadd.f32 %v6633_v30, %v6243_v52  ;;  %v6647_v20 = vpop.f32.mrf.mxu1  ;;  %v6660_v45 = vadd.f32 %v6659_v35, %v6646_v37 }
 0x3f6   :  { %v6648_v13 = vadd.f32 %v6647_v20, %v6634_v51 }
 0x3fb   :  { %v6661_v16 = vpop.f32.mrf.mxu2 }
 0x3fc   :  { %v6662_v54 = vadd.f32 %v6661_v16, %v6648_v13 }
 0x447   :  { %v6617_v41 = vpop.f32.mrf.mxu3 }
 0x448   :  { %v6618_v43 = vadd.f32 %v6617_v41, %v6604_v31 }
 0x44a   :  { %v6678_v50 = vmax.f32 %v6618_v43, 0.0 }
 0x44f   :  { %v6619_v62 = vpop.f32.mrf.mxu3 }
 0x450   :  { %v6620_v2 = vadd.f32 %v6619_v62, %v6606_v6 }
 0x452   :  { %v6680_v47 = vmax.f32 %v6620_v2, 0.0 }
 0x454   :  { %v6682_v40 = vpack.c.bf16 %v6680_v47, %v6678_v50 }
 0x456   :  { %6824 = vmatmul.bf16.vlgmr.msra.gmra.mxu0 %v6682_v40 }
 0x457   :  { %v6673_v17 = vpop.f32.mrf.mxu3 }
 0x458   :  { %v6674_v58 = vadd.f32 %v6673_v17, %v6660_v45 }
 0x45a   :  { %v6679_v55 = vmax.f32 %v6674_v58, 0.0 }
 0x45f   :  { %v6675_v7 = vpop.f32.mrf.mxu3 }
 0x460   :  { %v6676_v23 = vadd.f32 %v6675_v7, %v6662_v54 }
 0x462   :  { %v6681_v21 = vmax.f32 %v6676_v23, 0.0 }
 0x464   :  { %v6683_v14 = vpack.c.bf16 %v6681_v21, %v6679_v55 }
 0x466   :  { %6838 = vmatmul.bf16.vlgmr.msra.gmra.mxu1 %v6683_v14 }
 0x4d3   :  { %v6825_v56 = vpop.f32.mrf.mxu0 }
 0x4d4   :  { %v6826_v24 = vadd.f32 %v11124_v49, %v6825_v56 }
 0x4db   :  { %v6827_v34 = vpop.f32.mrf.mxu0 }
 0x4dc   :  { %v6828_v63 = vadd.f32 %v11124_v49, %v6827_v34 }
 0x4e3   :  { %v6839_v38 = vpop.f32.mrf.mxu1 }
 0x4e4   :  { %v6840_v26 = vadd.f32 %v6839_v38, %v6826_v24 }
 0x4e6   :  { %6844 = vst [vmem:[#allocation14] sm:$0xff] %v6840_v26 }
 0x4eb   :  { %v6841_v59 = vpop.f32.mrf.mxu1 }
 0x4ec   :  { %v6842_v60 = vadd.f32 %v6841_v59, %v6828_v63 }
 0x4ee   :  { %6845 = vst [vmem:[#allocation14 + $0x8] sm:$0xff] %v6842_v60 }
 0x4ef   :  { %6858 = dma.vmem_to_hbm [thread:$0]  %s6851_s6, 256, %s6853_s18, [#allocation4], %s11334_s13, %s11334_s13, %s11335_s14  }
 0x4f0   :  { %11328 = dma.done.wait [#allocation4], 256  }
 0x4f1   :  { %11329 = vsyncadd [#allocation4], 4294967040 }
 0x4f2   :  { %6863 = vsyncpa [#allocation3], 1 }
 0x4f3   :  { %6864 = vsyncpa [#allocation6], 1 }
 0x4f4   :  { %6865 = vsyncpa [#allocation9], 1 }
 0x4f5   :  { %6866 = vsyncpa [#allocation12], 1 }
 0x4f6   :  { %6867 = vsyncpa [#allocation4], 1 }

</bundles_post_ra>
